<compile_context>
chip_gen: v7x
topology: tpu7x:2x2x1
jax: 0.10.0
libtpu: 0.0.40
codegen_flags: <defaults>
</compile_context>

<pallas_src>
import jax
import jax.numpy as jnp
from jax import lax
from jax.experimental import pallas as pl
from jax.experimental.pallas import tpu as pltpu

EPS = 1e-5


# ---------------------------------------------------------------------------
# Fused kernel for one bottleneck layer, operating on a list of feature chunks:
#   for each chunk:  BN1 -> ReLU -> (chunk @ W1_chunk)   accumulated in f32
#   BN2 (+ folded conv1 bias) -> ReLU
#   3x3 conv via kn2row: z = a @ W' (Cinner x 9*Cout), then 9 shifted adds
#   write ONLY the new growth_rate channels (bf16) to the output.
# One grid step == one image.
# ---------------------------------------------------------------------------
def _make_bottleneck_kernel(H, W, n_chunks, cinner, cout):
    def kernel(*args):
        xs = args[0:n_chunks]                       # bf16 (H*W, c_k)
        s1s = args[n_chunks:2 * n_chunks]           # f32  (1, c_k)
        t1s = args[2 * n_chunks:3 * n_chunks]       # f32  (1, c_k)
        w1s = args[3 * n_chunks:4 * n_chunks]       # bf16 (c_k, cinner)
        s2_ref, t2_ref, w2_ref, b2_ref = args[4 * n_chunks:4 * n_chunks + 4]
        o_ref = args[4 * n_chunks + 4]              # bf16 (H*W, cout)
        yacc_ref = args[4 * n_chunks + 5]           # f32  (H, W, cout) scratch

        # ---- Stage 1: BN1 -> ReLU -> 1x1 conv, accumulated over feature chunks ----
        acc = jnp.zeros((H * W, cinner), jnp.float32)
        for k in range(n_chunks):
            xk = xs[k][...].astype(jnp.float32)                   # f32 VPU math
            h1 = jnp.maximum(xk * s1s[k][...] + t1s[k][...], 0.0)
            acc = acc + jnp.dot(h1.astype(jnp.bfloat16), w1s[k][...],
                                preferred_element_type=jnp.float32)
        # BN2 (conv1 bias folded into shift) -> ReLU
        a = jnp.maximum(acc * s2_ref[...] + t2_ref[...], 0.0)

        # ---- Stage 2: 3x3 conv (padding=1) via kn2row ----
        # z[p, tap*cout+co] = sum_ci a[p, ci] * W[co, ci, ky, kx],  tap = ky*3+kx
        z = jnp.dot(a.astype(jnp.bfloat16), w2_ref[...],
                    preferred_element_type=jnp.float32)           # (H*W, 9*cout)
        z3 = z.reshape(H, W, 9 * cout)

        # y[i,j] = sum_{ky,kx} z[i+ky-1, j+kx-1, tap]   (zero outside the image)
        # centre tap (ky=kx=1) initialises the accumulator -> no scratch zeroing.
        yacc_ref[...] = z3[:, :, 4 * cout:5 * cout]
        for ky in range(3):
            for kx in range(3):
                if ky == 1 and kx == 1:
                    continue
                dy, dx = ky - 1, kx - 1
                oy0, oy1 = max(0, -dy), min(H, H - dy)
                ox0, ox1 = max(0, -dx), min(W, W - dx)
                tap = ky * 3 + kx
                yacc_ref[oy0:oy1, ox0:ox1, :] = (
                    yacc_ref[oy0:oy1, ox0:ox1, :]
                    + z3[oy0 + dy:oy1 + dy, ox0 + dx:ox1 + dx,
                         tap * cout:(tap + 1) * cout])

        # ---- Write only the new growth_rate channels, bf16, lane-dense block ----
        o_ref[...] = (yacc_ref[...].reshape(H * W, cout)
                      + b2_ref[...]).astype(o_ref.dtype)

    return kernel


def _fold_bn(g, b, mean, var):
    scale = g / jnp.sqrt(var + EPS)
    shift = b - mean * scale
    return scale, shift


# ---------------------------------------------------------------------------
# One bottleneck layer: reads the list of prior feature chunks (bf16, (N*H*W, c_k)),
# returns its growth_rate new channels as a bf16 (N*H*W, growth) array.
# ---------------------------------------------------------------------------
def _bottleneck_layer(chunks, chunk_ch, p, n, h, w):
    n_chunks = len(chunk_ch)
    cin = sum(chunk_ch)

    s1, t1 = _fold_bn(p["bn1_g"], p["bn1_b"], p["bn1_m"], p["bn1_v"])
    s2, t2 = _fold_bn(p["bn2_g"], p["bn2_b"], p["bn2_m"], p["bn2_v"])
    # Fold the 1x1-conv bias into the BN2 shift: s2*(z + b1) + t2 = s2*z + (s2*b1 + t2)
    t2 = t2 + s2 * p["conv1_b"]

    # 1x1 conv weight: torch (Cinner, Cin, 1, 1) -> (Cin, Cinner), split per chunk.
    w1 = jnp.transpose(p["conv1_w"][:, :, 0, 0], (1, 0))
    cinner = w1.shape[1]
    # 3x3 conv weight in kn2row layout: W'[ci, tap*cout+co] = w[co, ci, ky, kx].
    w2 = jnp.transpose(p["conv2_w"], (1, 2, 3, 0)).reshape(cinner, -1)
    cout = p["conv2_b"].shape[0]

    offs = [0]
    for c in chunk_ch:
        offs.append(offs[-1] + c)
    s1_c = [s1[offs[k]:offs[k + 1]].reshape(1, -1) for k in range(n_chunks)]
    t1_c = [t1[offs[k]:offs[k + 1]].reshape(1, -1) for k in range(n_chunks)]
    w1_c = [w1[offs[k]:offs[k + 1], :].astype(jnp.bfloat16) for k in range(n_chunks)]

    hw = h * w
    x_specs = [pl.BlockSpec((hw, c), lambda b: (b, 0)) for c in chunk_ch]
    full = lambda shape: pl.BlockSpec(shape, lambda b: (0, 0))
    param_specs = ([full((1, c)) for c in chunk_ch]            # BN1 scale chunks
                   + [full((1, c)) for c in chunk_ch]          # BN1 shift chunks
                   + [full((c, cinner)) for c in chunk_ch]     # W1 chunks (bf16)
                   + [full((1, cinner)), full((1, cinner)),    # BN2 scale/shift
                      full((cinner, 9 * cout)),                # W2 kn2row (bf16)
                      full((1, cout))])                        # conv2 bias

    # Scoped-VMEM budget from the real per-step footprint (double-buffered tiles,
    # resident weights, f32 scratch) + headroom; capped well under v7x's 64 MiB.
    in_tile_bytes = 2 * hw * cin            # bf16 inputs
    out_tile_bytes = 2 * hw * cout          # bf16 output
    param_bytes = (8 * cin + 2 * cin * cinner + 8 * cinner
                   + 2 * cinner * 9 * cout + 4 * cout)
    scratch_bytes = 4 * h * w * cout
    vmem_est = 2 * (in_tile_bytes + out_tile_bytes) + 2 * param_bytes + scratch_bytes
    vmem_limit = int(min(max(vmem_est + (2 << 20), 16 << 20), 48 << 20))

    y2d = pl.pallas_call(
        _make_bottleneck_kernel(h, w, n_chunks, cinner, cout),
        out_shape=jax.ShapeDtypeStruct((n * hw, cout), jnp.bfloat16),
        grid_spec=pltpu.PrefetchScalarGridSpec(
            num_scalar_prefetch=0,
            grid=(n,),                                   # one image per grid step
            in_specs=x_specs + param_specs,
            out_specs=pl.BlockSpec((hw, cout), lambda b: (b, 0)),
            scratch_shapes=[pltpu.VMEM((h, w, cout), jnp.float32)],
        ),
        compiler_params=pltpu.CompilerParams(
            dimension_semantics=("parallel",),
            vmem_limit_bytes=vmem_limit),
    )(*chunks,
      *s1_c, *t1_c, *w1_c,
      s2.reshape(1, cinner), t2.reshape(1, cinner),
      w2.astype(jnp.bfloat16), p["conv2_b"].reshape(1, cout))
    return y2d


# ---------------------------------------------------------------------------
# Dense block: features stay a list of bf16 channel chunks; each layer writes only
# its growth_rate channels.  The single concat at the block boundary is the one
# unavoidable materialization (it would feed the transition layer).
# ---------------------------------------------------------------------------
@jax.jit
def dense_block_forward_nhwc(x_nhwc, layer_params):
    n, h, w, c0 = x_nhwc.shape
    chunks = [x_nhwc.astype(jnp.bfloat16).reshape(n * h * w, c0)]
    chunk_ch = [c0]
    for p in layer_params:
        y = _bottleneck_layer(chunks, chunk_ch, p, n, h, w)
        chunks.append(y)
        chunk_ch.append(y.shape[-1])
    out = jnp.concatenate(chunks, axis=-1)
    return out.reshape(n, h, w, sum(chunk_ch))


# ---------------------------------------------------------------------------
# Pure-JAX reference (mirrors the PyTorch bottleneck with BN in eval mode), NHWC.
# ---------------------------------------------------------------------------
def bottleneck_reference_nhwc(x, p):
    def bn(h, g, b, m, v):
        inv = 1.0 / jnp.sqrt(v + EPS)
        return (h - m) * (g * inv) + b

    h = jax.nn.relu(bn(x, p["bn1_g"], p["bn1_b"], p["bn1_m"], p["bn1_v"]))
    w1 = jnp.transpose(p["conv1_w"], (2, 3, 1, 0))       # OIHW -> HWIO
    h = lax.conv_general_dilated(
        h, w1, (1, 1), "VALID",
        dimension_numbers=("NHWC", "HWIO", "NHWC"),
        precision=lax.Precision.HIGHEST) + p["conv1_b"]
    h = jax.nn.relu(bn(h, p["bn2_g"], p["bn2_b"], p["bn2_m"], p["bn2_v"]))
    w2 = jnp.transpose(p["conv2_w"], (2, 3, 1, 0))
    h = lax.conv_general_dilated(
        h, w2, (1, 1), ((1, 1), (1, 1)),
        dimension_numbers=("NHWC", "HWIO", "NHWC"),
        precision=lax.Precision.HIGHEST) + p["conv2_b"]
    return jnp.concatenate([x, h], axis=-1)


def dense_block_reference_nhwc(x, layer_params):
    out = x
    for p in layer_params:
        out = bottleneck_reference_nhwc(out, p)
    return out


# ---------------------------------------------------------------------------
def make_params(key, in_channel, growth_rate):
    inner = growth_rate * 4
    ks = jax.random.split(key, 12)
    f32 = jnp.float32
    # Conv weights rounded to bf16-representable values (they are fed to the MXU
    # as bf16 operands inside the kernel); BN params and biases stay full f32.
    rnd = lambda a: a.astype(jnp.bfloat16).astype(f32)
    return {
        "bn1_g": 1.0 + 0.1 * jax.random.normal(ks[0], (in_channel,), f32),
        "bn1_b": 0.1 * jax.random.normal(ks[1], (in_channel,), f32),
        "bn1_m": 0.1 * jax.random.normal(ks[2], (in_channel,), f32),
        "bn1_v": 1.0 + 0.1 * jax.random.uniform(ks[3], (in_channel,), f32),
        "conv1_w": rnd(0.1 * jax.random.normal(ks[4], (inner, in_channel, 1, 1), f32)),
        "conv1_b": 0.1 * jax.random.normal(ks[5], (inner,), f32),
        "bn2_g": 1.0 + 0.1 * jax.random.normal(ks[6], (inner,), f32),
        "bn2_b": 0.1 * jax.random.normal(ks[7], (inner,), f32),
        "bn2_m": 0.1 * jax.random.normal(ks[8], (inner,), f32),
        "bn2_v": 1.0 + 0.1 * jax.random.uniform(ks[9], (inner,), f32),
        "conv2_w": rnd(0.1 * jax.random.normal(ks[10], (growth_rate, inner, 3, 3), f32)),
        "conv2_b": 0.1 * jax.random.normal(ks[11], (growth_rate,), f32),
    }


if __name__ == "__main__":
    key = jax.random.PRNGKey(0)
    in_channel, growth_rate, n_layers = 4, 4, 2       # inner_channel = 16
    N, H, W = 2, 16, 16

    kx, kp = jax.random.split(key)
    # Channels-last interface; activations live in bf16 at the HBM boundary, so the
    # test input is quantized the same way for both kernel and reference.
    x_nhwc = jax.random.normal(kx, (N, H, W, in_channel), jnp.float32)
    x_nhwc = x_nhwc.astype(jnp.bfloat16).astype(jnp.float32)

    layer_params = []
    cin = in_channel
    for l in range(n_layers):
        layer_params.append(make_params(jax.random.fold_in(kp, l), cin, growth_rate))
        cin += growth_rate

    out = jax.block_until_ready(dense_block_forward_nhwc(x_nhwc, layer_params))
    assert out.shape == (N, H, W, in_channel + n_layers * growth_rate), out.shape

    ref = dense_block_reference_nhwc(x_nhwc, layer_params)
    max_err = float(jnp.max(jnp.abs(out.astype(jnp.float32) - ref)))
    # Error budget: bf16 MXU operands + bf16 activations at the HBM boundary across
    # two stacked layers (f32 accumulation everywhere inside the kernel).
    assert max_err < 5e-2, max_err

    print("KERNEL_OK")
</pallas_src>

<mosaic_0001>
module attributes {stable_mosaic.version = 11 : i64} {
  func.func @kernel(%arg0: i32, %arg1: memref<256x4xbf16, #tpu.memory_space<vmem>>, %arg2: memref<1x4xf32, #tpu.memory_space<vmem>>, %arg3: memref<1x4xf32, #tpu.memory_space<vmem>>, %arg4: memref<4x16xbf16, #tpu.memory_space<vmem>>, %arg5: memref<1x16xf32, #tpu.memory_space<vmem>>, %arg6: memref<1x16xf32, #tpu.memory_space<vmem>>, %arg7: memref<16x36xbf16, #tpu.memory_space<vmem>>, %arg8: memref<1x4xf32, #tpu.memory_space<vmem>>, %arg9: memref<256x4xbf16, #tpu.memory_space<vmem>>, %arg10: memref<16x16x4xf32, #tpu.memory_space<vmem>>) attributes {dimension_semantics = [#tpu.dimension_semantics<parallel>], iteration_bounds = array<i64: 2>, scalar_prefetch = 0 : i64, scratch_operands = 1 : i64, tpu.core_type = #tpu.core_type<tc>, window_params = [{transform_indices = @transform_0, window_bounds = array<i64: 256, 4>}, {pipeline_mode = #tpu.pipeline_mode<synchronous>, transform_indices = @transform_1, window_bounds = array<i64: 1, 4>}, {pipeline_mode = #tpu.pipeline_mode<synchronous>, transform_indices = @transform_2, window_bounds = array<i64: 1, 4>}, {pipeline_mode = #tpu.pipeline_mode<synchronous>, transform_indices = @transform_3, window_bounds = array<i64: 4, 16>}, {pipeline_mode = #tpu.pipeline_mode<synchronous>, transform_indices = @transform_4, window_bounds = array<i64: 1, 16>}, {pipeline_mode = #tpu.pipeline_mode<synchronous>, transform_indices = @transform_5, window_bounds = array<i64: 1, 16>}, {pipeline_mode = #tpu.pipeline_mode<synchronous>, transform_indices = @transform_6, window_bounds = array<i64: 16, 36>}, {pipeline_mode = #tpu.pipeline_mode<synchronous>, transform_indices = @transform_7, window_bounds = array<i64: 1, 4>}, {transform_indices = @transform_8, window_bounds = array<i64: 256, 4>}]} {
    %cst = arith.constant 0.000000e+00 : f32
    %0 = vector.broadcast %cst : f32 to vector<256x16xf32>
    %c0 = arith.constant 0 : index
    %c0_0 = arith.constant 0 : index
    %1 = vector.load %arg1[%c0, %c0_0] : memref<256x4xbf16, #tpu.memory_space<vmem>>, vector<256x4xbf16>
    %2 = arith.extf %1 : vector<256x4xbf16> to vector<256x4xf32>
    %c0_1 = arith.constant 0 : index
    %c0_2 = arith.constant 0 : index
    %3 = vector.load %arg2[%c0_1, %c0_2] : memref<1x4xf32, #tpu.memory_space<vmem>>, vector<1x4xf32>
    %4 = vector.broadcast %3 : vector<1x4xf32> to vector<256x4xf32>
    %5 = arith.mulf %2, %4 : vector<256x4xf32>
    %c0_3 = arith.constant 0 : index
    %c0_4 = arith.constant 0 : index
    %6 = vector.load %arg3[%c0_3, %c0_4] : memref<1x4xf32, #tpu.memory_space<vmem>>, vector<1x4xf32>
    %7 = vector.broadcast %6 : vector<1x4xf32> to vector<256x4xf32>
    %8 = arith.addf %5, %7 : vector<256x4xf32>
    %cst_5 = arith.constant 0.000000e+00 : f32
    %9 = vector.broadcast %cst_5 : f32 to vector<256x4xf32>
    %10 = arith.maximumf %8, %9 : vector<256x4xf32>
    %11 = arith.truncf %10 : vector<256x4xf32> to vector<256x4xbf16>
    %c0_6 = arith.constant 0 : index
    %c0_7 = arith.constant 0 : index
    %12 = vector.load %arg4[%c0_6, %c0_7] : memref<4x16xbf16, #tpu.memory_space<vmem>>, vector<4x16xbf16>
    %cst_8 = arith.constant dense<0.000000e+00> : vector<256x16xf32>
    %13 = tpu.matmul %11, %12, %cst_8 {dimension_numbers = #tpu.dot_dimension_numbers<[1], [0], [0], [1], [0, 0, 1, 1], [], []>} : vector<256x4xbf16>, vector<4x16xbf16>, vector<256x16xf32> -> vector<256x16xf32>
    %14 = arith.addf %0, %13 : vector<256x16xf32>
    %c0_9 = arith.constant 0 : index
    %c0_10 = arith.constant 0 : index
    %15 = vector.load %arg5[%c0_9, %c0_10] : memref<1x16xf32, #tpu.memory_space<vmem>>, vector<1x16xf32>
    %16 = vector.broadcast %15 : vector<1x16xf32> to vector<256x16xf32>
    %17 = arith.mulf %14, %16 : vector<256x16xf32>
    %c0_11 = arith.constant 0 : index
    %c0_12 = arith.constant 0 : index
    %18 = vector.load %arg6[%c0_11, %c0_12] : memref<1x16xf32, #tpu.memory_space<vmem>>, vector<1x16xf32>
    %19 = vector.broadcast %18 : vector<1x16xf32> to vector<256x16xf32>
    %20 = arith.addf %17, %19 : vector<256x16xf32>
    %cst_13 = arith.constant 0.000000e+00 : f32
    %21 = vector.broadcast %cst_13 : f32 to vector<256x16xf32>
    %22 = arith.maximumf %20, %21 : vector<256x16xf32>
    %23 = arith.truncf %22 : vector<256x16xf32> to vector<256x16xbf16>
    %c0_14 = arith.constant 0 : index
    %c0_15 = arith.constant 0 : index
    %24 = vector.load %arg7[%c0_14, %c0_15] : memref<16x36xbf16, #tpu.memory_space<vmem>>, vector<16x36xbf16>
    %cst_16 = arith.constant dense<0.000000e+00> : vector<256x36xf32>
    %25 = tpu.matmul %23, %24, %cst_16 {dimension_numbers = #tpu.dot_dimension_numbers<[1], [0], [0], [1], [0, 0, 1, 1], [], []>} : vector<256x16xbf16>, vector<16x36xbf16>, vector<256x36xf32> -> vector<256x36xf32>
    %26 = vector.shape_cast %25 : vector<256x36xf32> to vector<16x16x36xf32>
    %27 = vector.extract_strided_slice %26 {offsets = [0, 0, 16], sizes = [16, 16, 4], strides = [1, 1, 1]} : vector<16x16x36xf32> to vector<16x16x4xf32>
    %c0_17 = arith.constant 0 : index
    %c0_18 = arith.constant 0 : index
    %c0_19 = arith.constant 0 : index
    %28 = vector.load %arg10[%c0_17, %c0_18, %c0_19] : memref<16x16x4xf32, #tpu.memory_space<vmem>>, vector<16x16x4xf32>
    tpu.vector_store %arg10[%c0_17, %c0_18, %c0_19], %27 {strides = array<i32>} : memref<16x16x4xf32, #tpu.memory_space<vmem>>, vector<16x16x4xf32>,
    %c1 = arith.constant 1 : index
    %c1_20 = arith.constant 1 : index
    %c0_21 = arith.constant 0 : index
    %29 = vector.load %arg10[%c1, %c1_20, %c0_21] : memref<16x16x4xf32, #tpu.memory_space<vmem>>, vector<15x15x4xf32>
    %30 = vector.extract_strided_slice %26 {offsets = [0, 0, 0], sizes = [15, 15, 4], strides = [1, 1, 1]} : vector<16x16x36xf32> to vector<15x15x4xf32>
    %31 = arith.addf %29, %30 : vector<15x15x4xf32>
    %c1_22 = arith.constant 1 : index
    %c1_23 = arith.constant 1 : index
    %c0_24 = arith.constant 0 : index
    %32 = vector.load %arg10[%c1_22, %c1_23, %c0_24] : memref<16x16x4xf32, #tpu.memory_space<vmem>>, vector<15x15x4xf32>
    tpu.vector_store %arg10[%c1_22, %c1_23, %c0_24], %31 {strides = array<i32>} : memref<16x16x4xf32, #tpu.memory_space<vmem>>, vector<15x15x4xf32>,
    %c1_25 = arith.constant 1 : index
    %c0_26 = arith.constant 0 : index
    %c0_27 = arith.constant 0 : index
    %33 = vector.load %arg10[%c1_25, %c0_26, %c0_27] : memref<16x16x4xf32, #tpu.memory_space<vmem>>, vector<15x16x4xf32>
    %34 = vector.extract_strided_slice %26 {offsets = [0, 0, 4], sizes = [15, 16, 4], strides = [1, 1, 1]} : vector<16x16x36xf32> to vector<15x16x4xf32>
    %35 = arith.addf %33, %34 : vector<15x16x4xf32>
    %c1_28 = arith.constant 1 : index
    %c0_29 = arith.constant 0 : index
    %c0_30 = arith.constant 0 : index
    %36 = vector.load %arg10[%c1_28, %c0_29, %c0_30] : memref<16x16x4xf32, #tpu.memory_space<vmem>>, vector<15x16x4xf32>
    tpu.vector_store %arg10[%c1_28, %c0_29, %c0_30], %35 {strides = array<i32>} : memref<16x16x4xf32, #tpu.memory_space<vmem>>, vector<15x16x4xf32>,
    %c1_31 = arith.constant 1 : index
    %c0_32 = arith.constant 0 : index
    %c0_33 = arith.constant 0 : index
    %37 = vector.load %arg10[%c1_31, %c0_32, %c0_33] : memref<16x16x4xf32, #tpu.memory_space<vmem>>, vector<15x15x4xf32>
    %38 = vector.extract_strided_slice %26 {offsets = [0, 1, 8], sizes = [15, 15, 4], strides = [1, 1, 1]} : vector<16x16x36xf32> to vector<15x15x4xf32>
    %39 = arith.addf %37, %38 : vector<15x15x4xf32>
    %c1_34 = arith.constant 1 : index
    %c0_35 = arith.constant 0 : index
    %c0_36 = arith.constant 0 : index
    %40 = vector.load %arg10[%c1_34, %c0_35, %c0_36] : memref<16x16x4xf32, #tpu.memory_space<vmem>>, vector<15x15x4xf32>
    tpu.vector_store %arg10[%c1_34, %c0_35, %c0_36], %39 {strides = array<i32>} : memref<16x16x4xf32, #tpu.memory_space<vmem>>, vector<15x15x4xf32>,
    %c0_37 = arith.constant 0 : index
    %c1_38 = arith.constant 1 : index
    %c0_39 = arith.constant 0 : index
    %41 = vector.load %arg10[%c0_37, %c1_38, %c0_39] : memref<16x16x4xf32, #tpu.memory_space<vmem>>, vector<16x15x4xf32>
    %42 = vector.extract_strided_slice %26 {offsets = [0, 0, 12], sizes = [16, 15, 4], strides = [1, 1, 1]} : vector<16x16x36xf32> to vector<16x15x4xf32>
    %43 = arith.addf %41, %42 : vector<16x15x4xf32>
    %c0_40 = arith.constant 0 : index
    %c1_41 = arith.constant 1 : index
    %c0_42 = arith.constant 0 : index
    %44 = vector.load %arg10[%c0_40, %c1_41, %c0_42] : memref<16x16x4xf32, #tpu.memory_space<vmem>>, vector<16x15x4xf32>
    tpu.vector_store %arg10[%c0_40, %c1_41, %c0_42], %43 {strides = array<i32>} : memref<16x16x4xf32, #tpu.memory_space<vmem>>, vector<16x15x4xf32>,
    %c0_43 = arith.constant 0 : index
    %c0_44 = arith.constant 0 : index
    %c0_45 = arith.constant 0 : index
    %45 = vector.load %arg10[%c0_43, %c0_44, %c0_45] : memref<16x16x4xf32, #tpu.memory_space<vmem>>, vector<16x15x4xf32>
    %46 = vector.extract_strided_slice %26 {offsets = [0, 1, 20], sizes = [16, 15, 4], strides = [1, 1, 1]} : vector<16x16x36xf32> to vector<16x15x4xf32>
    %47 = arith.addf %45, %46 : vector<16x15x4xf32>
    %c0_46 = arith.constant 0 : index
    %c0_47 = arith.constant 0 : index
    %c0_48 = arith.constant 0 : index
    %48 = vector.load %arg10[%c0_46, %c0_47, %c0_48] : memref<16x16x4xf32, #tpu.memory_space<vmem>>, vector<16x15x4xf32>
    tpu.vector_store %arg10[%c0_46, %c0_47, %c0_48], %47 {strides = array<i32>} : memref<16x16x4xf32, #tpu.memory_space<vmem>>, vector<16x15x4xf32>,
    %c0_49 = arith.constant 0 : index
    %c1_50 = arith.constant 1 : index
    %c0_51 = arith.constant 0 : index
    %49 = vector.load %arg10[%c0_49, %c1_50, %c0_51] : memref<16x16x4xf32, #tpu.memory_space<vmem>>, vector<15x15x4xf32>
    %50 = vector.extract_strided_slice %26 {offsets = [1, 0, 24], sizes = [15, 15, 4], strides = [1, 1, 1]} : vector<16x16x36xf32> to vector<15x15x4xf32>
    %51 = arith.addf %49, %50 : vector<15x15x4xf32>
    %c0_52 = arith.constant 0 : index
    %c1_53 = arith.constant 1 : index
    %c0_54 = arith.constant 0 : index
    %52 = vector.load %arg10[%c0_52, %c1_53, %c0_54] : memref<16x16x4xf32, #tpu.memory_space<vmem>>, vector<15x15x4xf32>
    tpu.vector_store %arg10[%c0_52, %c1_53, %c0_54], %51 {strides = array<i32>} : memref<16x16x4xf32, #tpu.memory_space<vmem>>, vector<15x15x4xf32>,
    %c0_55 = arith.constant 0 : index
    %c0_56 = arith.constant 0 : index
    %c0_57 = arith.constant 0 : index
    %53 = vector.load %arg10[%c0_55, %c0_56, %c0_57] : memref<16x16x4xf32, #tpu.memory_space<vmem>>, vector<15x16x4xf32>
    %54 = vector.extract_strided_slice %26 {offsets = [1, 0, 28], sizes = [15, 16, 4], strides = [1, 1, 1]} : vector<16x16x36xf32> to vector<15x16x4xf32>
    %55 = arith.addf %53, %54 : vector<15x16x4xf32>
    %c0_58 = arith.constant 0 : index
    %c0_59 = arith.constant 0 : index
    %c0_60 = arith.constant 0 : index
    %56 = vector.load %arg10[%c0_58, %c0_59, %c0_60] : memref<16x16x4xf32, #tpu.memory_space<vmem>>, vector<15x16x4xf32>
    tpu.vector_store %arg10[%c0_58, %c0_59, %c0_60], %55 {strides = array<i32>} : memref<16x16x4xf32, #tpu.memory_space<vmem>>, vector<15x16x4xf32>,
    %c0_61 = arith.constant 0 : index
    %c0_62 = arith.constant 0 : index
    %c0_63 = arith.constant 0 : index
    %57 = vector.load %arg10[%c0_61, %c0_62, %c0_63] : memref<16x16x4xf32, #tpu.memory_space<vmem>>, vector<15x15x4xf32>
    %58 = vector.extract_strided_slice %26 {offsets = [1, 1, 32], sizes = [15, 15, 4], strides = [1, 1, 1]} : vector<16x16x36xf32> to vector<15x15x4xf32>
    %59 = arith.addf %57, %58 : vector<15x15x4xf32>
    %c0_64 = arith.constant 0 : index
    %c0_65 = arith.constant 0 : index
    %c0_66 = arith.constant 0 : index
    %60 = vector.load %arg10[%c0_64, %c0_65, %c0_66] : memref<16x16x4xf32, #tpu.memory_space<vmem>>, vector<15x15x4xf32>
    tpu.vector_store %arg10[%c0_64, %c0_65, %c0_66], %59 {strides = array<i32>} : memref<16x16x4xf32, #tpu.memory_space<vmem>>, vector<15x15x4xf32>,
    %c0_67 = arith.constant 0 : index
    %c0_68 = arith.constant 0 : index
    %c0_69 = arith.constant 0 : index
    %61 = vector.load %arg10[%c0_67, %c0_68, %c0_69] : memref<16x16x4xf32, #tpu.memory_space<vmem>>, vector<16x16x4xf32>
    %62 = vector.shape_cast %61 : vector<16x16x4xf32> to vector<256x4xf32>
    %c0_70 = arith.constant 0 : index
    %c0_71 = arith.constant 0 : index
    %63 = vector.load %arg8[%c0_70, %c0_71] : memref<1x4xf32, #tpu.memory_space<vmem>>, vector<1x4xf32>
    %64 = vector.broadcast %63 : vector<1x4xf32> to vector<256x4xf32>
    %65 = arith.addf %62, %64 : vector<256x4xf32>
    %66 = arith.truncf %65 : vector<256x4xf32> to vector<256x4xbf16>
    %c0_72 = arith.constant 0 : index
    %c0_73 = arith.constant 0 : index
    %67 = vector.load %arg9[%c0_72, %c0_73] : memref<256x4xbf16, #tpu.memory_space<vmem>>, vector<256x4xbf16>
    tpu.vector_store %arg9[%c0_72, %c0_73], %66 {strides = array<i32>} : memref<256x4xbf16, #tpu.memory_space<vmem>>, vector<256x4xbf16>,
    return
  }
  func.func @transform_0(%arg0: i32) -> (i32, i32) {
    %c0_i32 = arith.constant 0 : i32
    %c0_i32_0 = arith.constant 0 : i32
    return %arg0, %c0_i32 : i32, i32
  }
  func.func @transform_1(%arg0: i32) -> (i32, i32) {
    %c0_i32 = arith.constant 0 : i32
    %c0_i32_0 = arith.constant 0 : i32
    %c0_i32_1 = arith.constant 0 : i32
    return %c0_i32, %c0_i32_0 : i32, i32
  }
  func.func @transform_2(%arg0: i32) -> (i32, i32) {
    %c0_i32 = arith.constant 0 : i32
    %c0_i32_0 = arith.constant 0 : i32
    %c0_i32_1 = arith.constant 0 : i32
    return %c0_i32, %c0_i32_0 : i32, i32
  }
  func.func @transform_3(%arg0: i32) -> (i32, i32) {
    %c0_i32 = arith.constant 0 : i32
    %c0_i32_0 = arith.constant 0 : i32
    %c0_i32_1 = arith.constant 0 : i32
    return %c0_i32, %c0_i32_0 : i32, i32
  }
  func.func @transform_4(%arg0: i32) -> (i32, i32) {
    %c0_i32 = arith.constant 0 : i32
    %c0_i32_0 = arith.constant 0 : i32
    %c0_i32_1 = arith.constant 0 : i32
    return %c0_i32, %c0_i32_0 : i32, i32
  }
  func.func @transform_5(%arg0: i32) -> (i32, i32) {
    %c0_i32 = arith.constant 0 : i32
    %c0_i32_0 = arith.constant 0 : i32
    %c0_i32_1 = arith.constant 0 : i32
    return %c0_i32, %c0_i32_0 : i32, i32
  }
  func.func @transform_6(%arg0: i32) -> (i32, i32) {
    %c0_i32 = arith.constant 0 : i32
    %c0_i32_0 = arith.constant 0 : i32
    %c0_i32_1 = arith.constant 0 : i32
    return %c0_i32, %c0_i32_0 : i32, i32
  }
  func.func @transform_7(%arg0: i32) -> (i32, i32) {
    %c0_i32 = arith.constant 0 : i32
    %c0_i32_0 = arith.constant 0 : i32
    %c0_i32_1 = arith.constant 0 : i32
    return %c0_i32, %c0_i32_0 : i32, i32
  }
  func.func @transform_8(%arg0: i32) -> (i32, i32) {
    %c0_i32 = arith.constant 0 : i32
    %c0_i32_0 = arith.constant 0 : i32
    return %arg0, %c0_i32 : i32, i32
  }
}

module attributes {stable_mosaic.version = 11 : i64} {
  func.func @kernel(%arg0: i32, %arg1: memref<256x4xbf16, #tpu.memory_space<vmem>>, %arg2: memref<256x4xbf16, #tpu.memory_space<vmem>>, %arg3: memref<1x4xf32, #tpu.memory_space<vmem>>, %arg4: memref<1x4xf32, #tpu.memory_space<vmem>>, %arg5: memref<1x4xf32, #tpu.memory_space<vmem>>, %arg6: memref<1x4xf32, #tpu.memory_space<vmem>>, %arg7: memref<4x16xbf16, #tpu.memory_space<vmem>>, %arg8: memref<4x16xbf16, #tpu.memory_space<vmem>>, %arg9: memref<1x16xf32, #tpu.memory_space<vmem>>, %arg10: memref<1x16xf32, #tpu.memory_space<vmem>>, %arg11: memref<16x36xbf16, #tpu.memory_space<vmem>>, %arg12: memref<1x4xf32, #tpu.memory_space<vmem>>, %arg13: memref<256x4xbf16, #tpu.memory_space<vmem>>, %arg14: memref<16x16x4xf32, #tpu.memory_space<vmem>>) attributes {dimension_semantics = [#tpu.dimension_semantics<parallel>], iteration_bounds = array<i64: 2>, scalar_prefetch = 0 : i64, scratch_operands = 1 : i64, tpu.core_type = #tpu.core_type<tc>, window_params = [{transform_indices = @transform_0, window_bounds = array<i64: 256, 4>}, {transform_indices = @transform_1, window_bounds = array<i64: 256, 4>}, {pipeline_mode = #tpu.pipeline_mode<synchronous>, transform_indices = @transform_2, window_bounds = array<i64: 1, 4>}, {pipeline_mode = #tpu.pipeline_mode<synchronous>, transform_indices = @transform_3, window_bounds = array<i64: 1, 4>}, {pipeline_mode = #tpu.pipeline_mode<synchronous>, transform_indices = @transform_4, window_bounds = array<i64: 1, 4>}, {pipeline_mode = #tpu.pipeline_mode<synchronous>, transform_indices = @transform_5, window_bounds = array<i64: 1, 4>}, {pipeline_mode = #tpu.pipeline_mode<synchronous>, transform_indices = @transform_6, window_bounds = array<i64: 4, 16>}, {pipeline_mode = #tpu.pipeline_mode<synchronous>, transform_indices = @transform_7, window_bounds = array<i64: 4, 16>}, {pipeline_mode = #tpu.pipeline_mode<synchronous>, transform_indices = @transform_8, window_bounds = array<i64: 1, 16>}, {pipeline_mode = #tpu.pipeline_mode<synchronous>, transform_indices = @transform_9, window_bounds = array<i64: 1, 16>}, {pipeline_mode = #tpu.pipeline_mode<synchronous>, transform_indices = @transform_10, window_bounds = array<i64: 16, 36>}, {pipeline_mode = #tpu.pipeline_mode<synchronous>, transform_indices = @transform_11, window_bounds = array<i64: 1, 4>}, {transform_indices = @transform_12, window_bounds = array<i64: 256, 4>}]} {
    %cst = arith.constant 0.000000e+00 : f32
    %0 = vector.broadcast %cst : f32 to vector<256x16xf32>
    %c0 = arith.constant 0 : index
    %c0_0 = arith.constant 0 : index
    %1 = vector.load %arg1[%c0, %c0_0] : memref<256x4xbf16, #tpu.memory_space<vmem>>, vector<256x4xbf16>
    %2 = arith.extf %1 : vector<256x4xbf16> to vector<256x4xf32>
    %c0_1 = arith.constant 0 : index
    %c0_2 = arith.constant 0 : index
    %3 = vector.load %arg3[%c0_1, %c0_2] : memref<1x4xf32, #tpu.memory_space<vmem>>, vector<1x4xf32>
    %4 = vector.broadcast %3 : vector<1x4xf32> to vector<256x4xf32>
    %5 = arith.mulf %2, %4 : vector<256x4xf32>
    %c0_3 = arith.constant 0 : index
    %c0_4 = arith.constant 0 : index
    %6 = vector.load %arg5[%c0_3, %c0_4] : memref<1x4xf32, #tpu.memory_space<vmem>>, vector<1x4xf32>
    %7 = vector.broadcast %6 : vector<1x4xf32> to vector<256x4xf32>
    %8 = arith.addf %5, %7 : vector<256x4xf32>
    %cst_5 = arith.constant 0.000000e+00 : f32
    %9 = vector.broadcast %cst_5 : f32 to vector<256x4xf32>
    %10 = arith.maximumf %8, %9 : vector<256x4xf32>
    %11 = arith.truncf %10 : vector<256x4xf32> to vector<256x4xbf16>
    %c0_6 = arith.constant 0 : index
    %c0_7 = arith.constant 0 : index
    %12 = vector.load %arg7[%c0_6, %c0_7] : memref<4x16xbf16, #tpu.memory_space<vmem>>, vector<4x16xbf16>
    %cst_8 = arith.constant dense<0.000000e+00> : vector<256x16xf32>
    %13 = tpu.matmul %11, %12, %cst_8 {dimension_numbers = #tpu.dot_dimension_numbers<[1], [0], [0], [1], [0, 0, 1, 1], [], []>} : vector<256x4xbf16>, vector<4x16xbf16>, vector<256x16xf32> -> vector<256x16xf32>
    %14 = arith.addf %0, %13 : vector<256x16xf32>
    %c0_9 = arith.constant 0 : index
    %c0_10 = arith.constant 0 : index
    %15 = vector.load %arg2[%c0_9, %c0_10] : memref<256x4xbf16, #tpu.memory_space<vmem>>, vector<256x4xbf16>
    %16 = arith.extf %15 : vector<256x4xbf16> to vector<256x4xf32>
    %c0_11 = arith.constant 0 : index
    %c0_12 = arith.constant 0 : index
    %17 = vector.load %arg4[%c0_11, %c0_12] : memref<1x4xf32, #tpu.memory_space<vmem>>, vector<1x4xf32>
    %18 = vector.broadcast %17 : vector<1x4xf32> to vector<256x4xf32>
    %19 = arith.mulf %16, %18 : vector<256x4xf32>
    %c0_13 = arith.constant 0 : index
    %c0_14 = arith.constant 0 : index
    %20 = vector.load %arg6[%c0_13, %c0_14] : memref<1x4xf32, #tpu.memory_space<vmem>>, vector<1x4xf32>
    %21 = vector.broadcast %20 : vector<1x4xf32> to vector<256x4xf32>
    %22 = arith.addf %19, %21 : vector<256x4xf32>
    %cst_15 = arith.constant 0.000000e+00 : f32
    %23 = vector.broadcast %cst_15 : f32 to vector<256x4xf32>
    %24 = arith.maximumf %22, %23 : vector<256x4xf32>
    %25 = arith.truncf %24 : vector<256x4xf32> to vector<256x4xbf16>
    %c0_16 = arith.constant 0 : index
    %c0_17 = arith.constant 0 : index
    %26 = vector.load %arg8[%c0_16, %c0_17] : memref<4x16xbf16, #tpu.memory_space<vmem>>, vector<4x16xbf16>
    %cst_18 = arith.constant dense<0.000000e+00> : vector<256x16xf32>
    %27 = tpu.matmul %25, %26, %cst_18 {dimension_numbers = #tpu.dot_dimension_numbers<[1], [0], [0], [1], [0, 0, 1, 1], [], []>} : vector<256x4xbf16>, vector<4x16xbf16>, vector<256x16xf32> -> vector<256x16xf32>
    %28 = arith.addf %14, %27 : vector<256x16xf32>
    %c0_19 = arith.constant 0 : index
    %c0_20 = arith.constant 0 : index
    %29 = vector.load %arg9[%c0_19, %c0_20] : memref<1x16xf32, #tpu.memory_space<vmem>>, vector<1x16xf32>
    %30 = vector.broadcast %29 : vector<1x16xf32> to vector<256x16xf32>
    %31 = arith.mulf %28, %30 : vector<256x16xf32>
    %c0_21 = arith.constant 0 : index
    %c0_22 = arith.constant 0 : index
    %32 = vector.load %arg10[%c0_21, %c0_22] : memref<1x16xf32, #tpu.memory_space<vmem>>, vector<1x16xf32>
    %33 = vector.broadcast %32 : vector<1x16xf32> to vector<256x16xf32>
    %34 = arith.addf %31, %33 : vector<256x16xf32>
    %cst_23 = arith.constant 0.000000e+00 : f32
    %35 = vector.broadcast %cst_23 : f32 to vector<256x16xf32>
    %36 = arith.maximumf %34, %35 : vector<256x16xf32>
    %37 = arith.truncf %36 : vector<256x16xf32> to vector<256x16xbf16>
    %c0_24 = arith.constant 0 : index
    %c0_25 = arith.constant 0 : index
    %38 = vector.load %arg11[%c0_24, %c0_25] : memref<16x36xbf16, #tpu.memory_space<vmem>>, vector<16x36xbf16>
    %cst_26 = arith.constant dense<0.000000e+00> : vector<256x36xf32>
    %39 = tpu.matmul %37, %38, %cst_26 {dimension_numbers = #tpu.dot_dimension_numbers<[1], [0], [0], [1], [0, 0, 1, 1], [], []>} : vector<256x16xbf16>, vector<16x36xbf16>, vector<256x36xf32> -> vector<256x36xf32>
    %40 = vector.shape_cast %39 : vector<256x36xf32> to vector<16x16x36xf32>
    %41 = vector.extract_strided_slice %40 {offsets = [0, 0, 16], sizes = [16, 16, 4], strides = [1, 1, 1]} : vector<16x16x36xf32> to vector<16x16x4xf32>
    %c0_27 = arith.constant 0 : index
    %c0_28 = arith.constant 0 : index
    %c0_29 = arith.constant 0 : index
    %42 = vector.load %arg14[%c0_27, %c0_28, %c0_29] : memref<16x16x4xf32, #tpu.memory_space<vmem>>, vector<16x16x4xf32>
    tpu.vector_store %arg14[%c0_27, %c0_28, %c0_29], %41 {strides = array<i32>} : memref<16x16x4xf32, #tpu.memory_space<vmem>>, vector<16x16x4xf32>,
    %c1 = arith.constant 1 : index
    %c1_30 = arith.constant 1 : index
    %c0_31 = arith.constant 0 : index
    %43 = vector.load %arg14[%c1, %c1_30, %c0_31] : memref<16x16x4xf32, #tpu.memory_space<vmem>>, vector<15x15x4xf32>
    %44 = vector.extract_strided_slice %40 {offsets = [0, 0, 0], sizes = [15, 15, 4], strides = [1, 1, 1]} : vector<16x16x36xf32> to vector<15x15x4xf32>
    %45 = arith.addf %43, %44 : vector<15x15x4xf32>
    %c1_32 = arith.constant 1 : index
    %c1_33 = arith.constant 1 : index
    %c0_34 = arith.constant 0 : index
    %46 = vector.load %arg14[%c1_32, %c1_33, %c0_34] : memref<16x16x4xf32, #tpu.memory_space<vmem>>, vector<15x15x4xf32>
    tpu.vector_store %arg14[%c1_32, %c1_33, %c0_34], %45 {strides = array<i32>} : memref<16x16x4xf32, #tpu.memory_space<vmem>>, vector<15x15x4xf32>,
    %c1_35 = arith.constant 1 : index
    %c0_36 = arith.constant 0 : index
    %c0_37 = arith.constant 0 : index
    %47 = vector.load %arg14[%c1_35, %c0_36, %c0_37] : memref<16x16x4xf32, #tpu.memory_space<vmem>>, vector<15x16x4xf32>
    %48 = vector.extract_strided_slice %40 {offsets = [0, 0, 4], sizes = [15, 16, 4], strides = [1, 1, 1]} : vector<16x16x36xf32> to vector<15x16x4xf32>
    %49 = arith.addf %47, %48 : vector<15x16x4xf32>
    %c1_38 = arith.constant 1 : index
    %c0_39 = arith.constant 0 : index
    %c0_40 = arith.constant 0 : index
    %50 = vector.load %arg14[%c1_38, %c0_39, %c0_40] : memref<16x16x4xf32, #tpu.memory_space<vmem>>, vector<15x16x4xf32>
    tpu.vector_store %arg14[%c1_38, %c0_39, %c0_40], %49 {strides = array<i32>} : memref<16x16x4xf32, #tpu.memory_space<vmem>>, vector<15x16x4xf32>,
    %c1_41 = arith.constant 1 : index
    %c0_42 = arith.constant 0 : index
    %c0_43 = arith.constant 0 : index
    %51 = vector.load %arg14[%c1_41, %c0_42, %c0_43] : memref<16x16x4xf32, #tpu.memory_space<vmem>>, vector<15x15x4xf32>
    %52 = vector.extract_strided_slice %40 {offsets = [0, 1, 8], sizes = [15, 15, 4], strides = [1, 1, 1]} : vector<16x16x36xf32> to vector<15x15x4xf32>
    %53 = arith.addf %51, %52 : vector<15x15x4xf32>
    %c1_44 = arith.constant 1 : index
    %c0_45 = arith.constant 0 : index
    %c0_46 = arith.constant 0 : index
    %54 = vector.load %arg14[%c1_44, %c0_45, %c0_46] : memref<16x16x4xf32, #tpu.memory_space<vmem>>, vector<15x15x4xf32>
    tpu.vector_store %arg14[%c1_44, %c0_45, %c0_46], %53 {strides = array<i32>} : memref<16x16x4xf32, #tpu.memory_space<vmem>>, vector<15x15x4xf32>,
    %c0_47 = arith.constant 0 : index
    %c1_48 = arith.constant 1 : index
    %c0_49 = arith.constant 0 : index
    %55 = vector.load %arg14[%c0_47, %c1_48, %c0_49] : memref<16x16x4xf32, #tpu.memory_space<vmem>>, vector<16x15x4xf32>
    %56 = vector.extract_strided_slice %40 {offsets = [0, 0, 12], sizes = [16, 15, 4], strides = [1, 1, 1]} : vector<16x16x36xf32> to vector<16x15x4xf32>
    %57 = arith.addf %55, %56 : vector<16x15x4xf32>
    %c0_50 = arith.constant 0 : index
    %c1_51 = arith.constant 1 : index
    %c0_52 = arith.constant 0 : index
    %58 = vector.load %arg14[%c0_50, %c1_51, %c0_52] : memref<16x16x4xf32, #tpu.memory_space<vmem>>, vector<16x15x4xf32>
    tpu.vector_store %arg14[%c0_50, %c1_51, %c0_52], %57 {strides = array<i32>} : memref<16x16x4xf32, #tpu.memory_space<vmem>>, vector<16x15x4xf32>,
    %c0_53 = arith.constant 0 : index
    %c0_54 = arith.constant 0 : index
    %c0_55 = arith.constant 0 : index
    %59 = vector.load %arg14[%c0_53, %c0_54, %c0_55] : memref<16x16x4xf32, #tpu.memory_space<vmem>>, vector<16x15x4xf32>
    %60 = vector.extract_strided_slice %40 {offsets = [0, 1, 20], sizes = [16, 15, 4], strides = [1, 1, 1]} : vector<16x16x36xf32> to vector<16x15x4xf32>
    %61 = arith.addf %59, %60 : vector<16x15x4xf32>
    %c0_56 = arith.constant 0 : index
    %c0_57 = arith.constant 0 : index
    %c0_58 = arith.constant 0 : index
    %62 = vector.load %arg14[%c0_56, %c0_57, %c0_58] : memref<16x16x4xf32, #tpu.memory_space<vmem>>, vector<16x15x4xf32>
    tpu.vector_store %arg14[%c0_56, %c0_57, %c0_58], %61 {strides = array<i32>} : memref<16x16x4xf32, #tpu.memory_space<vmem>>, vector<16x15x4xf32>,
    %c0_59 = arith.constant 0 : index
    %c1_60 = arith.constant 1 : index
    %c0_61 = arith.constant 0 : index
    %63 = vector.load %arg14[%c0_59, %c1_60, %c0_61] : memref<16x16x4xf32, #tpu.memory_space<vmem>>, vector<15x15x4xf32>
    %64 = vector.extract_strided_slice %40 {offsets = [1, 0, 24], sizes = [15, 15, 4], strides = [1, 1, 1]} : vector<16x16x36xf32> to vector<15x15x4xf32>
    %65 = arith.addf %63, %64 : vector<15x15x4xf32>
    %c0_62 = arith.constant 0 : index
    %c1_63 = arith.constant 1 : index
    %c0_64 = arith.constant 0 : index
    %66 = vector.load %arg14[%c0_62, %c1_63, %c0_64] : memref<16x16x4xf32, #tpu.memory_space<vmem>>, vector<15x15x4xf32>
    tpu.vector_store %arg14[%c0_62, %c1_63, %c0_64], %65 {strides = array<i32>} : memref<16x16x4xf32, #tpu.memory_space<vmem>>, vector<15x15x4xf32>,
    %c0_65 = arith.constant 0 : index
    %c0_66 = arith.constant 0 : index
    %c0_67 = arith.constant 0 : index
    %67 = vector.load %arg14[%c0_65, %c0_66, %c0_67] : memref<16x16x4xf32, #tpu.memory_space<vmem>>, vector<15x16x4xf32>
    %68 = vector.extract_strided_slice %40 {offsets = [1, 0, 28], sizes = [15, 16, 4], strides = [1, 1, 1]} : vector<16x16x36xf32> to vector<15x16x4xf32>
    %69 = arith.addf %67, %68 : vector<15x16x4xf32>
    %c0_68 = arith.constant 0 : index
    %c0_69 = arith.constant 0 : index
    %c0_70 = arith.constant 0 : index
    %70 = vector.load %arg14[%c0_68, %c0_69, %c0_70] : memref<16x16x4xf32, #tpu.memory_space<vmem>>, vector<15x16x4xf32>
    tpu.vector_store %arg14[%c0_68, %c0_69, %c0_70], %69 {strides = array<i32>} : memref<16x16x4xf32, #tpu.memory_space<vmem>>, vector<15x16x4xf32>,
    %c0_71 = arith.constant 0 : index
    %c0_72 = arith.constant 0 : index
    %c0_73 = arith.constant 0 : index
    %71 = vector.load %arg14[%c0_71, %c0_72, %c0_73] : memref<16x16x4xf32, #tpu.memory_space<vmem>>, vector<15x15x4xf32>
    %72 = vector.extract_strided_slice %40 {offsets = [1, 1, 32], sizes = [15, 15, 4], strides = [1, 1, 1]} : vector<16x16x36xf32> to vector<15x15x4xf32>
    %73 = arith.addf %71, %72 : vector<15x15x4xf32>
    %c0_74 = arith.constant 0 : index
    %c0_75 = arith.constant 0 : index
    %c0_76 = arith.constant 0 : index
    %74 = vector.load %arg14[%c0_74, %c0_75, %c0_76] : memref<16x16x4xf32, #tpu.memory_space<vmem>>, vector<15x15x4xf32>
    tpu.vector_store %arg14[%c0_74, %c0_75, %c0_76], %73 {strides = array<i32>} : memref<16x16x4xf32, #tpu.memory_space<vmem>>, vector<15x15x4xf32>,
    %c0_77 = arith.constant 0 : index
    %c0_78 = arith.constant 0 : index
    %c0_79 = arith.constant 0 : index
    %75 = vector.load %arg14[%c0_77, %c0_78, %c0_79] : memref<16x16x4xf32, #tpu.memory_space<vmem>>, vector<16x16x4xf32>
    %76 = vector.shape_cast %75 : vector<16x16x4xf32> to vector<256x4xf32>
    %c0_80 = arith.constant 0 : index
    %c0_81 = arith.constant 0 : index
    %77 = vector.load %arg12[%c0_80, %c0_81] : memref<1x4xf32, #tpu.memory_space<vmem>>, vector<1x4xf32>
    %78 = vector.broadcast %77 : vector<1x4xf32> to vector<256x4xf32>
    %79 = arith.addf %76, %78 : vector<256x4xf32>
    %80 = arith.truncf %79 : vector<256x4xf32> to vector<256x4xbf16>
    %c0_82 = arith.constant 0 : index
    %c0_83 = arith.constant 0 : index
    %81 = vector.load %arg13[%c0_82, %c0_83] : memref<256x4xbf16, #tpu.memory_space<vmem>>, vector<256x4xbf16>
    tpu.vector_store %arg13[%c0_82, %c0_83], %80 {strides = array<i32>} : memref<256x4xbf16, #tpu.memory_space<vmem>>, vector<256x4xbf16>,
    return
  }
  func.func @transform_0(%arg0: i32) -> (i32, i32) {
    %c0_i32 = arith.constant 0 : i32
    %c0_i32_0 = arith.constant 0 : i32
    return %arg0, %c0_i32 : i32, i32
  }
  func.func @transform_1(%arg0: i32) -> (i32, i32) {
    %c0_i32 = arith.constant 0 : i32
    %c0_i32_0 = arith.constant 0 : i32
    return %arg0, %c0_i32 : i32, i32
  }
  func.func @transform_2(%arg0: i32) -> (i32, i32) {
    %c0_i32 = arith.constant 0 : i32
    %c0_i32_0 = arith.constant 0 : i32
    %c0_i32_1 = arith.constant 0 : i32
    return %c0_i32, %c0_i32_0 : i32, i32
  }
  func.func @transform_3(%arg0: i32) -> (i32, i32) {
    %c0_i32 = arith.constant 0 : i32
    %c0_i32_0 = arith.constant 0 : i32
    %c0_i32_1 = arith.constant 0 : i32
    return %c0_i32, %c0_i32_0 : i32, i32
  }
  func.func @transform_4(%arg0: i32) -> (i32, i32) {
    %c0_i32 = arith.constant 0 : i32
    %c0_i32_0 = arith.constant 0 : i32
    %c0_i32_1 = arith.constant 0 : i32
    return %c0_i32, %c0_i32_0 : i32, i32
  }
  func.func @transform_5(%arg0: i32) -> (i32, i32) {
    %c0_i32 = arith.constant 0 : i32
    %c0_i32_0 = arith.constant 0 : i32
    %c0_i32_1 = arith.constant 0 : i32
    return %c0_i32, %c0_i32_0 : i32, i32
  }
  func.func @transform_6(%arg0: i32) -> (i32, i32) {
    %c0_i32 = arith.constant 0 : i32
    %c0_i32_0 = arith.constant 0 : i32
    %c0_i32_1 = arith.constant 0 : i32
    return %c0_i32, %c0_i32_0 : i32, i32
  }
  func.func @transform_7(%arg0: i32) -> (i32, i32) {
    %c0_i32 = arith.constant 0 : i32
    %c0_i32_0 = arith.constant 0 : i32
    %c0_i32_1 = arith.constant 0 : i32
    return %c0_i32, %c0_i32_0 : i32, i32
  }
  func.func @transform_8(%arg0: i32) -> (i32, i32) {
    %c0_i32 = arith.constant 0 : i32
    %c0_i32_0 = arith.constant 0 : i32
    %c0_i32_1 = arith.constant 0 : i32
    return %c0_i32, %c0_i32_0 : i32, i32
  }
  func.func @transform_9(%arg0: i32) -> (i32, i32) {
    %c0_i32 = arith.constant 0 : i32
    %c0_i32_0 = arith.constant 0 : i32
    %c0_i32_1 = arith.constant 0 : i32
    return %c0_i32, %c0_i32_0 : i32, i32
  }
  func.func @transform_10(%arg0: i32) -> (i32, i32) {
    %c0_i32 = arith.constant 0 : i32
    %c0_i32_0 = arith.constant 0 : i32
    %c0_i32_1 = arith.constant 0 : i32
    return %c0_i32, %c0_i32_0 : i32, i32
  }
  func.func @transform_11(%arg0: i32) -> (i32, i32) {
    %c0_i32 = arith.constant 0 : i32
    %c0_i32_0 = arith.constant 0 : i32
    %c0_i32_1 = arith.constant 0 : i32
    return %c0_i32, %c0_i32_0 : i32, i32
  }
  func.func @transform_12(%arg0: i32) -> (i32, i32) {
    %c0_i32 = arith.constant 0 : i32
    %c0_i32_0 = arith.constant 0 : i32
    return %arg0, %c0_i32 : i32, i32
  }
}

</mosaic_0001>

<bundles_post_ra>
// kernel: dense_block_forward_nhwc.2
= control target key start
LH: loop header
LB: loop body
LE: loop exit
PB: predicated region body
PF: predicated region fallthrough
CT: control target
= control target key end

     0   :  { %s3306_s27 = smov 0   ;;  %s4932_s0 = inlined_call_operand.vmem [shape: bf16[512,4], index: 0, kind: input, shape index: {}]   ;;  %s4933_s1 = inlined_call_operand.vmem [shape: f32[1,4], index: 1, kind: input, shape index: {}]   ;;  %s4934_s2 = inlined_call_operand.vmem [shape: f32[1,4], index: 2, kind: input, shape index: {}]   ;;  %s4935_s3 = inlined_call_operand.vmem [shape: bf16[4,16], index: 3, kind: input, shape index: {}]   ;;  %s4936_s4 = inlined_call_operand.vmem [shape: f32[1,16], index: 4, kind: input, shape index: {}]   ;;  %s4937_s5 = inlined_call_operand.vmem [shape: f32[1,16], index: 5, kind: input, shape index: {}]   ;;  %s4938_s6 = inlined_call_operand.vmem [shape: bf16[16,36], index: 6, kind: input, shape index: {}]   ;;  %s4939_s7 = inlined_call_operand.vmem [shape: f32[1,4], index: 7, kind: input, shape index: {}]   ;;  %s4940_s8 = inlined_call_operand.vmem [shape: bf16[512,4], index: 8, kind: output, shape index: {}]  }
   0x1 LB: > { %s2932_s28 = sadd.s32 4294967295, %s3251_s27   ;;  %p2936_p0 = scmp.ge.s32.totalorder %s3251_s27, 1  ;;  %s3251_s27 = sphi %s3306_s27, %s18_s27  }
   0x2   : > { %p263_p1 = scmp.lt.s32.totalorder %s3251_s27, 3 }
   0x4   : > { %p264_p2 = pnand %p2936_p0, %p263_p1 }
   0x6   : > { %267 = sbr.rel (%p264_p2) target bundleno = 1092 (0x444), region = 52 }
   0xd   : > { %v500_v0 = vld [vmem:[%s4935_s3] sm:$0x3]  ;;  %vm550_vm0 = vcmask 1041408   ;;  %s2937_s9 = sshll.u32 %s2932_s28, 5  ;;  %vm501_vm1 = vcmask 31744   ;;  %vm849_vm2 = vcmask 130048  }
   0xe   : > { %3226 = vmatprep.subr.msk.bf16.mxu0 %vm550_vm0, %v500_v0  ;;  %v552_v1 = vsel %vm550_vm0, %v500_v0, 0  ;;  %p298_p3 = scmp.lt.s32.totalorder %s2937_s9, 63  ;;  %v3330_v2 = vld [vmem:[%s4933_s1] ss:$0 sm:$0xff]  ;;  %s3253_s24 = smov 124   ;;  %vm1521_vm3 = vcmask 1046528  }
   0xf   : > { %3159 = vmatpush3.bf16.msra.mxu0 %v552_v1  ;;  %v3339_v11 = vld [vmem:[%s4934_s2] ss:$0 sm:$0xff]  ;;  %s3254_s25 = smov 112   ;;  %s3255_s26 = smov 116   ;;  %vm1281_vm4 = vcmask 30720   ;;  %vm2843_vm5 = vcmask 27648  }
  0x10   : > { %s4951_s9 = smov (!%p298_p3, %s2937_s9), 63  ;;  %s3256_s28 = smov 104  }
  0x11   : > { %s2938_s10 = sshll.u32 %s4951_s9, 2  ;;  %s3257_s29 = smov 100  }
  0x12   : > { %s3325_s13 = scalar_lea.vmem %s4932_s0, %s2938_s10  ;;  %s3258_s30 = smov 120  }
  0x13   : > { %v3046_v3 = vld [vmem:[%s3325_s13] sm:$0xff]   ;;  %v3109_v4 = vld [vmem:[%s3325_s13 + $0x8] sm:$0xff]   ;;  %v3110_v5 = vld [vmem:[%s3325_s13 + $0x10] sm:$0xff]   ;;  %s3259_s11 = smov 108   ;;  %s3260_s12 = smov 96  }
  0x14   : > { %v3047_v6 = vunpack.c.l.bf16 %v3046_v3  ;;  %v3048_v7 = vunpack.c.h.bf16 %v3046_v3  ;;  %v3051_v8 = vunpack.c.l.bf16 %v3109_v4  ;;  %v3052_v9 = vunpack.c.h.bf16 %v3109_v4  ;;  %v3111_v10 = vld [vmem:[%s3325_s13 + $0x18] sm:$0xff]   ;;  %v3112_v32 = vld [vmem:[%s3325_s13 + $0x20] sm:$0xff]   ;;  %v3113_v37 = vld [vmem:[%s3325_s13 + $0x28] sm:$0xff]   ;;  %s3933_s17 = scalar_lea.vmem %s4940_s8, %s2938_s10 }
  0x15   : > { %v3055_v12 = vunpack.c.l.bf16 %v3110_v5  ;;  %v3056_v13 = vunpack.c.h.bf16 %v3110_v5  ;;  %v3059_v14 = vunpack.c.l.bf16 %v3111_v10  ;;  %v3060_v15 = vunpack.c.h.bf16 %v3111_v10  ;;  %v3114_v41 = vld [vmem:[%s3325_s13 + $0x30] sm:$0xff]   ;;  %v3115_v60 = vld [vmem:[%s3325_s13 + $0x38] sm:$0xff]  }
  0x16   : > { %v381_v16 = vmul.f32 %v3047_v6, %v3330_v2  ;;  %v382_v17 = vmul.f32 %v3048_v7, %v3330_v2  ;;  %v383_v18 = vmul.f32 %v3051_v8, %v3330_v2  ;;  %v384_v19 = vmul.f32 %v3052_v9, %v3330_v2 }
  0x17   : > { %v385_v20 = vmul.f32 %v3055_v12, %v3330_v2  ;;  %v386_v21 = vmul.f32 %v3056_v13, %v3330_v2  ;;  %v387_v22 = vmul.f32 %v3059_v14, %v3330_v2  ;;  %v388_v23 = vmul.f32 %v3060_v15, %v3330_v2 }
  0x18   : > { %v420_v24 = vadd.f32 %v3339_v11, %v381_v16  ;;  %v421_v25 = vadd.f32 %v3339_v11, %v382_v17  ;;  %v422_v26 = vadd.f32 %v3339_v11, %v383_v18  ;;  %v423_v27 = vadd.f32 %v3339_v11, %v384_v19 }
  0x19   : > { %v424_v28 = vadd.f32 %v3339_v11, %v385_v20  ;;  %v425_v29 = vadd.f32 %v3339_v11, %v386_v21  ;;  %v426_v30 = vadd.f32 %v3339_v11, %v387_v22  ;;  %v427_v31 = vadd.f32 %v3339_v11, %v388_v23  ;;  %v3116_v22 = vld [vmem:[%s3325_s13 + $0x40] sm:$0xff]  }
  0x1a   : > { %v452_v33 = vmax.f32 %v420_v24, 0.0  ;;  %v453_v34 = vmax.f32 %v421_v25, 0.0  ;;  %v454_v35 = vmax.f32 %v422_v26, 0.0  ;;  %v455_v36 = vmax.f32 %v423_v27, 0.0  ;;  %v3117_v25 = vld [vmem:[%s3325_s13 + $0x48] sm:$0xff]  }
  0x1b   : > { %v456_v38 = vmax.f32 %v424_v28, 0.0  ;;  %v457_v39 = vmax.f32 %v425_v29, 0.0  ;;  %v458_v40 = vmax.f32 %v426_v30, 0.0  ;;  %v3063_v44 = vunpack.c.l.bf16 %v3112_v32 }
  0x1c   : > { %v484_v42 = vpack.c.bf16 %v453_v34, %v452_v33  ;;  %v485_v43 = vpack.c.bf16 %v455_v36, %v454_v35  ;;  %v3064_v45 = vunpack.c.h.bf16 %v3112_v32  ;;  %v459_v47 = vmax.f32 %v427_v31, 0.0 }
  0x1d   : > { %v486_v46 = vpack.c.bf16 %v457_v39, %v456_v38  ;;  %v3067_v48 = vunpack.c.l.bf16 %v3113_v37  ;;  %v3068_v49 = vunpack.c.h.bf16 %v3113_v37  ;;  %v389_v50 = vmul.f32 %v3063_v44, %v3330_v2  ;;  %v3119_v44 = vld [vmem:[%s3325_s13 + $0x58] sm:$0xff]  }
  0x1e   : > { %3160 = vmatprep.mubr.msk.bf16.mxu0 %vm501_vm1, %v484_v42  ;;  %v390_v51 = vmul.f32 %v3064_v45, %v3330_v2  ;;  %v3071_v52 = vunpack.c.l.bf16 %v3114_v41  ;;  %v3072_v53 = vunpack.c.h.bf16 %v3114_v41  ;;  %v487_v61 = vpack.c.bf16 %v459_v47, %v458_v40  ;;  %v3243_v42 = vld [vmem:[%s4938_s6] sm:$0xff]  }
  0x1f   : > { %3161 = vmatmul.mubr.msk.bf16.vlgmr.msra.gmra.mrb[0].mxu0 %vm501_vm1, %v485_v43  ;;  %v391_v54 = vmul.f32 %v3067_v48, %v3330_v2  ;;  %v392_v55 = vmul.f32 %v3068_v49, %v3330_v2  ;;  %v428_v56 = vadd.f32 %v3339_v11, %v389_v50  ;;  %v3075_v3 = vunpack.c.l.bf16 %v3115_v60  ;;  %3192 = vmatprep.subr.bf16.mxu1 %v3243_v42  ;;  %v3118_v43 = vld [vmem:[%s3325_s13 + $0x50] sm:$0xff]  }
  0x20   : > { %3164 = vmatprep.mubr.msk.bf16.mxu0 %vm501_vm1, %v486_v46  ;;  %v429_v57 = vadd.f32 %v3339_v11, %v390_v51  ;;  %v393_v58 = vmul.f32 %v3071_v52, %v3330_v2  ;;  %v394_v59 = vmul.f32 %v3072_v53, %v3330_v2  ;;  %v3076_v4 = vunpack.c.h.bf16 %v3115_v60  ;;  %3193 = vmatpush3.bf16.msra.mxu1 %v3243_v42  ;;  %v3444_v42 = vld [vmem:[%s4937_s5] ss:$0 sm:$0xff] }
  0x21   : > { %v460_v62 = vmax.f32 %v428_v56, 0.0  ;;  %v430_v0 = vadd.f32 %v3339_v11, %v391_v54  ;;  %v431_v1 = vadd.f32 %v3339_v11, %v392_v55  ;;  %v395_v10 = vmul.f32 %v3075_v3, %v3330_v2 }
  0x22   : > { %v461_v63 = vmax.f32 %v429_v57, 0.0  ;;  %v432_v6 = vadd.f32 %v3339_v11, %v393_v58  ;;  %v433_v7 = vadd.f32 %v3339_v11, %v394_v59  ;;  %v396_v12 = vmul.f32 %v3076_v4, %v3330_v2  ;;  %v3120_v57 = vld [vmem:[%s3325_s13 + $0x60] sm:$0xff]  }
  0x23   : > { %v462_v8 = vmax.f32 %v430_v0, 0.0  ;;  %v463_v9 = vmax.f32 %v431_v1, 0.0  ;;  %v434_v16 = vadd.f32 %v3339_v11, %v395_v10  ;;  %v3079_v23 = vunpack.c.l.bf16 %v3116_v22  ;;  %v3121_v0 = vld [vmem:[%s3325_s13 + $0x68] sm:$0xff]  }
  0x24   : > { %v488_v5 = vpack.c.bf16 %v461_v63, %v460_v62  ;;  %v464_v13 = vmax.f32 %v432_v6, 0.0  ;;  %v465_v14 = vmax.f32 %v433_v7, 0.0  ;;  %v435_v17 = vadd.f32 %v3339_v11, %v396_v12 }
  0x25   : > { %v489_v15 = vpack.c.bf16 %v463_v9, %v462_v8  ;;  %v466_v19 = vmax.f32 %v434_v16, 0.0  ;;  %v3080_v24 = vunpack.c.h.bf16 %v3116_v22  ;;  %v3083_v26 = vunpack.c.l.bf16 %v3117_v25 }
  0x26   : > { %v490_v18 = vpack.c.bf16 %v465_v14, %v464_v13  ;;  %v467_v20 = vmax.f32 %v435_v17, 0.0  ;;  %v3084_v27 = vunpack.c.h.bf16 %v3117_v25  ;;  %v397_v28 = vmul.f32 %v3079_v23, %v3330_v2  ;;  %v3122_v17 = vld [vmem:[%s3325_s13 + $0x70] sm:$0xff]   ;;  %v3123_v23 = vld [vmem:[%s3325_s13 + $0x78] sm:$0xff]  }
  0x27   : > { %3165 = vmatmul.mubr.msk.bf16.gmra.mrb[4].mxu0 %vm501_vm1, %v487_v61  ;;  %v398_v29 = vmul.f32 %v3080_v24, %v3330_v2  ;;  %v399_v30 = vmul.f32 %v3083_v26, %v3330_v2  ;;  %v3087_v45 = vunpack.c.l.bf16 %v3118_v43  ;;  %v3088_v46 = vunpack.c.h.bf16 %v3118_v43 }
  0x28   : > { %3168 = vmatprep.mubr.msk.bf16.mxu0 %vm501_vm1, %v488_v5  ;;  %v491_v21 = vpack.c.bf16 %v467_v20, %v466_v19  ;;  %v400_v31 = vmul.f32 %v3084_v27, %v3330_v2  ;;  %v436_v32 = vadd.f32 %v3339_v11, %v397_v28  ;;  %v3091_v47 = vunpack.c.l.bf16 %v3119_v44 }
  0x29   : > { %v437_v33 = vadd.f32 %v3339_v11, %v398_v29  ;;  %v438_v34 = vadd.f32 %v3339_v11, %v399_v30  ;;  %v3092_v48 = vunpack.c.h.bf16 %v3119_v44  ;;  %v401_v49 = vmul.f32 %v3087_v45, %v3330_v2 }
  0x2a   : > { %v439_v35 = vadd.f32 %v3339_v11, %v400_v31  ;;  %v468_v36 = vmax.f32 %v436_v32, 0.0  ;;  %v402_v50 = vmul.f32 %v3088_v46, %v3330_v2  ;;  %v403_v51 = vmul.f32 %v3091_v47, %v3330_v2 }
  0x2b   : > { %v469_v37 = vmax.f32 %v437_v33, 0.0  ;;  %v470_v38 = vmax.f32 %v438_v34, 0.0  ;;  %v404_v52 = vmul.f32 %v3092_v48, %v3330_v2  ;;  %v440_v53 = vadd.f32 %v3339_v11, %v401_v49 }
  0x2c   : > { %v471_v39 = vmax.f32 %v439_v35, 0.0  ;;  %v441_v54 = vadd.f32 %v3339_v11, %v402_v50  ;;  %v442_v55 = vadd.f32 %v3339_v11, %v403_v51  ;;  %v3095_v58 = vunpack.c.l.bf16 %v3120_v57 }
  0x2d   : > { %v492_v40 = vpack.c.bf16 %v469_v37, %v468_v36  ;;  %v443_v56 = vadd.f32 %v3339_v11, %v404_v52  ;;  %v3096_v59 = vunpack.c.h.bf16 %v3120_v57  ;;  %v472_v60 = vmax.f32 %v440_v53, 0.0 }
  0x2e   : > { %v493_v41 = vpack.c.bf16 %v471_v39, %v470_v38  ;;  %v473_v61 = vmax.f32 %v441_v54, 0.0  ;;  %v474_v62 = vmax.f32 %v442_v55, 0.0  ;;  %v405_v1 = vmul.f32 %v3095_v58, %v3330_v2 }
  0x2f   : > { %3169 = vmatmul.mubr.msk.bf16.gmra.mrb[8].mxu0 %vm501_vm1, %v489_v15  ;;  %v475_v63 = vmax.f32 %v443_v56, 0.0  ;;  %v406_v3 = vmul.f32 %v3096_v59, %v3330_v2  ;;  %v3099_v4 = vunpack.c.l.bf16 %v3121_v0  ;;  %v3100_v5 = vunpack.c.h.bf16 %v3121_v0 }
  0x30   : > { %3172 = vmatprep.mubr.msk.bf16.mxu0 %vm501_vm1, %v490_v18  ;;  %v494_v6 = vpack.c.bf16 %v473_v61, %v472_v60  ;;  %v444_v8 = vadd.f32 %v3339_v11, %v405_v1  ;;  %v3104_v22 = vunpack.c.h.bf16 %v3122_v17  ;;  %v3107_v26 = vunpack.c.l.bf16 %v3123_v23 }
  0x31   : > { %v495_v7 = vpack.c.bf16 %v475_v63, %v474_v62  ;;  %v445_v9 = vadd.f32 %v3339_v11, %v406_v3  ;;  %v407_v10 = vmul.f32 %v3099_v4, %v3330_v2  ;;  %v408_v12 = vmul.f32 %v3100_v5, %v3330_v2 }
  0x32   : > { %v476_v13 = vmax.f32 %v444_v8, 0.0  ;;  %v3108_v27 = vunpack.c.h.bf16 %v3123_v23  ;;  %v410_v28 = vmul.f32 %v3104_v22, %v3330_v2  ;;  %v411_v30 = vmul.f32 %v3107_v26, %v3330_v2 }
  0x33   : > { %v477_v14 = vmax.f32 %v445_v9, 0.0  ;;  %v446_v15 = vadd.f32 %v3339_v11, %v407_v10  ;;  %v447_v16 = vadd.f32 %v3339_v11, %v408_v12 }
  0x34   : > { %v412_v31 = vmul.f32 %v3108_v27, %v3330_v2  ;;  %v449_v32 = vadd.f32 %v3339_v11, %v410_v28  ;;  %v450_v34 = vadd.f32 %v3339_v11, %v411_v30 }
  0x35   : > { %v496_v18 = vpack.c.bf16 %v477_v14, %v476_v13  ;;  %v478_v19 = vmax.f32 %v446_v15, 0.0  ;;  %v479_v20 = vmax.f32 %v447_v16, 0.0 }
  0x36   : > { %v451_v35 = vadd.f32 %v3339_v11, %v412_v31  ;;  %v481_v36 = vmax.f32 %v449_v32, 0.0  ;;  %v482_v37 = vmax.f32 %v450_v34, 0.0 }
  0x37   : > { %3173 = vmatmul.mubr.msk.bf16.gmra.mrb[12].mxu0 %vm501_vm1, %v491_v21  ;;  %v3103_v21 = vunpack.c.l.bf16 %v3122_v17  ;;  %v497_v24 = vpack.c.bf16 %v479_v20, %v478_v19 }
  0x38   : > { %3176 = vmatprep.mubr.msk.bf16.mxu0 %vm501_vm1, %v492_v40  ;;  %v483_v38 = vmax.f32 %v451_v35, 0.0 }
  0x39   : > { %v409_v25 = vmul.f32 %v3103_v21, %v3330_v2  ;;  %v3439_v2 = vld [vmem:[%s4936_s4] ss:$0 sm:$0xff] }
  0x3a   : > { %v499_v40 = vpack.c.bf16 %v483_v38, %v482_v37 }
  0x3b   : > { %v448_v29 = vadd.f32 %v3339_v11, %v409_v25 }
  0x3d   : > { %v480_v33 = vmax.f32 %v448_v29, 0.0 }
  0x3f   : > { %3177 = vmatmul.mubr.msk.bf16.gmra.mrb[16].mxu0 %vm501_vm1, %v493_v41  ;;  %v498_v39 = vpack.c.bf16 %v481_v36, %v480_v33 }
  0x40   : > { %3180 = vmatprep.mubr.msk.bf16.mxu0 %vm501_vm1, %v494_v6 }
  0x47   : > { %3181 = vmatmul.mubr.msk.bf16.gmra.mrb[20].mxu0 %vm501_vm1, %v495_v7 }
  0x48   : > { %3184 = vmatprep.mubr.msk.bf16.mxu0 %vm501_vm1, %v496_v18 }
  0x4f   : > { %3185 = vmatmul.mubr.msk.bf16.gmra.mrb[24].mxu0 %vm501_vm1, %v497_v24 }
  0x50   : > { %3188 = vmatprep.mubr.msk.bf16.mxu0 %vm501_vm1, %v498_v39 }
  0x57   : > { %3189 = vmatmul.mubr.msk.bf16.gmra.mrb[28].mxu0 %vm501_vm1, %v499_v40 }
  0xf2   : > { %v3162_v41 = vpop.f32.mrb[0].mxu0 }
  0xf3   : > { %v724_v11 = vmul.f32 %v3162_v41, %v3439_v2  ;;  %v588_v43 = vpop.f32.mrb[1].mxu0 }
  0xf4   : > { %v722_v44 = vmul.f32 %v3439_v2, %v588_v43  ;;  %v3163_v45 = vpop.f32.mrb[2].mxu0 }
  0xf5   : > { %v763_v46 = vadd.f32 %v3444_v42, %v724_v11  ;;  %v725_v47 = vmul.f32 %v3163_v45, %v3439_v2  ;;  %v591_v48 = vpop.f32.mrb[3].mxu0 }
  0xf6   : > { %v761_v49 = vadd.f32 %v3444_v42, %v722_v44  ;;  %v723_v50 = vmul.f32 %v3439_v2, %v591_v48 }
  0xf7   : > { %v764_v51 = vadd.f32 %v3444_v42, %v725_v47  ;;  %v795_v53 = vmax.f32 %v763_v46, 0.0 }
  0xf8   : > { %v762_v52 = vadd.f32 %v3444_v42, %v723_v50  ;;  %v793_v55 = vmax.f32 %v761_v49, 0.0 }
  0xf9   : > { %v796_v54 = vmax.f32 %v764_v51, 0.0 }
  0xfa   : > { %v794_v56 = vmax.f32 %v762_v52, 0.0  ;;  %v3166_v57 = vpop.f32.mrb[4].mxu0 }
  0xfb   : > { %v826_v58 = vpack.c.bf16 %v796_v54, %v795_v53  ;;  %v728_v59 = vmul.f32 %v3166_v57, %v3439_v2  ;;  %v604_v60 = vpop.f32.mrb[5].mxu0 }
  0xfc   : > { %v825_v61 = vpack.c.bf16 %v794_v56, %v793_v55  ;;  %v726_v62 = vmul.f32 %v3439_v2, %v604_v60  ;;  %v3167_v63 = vpop.f32.mrb[6].mxu0 }
  0xfd   : > { %v767_v0 = vadd.f32 %v3444_v42, %v728_v59  ;;  %v729_v1 = vmul.f32 %v3167_v63, %v3439_v2  ;;  %v607_v3 = vpop.f32.mrb[7].mxu0 }
  0xfe   : > { %3194 = vmatprep.mubr.msk.bf16.mxu1 %vm849_vm2, %v825_v61  ;;  %v765_v4 = vadd.f32 %v3444_v42, %v726_v62  ;;  %v727_v5 = vmul.f32 %v3439_v2, %v607_v3 }
  0xff   : > { %3195 = vmatmul.mubr.msk.bf16.vlgmr.msra.gmra.mrb[0].mxu1 %vm849_vm2, %v826_v58  ;;  %v799_v6 = vmax.f32 %v767_v0, 0.0  ;;  %v768_v7 = vadd.f32 %v3444_v42, %v729_v1 }
 0x100   : > { %v797_v8 = vmax.f32 %v765_v4, 0.0  ;;  %v766_v9 = vadd.f32 %v3444_v42, %v727_v5 }
 0x101   : > { %v800_v10 = vmax.f32 %v768_v7, 0.0 }
 0x102   : > { %v798_v12 = vmax.f32 %v766_v9, 0.0  ;;  %v3170_v13 = vpop.f32.mrb[8].mxu0 }
 0x103   : > { %v828_v14 = vpack.c.bf16 %v800_v10, %v799_v6  ;;  %v732_v15 = vmul.f32 %v3170_v13, %v3439_v2  ;;  %v620_v16 = vpop.f32.mrb[9].mxu0 }
 0x104   : > { %v827_v17 = vpack.c.bf16 %v798_v12, %v797_v8  ;;  %v730_v18 = vmul.f32 %v3439_v2, %v620_v16  ;;  %v3171_v19 = vpop.f32.mrb[10].mxu0 }
 0x105   : > { %v771_v20 = vadd.f32 %v3444_v42, %v732_v15  ;;  %v733_v21 = vmul.f32 %v3171_v19, %v3439_v2  ;;  %v623_v22 = vpop.f32.mrb[11].mxu0 }
 0x106   : > { %3198 = vmatprep.mubr.msk.bf16.mxu1 %vm849_vm2, %v827_v17  ;;  %v769_v23 = vadd.f32 %v3444_v42, %v730_v18  ;;  %v731_v24 = vmul.f32 %v3439_v2, %v623_v22 }
 0x107   : > { %3199 = vmatmul.mubr.msk.bf16.gmra.mrb[4].mxu1 %vm849_vm2, %v828_v14  ;;  %v803_v25 = vmax.f32 %v771_v20, 0.0  ;;  %v772_v26 = vadd.f32 %v3444_v42, %v733_v21 }
 0x108   : > { %v801_v27 = vmax.f32 %v769_v23, 0.0  ;;  %v770_v28 = vadd.f32 %v3444_v42, %v731_v24 }
 0x109   : > { %v804_v29 = vmax.f32 %v772_v26, 0.0 }
 0x10a   : > { %v802_v30 = vmax.f32 %v770_v28, 0.0  ;;  %v3174_v31 = vpop.f32.mrb[12].mxu0 }
 0x10b   : > { %v830_v32 = vpack.c.bf16 %v804_v29, %v803_v25  ;;  %v736_v33 = vmul.f32 %v3174_v31, %v3439_v2  ;;  %v636_v34 = vpop.f32.mrb[13].mxu0 }
 0x10c   : > { %v829_v35 = vpack.c.bf16 %v802_v30, %v801_v27  ;;  %v734_v36 = vmul.f32 %v3439_v2, %v636_v34  ;;  %v3175_v37 = vpop.f32.mrb[14].mxu0 }
 0x10d   : > { %v775_v38 = vadd.f32 %v3444_v42, %v736_v33  ;;  %v737_v39 = vmul.f32 %v3175_v37, %v3439_v2  ;;  %v639_v40 = vpop.f32.mrb[15].mxu0 }
 0x10e   : > { %3202 = vmatprep.mubr.msk.bf16.mxu1 %vm849_vm2, %v829_v35  ;;  %v773_v41 = vadd.f32 %v3444_v42, %v734_v36  ;;  %v735_v11 = vmul.f32 %v3439_v2, %v639_v40 }
 0x10f   : > { %3203 = vmatmul.mubr.msk.bf16.gmra.mrb[8].mxu1 %vm849_vm2, %v830_v32  ;;  %v807_v43 = vmax.f32 %v775_v38, 0.0  ;;  %v776_v44 = vadd.f32 %v3444_v42, %v737_v39 }
 0x110   : > { %v805_v45 = vmax.f32 %v773_v41, 0.0  ;;  %v774_v46 = vadd.f32 %v3444_v42, %v735_v11 }
 0x111   : > { %v808_v47 = vmax.f32 %v776_v44, 0.0 }
 0x112   : > { %v806_v48 = vmax.f32 %v774_v46, 0.0  ;;  %v3178_v51 = vpop.f32.mrb[16].mxu0 }
 0x113   : > { %v832_v49 = vpack.c.bf16 %v808_v47, %v807_v43  ;;  %v740_v52 = vmul.f32 %v3178_v51, %v3439_v2  ;;  %v652_v53 = vpop.f32.mrb[17].mxu0 }
 0x114   : > { %v831_v50 = vpack.c.bf16 %v806_v48, %v805_v45  ;;  %v738_v54 = vmul.f32 %v3439_v2, %v652_v53  ;;  %v3179_v55 = vpop.f32.mrb[18].mxu0 }
 0x115   : > { %v779_v56 = vadd.f32 %v3444_v42, %v740_v52  ;;  %v741_v57 = vmul.f32 %v3179_v55, %v3439_v2  ;;  %v655_v58 = vpop.f32.mrb[19].mxu0 }
 0x116   : > { %3206 = vmatprep.mubr.msk.bf16.mxu1 %vm849_vm2, %v831_v50  ;;  %v777_v59 = vadd.f32 %v3444_v42, %v738_v54  ;;  %v739_v60 = vmul.f32 %v3439_v2, %v655_v58 }
 0x117   : > { %3207 = vmatmul.mubr.msk.bf16.gmra.mrb[12].mxu1 %vm849_vm2, %v832_v49  ;;  %v811_v61 = vmax.f32 %v779_v56, 0.0  ;;  %v780_v62 = vadd.f32 %v3444_v42, %v741_v57 }
 0x118   : > { %v809_v63 = vmax.f32 %v777_v59, 0.0  ;;  %v778_v0 = vadd.f32 %v3444_v42, %v739_v60 }
 0x119   : > { %v812_v1 = vmax.f32 %v780_v62, 0.0 }
 0x11a   : > { %v810_v3 = vmax.f32 %v778_v0, 0.0  ;;  %v3182_v6 = vpop.f32.mrb[20].mxu0 }
 0x11b   : > { %v834_v4 = vpack.c.bf16 %v812_v1, %v811_v61  ;;  %v744_v7 = vmul.f32 %v3182_v6, %v3439_v2  ;;  %v668_v8 = vpop.f32.mrb[21].mxu0 }
 0x11c   : > { %v833_v5 = vpack.c.bf16 %v810_v3, %v809_v63  ;;  %v742_v9 = vmul.f32 %v3439_v2, %v668_v8  ;;  %v3183_v13 = vpop.f32.mrb[22].mxu0 }
 0x11d   : > { %v783_v10 = vadd.f32 %v3444_v42, %v744_v7  ;;  %v745_v14 = vmul.f32 %v3183_v13, %v3439_v2  ;;  %v671_v15 = vpop.f32.mrb[23].mxu0 }
 0x11e   : > { %3210 = vmatprep.mubr.msk.bf16.mxu1 %vm849_vm2, %v833_v5  ;;  %v781_v12 = vadd.f32 %v3444_v42, %v742_v9  ;;  %v743_v16 = vmul.f32 %v3439_v2, %v671_v15 }
 0x11f   : > { %3211 = vmatmul.mubr.msk.bf16.gmra.mrb[16].mxu1 %vm849_vm2, %v834_v4  ;;  %v815_v17 = vmax.f32 %v783_v10, 0.0  ;;  %v784_v18 = vadd.f32 %v3444_v42, %v745_v14 }
 0x120   : > { %v813_v19 = vmax.f32 %v781_v12, 0.0  ;;  %v782_v20 = vadd.f32 %v3444_v42, %v743_v16 }
 0x121   : > { %v816_v21 = vmax.f32 %v784_v18, 0.0 }
 0x122   : > { %v814_v22 = vmax.f32 %v782_v20, 0.0  ;;  %v3186_v25 = vpop.f32.mrb[24].mxu0 }
 0x123   : > { %v836_v23 = vpack.c.bf16 %v816_v21, %v815_v17  ;;  %v748_v26 = vmul.f32 %v3186_v25, %v3439_v2  ;;  %v684_v27 = vpop.f32.mrb[25].mxu0 }
 0x124   : > { %v835_v24 = vpack.c.bf16 %v814_v22, %v813_v19  ;;  %v746_v28 = vmul.f32 %v3439_v2, %v684_v27  ;;  %v3187_v31 = vpop.f32.mrb[26].mxu0 }
 0x125   : > { %v787_v29 = vadd.f32 %v3444_v42, %v748_v26  ;;  %v749_v32 = vmul.f32 %v3187_v31, %v3439_v2  ;;  %v687_v33 = vpop.f32.mrb[27].mxu0 }
 0x126   : > { %3214 = vmatprep.mubr.msk.bf16.mxu1 %vm849_vm2, %v835_v24  ;;  %v785_v30 = vadd.f32 %v3444_v42, %v746_v28  ;;  %v747_v34 = vmul.f32 %v3439_v2, %v687_v33 }
 0x127   : > { %3215 = vmatmul.mubr.msk.bf16.gmra.mrb[20].mxu1 %vm849_vm2, %v836_v23  ;;  %v819_v35 = vmax.f32 %v787_v29, 0.0  ;;  %v788_v36 = vadd.f32 %v3444_v42, %v749_v32 }
 0x128   : > { %v817_v37 = vmax.f32 %v785_v30, 0.0  ;;  %v786_v38 = vadd.f32 %v3444_v42, %v747_v34 }
 0x129   : > { %v820_v39 = vmax.f32 %v788_v36, 0.0 }
 0x12a   : > { %v818_v40 = vmax.f32 %v786_v38, 0.0  ;;  %v3190_v0 = vpop.f32.mrb[28].mxu0 }
 0x12b   : > { %v838_v41 = vpack.c.bf16 %v820_v39, %v819_v35  ;;  %v700_v3 = vpop.f32.mrb[29].mxu0  ;;  %v752_v12 = vmul.f32 %v3190_v0, %v3439_v2 }
 0x12c   : > { %v837_v11 = vpack.c.bf16 %v818_v40, %v817_v37  ;;  %v3191_v5 = vpop.f32.mrb[30].mxu0  ;;  %v750_v9 = vmul.f32 %v3439_v2, %v700_v3 }
 0x12d   : > { %v703_v7 = vpop.f32.mrb[31].mxu0  ;;  %v753_v13 = vmul.f32 %v3191_v5, %v3439_v2  ;;  %v791_v16 = vadd.f32 %v3444_v42, %v752_v12 }
 0x12e   : > { %3218 = vmatprep.mubr.msk.bf16.mxu1 %vm849_vm2, %v837_v11  ;;  %v751_v10 = vmul.f32 %v3439_v2, %v703_v7  ;;  %v789_v14 = vadd.f32 %v3444_v42, %v750_v9 }
 0x12f   : > { %3219 = vmatmul.mubr.msk.bf16.gmra.mrb[24].mxu1 %vm849_vm2, %v838_v41  ;;  %v792_v17 = vadd.f32 %v3444_v42, %v753_v13  ;;  %v823_v20 = vmax.f32 %v791_v16, 0.0 }
 0x130   : > { %v790_v15 = vadd.f32 %v3444_v42, %v751_v10  ;;  %v821_v18 = vmax.f32 %v789_v14, 0.0 }
 0x131   : > { %v824_v21 = vmax.f32 %v792_v17, 0.0 }
 0x132   : > { %v822_v19 = vmax.f32 %v790_v15, 0.0 }
 0x133   : > { %v840_v22 = vpack.c.bf16 %v824_v21, %v823_v20 }
 0x134   : > { %v839_v2 = vpack.c.bf16 %v822_v19, %v821_v18 }
 0x136   : > { %3222 = vmatprep.mubr.msk.bf16.mxu1 %vm849_vm2, %v839_v2 }
 0x137   : > { %3223 = vmatmul.mubr.msk.bf16.gmra.mrb[28].mxu1 %vm849_vm2, %v840_v22 }
 0x1d2   : > { %v3516_v43 = vpop.f32.mrb[0].mxu1 }
 0x1d3   : > { %1345 = vrot.lane.b32.xlu0 %v3516_v43, %s3253_s24  ;;  %1095 = vrot.lane.b32.xlu1 %v3516_v43, %s3254_s25  ;;  %v3522_v44 = vpop.f32.mrb[1].mxu1  ;;  %v1525_v48 = vrot.slane %v3516_v43, 1 }
 0x1d4   : > { %v3524_v45 = vpop.f32.mrb[2].mxu1  ;;  %v1522_v50 = vrot.slane %v3522_v44, 1 }
 0x1d5   : > { %v3526_v46 = vpop.f32.mrb[3].mxu1  ;;  %v1526_v47 = vrot.slane %v3524_v45, 1 }
 0x1d6   : > { %v3531_v49 = vrot.slane %v3526_v46, 1 }
 0x1d7   : > { %1753 = vrot.lane.b32.xlu0 %v3516_v43, %s3255_s26  ;;  %1097 = vrot.lane.b32.xlu1 %v3524_v45, %s3254_s25  ;;  %v1527_v51 = vsel %vm1521_vm3, %v1525_v48, %v1526_v47 }
 0x1d8   : > { %v1524_v52 = vsel %vm1521_vm3, %v1522_v50, %v3531_v49 }
 0x1da   : > { %v3541_v53 = vpop.f32.mrb[4].mxu1 }
 0x1db   : > { %2134 = vrot.lane.b32.xlu0 %v3516_v43, %s3256_s28  ;;  %1347 = vrot.lane.b32.xlu1 %v3524_v45, %s3253_s24  ;;  %v3547_v54 = vpop.f32.mrb[5].mxu1  ;;  %v1531_v42 = vrot.slane %v3541_v53, 1 }
 0x1dc   : > { %v3549_v55 = vpop.f32.mrb[6].mxu1  ;;  %v1528_v56 = vrot.slane %v3547_v54, 1 }
 0x1dd   : > { %v3552_v57 = vpop.f32.mrb[7].mxu1  ;;  %v3657_v23 = vrot.slane %v3549_v55, 1 }
 0x1de   : > { %v3555_v58 = vrot.slane %v3552_v57, 1 }
 0x1df   : > { %2314 = vrot.lane.b32.xlu0 %v3516_v43, %s3257_s29  ;;  %1755 = vrot.lane.b32.xlu1 %v3524_v45, %s3255_s26  ;;  %v3673_v28 = vsel %vm1521_vm3, %v1531_v42, %v3657_v23 }
 0x1e0   : > { %v3563_v59 = vsel %vm1521_vm3, %v1528_v56, %v3555_v58 }
 0x1e2   : > { %v3565_v60 = vpop.f32.mrb[8].mxu1 }
 0x1e3   : > { %1091 = vrot.lane.b32.xlu0 %v3522_v44, %s3254_s25  ;;  %2136 = vrot.lane.b32.xlu1 %v3524_v45, %s3256_s28  ;;  %v3571_v61 = vpop.f32.mrb[9].mxu1  ;;  %v1537_v7 = vrot.slane %v3565_v60, 1 }
 0x1e4   : > { %v3573_v62 = vpop.f32.mrb[10].mxu1  ;;  %v1534_v22 = vrot.slane %v3571_v61, 1 }
 0x1e5   : > { %v3575_v63 = vpop.f32.mrb[11].mxu1  ;;  %v3767_v9 = vrot.slane %v3573_v62, 1 }
 0x1e6   : > { %v3796_v2 = vrot.slane %v3575_v63, 1 }
 0x1e7   : > { %1341 = vrot.lane.b32.xlu0 %v3522_v44, %s3253_s24  ;;  %2316 = vrot.lane.b32.xlu1 %v3524_v45, %s3257_s29  ;;  %v3783_v19 = vsel %vm1521_vm3, %v1537_v7, %v3767_v9 }
 0x1ea   : > { %v3589_v1 = vpop.f32.mrb[12].mxu1 }
 0x1eb   : > { %1749 = vrot.lane.b32.xlu0 %v3522_v44, %s3255_s26  ;;  %1343 = vrot.lane.b32.xlu1 %v3526_v46, %s3253_s24  ;;  %v3591_v4 = vpop.f32.mrb[13].mxu1 }
 0x1ec   : > { %v3595_v6 = vpop.f32.mrb[14].mxu1 }
 0x1ed   : > { %v3597_v8 = vpop.f32.mrb[15].mxu1 }
 0x1ef   : > { %1751 = vrot.lane.b32.xlu1 %v3526_v46, %s3255_s26  ;;  %1093 = vrot.lane.b32.xlu0 %v3526_v46, %s3254_s25 }
 0x1f2   : > { %v3659_v24 = vpop.f32.mrb[16].mxu1 }
 0x1f3   : > { %1573 = vrot.lane.b32.xlu1 %v1526_v47, %s3258_s30  ;;  %1571 = vrot.lane.b32.xlu0 %v1527_v51, %s3258_s30  ;;  %v3665_v25 = vpop.f32.mrb[17].mxu1 }
 0x1f4   : > { %v3667_v26 = vpop.f32.mrb[18].mxu1 }
 0x1f5   : > { %v3669_v27 = vpop.f32.mrb[19].mxu1 }
 0x1f7   : > { %1950 = vrot.lane.b32.xlu1 %v1526_v47, %s3259_s11  ;;  %1948 = vrot.lane.b32.xlu0 %v1527_v51, %s3259_s11 }
 0x1fb   : > { %2496 = vrot.lane.b32.xlu1 %v1526_v47, %s3260_s12  ;;  %2494 = vrot.lane.b32.xlu0 %v1527_v51, %s3260_s12 }
 0x1ff   : > { %1569 = vrot.lane.b32.xlu1 %v3531_v49, %s3258_s30  ;;  %1567 = vrot.lane.b32.xlu0 %v1524_v52, %s3258_s30 }
 0x203   : > { %1946 = vrot.lane.b32.xlu1 %v3531_v49, %s3259_s11  ;;  %1944 = vrot.lane.b32.xlu0 %v1524_v52, %s3259_s11 }
 0x207   : > { %1103 = vrot.lane.b32.xlu0 %v3541_v53, %s3254_s25  ;;  %1105 = vrot.lane.b32.xlu1 %v3549_v55, %s3254_s25 }
 0x20b   : > { %1353 = vrot.lane.b32.xlu0 %v3541_v53, %s3253_s24  ;;  %1355 = vrot.lane.b32.xlu1 %v3549_v55, %s3253_s24 }
 0x20f   : > { %1761 = vrot.lane.b32.xlu0 %v3541_v53, %s3255_s26  ;;  %1763 = vrot.lane.b32.xlu1 %v3549_v55, %s3255_s26 }
 0x213   : > { %2142 = vrot.lane.b32.xlu0 %v3541_v53, %s3256_s28  ;;  %2144 = vrot.lane.b32.xlu1 %v3549_v55, %s3256_s28 }
 0x217   : > { %2322 = vrot.lane.b32.xlu0 %v3541_v53, %s3257_s29  ;;  %2324 = vrot.lane.b32.xlu1 %v3549_v55, %s3257_s29 }
 0x21b   : > { %1099 = vrot.lane.b32.xlu0 %v3547_v54, %s3254_s25  ;;  %1101 = vrot.lane.b32.xlu1 %v3552_v57, %s3254_s25 }
 0x21f   : > { %1349 = vrot.lane.b32.xlu0 %v3547_v54, %s3253_s24  ;;  %1351 = vrot.lane.b32.xlu1 %v3552_v57, %s3253_s24 }
 0x223   : > { %1757 = vrot.lane.b32.xlu0 %v3547_v54, %s3255_s26  ;;  %1759 = vrot.lane.b32.xlu1 %v3552_v57, %s3255_s26 }
 0x227   : > { %2138 = vrot.lane.b32.xlu0 %v3547_v54, %s3256_s28  ;;  %2140 = vrot.lane.b32.xlu1 %v3552_v57, %s3256_s28 }
 0x22b   : > { %2318 = vrot.lane.b32.xlu0 %v3547_v54, %s3257_s29  ;;  %2320 = vrot.lane.b32.xlu1 %v3552_v57, %s3257_s29 }
 0x22f   : > { %1579 = vrot.lane.b32.xlu0 %v3673_v28, %s3258_s30  ;;  %1581 = vrot.lane.b32.xlu1 %v3657_v23, %s3258_s30 }
 0x233   : > { %1956 = vrot.lane.b32.xlu0 %v3673_v28, %s3259_s11  ;;  %1958 = vrot.lane.b32.xlu1 %v3657_v23, %s3259_s11 }
 0x237   : > { %1577 = vrot.lane.b32.xlu1 %v3555_v58, %s3258_s30  ;;  %1575 = vrot.lane.b32.xlu0 %v3563_v59, %s3258_s30 }
 0x23b   : > { %1954 = vrot.lane.b32.xlu1 %v3555_v58, %s3259_s11  ;;  %1952 = vrot.lane.b32.xlu0 %v3563_v59, %s3259_s11 }
 0x23f   : > { %2500 = vrot.lane.b32.xlu1 %v3555_v58, %s3260_s12  ;;  %2498 = vrot.lane.b32.xlu0 %v3563_v59, %s3260_s12  ;;  %v3757_v59 = vpop.f32.mrb[20].mxu1 }
 0x240   : > { %v3759_v0 = vpop.f32.mrb[21].mxu1 }
 0x241   : > { %v3769_v10 = vpop.f32.mrb[22].mxu1 }
 0x242   : > { %v3775_v12 = vpop.f32.mrb[23].mxu1 }
 0x243   : > { %1111 = vrot.lane.b32.xlu0 %v3565_v60, %s3254_s25  ;;  %1113 = vrot.lane.b32.xlu1 %v3573_v62, %s3254_s25 }
 0x245   : > { %v3699_v29 = vpop.permute.xlu0 %1345  ;;  %v1096_v30 = vpop.permute.xlu1 %1095 }
 0x246   : > { %1189 = vst.msk [vmem:[#allocation2 + $0x10] sm:$0xff] %vm501_vm1, %v1096_v30 }
 0x247   : > { %1361 = vrot.lane.b32.xlu0 %v3565_v60, %s3253_s24  ;;  %1363 = vrot.lane.b32.xlu1 %v3573_v62, %s3253_s24 }
 0x249   : > { %v3706_v31 = vpop.permute.xlu0 %1753  ;;  %v1098_v32 = vpop.permute.xlu1 %1097 }
 0x24a   : > { %1190 = vst.msk [vmem:[#allocation2 + $0x18] sm:$0xff] %vm501_vm1, %v1098_v32 }
 0x24b   : > { %1769 = vrot.lane.b32.xlu0 %v3565_v60, %s3255_s26  ;;  %1771 = vrot.lane.b32.xlu1 %v3573_v62, %s3255_s26 }
 0x24d   : > { %v3713_v33 = vpop.permute.xlu0 %2134  ;;  %v3715_v34 = vpop.permute.xlu1 %1347 }
 0x24f   : > { %2150 = vrot.lane.b32.xlu0 %v3565_v60, %s3256_s28  ;;  %2152 = vrot.lane.b32.xlu1 %v3573_v62, %s3256_s28 }
 0x251   : > { %v1220_v35 = vld [vmem:[#allocation2 + $0x11] sm:$0xff]  ;;  %v1221_v36 = vld [vmem:[#allocation2 + $0x19] sm:$0x7f]  ;;  %v3721_v37 = vpop.permute.xlu0 %2314  ;;  %v3723_v38 = vpop.permute.xlu1 %1755 }
 0x252   : > { %v1250_v39 = vadd.f32 %v1220_v35, %v3522_v44  ;;  %v1251_v40 = vadd.f32 %v1221_v36, %v3526_v46 }
 0x253   : > { %2330 = vrot.lane.b32.xlu0 %v3565_v60, %s3257_s29  ;;  %2332 = vrot.lane.b32.xlu1 %v3573_v62, %s3257_s29 }
 0x254   : > { %1280 = vst.msk [vmem:[#allocation2 + $0x11] sm:$0xff] %vm501_vm1, %v1250_v39 }
 0x255   : > { %1282 = vst.msk [vmem:[#allocation2 + $0x19] sm:$0x7f] %vm1281_vm4, %v1251_v40  ;;  %v1092_v41 = vpop.permute.xlu0 %1091  ;;  %v3733_v11 = vpop.permute.xlu1 %2136  ;;  %v3805_v40 = vsel %vm1521_vm3, %v1534_v22, %v3796_v2 }
 0x256   : > { %1187 = vst.msk [vmem:[#allocation2] sm:$0xff] %vm501_vm1, %v1092_v41 }
 0x257   : > { %1107 = vrot.lane.b32.xlu0 %v3571_v61, %s3254_s25  ;;  %1109 = vrot.lane.b32.xlu1 %v3575_v63, %s3254_s25 }
 0x259   : > { %v1342_v44 = vpop.permute.xlu0 %1341  ;;  %v3740_v46 = vpop.permute.xlu1 %2316 }
 0x25b   : > { %v1311_v47 = vld [vmem:[#allocation2 + $0x10] sm:$0xff]  ;;  %1357 = vrot.lane.b32.xlu0 %v3571_v61, %s3253_s24  ;;  %1359 = vrot.lane.b32.xlu1 %v3575_v63, %s3253_s24 }
 0x25c   : > { %v1431_v48 = vadd.f32 %v1342_v44, %v1311_v47  ;;  %v1312_v51 = vld [vmem:[#allocation2 + $0x18] sm:$0xff] }
 0x25d   : > { %v1750_v49 = vpop.permute.xlu0 %1749  ;;  %v1344_v50 = vpop.permute.xlu1 %1343 }
 0x25e   : > { %1461 = vst.msk [vmem:[#allocation2 + $0x10] sm:$0xff] %vm501_vm1, %v1431_v48  ;;  %v1432_v52 = vadd.f32 %v1344_v50, %v1312_v51 }
 0x25f   : > { %1765 = vrot.lane.b32.xlu0 %v3571_v61, %s3255_s26  ;;  %1767 = vrot.lane.b32.xlu1 %v3575_v63, %s3255_s26 }
 0x260   : > { %1462 = vst.msk [vmem:[#allocation2 + $0x18] sm:$0xff] %vm501_vm1, %v1432_v52 }
 0x261   : > { %v1752_v56 = vpop.permute.xlu1 %1751  ;;  %v1094_v58 = vpop.permute.xlu0 %1093 }
 0x262   : > { %1188 = vst.msk [vmem:[#allocation2 + $0x8] sm:$0xff] %vm501_vm1, %v1094_v58 }
 0x263   : > { %2146 = vrot.lane.b32.xlu0 %v3571_v61, %s3256_s28  ;;  %2148 = vrot.lane.b32.xlu1 %v3575_v63, %s3256_s28 }
 0x265   : > { %v3761_v3 = vpop.permute.xlu1 %1573  ;;  %v3763_v5 = vpop.permute.xlu0 %1571  ;;  %v1491_v32 = vld [vmem:[#allocation2 + $0x10] sm:$0xff] }
 0x267   : > { %2326 = vrot.lane.b32.xlu0 %v3571_v61, %s3257_s29  ;;  %2328 = vrot.lane.b32.xlu1 %v3575_v63, %s3257_s29  ;;  %v1492_v30 = vld [vmem:[#allocation2 + $0x18] sm:$0x7f] }
 0x269   : > { %v1717_v13 = vld [vmem:[#allocation2 + $0x1] sm:$0xff]  ;;  %v1718_v14 = vld [vmem:[#allocation2 + $0x9] sm:$0x7f]  ;;  %v3777_v15 = vpop.permute.xlu1 %1950  ;;  %v3779_v16 = vpop.permute.xlu0 %1948 }
 0x26a   : > { %v1845_v17 = vadd.f32 %v1750_v49, %v1717_v13  ;;  %v1846_v18 = vadd.f32 %v1752_v56, %v1718_v14 }
 0x26b   : > { %1587 = vrot.lane.b32.xlu0 %v3783_v19, %s3258_s30  ;;  %1589 = vrot.lane.b32.xlu1 %v3767_v9, %s3258_s30 }
 0x26c   : > { %1877 = vst.msk [vmem:[#allocation2 + $0x1] sm:$0xff] %vm501_vm1, %v1845_v17 }
 0x26d   : > { %1878 = vst.msk [vmem:[#allocation2 + $0x9] sm:$0x7f] %vm1281_vm4, %v1846_v18  ;;  %v3791_v20 = vpop.permute.xlu1 %2496  ;;  %v3793_v21 = vpop.permute.xlu0 %2494 }
 0x26f   : > { %1964 = vrot.lane.b32.xlu0 %v3783_v19, %s3259_s11  ;;  %1966 = vrot.lane.b32.xlu1 %v3767_v9, %s3259_s11 }
 0x271   : > { %v1570_v42 = vpop.permute.xlu1 %1569  ;;  %v1568_v35 = vpop.permute.xlu0 %1567 }
 0x272   : > { %v1658_v36 = vadd.f32 %v1570_v42, %v1492_v30  ;;  %v1657_v39 = vadd.f32 %v1568_v35, %v1491_v32 }
 0x273   : > { %1585 = vrot.lane.b32.xlu1 %v3796_v2, %s3258_s30  ;;  %1583 = vrot.lane.b32.xlu0 %v3805_v40, %s3258_s30  ;;  %v1909_v47 = vld [vmem:[#allocation2] sm:$0xff] }
 0x274   : > { %1688 = vst.msk [vmem:[#allocation2 + $0x18] sm:$0x7f] %vm1281_vm4, %v1658_v36  ;;  %v1910_v41 = vld [vmem:[#allocation2 + $0x8] sm:$0x7f] }
 0x275   : > { %1687 = vst.msk [vmem:[#allocation2 + $0x10] sm:$0xff] %vm501_vm1, %v1657_v39  ;;  %v1947_v44 = vpop.permute.xlu1 %1946  ;;  %v1945_v48 = vpop.permute.xlu0 %1944 }
 0x276   : > { %v2041_v49 = vadd.f32 %v1947_v44, %v1910_v41  ;;  %v2040_v50 = vadd.f32 %v1945_v48, %v1909_v47 }
 0x277   : > { %1962 = vrot.lane.b32.xlu1 %v3796_v2, %s3259_s11  ;;  %1960 = vrot.lane.b32.xlu0 %v3805_v40, %s3259_s11 }
 0x278   : > { %2073 = vst.msk [vmem:[#allocation2 + $0x8] sm:$0x7f] %vm1281_vm4, %v2041_v49 }
 0x279   : > { %2072 = vst.msk [vmem:[#allocation2] sm:$0xff] %vm501_vm1, %v2040_v50  ;;  %v1104_v51 = vpop.permute.xlu0 %1103  ;;  %v1106_v52 = vpop.permute.xlu1 %1105 }
 0x27a   : > { %1193 = vst.msk [vmem:[#allocation2 + $0x30] sm:$0xff] %vm501_vm1, %v1104_v51  ;;  %1194 = vst.msk [vmem:[#allocation2 + $0x38] sm:$0xff] %vm501_vm1, %v1106_v52 }
 0x27b   : > { %v1720_v56 = vld [vmem:[#allocation2 + $0x19] sm:$0x7f]  ;;  %1119 = vrot.lane.b32.xlu0 %v3589_v1, %s3254_s25  ;;  %1121 = vrot.lane.b32.xlu1 %v3595_v6, %s3254_s25 }
 0x27c   : > { %v1719_v58 = vld [vmem:[#allocation2 + $0x11] sm:$0xff]  ;;  %v1848_v7 = vadd.f32 %v3723_v38, %v1720_v56 }
 0x27d   : > { %v1847_v13 = vadd.f32 %v3706_v31, %v1719_v58  ;;  %v3827_v14 = vpop.permute.xlu0 %1353  ;;  %v3829_v17 = vpop.permute.xlu1 %1355 }
 0x27e   : > { %1880 = vst.msk [vmem:[#allocation2 + $0x19] sm:$0x7f] %vm1281_vm4, %v1848_v7 }
 0x27f   : > { %1879 = vst.msk [vmem:[#allocation2 + $0x11] sm:$0xff] %vm501_vm1, %v1847_v13  ;;  %v2105_v18 = vld [vmem:[#allocation2 + $0x9] sm:$0x7f]  ;;  %1369 = vrot.lane.b32.xlu0 %v3589_v1, %s3253_s24  ;;  %1371 = vrot.lane.b32.xlu1 %v3595_v6, %s3253_s24 }
 0x280   : > { %v2104_v22 = vld [vmem:[#allocation2 + $0x1] sm:$0xff]  ;;  %v2225_v38 = vadd.f32 %v3733_v11, %v2105_v18 }
 0x281   : > { %v2224_v31 = vadd.f32 %v3713_v33, %v2104_v22  ;;  %v1224_v42 = vld [vmem:[#allocation2 + $0x31] sm:$0xff]  ;;  %v1225_v30 = vld [vmem:[#allocation2 + $0x39] sm:$0x7f]  ;;  %v3839_v32 = vpop.permute.xlu0 %1761  ;;  %v3841_v35 = vpop.permute.xlu1 %1763 }
 0x282   : > { %2255 = vst.msk [vmem:[#allocation2 + $0x9] sm:$0x7f] %vm1281_vm4, %v2225_v38  ;;  %v1254_v36 = vadd.f32 %v1224_v42, %v3547_v54  ;;  %v1255_v39 = vadd.f32 %v1225_v30, %v3552_v57 }
 0x283   : > { %2254 = vst.msk [vmem:[#allocation2 + $0x1] sm:$0xff] %vm501_vm1, %v2224_v31  ;;  %1777 = vrot.lane.b32.xlu0 %v3589_v1, %s3255_s26  ;;  %1779 = vrot.lane.b32.xlu1 %v3595_v6, %s3255_s26 }
 0x284   : > { %1285 = vst.msk [vmem:[#allocation2 + $0x31] sm:$0xff] %vm501_vm1, %v1254_v36 }
 0x285   : > { %1286 = vst.msk [vmem:[#allocation2 + $0x39] sm:$0x7f] %vm1281_vm4, %v1255_v39  ;;  %v3853_v11 = vpop.permute.xlu0 %2142  ;;  %v3855_v41 = vpop.permute.xlu1 %2144 }
 0x286   : > { %v1911_v33 = vld [vmem:[#allocation2 + $0x10] sm:$0xff]  ;;  %v1912_v44 = vld [vmem:[#allocation2 + $0x18] sm:$0x7f] }
 0x287   : > { %v2042_v54 = vadd.f32 %v3779_v16, %v1911_v33  ;;  %v2043_v57 = vadd.f32 %v3777_v15, %v1912_v44  ;;  %2158 = vrot.lane.b32.xlu0 %v3589_v1, %s3256_s28  ;;  %2160 = vrot.lane.b32.xlu1 %v3595_v6, %s3256_s28 }
 0x289   : > { %2074 = vst.msk [vmem:[#allocation2 + $0x10] sm:$0xff] %vm501_vm1, %v2042_v54  ;;  %v3865_v49 = vpop.permute.xlu0 %2322  ;;  %v3867_v50 = vpop.permute.xlu1 %2324 }
 0x28a   : > { %2075 = vst.msk [vmem:[#allocation2 + $0x18] sm:$0x7f] %vm1281_vm4, %v2043_v57  ;;  %v2284_v47 = vld [vmem:[#allocation2] sm:$0xff]  ;;  %v2285_v48 = vld [vmem:[#allocation2 + $0x8] sm:$0xff] }
 0x28b   : > { %v2404_v16 = vadd.f32 %v3721_v37, %v2284_v47  ;;  %v2405_v15 = vadd.f32 %v3740_v46, %v2285_v48  ;;  %2338 = vrot.lane.b32.xlu0 %v3589_v1, %s3257_s29  ;;  %2340 = vrot.lane.b32.xlu1 %v3595_v6, %s3257_s29  ;;  %v1315_v46 = vld [vmem:[#allocation2 + $0x30] sm:$0xff] }
 0x28c   : > { %v1316_v58 = vld [vmem:[#allocation2 + $0x38] sm:$0xff] }
 0x28d   : > { %2434 = vst.msk [vmem:[#allocation2] sm:$0xff] %vm501_vm1, %v2404_v16  ;;  %2435 = vst.msk [vmem:[#allocation2 + $0x8] sm:$0xff] %vm501_vm1, %v2405_v15  ;;  %v1100_v51 = vpop.permute.xlu0 %1099  ;;  %v1102_v52 = vpop.permute.xlu1 %1101 }
 0x28e   : > { %1191 = vst.msk [vmem:[#allocation2 + $0x20] sm:$0xff] %vm501_vm1, %v1100_v51  ;;  %1192 = vst.msk [vmem:[#allocation2 + $0x28] sm:$0xff] %vm501_vm1, %v1102_v52 }
 0x28f   : > { %1115 = vrot.lane.b32.xlu0 %v3591_v4, %s3254_s25  ;;  %1117 = vrot.lane.b32.xlu1 %v3597_v8, %s3254_s25 }
 0x291   : > { %v1350_v37 = vpop.permute.xlu0 %1349  ;;  %v1352_v56 = vpop.permute.xlu1 %1351  ;;  %v2107_v54 = vld [vmem:[#allocation2 + $0x19] sm:$0x7f] }
 0x292   : > { %v1435_v7 = vadd.f32 %v1350_v37, %v1315_v46  ;;  %v1436_v13 = vadd.f32 %v1352_v56, %v1316_v58  ;;  %v1543_v58 = vrot.slane %v3589_v1, 1 }
 0x293   : > { %1365 = vrot.lane.b32.xlu0 %v3591_v4, %s3253_s24  ;;  %1367 = vrot.lane.b32.xlu1 %v3597_v8, %s3253_s24 }
 0x294   : > { %v2464_v18 = vld [vmem:[#allocation2] sm:$0xff]  ;;  %v2465_v22 = vld [vmem:[#allocation2 + $0x8] sm:$0x7f]  ;;  %1465 = vst.msk [vmem:[#allocation2 + $0x30] sm:$0xff] %vm501_vm1, %v1435_v7  ;;  %1466 = vst.msk [vmem:[#allocation2 + $0x38] sm:$0xff] %vm501_vm1, %v1436_v13  ;;  %v3924_v7 = vrot.slane %v3595_v6, 1 }
 0x295   : > { %v2584_v38 = vadd.f32 %v3793_v21, %v2464_v18  ;;  %v2585_v31 = vadd.f32 %v3791_v20, %v2465_v22  ;;  %v1222_v42 = vld [vmem:[#allocation2 + $0x21] sm:$0xff]  ;;  %v1223_v30 = vld [vmem:[#allocation2 + $0x29] sm:$0x7f]  ;;  %v3891_v36 = vpop.permute.xlu0 %1757  ;;  %v3893_v39 = vpop.permute.xlu1 %1759  ;;  %v2106_v20 = vld [vmem:[#allocation2 + $0x11] sm:$0xff] }
 0x296   : > { %v1252_v33 = vadd.f32 %v3516_v43, %v1222_v42  ;;  %v1253_v21 = vadd.f32 %v3524_v45, %v1223_v30  ;;  %v3908_v43 = vld [vmem:[%s4939_s7] ss:$0 sm:$0xff]  ;;  %v3914_v45 = vpop.f32.mrb[24].mxu1 }
 0x297   : > { %2614 = vst.msk [vmem:[#allocation2] sm:$0xff] %vm501_vm1, %v2584_v38  ;;  %1773 = vrot.lane.b32.xlu0 %v3591_v4, %s3255_s26  ;;  %1775 = vrot.lane.b32.xlu1 %v3597_v8, %s3255_s26  ;;  %v3918_v16 = vpop.f32.mrb[25].mxu1 }
 0x298   : > { %2615 = vst.msk [vmem:[#allocation2 + $0x8] sm:$0x7f] %vm1281_vm4, %v2585_v31  ;;  %1284 = vst.msk [vmem:[#allocation2 + $0x29] sm:$0x7f] %vm1281_vm4, %v1253_v21  ;;  %v3926_v13 = vpop.f32.mrb[26].mxu1 }
 0x299   : > { %1283 = vst.msk [vmem:[#allocation2 + $0x21] sm:$0xff] %vm501_vm1, %v1252_v33  ;;  %v2139_v44 = vpop.permute.xlu0 %2138  ;;  %v2141_v57 = vpop.permute.xlu1 %2140 }
 0x29a   : > { %v2226_v47 = vadd.f32 %v2139_v44, %v2106_v20  ;;  %v2227_v48 = vadd.f32 %v2141_v57, %v2107_v54  ;;  %v3939_v38 = vpop.f32.mrb[27].mxu1  ;;  %v3955_v44 = vsel %vm1521_vm3, %v1543_v58, %v3924_v7 }
 0x29b   : > { %2154 = vrot.lane.b32.xlu0 %v3591_v4, %s3256_s28  ;;  %2156 = vrot.lane.b32.xlu1 %v3597_v8, %s3256_s28  ;;  %v1495_v58 = vld [vmem:[#allocation2 + $0x30] sm:$0xff] }
 0x29c   : > { %2256 = vst.msk [vmem:[#allocation2 + $0x11] sm:$0xff] %vm501_vm1, %v2226_v47 }
 0x29d   : > { %2257 = vst.msk [vmem:[#allocation2 + $0x19] sm:$0x7f] %vm1281_vm4, %v2227_v48  ;;  %v2319_v52 = vpop.permute.xlu0 %2318  ;;  %v2321_v37 = vpop.permute.xlu1 %2320 }
 0x29e   : > { %v2644_v15 = vld [vmem:[#allocation2] sm:$0xff] }
 0x29f   : > { %v2645_v51 = vld [vmem:[#allocation2 + $0x8] sm:$0xff]  ;;  %v2683_v46 = vadd.f32 %v3908_v43, %v2644_v15  ;;  %2334 = vrot.lane.b32.xlu0 %v3591_v4, %s3257_s29  ;;  %2336 = vrot.lane.b32.xlu1 %v3597_v8, %s3257_s29  ;;  %v3966_v15 = vrot.slane %v3597_v8, 1 }
 0x2a0   : > { %v2684_v56 = vadd.f32 %v3908_v43, %v2645_v51  ;;  %v1313_v18 = vld [vmem:[#allocation2 + $0x20] sm:$0xff]  ;;  %v1314_v22 = vld [vmem:[#allocation2 + $0x28] sm:$0xff]  ;;  %v1540_v51 = vrot.slane %v3591_v4, 1 }
 0x2a1   : > { %v3013_v31 = vpack.c.bf16 %v2683_v46, %v2683_v46  ;;  %v1433_v30 = vadd.f32 %v3699_v29, %v1313_v18  ;;  %v1434_v33 = vadd.f32 %v3715_v34, %v1314_v22  ;;  %v3943_v21 = vpop.permute.xlu0 %1579  ;;  %v3945_v20 = vpop.permute.xlu1 %1581 }
 0x2a2   : > { %v3014_v42 = vpack.c.bf16 %v2684_v56, %v2684_v56  ;;  %v3977_v22 = vsel %vm1521_vm3, %v1540_v51, %v3966_v15 }
 0x2a3   : > { %2844 = vst.msk [vmem:[%s3933_s17] sm:$0xf] %vm2843_vm5, %v3013_v31  ;;  %v2286_v54 = vld [vmem:[#allocation2 + $0x10] sm:$0xff]  ;;  %1595 = vrot.lane.b32.xlu0 %v3955_v44, %s3258_s30  ;;  %1597 = vrot.lane.b32.xlu1 %v3924_v7, %s3258_s30 }
 0x2a4   : > { %2845 = vst.msk [vmem:[%s3933_s17 + $0x4] sm:$0xf] %vm2843_vm5, %v3014_v42  ;;  %v2287_v29 = vld [vmem:[#allocation2 + $0x18] sm:$0xff]  ;;  %v2406_v34 = vadd.f32 %v2319_v52, %v2286_v54 }
 0x2a5   : > { %1463 = vst.msk [vmem:[#allocation2 + $0x20] sm:$0xff] %vm501_vm1, %v1433_v30  ;;  %1464 = vst.msk [vmem:[#allocation2 + $0x28] sm:$0xff] %vm501_vm1, %v1434_v33  ;;  %v2407_v57 = vadd.f32 %v2321_v37, %v2287_v29  ;;  %v3961_v47 = vpop.permute.xlu0 %1956  ;;  %v3963_v48 = vpop.permute.xlu1 %1958  ;;  %v1496_v52 = vld [vmem:[#allocation2 + $0x38] sm:$0x7f] }
 0x2a6   : > { %2436 = vst.msk [vmem:[#allocation2 + $0x10] sm:$0xff] %vm501_vm1, %v2406_v34 }
 0x2a7   : > { %2437 = vst.msk [vmem:[#allocation2 + $0x18] sm:$0xff] %vm501_vm1, %v2407_v57  ;;  %1972 = vrot.lane.b32.xlu0 %v3955_v44, %s3259_s11  ;;  %1974 = vrot.lane.b32.xlu1 %v3924_v7, %s3259_s11 }
 0x2a9   : > { %v1578_v56 = vpop.permute.xlu1 %1577  ;;  %v1576_v18 = vpop.permute.xlu0 %1575 }
 0x2aa   : > { %v1662_v30 = vadd.f32 %v1578_v56, %v1496_v52  ;;  %v1661_v33 = vadd.f32 %v1576_v18, %v1495_v58 }
 0x2ab   : > { %1593 = vrot.lane.b32.xlu1 %v3966_v15, %s3258_s30  ;;  %1591 = vrot.lane.b32.xlu0 %v3977_v22, %s3258_s30 }
 0x2ac   : > { %v1493_v37 = vld [vmem:[#allocation2 + $0x20] sm:$0xff]  ;;  %v1494_v46 = vld [vmem:[#allocation2 + $0x28] sm:$0x7f]  ;;  %1692 = vst.msk [vmem:[#allocation2 + $0x38] sm:$0x7f] %vm1281_vm4, %v1662_v30 }
 0x2ad   : > { %v1659_v31 = vadd.f32 %v3763_v5, %v1493_v37  ;;  %v1660_v42 = vadd.f32 %v3761_v3, %v1494_v46  ;;  %1691 = vst.msk [vmem:[#allocation2 + $0x30] sm:$0xff] %vm501_vm1, %v1661_v33  ;;  %v1955_v54 = vpop.permute.xlu1 %1954  ;;  %v1953_v5 = vpop.permute.xlu0 %1952  ;;  %v2466_v34 = vld [vmem:[#allocation2 + $0x10] sm:$0xff] }
 0x2ae   : > { %v2467_v3 = vld [vmem:[#allocation2 + $0x18] sm:$0x7f] }
 0x2af   : > { %1689 = vst.msk [vmem:[#allocation2 + $0x20] sm:$0xff] %vm501_vm1, %v1659_v31  ;;  %1970 = vrot.lane.b32.xlu1 %v3966_v15, %s3259_s11  ;;  %1968 = vrot.lane.b32.xlu0 %v3977_v22, %s3259_s11 }
 0x2b0   : > { %1690 = vst.msk [vmem:[#allocation2 + $0x28] sm:$0x7f] %vm1281_vm4, %v1660_v42 }
 0x2b1   : > { %v2501_v29 = vpop.permute.xlu1 %2500  ;;  %v2499_v57 = vpop.permute.xlu0 %2498 }
 0x2b2   : > { %v2587_v51 = vadd.f32 %v2501_v29, %v2467_v3  ;;  %v2586_v52 = vadd.f32 %v2499_v57, %v2466_v34 }
 0x2b3   : > { %v1724_v56 = vld [vmem:[#allocation2 + $0x39] sm:$0x7f]  ;;  %1127 = vrot.lane.b32.xlu0 %v3659_v24, %s3254_s25  ;;  %1129 = vrot.lane.b32.xlu1 %v3667_v26, %s3254_s25 }
 0x2b4   : > { %v1852_v31 = vadd.f32 %v3841_v35, %v1724_v56  ;;  %v1723_v42 = vld [vmem:[#allocation2 + $0x31] sm:$0xff]  ;;  %2617 = vst.msk [vmem:[#allocation2 + $0x18] sm:$0x7f] %vm1281_vm4, %v2587_v51 }
 0x2b5   : > { %2616 = vst.msk [vmem:[#allocation2 + $0x10] sm:$0xff] %vm501_vm1, %v2586_v52  ;;  %v1851_v30 = vadd.f32 %v3839_v32, %v1723_v42  ;;  %v1112_v33 = vpop.permute.xlu0 %1111  ;;  %v1114_v3 = vpop.permute.xlu1 %1113 }
 0x2b6   : > { %1884 = vst.msk [vmem:[#allocation2 + $0x39] sm:$0x7f] %vm1281_vm4, %v1852_v31 }
 0x2b7   : > { %v1721_v37 = vld [vmem:[#allocation2 + $0x21] sm:$0xff]  ;;  %v1722_v46 = vld [vmem:[#allocation2 + $0x29] sm:$0x7f]  ;;  %1197 = vst.msk [vmem:[#allocation2 + $0x50] sm:$0xff] %vm501_vm1, %v1112_v33  ;;  %1198 = vst.msk [vmem:[#allocation2 + $0x58] sm:$0xff] %vm501_vm1, %v1114_v3  ;;  %1377 = vrot.lane.b32.xlu0 %v3659_v24, %s3253_s24  ;;  %1379 = vrot.lane.b32.xlu1 %v3667_v26, %s3253_s24 }
 0x2b8   : > { %v1849_v58 = vadd.f32 %v3891_v36, %v1721_v37  ;;  %v1850_v18 = vadd.f32 %v3893_v39, %v1722_v46  ;;  %1883 = vst.msk [vmem:[#allocation2 + $0x31] sm:$0xff] %vm501_vm1, %v1851_v30 }
 0x2b9   : > { %v4013_v32 = vpop.permute.xlu0 %1361  ;;  %v4015_v35 = vpop.permute.xlu1 %1363 }
 0x2ba   : > { %1881 = vst.msk [vmem:[#allocation2 + $0x21] sm:$0xff] %vm501_vm1, %v1849_v58 }
 0x2bb   : > { %1882 = vst.msk [vmem:[#allocation2 + $0x29] sm:$0x7f] %vm1281_vm4, %v1850_v18  ;;  %v2647_v36 = vld [vmem:[#allocation2 + $0x18] sm:$0xff]  ;;  %1785 = vrot.lane.b32.xlu0 %v3659_v24, %s3255_s26  ;;  %1787 = vrot.lane.b32.xlu1 %v3667_v26, %s3255_s26 }
 0x2bc   : > { %v2646_v39 = vld [vmem:[#allocation2 + $0x10] sm:$0xff]  ;;  %v2686_v29 = vadd.f32 %v3908_v43, %v2647_v36 }
 0x2bd   : > { %v2685_v34 = vadd.f32 %v3908_v43, %v2646_v39  ;;  %v4023_v37 = vpop.permute.xlu0 %1769  ;;  %v4025_v46 = vpop.permute.xlu1 %1771 }
 0x2be   : > { %v1228_v52 = vld [vmem:[#allocation2 + $0x51] sm:$0xff]  ;;  %v3016_v31 = vpack.c.bf16 %v2686_v29, %v2686_v29  ;;  %v1229_v30 = vld [vmem:[#allocation2 + $0x59] sm:$0x7f] }
 0x2bf   : > { %v1915_v56 = vld [vmem:[#allocation2 + $0x30] sm:$0xff]  ;;  %v3015_v42 = vpack.c.bf16 %v2685_v34, %v2685_v34  ;;  %v1916_v33 = vld [vmem:[#allocation2 + $0x38] sm:$0x7f]  ;;  %v1258_v43 = vadd.f32 %v1228_v52, %v3571_v61  ;;  %v1259_v36 = vadd.f32 %v1229_v30, %v3575_v63  ;;  %2166 = vrot.lane.b32.xlu0 %v3659_v24, %s3256_s28  ;;  %2168 = vrot.lane.b32.xlu1 %v3667_v26, %s3256_s28 }
 0x2c0   : > { %v2046_v3 = vadd.f32 %v3961_v47, %v1915_v56  ;;  %2847 = vst.msk [vmem:[%s3933_s17 + $0xc] sm:$0xf] %vm2843_vm5, %v3016_v31  ;;  %v2047_v47 = vadd.f32 %v3963_v48, %v1916_v33 }
 0x2c1   : > { %v1913_v51 = vld [vmem:[#allocation2 + $0x20] sm:$0xff]  ;;  %2846 = vst.msk [vmem:[%s3933_s17 + $0x8] sm:$0xf] %vm2843_vm5, %v3015_v42  ;;  %v4044_v61 = vpop.permute.xlu0 %2150  ;;  %v4046_v63 = vpop.permute.xlu1 %2152 }
 0x2c2   : > { %v1914_v57 = vld [vmem:[#allocation2 + $0x28] sm:$0x7f]  ;;  %v2044_v18 = vadd.f32 %v1953_v5, %v1913_v51  ;;  %2078 = vst.msk [vmem:[#allocation2 + $0x30] sm:$0xff] %vm501_vm1, %v2046_v3  ;;  %1289 = vst.msk [vmem:[#allocation2 + $0x51] sm:$0xff] %vm501_vm1, %v1258_v43 }
 0x2c3   : > { %v2045_v58 = vadd.f32 %v1955_v54, %v1914_v57  ;;  %1290 = vst.msk [vmem:[#allocation2 + $0x59] sm:$0x7f] %vm1281_vm4, %v1259_v36  ;;  %2079 = vst.msk [vmem:[#allocation2 + $0x38] sm:$0x7f] %vm1281_vm4, %v2047_v47  ;;  %2346 = vrot.lane.b32.xlu0 %v3659_v24, %s3257_s29  ;;  %2348 = vrot.lane.b32.xlu1 %v3667_v26, %s3257_s29 }
 0x2c4   : > { %2076 = vst.msk [vmem:[#allocation2 + $0x20] sm:$0xff] %vm501_vm1, %v2044_v18 }
 0x2c5   : > { %2077 = vst.msk [vmem:[#allocation2 + $0x28] sm:$0x7f] %vm1281_vm4, %v2045_v58  ;;  %v4053_v54 = vpop.permute.xlu0 %2330  ;;  %v4055_v48 = vpop.permute.xlu1 %2332 }
 0x2c7   : > { %1123 = vrot.lane.b32.xlu0 %v3665_v25, %s3254_s25  ;;  %1125 = vrot.lane.b32.xlu1 %v3669_v27, %s3254_s25 }
 0x2c9   : > { %v1108_v57 = vpop.permute.xlu0 %1107  ;;  %v1110_v51 = vpop.permute.xlu1 %1109 }
 0x2ca   : > { %1195 = vst.msk [vmem:[#allocation2 + $0x40] sm:$0xff] %vm501_vm1, %v1108_v57  ;;  %1196 = vst.msk [vmem:[#allocation2 + $0x48] sm:$0xff] %vm501_vm1, %v1110_v51 }
 0x2cb   : > { %1373 = vrot.lane.b32.xlu0 %v3665_v25, %s3253_s24  ;;  %1375 = vrot.lane.b32.xlu1 %v3669_v27, %s3253_s24 }
 0x2cc   : > { %v2108_v5 = vld [vmem:[#allocation2 + $0x21] sm:$0xff]  ;;  %v2109_v39 = vld [vmem:[#allocation2 + $0x29] sm:$0x7f] }
 0x2cd   : > { %v2228_v29 = vadd.f32 %v3853_v11, %v2108_v5  ;;  %v2229_v34 = vadd.f32 %v3855_v41, %v2109_v39  ;;  %v1358_v52 = vpop.permute.xlu0 %1357  ;;  %v1319_v11 = vld [vmem:[#allocation2 + $0x50] sm:$0xff]  ;;  %v1360_v56 = vpop.permute.xlu1 %1359  ;;  %v1320_v41 = vld [vmem:[#allocation2 + $0x58] sm:$0xff] }
 0x2ce   : > { %v1439_v58 = vadd.f32 %v1358_v52, %v1319_v11  ;;  %v1440_v18 = vadd.f32 %v1360_v56, %v1320_v41  ;;  %v4088_v39 = vpop.f32.mrb[28].mxu1  ;;  %v1549_v11 = vrot.slane %v3659_v24, 1 }
 0x2cf   : > { %2258 = vst.msk [vmem:[#allocation2 + $0x21] sm:$0xff] %vm501_vm1, %v2228_v29  ;;  %1781 = vrot.lane.b32.xlu0 %v3665_v25, %s3255_s26  ;;  %1783 = vrot.lane.b32.xlu1 %v3669_v27, %s3255_s26 }
 0x2d0   : > { %2259 = vst.msk [vmem:[#allocation2 + $0x29] sm:$0x7f] %vm1281_vm4, %v2229_v34  ;;  %v2111_v34 = vld [vmem:[#allocation2 + $0x39] sm:$0x7f] }
 0x2d1   : > { %1469 = vst.msk [vmem:[#allocation2 + $0x50] sm:$0xff] %vm501_vm1, %v1439_v58  ;;  %1470 = vst.msk [vmem:[#allocation2 + $0x58] sm:$0xff] %vm501_vm1, %v1440_v18  ;;  %v1226_v31 = vld [vmem:[#allocation2 + $0x41] sm:$0xff]  ;;  %v1227_v42 = vld [vmem:[#allocation2 + $0x49] sm:$0x7f]  ;;  %v4077_v30 = vpop.permute.xlu0 %1765  ;;  %v4079_v33 = vpop.permute.xlu1 %1767  ;;  %v1941_v58 = vrot.slane %v4088_v39, 1 }
 0x2d2   : > { %v1256_v43 = vadd.f32 %v3541_v53, %v1226_v31  ;;  %v1257_v36 = vadd.f32 %v3549_v55, %v1227_v42  ;;  %v4093_v53 = vpop.f32.mrb[29].mxu1  ;;  %v2110_v55 = vld [vmem:[#allocation2 + $0x31] sm:$0xff] }
 0x2d3   : > { %2162 = vrot.lane.b32.xlu0 %v3665_v25, %s3256_s28  ;;  %2164 = vrot.lane.b32.xlu1 %v3669_v27, %s3256_s28  ;;  %v4101_v56 = vpop.f32.mrb[30].mxu1  ;;  %v1564_v42 = vrot.slane %v4093_v53, 1 }
 0x2d4   : > { %1287 = vst.msk [vmem:[#allocation2 + $0x41] sm:$0xff] %vm501_vm1, %v1256_v43  ;;  %v4107_v41 = vpop.f32.mrb[31].mxu1  ;;  %v4111_v18 = vrot.slane %v4101_v56, 1 }
 0x2d5   : > { %1288 = vst.msk [vmem:[#allocation2 + $0x49] sm:$0x7f] %vm1281_vm4, %v1257_v36  ;;  %v2149_v57 = vpop.permute.xlu1 %2148  ;;  %v4116_v31 = vrot.slane %v4107_v41, 1 }
 0x2d6   : > { %v2288_v3 = vld [vmem:[#allocation2 + $0x20] sm:$0xff]  ;;  %v2231_v52 = vadd.f32 %v2149_v57, %v2111_v34  ;;  %v4121_v36 = vsel %vm1521_vm3, %v1941_v58, %v4111_v18 }
 0x2d7   : > { %v2408_v47 = vadd.f32 %v3865_v49, %v2288_v3  ;;  %v2289_v5 = vld [vmem:[#allocation2 + $0x28] sm:$0xff]  ;;  %v2147_v49 = vpop.permute.xlu0 %2146  ;;  %2342 = vrot.lane.b32.xlu0 %v3665_v25, %s3257_s29  ;;  %2344 = vrot.lane.b32.xlu1 %v3669_v27, %s3257_s29 }
 0x2d8   : > { %v2409_v29 = vadd.f32 %v3867_v50, %v2289_v5  ;;  %v2230_v51 = vadd.f32 %v2147_v49, %v2110_v55  ;;  %v4099_v50 = vrot.slane %v3667_v26, 1  ;;  %2261 = vst.msk [vmem:[#allocation2 + $0x39] sm:$0x7f] %vm1281_vm4, %v2231_v52  ;;  %v4129_v5 = vsel %vm1521_vm3, %v1564_v42, %v4116_v31 }
 0x2d9   : > { %2438 = vst.msk [vmem:[#allocation2 + $0x20] sm:$0xff] %vm501_vm1, %v2408_v47  ;;  %v2329_v43 = vpop.permute.xlu1 %2328  ;;  %4946 = vst [vmem:[#allocation5_spill] sm:$0xff] %v4129_v5  ;;  %v4144_v52 = vrot.slane %v3669_v27, 1 }
 0x2da   : > { %2439 = vst.msk [vmem:[#allocation2 + $0x28] sm:$0xff] %vm501_vm1, %v2409_v29  ;;  %4944 = vst [vmem:[#allocation3_spill] sm:$0xff] %v4099_v50  ;;  %v4125_v47 = vsel %vm1521_vm3, %v1549_v11, %v4099_v50  ;;  %v1546_v11 = vrot.slane %v3665_v25, 1 }
 0x2db   : > { %2260 = vst.msk [vmem:[#allocation2 + $0x31] sm:$0xff] %vm501_vm1, %v2230_v51  ;;  %v2327_v3 = vpop.permute.xlu0 %2326  ;;  %4945 = vst [vmem:[#allocation4_spill] sm:$0xff] %v4125_v47  ;;  %v1317_v29 = vld [vmem:[#allocation2 + $0x40] sm:$0xff]  ;;  %1603 = vrot.lane.b32.xlu0 %v4125_v47, %s3258_s30  ;;  %1605 = vrot.lane.b32.xlu1 %v4099_v50, %s3258_s30 }
 0x2dc   : > { %v1318_v55 = vld [vmem:[#allocation2 + $0x48] sm:$0xff]  ;;  %v1437_v49 = vadd.f32 %v3827_v14, %v1317_v29 }
 0x2dd   : > { %v1438_v34 = vadd.f32 %v3829_v17, %v1318_v55  ;;  %v4139_v51 = vpop.permute.xlu1 %1589 }
 0x2de   : > { %1467 = vst.msk [vmem:[#allocation2 + $0x40] sm:$0xff] %vm501_vm1, %v1437_v49  ;;  %v4159_v49 = vsel %vm1521_vm3, %v1546_v11, %v4144_v52 }
 0x2df   : > { %v4137_v57 = vpop.permute.xlu0 %1587  ;;  %1468 = vst.msk [vmem:[#allocation2 + $0x48] sm:$0xff] %vm501_vm1, %v1438_v34  ;;  %1980 = vrot.lane.b32.xlu0 %v4125_v47, %s3259_s11  ;;  %1982 = vrot.lane.b32.xlu1 %v4099_v50, %s3259_s11 }
 0x2e1   : > { %v4153_v55 = vpop.permute.xlu1 %1966 }
 0x2e2   : > { %v2290_v58 = vld [vmem:[#allocation2 + $0x30] sm:$0xff]  ;;  %v2291_v42 = vld [vmem:[#allocation2 + $0x38] sm:$0xff] }
 0x2e3   : > { %v2410_v14 = vadd.f32 %v2327_v3, %v2290_v58  ;;  %v2411_v17 = vadd.f32 %v2329_v43, %v2291_v42  ;;  %v4151_v29 = vpop.permute.xlu0 %1964  ;;  %1601 = vrot.lane.b32.xlu1 %v4144_v52, %s3258_s30  ;;  %1599 = vrot.lane.b32.xlu0 %v4159_v49, %s3258_s30  ;;  %v1500_v3 = vld [vmem:[#allocation2 + $0x58] sm:$0x7f]  ;;  %v1499_v42 = vld [vmem:[#allocation2 + $0x50] sm:$0xff] }
 0x2e5   : > { %2440 = vst.msk [vmem:[#allocation2 + $0x30] sm:$0xff] %vm501_vm1, %v2410_v14  ;;  %2441 = vst.msk [vmem:[#allocation2 + $0x38] sm:$0xff] %vm501_vm1, %v2411_v17  ;;  %v1497_v43 = vld [vmem:[#allocation2 + $0x40] sm:$0xff]  ;;  %v1586_v58 = vpop.permute.xlu1 %1585 }
 0x2e6   : > { %v1498_v34 = vld [vmem:[#allocation2 + $0x48] sm:$0x7f]  ;;  %v1663_v14 = vadd.f32 %v3943_v21, %v1497_v43  ;;  %v1666_v50 = vadd.f32 %v1586_v58, %v1500_v3 }
 0x2e7   : > { %v1584_v47 = vpop.permute.xlu0 %1583  ;;  %v1664_v17 = vadd.f32 %v3945_v20, %v1498_v34  ;;  %1978 = vrot.lane.b32.xlu1 %v4144_v52, %s3259_s11  ;;  %1976 = vrot.lane.b32.xlu0 %v4159_v49, %s3259_s11 }
 0x2e8   : > { %v1665_v5 = vadd.f32 %v1584_v47, %v1499_v42  ;;  %1693 = vst.msk [vmem:[#allocation2 + $0x40] sm:$0xff] %vm501_vm1, %v1663_v14 }
 0x2e9   : > { %1694 = vst.msk [vmem:[#allocation2 + $0x48] sm:$0x7f] %vm1281_vm4, %v1664_v17  ;;  %1696 = vst.msk [vmem:[#allocation2 + $0x58] sm:$0x7f] %vm1281_vm4, %v1666_v50  ;;  %v1963_v11 = vpop.permute.xlu1 %1962 }
 0x2ea   : > { %1695 = vst.msk [vmem:[#allocation2 + $0x50] sm:$0xff] %vm501_vm1, %v1665_v5 }
 0x2eb   : > { %v1961_v21 = vpop.permute.xlu0 %1960  ;;  %1135 = vrot.lane.b32.xlu0 %v3757_v59, %s3254_s25  ;;  %1137 = vrot.lane.b32.xlu1 %v3769_v10, %s3254_s25 }
 0x2ed   : > { %v1122_v47 = vpop.permute.xlu1 %1121 }
 0x2ee   : > { %1202 = vst.msk [vmem:[#allocation2 + $0x78] sm:$0xff] %vm501_vm1, %v1122_v47 }
 0x2ef   : > { %v1120_v20 = vpop.permute.xlu0 %1119  ;;  %1385 = vrot.lane.b32.xlu0 %v3757_v59, %s3253_s24  ;;  %1387 = vrot.lane.b32.xlu1 %v3769_v10, %s3253_s24 }
 0x2f0   : > { %1201 = vst.msk [vmem:[#allocation2 + $0x70] sm:$0xff] %vm501_vm1, %v1120_v20  ;;  %v1725_v3 = vld [vmem:[#allocation2 + $0x41] sm:$0xff]  ;;  %v1726_v43 = vld [vmem:[#allocation2 + $0x49] sm:$0x7f]  ;;  %v1728_v34 = vld [vmem:[#allocation2 + $0x59] sm:$0x7f] }
 0x2f1   : > { %v1853_v50 = vadd.f32 %v4077_v30, %v1725_v3  ;;  %v1854_v5 = vadd.f32 %v4079_v33, %v1726_v43  ;;  %v1856_v58 = vadd.f32 %v4025_v46, %v1728_v34  ;;  %v1727_v42 = vld [vmem:[#allocation2 + $0x51] sm:$0xff]  ;;  %v4191_v20 = vpop.permute.xlu1 %1371 }
 0x2f2   : > { %v1855_v14 = vadd.f32 %v4023_v37, %v1727_v42 }
 0x2f3   : > { %v4189_v17 = vpop.permute.xlu0 %1369  ;;  %1885 = vst.msk [vmem:[#allocation2 + $0x41] sm:$0xff] %vm501_vm1, %v1853_v50  ;;  %1793 = vrot.lane.b32.xlu0 %v3757_v59, %s3255_s26  ;;  %1795 = vrot.lane.b32.xlu1 %v3769_v10, %s3255_s26 }
 0x2f4   : > { %1886 = vst.msk [vmem:[#allocation2 + $0x49] sm:$0x7f] %vm1281_vm4, %v1854_v5  ;;  %1888 = vst.msk [vmem:[#allocation2 + $0x59] sm:$0x7f] %vm1281_vm4, %v1856_v58 }
 0x2f5   : > { %1887 = vst.msk [vmem:[#allocation2 + $0x51] sm:$0xff] %vm501_vm1, %v1855_v14  ;;  %v1233_v37 = vld [vmem:[#allocation2 + $0x79] sm:$0x7f]  ;;  %v4203_v33 = vpop.permute.xlu1 %1779 }
 0x2f6   : > { %v1263_v3 = vadd.f32 %v1233_v37, %v3597_v8 }
 0x2f7   : > { %v1232_v46 = vld [vmem:[#allocation2 + $0x71] sm:$0xff]  ;;  %v4201_v30 = vpop.permute.xlu0 %1777  ;;  %2174 = vrot.lane.b32.xlu0 %v3757_v59, %s3256_s28  ;;  %2176 = vrot.lane.b32.xlu1 %v3769_v10, %s3256_s28 }
 0x2f8   : > { %v1262_v47 = vadd.f32 %v1232_v46, %v3591_v4  ;;  %1294 = vst.msk [vmem:[#allocation2 + $0x79] sm:$0x7f] %vm1281_vm4, %v1263_v3 }
 0x2f9   : > { %v4215_v5 = vpop.permute.xlu1 %2160 }
 0x2fa   : > { %1293 = vst.msk [vmem:[#allocation2 + $0x71] sm:$0xff] %vm501_vm1, %v1262_v47  ;;  %v1917_v34 = vld [vmem:[#allocation2 + $0x40] sm:$0xff] }
 0x2fb   : > { %v1918_v43 = vld [vmem:[#allocation2 + $0x48] sm:$0x7f]  ;;  %v4213_v50 = vpop.permute.xlu0 %2158  ;;  %v2048_v42 = vadd.f32 %v1961_v21, %v1917_v34  ;;  %2354 = vrot.lane.b32.xlu0 %v3757_v59, %s3257_s29  ;;  %2356 = vrot.lane.b32.xlu1 %v3769_v10, %s3257_s29 }
 0x2fc   : > { %v1919_v58 = vld [vmem:[#allocation2 + $0x50] sm:$0xff]  ;;  %v2049_v4 = vadd.f32 %v1963_v11, %v1918_v43  ;;  %v1920_v8 = vld [vmem:[#allocation2 + $0x58] sm:$0x7f] }
 0x2fd   : > { %v2050_v14 = vadd.f32 %v4151_v29, %v1919_v58  ;;  %v2051_v46 = vadd.f32 %v4153_v55, %v1920_v8  ;;  %2080 = vst.msk [vmem:[#allocation2 + $0x40] sm:$0xff] %vm501_vm1, %v2048_v42  ;;  %v4228_v11 = vpop.permute.xlu1 %2340 }
 0x2fe   : > { %2081 = vst.msk [vmem:[#allocation2 + $0x48] sm:$0x7f] %vm1281_vm4, %v2049_v4 }
 0x2ff   : > { %2082 = vst.msk [vmem:[#allocation2 + $0x50] sm:$0xff] %vm501_vm1, %v2050_v14  ;;  %v4226_v37 = vpop.permute.xlu0 %2338  ;;  %1131 = vrot.lane.b32.xlu0 %v3759_v0, %s3254_s25  ;;  %1133 = vrot.lane.b32.xlu1 %v3775_v12, %s3254_s25 }
 0x300   : > { %2083 = vst.msk [vmem:[#allocation2 + $0x58] sm:$0x7f] %vm1281_vm4, %v2051_v46 }
 0x301   : > { %v1118_v55 = vpop.permute.xlu1 %1117  ;;  %v1323_v58 = vld [vmem:[#allocation2 + $0x70] sm:$0xff]  ;;  %v1324_v42 = vld [vmem:[#allocation2 + $0x78] sm:$0xff] }
 0x302   : > { %1200 = vst.msk [vmem:[#allocation2 + $0x68] sm:$0xff] %vm501_vm1, %v1118_v55 }
 0x303   : > { %v1116_v29 = vpop.permute.xlu0 %1115  ;;  %1381 = vrot.lane.b32.xlu0 %v3759_v0, %s3253_s24  ;;  %1383 = vrot.lane.b32.xlu1 %v3775_v12, %s3253_s24 }
 0x304   : > { %1199 = vst.msk [vmem:[#allocation2 + $0x60] sm:$0xff] %vm501_vm1, %v1116_v29 }
 0x305   : > { %v2112_v21 = vld [vmem:[#allocation2 + $0x41] sm:$0xff]  ;;  %v2113_v47 = vld [vmem:[#allocation2 + $0x49] sm:$0x7f]  ;;  %v1368_v4 = vpop.permute.xlu1 %1367 }
 0x306   : > { %v2232_v3 = vadd.f32 %v4044_v61, %v2112_v21  ;;  %v2233_v43 = vadd.f32 %v4046_v63, %v2113_v47  ;;  %v1444_v14 = vadd.f32 %v1368_v4, %v1324_v42 }
 0x307   : > { %v1366_v34 = vpop.permute.xlu0 %1365  ;;  %1789 = vrot.lane.b32.xlu0 %v3759_v0, %s3255_s26  ;;  %1791 = vrot.lane.b32.xlu1 %v3775_v12, %s3255_s26  ;;  %v2114_v47 = vld [vmem:[#allocation2 + $0x51] sm:$0xff] }
 0x308   : > { %2262 = vst.msk [vmem:[#allocation2 + $0x41] sm:$0xff] %vm501_vm1, %v2232_v3  ;;  %v1443_v8 = vadd.f32 %v1366_v34, %v1323_v58  ;;  %1474 = vst.msk [vmem:[#allocation2 + $0x78] sm:$0xff] %vm501_vm1, %v1444_v14  ;;  %v1555_v58 = vrot.slane %v3757_v59, 1 }
 0x309   : > { %2263 = vst.msk [vmem:[#allocation2 + $0x49] sm:$0x7f] %vm1281_vm4, %v2233_v43  ;;  %v1231_v63 = vld [vmem:[#allocation2 + $0x69] sm:$0x7f]  ;;  %v4253_v29 = vpop.permute.xlu1 %1775  ;;  %v2115_v43 = vld [vmem:[#allocation2 + $0x59] sm:$0x7f] }
 0x30a   : > { %1473 = vst.msk [vmem:[#allocation2 + $0x70] sm:$0xff] %vm501_vm1, %v1443_v8  ;;  %v1261_v21 = vadd.f32 %v3573_v62, %v1231_v63 }
 0x30b   : > { %v1230_v61 = vld [vmem:[#allocation2 + $0x61] sm:$0xff]  ;;  %v4251_v46 = vpop.permute.xlu0 %1773  ;;  %2170 = vrot.lane.b32.xlu0 %v3759_v0, %s3256_s28  ;;  %2172 = vrot.lane.b32.xlu1 %v3775_v12, %s3256_s28 }
 0x30c   : > { %v1260_v55 = vadd.f32 %v3565_v60, %v1230_v61  ;;  %1292 = vst.msk [vmem:[#allocation2 + $0x69] sm:$0x7f] %vm1281_vm4, %v1261_v21  ;;  %v4265_v60 = vrot.slane %v3769_v10, 1 }
 0x30d   : > { %v2157_v34 = vpop.permute.xlu1 %2156 }
 0x30e   : > { %1291 = vst.msk [vmem:[#allocation2 + $0x61] sm:$0xff] %vm501_vm1, %v1260_v55  ;;  %v2235_v8 = vadd.f32 %v2157_v34, %v2115_v43 }
 0x30f   : > { %v2155_v3 = vpop.permute.xlu0 %2154  ;;  %v2292_v4 = vld [vmem:[#allocation2 + $0x40] sm:$0xff]  ;;  %2350 = vrot.lane.b32.xlu0 %v3759_v0, %s3257_s29  ;;  %2352 = vrot.lane.b32.xlu1 %v3775_v12, %s3257_s29 }
 0x310   : > { %v2293_v62 = vld [vmem:[#allocation2 + $0x48] sm:$0xff]  ;;  %v2234_v42 = vadd.f32 %v2155_v3, %v2114_v47  ;;  %v2412_v61 = vadd.f32 %v4053_v54, %v2292_v4  ;;  %2265 = vst.msk [vmem:[#allocation2 + $0x59] sm:$0x7f] %vm1281_vm4, %v2235_v8 }
 0x311   : > { %v2413_v14 = vadd.f32 %v4055_v48, %v2293_v62  ;;  %v2337_v55 = vpop.permute.xlu1 %2336  ;;  %v4279_v48 = vsel %vm1521_vm3, %v1555_v58, %v4265_v60  ;;  %v4294_v58 = vrot.slane %v3775_v12, 1  ;;  %v1552_v62 = vrot.slane %v3759_v0, 1 }
 0x312   : > { %2264 = vst.msk [vmem:[#allocation2 + $0x51] sm:$0xff] %vm501_vm1, %v2234_v42  ;;  %2442 = vst.msk [vmem:[#allocation2 + $0x40] sm:$0xff] %vm501_vm1, %v2412_v61 }
 0x313   : > { %2443 = vst.msk [vmem:[#allocation2 + $0x48] sm:$0xff] %vm501_vm1, %v2413_v14  ;;  %v2335_v63 = vpop.permute.xlu0 %2334  ;;  %1611 = vrot.lane.b32.xlu0 %v4279_v48, %s3258_s30  ;;  %1613 = vrot.lane.b32.xlu1 %v4265_v60, %s3258_s30  ;;  %v4309_v61 = vsel %vm1521_vm3, %v1552_v62, %v4294_v58 }
 0x315   : > { %v1321_v54 = vld [vmem:[#allocation2 + $0x60] sm:$0xff]  ;;  %v1322_v21 = vld [vmem:[#allocation2 + $0x68] sm:$0xff]  ;;  %v4289_v34 = vpop.permute.xlu1 %1597 }
 0x316   : > { %v1441_v47 = vadd.f32 %v4013_v32, %v1321_v54  ;;  %v1442_v3 = vadd.f32 %v4015_v35, %v1322_v21 }
 0x317   : > { %v4287_v43 = vpop.permute.xlu0 %1595  ;;  %1988 = vrot.lane.b32.xlu0 %v4279_v48, %s3259_s11  ;;  %1990 = vrot.lane.b32.xlu1 %v4265_v60, %s3259_s11 }
 0x318   : > { %1471 = vst.msk [vmem:[#allocation2 + $0x60] sm:$0xff] %vm501_vm1, %v1441_v47  ;;  %1472 = vst.msk [vmem:[#allocation2 + $0x68] sm:$0xff] %vm501_vm1, %v1442_v3  ;;  %v1503_v47 = vld [vmem:[#allocation2 + $0x70] sm:$0xff] }
 0x319   : > { %v2294_v4 = vld [vmem:[#allocation2 + $0x50] sm:$0xff]  ;;  %v2295_v42 = vld [vmem:[#allocation2 + $0x58] sm:$0xff]  ;;  %v4303_v14 = vpop.permute.xlu1 %1974 }
 0x31a   : > { %v2414_v32 = vadd.f32 %v2335_v63, %v2294_v4  ;;  %v2415_v35 = vadd.f32 %v2337_v55, %v2295_v42  ;;  %v1504_v63 = vld [vmem:[#allocation2 + $0x78] sm:$0x7f] }
 0x31b   : > { %v4301_v8 = vpop.permute.xlu0 %1972  ;;  %1609 = vrot.lane.b32.xlu1 %v4294_v58, %s3258_s30  ;;  %1607 = vrot.lane.b32.xlu0 %v4309_v61, %s3258_s30 }
 0x31c   : > { %2444 = vst.msk [vmem:[#allocation2 + $0x50] sm:$0xff] %vm501_vm1, %v2414_v32  ;;  %2445 = vst.msk [vmem:[#allocation2 + $0x58] sm:$0xff] %vm501_vm1, %v2415_v35 }
 0x31d   : > { %v1594_v21 = vpop.permute.xlu1 %1593 }
 0x31e   : > { %v1670_v32 = vadd.f32 %v1594_v21, %v1504_v63 }
 0x31f   : > { %v1501_v55 = vld [vmem:[#allocation2 + $0x60] sm:$0xff]  ;;  %v1502_v54 = vld [vmem:[#allocation2 + $0x68] sm:$0x7f]  ;;  %v1592_v3 = vpop.permute.xlu0 %1591  ;;  %1986 = vrot.lane.b32.xlu1 %v4294_v58, %s3259_s11  ;;  %1984 = vrot.lane.b32.xlu0 %v4309_v61, %s3259_s11 }
 0x320   : > { %v1667_v4 = vadd.f32 %v4137_v57, %v1501_v55  ;;  %v1668_v42 = vadd.f32 %v4139_v51, %v1502_v54  ;;  %v1669_v35 = vadd.f32 %v1592_v3, %v1503_v47  ;;  %1700 = vst.msk [vmem:[#allocation2 + $0x78] sm:$0x7f] %vm1281_vm4, %v1670_v32 }
 0x321   : > { %v1971_v62 = vpop.permute.xlu1 %1970 }
 0x322   : > { %1697 = vst.msk [vmem:[#allocation2 + $0x60] sm:$0xff] %vm501_vm1, %v1667_v4  ;;  %1699 = vst.msk [vmem:[#allocation2 + $0x70] sm:$0xff] %vm501_vm1, %v1669_v35 }
 0x323   : > { %1698 = vst.msk [vmem:[#allocation2 + $0x68] sm:$0x7f] %vm1281_vm4, %v1668_v42  ;;  %v1969_v57 = vpop.permute.xlu0 %1968  ;;  %1143 = vrot.lane.b32.xlu0 %v3914_v45, %s3254_s25  ;;  %1145 = vrot.lane.b32.xlu1 %v3926_v13, %s3254_s25 }
 0x325   : > { %v1130_v63 = vpop.permute.xlu1 %1129 }
 0x326   : > { %1206 = vst.msk [vmem:[#allocation2 + $0x98] sm:$0xff] %vm501_vm1, %v1130_v63 }
 0x327   : > { %v1128_v51 = vpop.permute.xlu0 %1127  ;;  %v1732_v21 = vld [vmem:[#allocation2 + $0x79] sm:$0x7f]  ;;  %1393 = vrot.lane.b32.xlu0 %v3914_v45, %s3253_s24  ;;  %1395 = vrot.lane.b32.xlu1 %v3926_v13, %s3253_s24 }
 0x328   : > { %1205 = vst.msk [vmem:[#allocation2 + $0x90] sm:$0xff] %vm501_vm1, %v1128_v51  ;;  %v1860_v4 = vadd.f32 %v4203_v33, %v1732_v21 }
 0x329   : > { %v1731_v42 = vld [vmem:[#allocation2 + $0x71] sm:$0xff]  ;;  %v4341_v51 = vpop.permute.xlu1 %1379 }
 0x32a   : > { %v1729_v55 = vld [vmem:[#allocation2 + $0x61] sm:$0xff]  ;;  %v1730_v54 = vld [vmem:[#allocation2 + $0x69] sm:$0x7f]  ;;  %v1859_v32 = vadd.f32 %v4201_v30, %v1731_v42  ;;  %1892 = vst.msk [vmem:[#allocation2 + $0x79] sm:$0x7f] %vm1281_vm4, %v1860_v4 }
 0x32b   : > { %v1857_v47 = vadd.f32 %v4251_v46, %v1729_v55  ;;  %v1858_v3 = vadd.f32 %v4253_v29, %v1730_v54  ;;  %v4339_v35 = vpop.permute.xlu0 %1377  ;;  %1801 = vrot.lane.b32.xlu0 %v3914_v45, %s3255_s26  ;;  %1803 = vrot.lane.b32.xlu1 %v3926_v13, %s3255_s26 }
 0x32c   : > { %1891 = vst.msk [vmem:[#allocation2 + $0x71] sm:$0xff] %vm501_vm1, %v1859_v32 }
 0x32d   : > { %1889 = vst.msk [vmem:[#allocation2 + $0x61] sm:$0xff] %vm501_vm1, %v1857_v47  ;;  %v1237_v30 = vld [vmem:[#allocation2 + $0x99] sm:$0x7f]  ;;  %v4353_v29 = vpop.permute.xlu1 %1787 }
 0x32e   : > { %1890 = vst.msk [vmem:[#allocation2 + $0x69] sm:$0x7f] %vm1281_vm4, %v1858_v3  ;;  %v1267_v55 = vadd.f32 %v1237_v30, %v3669_v27 }
 0x32f   : > { %v1236_v33 = vld [vmem:[#allocation2 + $0x91] sm:$0xff]  ;;  %v4351_v46 = vpop.permute.xlu0 %1785  ;;  %2182 = vrot.lane.b32.xlu0 %v3914_v45, %s3256_s28  ;;  %2184 = vrot.lane.b32.xlu1 %v3926_v13, %s3256_s28 }
 0x330   : > { %v1266_v63 = vadd.f32 %v1236_v33, %v3665_v25  ;;  %1298 = vst.msk [vmem:[#allocation2 + $0x99] sm:$0x7f] %vm1281_vm4, %v1267_v55 }
 0x331   : > { %v4365_v3 = vpop.permute.xlu1 %2168 }
 0x332   : > { %1297 = vst.msk [vmem:[#allocation2 + $0x91] sm:$0xff] %vm501_vm1, %v1266_v63 }
 0x333   : > { %v4363_v47 = vpop.permute.xlu0 %2166  ;;  %v1923_v4 = vld [vmem:[#allocation2 + $0x70] sm:$0xff]  ;;  %v1924_v27 = vld [vmem:[#allocation2 + $0x78] sm:$0x7f]  ;;  %2362 = vrot.lane.b32.xlu0 %v3914_v45, %s3257_s29  ;;  %2364 = vrot.lane.b32.xlu1 %v3926_v13, %s3257_s29 }
 0x334   : > { %v1921_v21 = vld [vmem:[#allocation2 + $0x60] sm:$0xff]  ;;  %v2054_v32 = vadd.f32 %v4301_v8, %v1923_v4  ;;  %v2055_v33 = vadd.f32 %v4303_v14, %v1924_v27 }
 0x335   : > { %v1922_v54 = vld [vmem:[#allocation2 + $0x68] sm:$0x7f]  ;;  %v2052_v42 = vadd.f32 %v1969_v57, %v1921_v21 }
 0x336   : > { %v2053_v25 = vadd.f32 %v1971_v62, %v1922_v54  ;;  %2086 = vst.msk [vmem:[#allocation2 + $0x70] sm:$0xff] %vm501_vm1, %v2054_v32  ;;  %v4378_v62 = vpop.permute.xlu1 %2348 }
 0x337   : > { %2084 = vst.msk [vmem:[#allocation2 + $0x60] sm:$0xff] %vm501_vm1, %v2052_v42  ;;  %v4376_v30 = vpop.permute.xlu0 %2346  ;;  %1139 = vrot.lane.b32.xlu0 %v3918_v16, %s3254_s25  ;;  %1141 = vrot.lane.b32.xlu1 %v3939_v38, %s3254_s25 }
 0x338   : > { %2085 = vst.msk [vmem:[#allocation2 + $0x68] sm:$0x7f] %vm1281_vm4, %v2053_v25  ;;  %2087 = vst.msk [vmem:[#allocation2 + $0x78] sm:$0x7f] %vm1281_vm4, %v2055_v33 }
 0x339   : > { %v1327_v4 = vld [vmem:[#allocation2 + $0x90] sm:$0xff]  ;;  %v1328_v42 = vld [vmem:[#allocation2 + $0x98] sm:$0xff] }
 0x33a   : > { %v1126_v14 = vpop.permute.xlu1 %1125 }
 0x33b   : > { %v1124_v8 = vpop.permute.xlu0 %1123  ;;  %1204 = vst.msk [vmem:[#allocation2 + $0x88] sm:$0xff] %vm501_vm1, %v1126_v14  ;;  %1389 = vrot.lane.b32.xlu0 %v3918_v16, %s3253_s24  ;;  %1391 = vrot.lane.b32.xlu1 %v3939_v38, %s3253_s24 }
 0x33c   : > { %1203 = vst.msk [vmem:[#allocation2 + $0x80] sm:$0xff] %vm501_vm1, %v1124_v8 }
 0x33e   : > { %v1376_v25 = vpop.permute.xlu1 %1375 }
 0x33f   : > { %v2116_v57 = vld [vmem:[#allocation2 + $0x61] sm:$0xff]  ;;  %v2117_v63 = vld [vmem:[#allocation2 + $0x69] sm:$0x7f]  ;;  %v1374_v21 = vpop.permute.xlu0 %1373  ;;  %v1448_v32 = vadd.f32 %v1376_v25, %v1328_v42  ;;  %1797 = vrot.lane.b32.xlu0 %v3918_v16, %s3255_s26  ;;  %1799 = vrot.lane.b32.xlu1 %v3939_v38, %s3255_s26 }
 0x340   : > { %v2236_v55 = vadd.f32 %v4213_v50, %v2116_v57  ;;  %v2237_v54 = vadd.f32 %v4215_v5, %v2117_v63  ;;  %v1447_v27 = vadd.f32 %v1374_v21, %v1327_v4  ;;  %v2118_v63 = vld [vmem:[#allocation2 + $0x71] sm:$0xff]  ;;  %v1561_v4 = vrot.slane %v3914_v45, 1 }
 0x341   : > { %1478 = vst.msk [vmem:[#allocation2 + $0x98] sm:$0xff] %vm501_vm1, %v1448_v32 }
 0x342   : > { %2266 = vst.msk [vmem:[#allocation2 + $0x61] sm:$0xff] %vm501_vm1, %v2236_v55  ;;  %1477 = vst.msk [vmem:[#allocation2 + $0x90] sm:$0xff] %vm501_vm1, %v1447_v27  ;;  %v1235_v5 = vld [vmem:[#allocation2 + $0x89] sm:$0x7f]  ;;  %v4403_v8 = vpop.permute.xlu1 %1783 }
 0x343   : > { %2267 = vst.msk [vmem:[#allocation2 + $0x69] sm:$0x7f] %vm1281_vm4, %v2237_v54  ;;  %v1234_v50 = vld [vmem:[#allocation2 + $0x81] sm:$0xff]  ;;  %v4401_v33 = vpop.permute.xlu0 %1781  ;;  %v1265_v57 = vadd.f32 %v3595_v6, %v1235_v5  ;;  %2178 = vrot.lane.b32.xlu0 %v3918_v16, %s3256_s28  ;;  %2180 = vrot.lane.b32.xlu1 %v3939_v38, %s3256_s28  ;;  %v2119_v54 = vld [vmem:[#allocation2 + $0x79] sm:$0x7f] }
 0x344   : > { %v1264_v14 = vadd.f32 %v3589_v1, %v1234_v50  ;;  %v4415_v1 = vrot.slane %v3926_v13, 1 }
 0x345   : > { %1296 = vst.msk [vmem:[#allocation2 + $0x89] sm:$0x7f] %vm1281_vm4, %v1265_v57 }
 0x346   : > { %1295 = vst.msk [vmem:[#allocation2 + $0x81] sm:$0xff] %vm501_vm1, %v1264_v14  ;;  %v2165_v21 = vpop.permute.xlu1 %2164 }
 0x347   : > { %v2163_v55 = vpop.permute.xlu0 %2162  ;;  %v2239_v27 = vadd.f32 %v2165_v21, %v2119_v54  ;;  %2358 = vrot.lane.b32.xlu0 %v3918_v16, %s3257_s29  ;;  %2360 = vrot.lane.b32.xlu1 %v3939_v38, %s3257_s29 }
 0x348   : > { %v2238_v42 = vadd.f32 %v2163_v55, %v2118_v63 }
 0x349   : > { %v2296_v25 = vld [vmem:[#allocation2 + $0x60] sm:$0xff]  ;;  %2269 = vst.msk [vmem:[#allocation2 + $0x79] sm:$0x7f] %vm1281_vm4, %v2239_v27 }
 0x34a   : > { %v2297_v6 = vld [vmem:[#allocation2 + $0x68] sm:$0xff]  ;;  %v2416_v50 = vadd.f32 %v4226_v37, %v2296_v25  ;;  %2268 = vst.msk [vmem:[#allocation2 + $0x71] sm:$0xff] %vm501_vm1, %v2238_v42  ;;  %v2345_v14 = vpop.permute.xlu1 %2344 }
 0x34b   : > { %v2417_v32 = vadd.f32 %v4228_v11, %v2297_v6  ;;  %v2343_v5 = vpop.permute.xlu0 %2342  ;;  %v4429_v11 = vsel %vm1521_vm3, %v1561_v4, %v4415_v1  ;;  %1621 = vrot.lane.b32.xlu1 %v4415_v1, %s3258_s30  ;;  %v4444_v4 = vrot.slane %v3939_v38, 1  ;;  %v1558_v6 = vrot.slane %v3918_v16, 1 }
 0x34c   : > { %2446 = vst.msk [vmem:[#allocation2 + $0x60] sm:$0xff] %vm501_vm1, %v2416_v50  ;;  %1619 = vrot.lane.b32.xlu0 %v4429_v11, %s3258_s30 }
 0x34d   : > { %2447 = vst.msk [vmem:[#allocation2 + $0x68] sm:$0xff] %vm501_vm1, %v2417_v32  ;;  %v1325_v37 = vld [vmem:[#allocation2 + $0x80] sm:$0xff]  ;;  %v1326_v57 = vld [vmem:[#allocation2 + $0x88] sm:$0xff]  ;;  %v4459_v50 = vsel %vm1521_vm3, %v1558_v6, %v4444_v4 }
 0x34e   : > { %v1445_v63 = vadd.f32 %v4189_v17, %v1325_v37  ;;  %v1446_v55 = vadd.f32 %v4191_v20, %v1326_v57  ;;  %v4439_v21 = vpop.permute.xlu1 %1605 }
 0x34f   : > { %v4437_v54 = vpop.permute.xlu0 %1603  ;;  %1998 = vrot.lane.b32.xlu1 %v4415_v1, %s3259_s11 }
 0x350   : > { %1475 = vst.msk [vmem:[#allocation2 + $0x80] sm:$0xff] %vm501_vm1, %v1445_v63  ;;  %1476 = vst.msk [vmem:[#allocation2 + $0x88] sm:$0xff] %vm501_vm1, %v1446_v55  ;;  %1996 = vrot.lane.b32.xlu0 %v4429_v11, %s3259_s11  ;;  %v1507_v63 = vld [vmem:[#allocation2 + $0x90] sm:$0xff] }
 0x351   : > { %v2298_v25 = vld [vmem:[#allocation2 + $0x70] sm:$0xff]  ;;  %v2299_v42 = vld [vmem:[#allocation2 + $0x78] sm:$0xff] }
 0x352   : > { %v2418_v17 = vadd.f32 %v2343_v5, %v2298_v25  ;;  %v2419_v20 = vadd.f32 %v2345_v14, %v2299_v42  ;;  %v4453_v32 = vpop.permute.xlu1 %1982  ;;  %v1508_v5 = vld [vmem:[#allocation2 + $0x98] sm:$0x7f] }
 0x353   : > { %v4451_v27 = vpop.permute.xlu0 %1980  ;;  %1617 = vrot.lane.b32.xlu1 %v4444_v4, %s3258_s30 }
 0x354   : > { %2448 = vst.msk [vmem:[#allocation2 + $0x70] sm:$0xff] %vm501_vm1, %v2418_v17  ;;  %2449 = vst.msk [vmem:[#allocation2 + $0x78] sm:$0xff] %vm501_vm1, %v2419_v20  ;;  %1615 = vrot.lane.b32.xlu0 %v4459_v50, %s3258_s30 }
 0x356   : > { %v1602_v57 = vpop.permute.xlu1 %1601 }
 0x357   : > { %v1505_v14 = vld [vmem:[#allocation2 + $0x80] sm:$0xff]  ;;  %v1506_v37 = vld [vmem:[#allocation2 + $0x88] sm:$0x7f]  ;;  %v1600_v55 = vpop.permute.xlu0 %1599  ;;  %v1674_v17 = vadd.f32 %v1602_v57, %v1508_v5  ;;  %1994 = vrot.lane.b32.xlu1 %v4444_v4, %s3259_s11 }
 0x358   : > { %v1671_v25 = vadd.f32 %v4287_v43, %v1505_v14  ;;  %v1672_v42 = vadd.f32 %v4289_v34, %v1506_v37  ;;  %v1673_v20 = vadd.f32 %v1600_v55, %v1507_v63  ;;  %1992 = vrot.lane.b32.xlu0 %v4459_v50, %s3259_s11 }
 0x359   : > { %1704 = vst.msk [vmem:[#allocation2 + $0x98] sm:$0x7f] %vm1281_vm4, %v1674_v17 }
 0x35a   : > { %1701 = vst.msk [vmem:[#allocation2 + $0x80] sm:$0xff] %vm501_vm1, %v1671_v25  ;;  %1703 = vst.msk [vmem:[#allocation2 + $0x90] sm:$0xff] %vm501_vm1, %v1673_v20  ;;  %v1979_v6 = vpop.permute.xlu1 %1978 }
 0x35b   : > { %1702 = vst.msk [vmem:[#allocation2 + $0x88] sm:$0x7f] %vm1281_vm4, %v1672_v42  ;;  %v1977_v43 = vpop.permute.xlu0 %1976  ;;  %1153 = vrot.lane.b32.xlu1 %v4101_v56, %s3254_s25 }
 0x35c   : > { %1151 = vrot.lane.b32.xlu0 %v4088_v39, %s3254_s25 }
 0x35e   : > { %v1138_v5 = vpop.permute.xlu1 %1137 }
 0x35f   : > { %v1136_v34 = vpop.permute.xlu0 %1135  ;;  %1210 = vst.msk [vmem:[#allocation2 + $0xb8] sm:$0xff] %vm501_vm1, %v1138_v5  ;;  %1811 = vrot.lane.b32.xlu1 %v4101_v56, %s3255_s26 }
 0x360   : > { %1209 = vst.msk [vmem:[#allocation2 + $0xb0] sm:$0xff] %vm501_vm1, %v1136_v34  ;;  %v1736_v57 = vld [vmem:[#allocation2 + $0x99] sm:$0x7f]  ;;  %1809 = vrot.lane.b32.xlu0 %v4088_v39, %s3255_s26 }
 0x361   : > { %v1864_v25 = vadd.f32 %v4353_v29, %v1736_v57  ;;  %v1735_v42 = vld [vmem:[#allocation2 + $0x91] sm:$0xff] }
 0x362   : > { %v1733_v14 = vld [vmem:[#allocation2 + $0x81] sm:$0xff]  ;;  %v1734_v37 = vld [vmem:[#allocation2 + $0x89] sm:$0x7f]  ;;  %v1863_v17 = vadd.f32 %v4351_v46, %v1735_v42  ;;  %v4491_v34 = vpop.permute.xlu1 %1387 }
 0x363   : > { %v1861_v63 = vadd.f32 %v4401_v33, %v1733_v14  ;;  %v1862_v55 = vadd.f32 %v4403_v8, %v1734_v37  ;;  %v4489_v20 = vpop.permute.xlu0 %1385  ;;  %1896 = vst.msk [vmem:[#allocation2 + $0x99] sm:$0x7f] %vm1281_vm4, %v1864_v25  ;;  %2192 = vrot.lane.b32.xlu1 %v4101_v56, %s3256_s28 }
 0x364   : > { %1895 = vst.msk [vmem:[#allocation2 + $0x91] sm:$0xff] %vm501_vm1, %v1863_v17  ;;  %2190 = vrot.lane.b32.xlu0 %v4088_v39, %s3256_s28 }
 0x365   : > { %1893 = vst.msk [vmem:[#allocation2 + $0x81] sm:$0xff] %vm501_vm1, %v1861_v63 }
 0x366   : > { %1894 = vst.msk [vmem:[#allocation2 + $0x89] sm:$0x7f] %vm1281_vm4, %v1862_v55  ;;  %v1241_v46 = vld [vmem:[#allocation2 + $0xb9] sm:$0x7f]  ;;  %v4503_v8 = vpop.permute.xlu1 %1795 }
 0x367   : > { %v1240_v29 = vld [vmem:[#allocation2 + $0xb1] sm:$0xff]  ;;  %v4501_v33 = vpop.permute.xlu0 %1793  ;;  %v1271_v14 = vadd.f32 %v1241_v46, %v3775_v12  ;;  %2372 = vrot.lane.b32.xlu1 %v4101_v56, %s3257_s29 }
 0x368   : > { %v1270_v5 = vadd.f32 %v1240_v29, %v3759_v0  ;;  %2370 = vrot.lane.b32.xlu0 %v4088_v39, %s3257_s29 }
 0x369   : > { %1302 = vst.msk [vmem:[#allocation2 + $0xb9] sm:$0x7f] %vm1281_vm4, %v1271_v14 }
 0x36a   : > { %1301 = vst.msk [vmem:[#allocation2 + $0xb1] sm:$0xff] %vm501_vm1, %v1270_v5  ;;  %v4515_v55 = vpop.permute.xlu1 %2176 }
 0x36b   : > { %v4513_v63 = vpop.permute.xlu0 %2174  ;;  %v1927_v25 = vld [vmem:[#allocation2 + $0x90] sm:$0xff]  ;;  %v1928_v12 = vld [vmem:[#allocation2 + $0x98] sm:$0x7f]  ;;  %1149 = vrot.lane.b32.xlu1 %v4107_v41, %s3254_s25 }
 0x36c   : > { %v1925_v57 = vld [vmem:[#allocation2 + $0x80] sm:$0xff]  ;;  %v2058_v17 = vadd.f32 %v4451_v27, %v1927_v25  ;;  %1147 = vrot.lane.b32.xlu0 %v4093_v53, %s3254_s25  ;;  %v2059_v39 = vadd.f32 %v4453_v32, %v1928_v12 }
 0x36d   : > { %v1926_v37 = vld [vmem:[#allocation2 + $0x88] sm:$0x7f]  ;;  %v2056_v42 = vadd.f32 %v1977_v43, %v1925_v57 }
 0x36e   : > { %v2057_v0 = vadd.f32 %v1979_v6, %v1926_v37  ;;  %2090 = vst.msk [vmem:[#allocation2 + $0x90] sm:$0xff] %vm501_vm1, %v2058_v17  ;;  %v4528_v6 = vpop.permute.xlu1 %2356 }
 0x36f   : > { %2088 = vst.msk [vmem:[#allocation2 + $0x80] sm:$0xff] %vm501_vm1, %v2056_v42  ;;  %v4526_v56 = vpop.permute.xlu0 %2354  ;;  %2504 = vrot.lane.b32.xlu1 %v3657_v23, %s3260_s12 }
 0x370   : > { %2089 = vst.msk [vmem:[#allocation2 + $0x88] sm:$0x7f] %vm1281_vm4, %v2057_v0  ;;  %2091 = vst.msk [vmem:[#allocation2 + $0x98] sm:$0x7f] %vm1281_vm4, %v2059_v39  ;;  %2502 = vrot.lane.b32.xlu0 %v3673_v28, %s3260_s12 }
 0x371   : > { %v1331_v23 = vld [vmem:[#allocation2 + $0xb0] sm:$0xff]  ;;  %v1332_v37 = vld [vmem:[#allocation2 + $0xb8] sm:$0xff] }
 0x372   : > { %v1134_v32 = vpop.permute.xlu1 %1133 }
 0x373   : > { %v1132_v27 = vpop.permute.xlu0 %1131  ;;  %1208 = vst.msk [vmem:[#allocation2 + $0xa8] sm:$0xff] %vm501_vm1, %v1134_v32  ;;  %2508 = vrot.lane.b32.xlu1 %v3796_v2, %s3260_s12 }
 0x374   : > { %1207 = vst.msk [vmem:[#allocation2 + $0xa0] sm:$0xff] %vm501_vm1, %v1132_v27  ;;  %1397 = vrot.lane.b32.xlu0 %v4093_v53, %s3253_s24 }
 0x376   : > { %v1384_v14 = vpop.permute.xlu1 %1383 }
 0x377   : > { %v2120_v43 = vld [vmem:[#allocation2 + $0x81] sm:$0xff]  ;;  %v2121_v29 = vld [vmem:[#allocation2 + $0x89] sm:$0x7f]  ;;  %v1382_v5 = vpop.permute.xlu0 %1381  ;;  %v1452_v25 = vadd.f32 %v1384_v14, %v1332_v37  ;;  %2512 = vrot.lane.b32.xlu1 %v3767_v9, %s3260_s12  ;;  %v2122_v9 = vld [vmem:[#allocation2 + $0x91] sm:$0xff] }
 0x378   : > { %v2240_v46 = vadd.f32 %v4363_v47, %v2120_v43  ;;  %v2241_v28 = vadd.f32 %v4365_v3, %v2121_v29  ;;  %v1451_v57 = vadd.f32 %v1382_v5, %v1331_v23  ;;  %1805 = vrot.lane.b32.xlu0 %v4093_v53, %s3255_s26  ;;  %v2123_v39 = vld [vmem:[#allocation2 + $0x99] sm:$0x7f] }
 0x379   : > { %1482 = vst.msk [vmem:[#allocation2 + $0xb8] sm:$0xff] %vm501_vm1, %v1452_v25 }
 0x37a   : > { %2270 = vst.msk [vmem:[#allocation2 + $0x81] sm:$0xff] %vm501_vm1, %v2240_v46  ;;  %1481 = vst.msk [vmem:[#allocation2 + $0xb0] sm:$0xff] %vm501_vm1, %v1451_v57  ;;  %v1239_v47 = vld [vmem:[#allocation2 + $0xa9] sm:$0x7f]  ;;  %v4553_v0 = vpop.permute.xlu1 %1791 }
 0x37b   : > { %2271 = vst.msk [vmem:[#allocation2 + $0x89] sm:$0x7f] %vm1281_vm4, %v2241_v28  ;;  %v1238_v2 = vld [vmem:[#allocation2 + $0xa1] sm:$0xff]  ;;  %v4551_v3 = vpop.permute.xlu0 %1789  ;;  %v1269_v12 = vadd.f32 %v3667_v26, %v1239_v47  ;;  %2516 = vrot.lane.b32.xlu1 %v3966_v15, %s3260_s12 }
 0x37c   : > { %v1268_v42 = vadd.f32 %v3659_v24, %v1238_v2  ;;  %2186 = vrot.lane.b32.xlu0 %v4093_v53, %s3256_s28 }
 0x37d   : > { %1300 = vst.msk [vmem:[#allocation2 + $0xa9] sm:$0x7f] %vm1281_vm4, %v1269_v12 }
 0x37e   : > { %1299 = vst.msk [vmem:[#allocation2 + $0xa1] sm:$0xff] %vm501_vm1, %v1268_v42  ;;  %v2173_v27 = vpop.permute.xlu1 %2172 }
 0x37f   : > { %v2171_v17 = vpop.permute.xlu0 %2170  ;;  %v2243_v24 = vadd.f32 %v2173_v27, %v2123_v39  ;;  %2520 = vrot.lane.b32.xlu1 %v3924_v7, %s3260_s12 }
 0x380   : > { %v2242_v29 = vadd.f32 %v2171_v17, %v2122_v9  ;;  %2366 = vrot.lane.b32.xlu0 %v4093_v53, %s3257_s29 }
 0x381   : > { %v2300_v43 = vld [vmem:[#allocation2 + $0x80] sm:$0xff]  ;;  %2273 = vst.msk [vmem:[#allocation2 + $0x99] sm:$0x7f] %vm1281_vm4, %v2243_v24  ;;  %v1511_v12 = vld [vmem:[#allocation2 + $0xb0] sm:$0xff] }
 0x382   : > { %v2301_v32 = vld [vmem:[#allocation2 + $0x88] sm:$0xff]  ;;  %v2420_v46 = vadd.f32 %v4376_v30, %v2300_v43  ;;  %2272 = vst.msk [vmem:[#allocation2 + $0x91] sm:$0xff] %vm501_vm1, %v2242_v29  ;;  %v2353_v28 = vpop.permute.xlu1 %2352 }
 0x383   : > { %v2421_v26 = vadd.f32 %v4378_v62, %v2301_v32  ;;  %v2351_v15 = vpop.permute.xlu0 %2350  ;;  %1399 = vrot.lane.b32.xlu1 %v4107_v41, %s3253_s24 }
 0x384   : > { %2450 = vst.msk [vmem:[#allocation2 + $0x80] sm:$0xff] %vm501_vm1, %v2420_v46  ;;  %2506 = vrot.lane.b32.xlu0 %v3805_v40, %s3260_s12 }
 0x385   : > { %2451 = vst.msk [vmem:[#allocation2 + $0x88] sm:$0xff] %vm501_vm1, %v2421_v26  ;;  %v1329_v5 = vld [vmem:[#allocation2 + $0xa0] sm:$0xff]  ;;  %v1330_v62 = vld [vmem:[#allocation2 + $0xa8] sm:$0xff]  ;;  %v4947_v26 = vld [vmem:[#allocation5_spill] sm:$0xff] }
 0x386   : > { %v1449_v7 = vadd.f32 %v4339_v35, %v1329_v5  ;;  %v1450_v30 = vadd.f32 %v4341_v51, %v1330_v62  ;;  %v4581_v14 = vpop.permute.xlu1 %1613 }
 0x387   : > { %v4579_v23 = vpop.permute.xlu0 %1611  ;;  %1807 = vrot.lane.b32.xlu1 %v4107_v41, %s3255_s26 }
 0x388   : > { %1479 = vst.msk [vmem:[#allocation2 + $0xa0] sm:$0xff] %vm501_vm1, %v1449_v7  ;;  %1480 = vst.msk [vmem:[#allocation2 + $0xa8] sm:$0xff] %vm501_vm1, %v1450_v30  ;;  %2510 = vrot.lane.b32.xlu0 %v3783_v19, %s3260_s12  ;;  %v1512_v19 = vld [vmem:[#allocation2 + $0xb8] sm:$0x7f] }
 0x389   : > { %v2302_v37 = vld [vmem:[#allocation2 + $0x90] sm:$0xff]  ;;  %v2303_v57 = vld [vmem:[#allocation2 + $0x98] sm:$0xff] }
 0x38a   : > { %v2422_v40 = vadd.f32 %v2351_v15, %v2302_v37  ;;  %v2423_v35 = vadd.f32 %v2353_v28, %v2303_v57  ;;  %v4591_v51 = vpop.permute.xlu1 %1990 }
 0x38b   : > { %v4589_v25 = vpop.permute.xlu0 %1988  ;;  %2188 = vrot.lane.b32.xlu1 %v4107_v41, %s3256_s28 }
 0x38c   : > { %2452 = vst.msk [vmem:[#allocation2 + $0x90] sm:$0xff] %vm501_vm1, %v2422_v40  ;;  %2453 = vst.msk [vmem:[#allocation2 + $0x98] sm:$0xff] %vm501_vm1, %v2423_v35  ;;  %2514 = vrot.lane.b32.xlu0 %v3977_v22, %s3260_s12 }
 0x38e   : > { %v1610_v42 = vpop.permute.xlu1 %1609 }
 0x38f   : > { %v1509_v2 = vld [vmem:[#allocation2 + $0xa0] sm:$0xff]  ;;  %v1510_v47 = vld [vmem:[#allocation2 + $0xa8] sm:$0x7f]  ;;  %v1608_v9 = vpop.permute.xlu0 %1607  ;;  %v1678_v27 = vadd.f32 %v1610_v42, %v1512_v19  ;;  %2368 = vrot.lane.b32.xlu1 %v4107_v41, %s3257_s29 }
 0x390   : > { %v1675_v17 = vadd.f32 %v4437_v54, %v1509_v2  ;;  %v1676_v39 = vadd.f32 %v4439_v21, %v1510_v47  ;;  %v1677_v32 = vadd.f32 %v1608_v9, %v1511_v12  ;;  %2518 = vrot.lane.b32.xlu0 %v3955_v44, %s3260_s12 }
 0x391   : > { %1708 = vst.msk [vmem:[#allocation2 + $0xb8] sm:$0x7f] %vm1281_vm4, %v1678_v27 }
 0x392   : > { %1705 = vst.msk [vmem:[#allocation2 + $0xa0] sm:$0xff] %vm501_vm1, %v1675_v17  ;;  %1707 = vst.msk [vmem:[#allocation2 + $0xb0] sm:$0xff] %vm501_vm1, %v1677_v32  ;;  %v1987_v22 = vpop.permute.xlu1 %1986 }
 0x393   : > { %1706 = vst.msk [vmem:[#allocation2 + $0xa8] sm:$0x7f] %vm1281_vm4, %v1676_v39  ;;  %v1985_v54 = vpop.permute.xlu0 %1984  ;;  %2006 = vrot.lane.b32.xlu1 %v4111_v18, %s3259_s11 }
 0x394   : > { %2004 = vrot.lane.b32.xlu0 %v4121_v36, %s3259_s11 }
 0x396   : > { %v1146_v21 = vpop.permute.xlu1 %1145 }
 0x397   : > { %v1144_v44 = vpop.permute.xlu0 %1143  ;;  %1214 = vst.msk [vmem:[#allocation2 + $0xd8] sm:$0xff] %vm501_vm1, %v1146_v21  ;;  %1625 = vrot.lane.b32.xlu1 %v4116_v31, %s3258_s30 }
 0x398   : > { %1213 = vst.msk [vmem:[#allocation2 + $0xd0] sm:$0xff] %vm501_vm1, %v1144_v44  ;;  %v1740_v24 = vld [vmem:[#allocation2 + $0xb9] sm:$0x7f]  ;;  %1623 = vrot.lane.b32.xlu0 %v4947_v26, %s3258_s30 }
 0x399   : > { %v1868_v28 = vadd.f32 %v4503_v8, %v1740_v24  ;;  %v1739_v5 = vld [vmem:[#allocation2 + $0xb1] sm:$0xff] }
 0x39a   : > { %v1737_v43 = vld [vmem:[#allocation2 + $0xa1] sm:$0xff]  ;;  %v1738_v29 = vld [vmem:[#allocation2 + $0xa9] sm:$0x7f]  ;;  %v1867_v62 = vadd.f32 %v4501_v33, %v1739_v5  ;;  %v4625_v30 = vpop.permute.xlu1 %1395 }
 0x39b   : > { %v1865_v46 = vadd.f32 %v4551_v3, %v1737_v43  ;;  %v1866_v15 = vadd.f32 %v4553_v0, %v1738_v29  ;;  %v4623_v7 = vpop.permute.xlu0 %1393  ;;  %1900 = vst.msk [vmem:[#allocation2 + $0xb9] sm:$0x7f] %vm1281_vm4, %v1868_v28  ;;  %2002 = vrot.lane.b32.xlu1 %v4116_v31, %s3259_s11 }
 0x39c   : > { %1899 = vst.msk [vmem:[#allocation2 + $0xb1] sm:$0xff] %vm501_vm1, %v1867_v62  ;;  %2000 = vrot.lane.b32.xlu0 %v4947_v26, %s3259_s11 }
 0x39d   : > { %1897 = vst.msk [vmem:[#allocation2 + $0xa1] sm:$0xff] %vm501_vm1, %v1865_v46 }
 0x39e   : > { %1898 = vst.msk [vmem:[#allocation2 + $0xa9] sm:$0x7f] %vm1281_vm4, %v1866_v15  ;;  %v1245_v33 = vld [vmem:[#allocation2 + $0xd9] sm:$0x7f]  ;;  %v4637_v0 = vpop.permute.xlu1 %1803 }
 0x39f   : > { %v1244_v8 = vld [vmem:[#allocation2 + $0xd1] sm:$0xff]  ;;  %v4635_v3 = vpop.permute.xlu0 %1801  ;;  %v1275_v57 = vadd.f32 %v1245_v33, %v3939_v38  ;;  %2524 = vrot.lane.b32.xlu1 %v4144_v52, %s3260_s12  ;;  %v4948_v52 = vld [vmem:[#allocation3_spill] sm:$0xff] }
 0x3a0   : > { %v1274_v37 = vadd.f32 %v1244_v8, %v3918_v16  ;;  %2522 = vrot.lane.b32.xlu0 %v4159_v49, %s3260_s12  ;;  %v4949_v49 = vld [vmem:[#allocation4_spill] sm:$0xff] }
 0x3a1   : > { %1306 = vst.msk [vmem:[#allocation2 + $0xd9] sm:$0x7f] %vm1281_vm4, %v1275_v57 }
 0x3a2   : > { %1305 = vst.msk [vmem:[#allocation2 + $0xd1] sm:$0xff] %vm501_vm1, %v1274_v37  ;;  %v4649_v2 = vpop.permute.xlu1 %2184 }
 0x3a3   : > { %v4647_v19 = vpop.permute.xlu0 %2182  ;;  %v1931_v47 = vld [vmem:[#allocation2 + $0xb0] sm:$0xff]  ;;  %v1932_v38 = vld [vmem:[#allocation2 + $0xb8] sm:$0x7f]  ;;  %2528 = vrot.lane.b32.xlu1 %v4948_v52, %s3260_s12 }
 0x3a4   : > { %v1929_v35 = vld [vmem:[#allocation2 + $0xa0] sm:$0xff]  ;;  %v2062_v12 = vadd.f32 %v4589_v25, %v1931_v47  ;;  %2526 = vrot.lane.b32.xlu0 %v4949_v49, %s3260_s12  ;;  %v2063_v9 = vadd.f32 %v4591_v51, %v1932_v38 }
 0x3a5   : > { %v1930_v40 = vld [vmem:[#allocation2 + $0xa8] sm:$0x7f]  ;;  %v2060_v42 = vadd.f32 %v1985_v54, %v1929_v35 }
 0x3a6   : > { %v2061_v16 = vadd.f32 %v1987_v22, %v1930_v40  ;;  %2094 = vst.msk [vmem:[#allocation2 + $0xb0] sm:$0xff] %vm501_vm1, %v2062_v12  ;;  %v4662_v39 = vpop.permute.xlu1 %2364 }
 0x3a7   : > { %2092 = vst.msk [vmem:[#allocation2 + $0xa0] sm:$0xff] %vm501_vm1, %v2060_v42  ;;  %v4660_v17 = vpop.permute.xlu0 %2362  ;;  %2532 = vrot.lane.b32.xlu1 %v4294_v58, %s3260_s12 }
 0x3a8   : > { %2093 = vst.msk [vmem:[#allocation2 + $0xa8] sm:$0x7f] %vm1281_vm4, %v2061_v16  ;;  %2095 = vst.msk [vmem:[#allocation2 + $0xb8] sm:$0x7f] %vm1281_vm4, %v2063_v9  ;;  %2530 = vrot.lane.b32.xlu0 %v4309_v61, %s3260_s12 }
 0x3a9   : > { %v1335_v61 = vld [vmem:[#allocation2 + $0xd0] sm:$0xff]  ;;  %v1336_v21 = vld [vmem:[#allocation2 + $0xd8] sm:$0xff] }
 0x3aa   : > { %v1142_v51 = vpop.permute.xlu1 %1141 }
 0x3ab   : > { %v1140_v25 = vpop.permute.xlu0 %1139  ;;  %1212 = vst.msk [vmem:[#allocation2 + $0xc8] sm:$0xff] %vm501_vm1, %v1142_v51  ;;  %2536 = vrot.lane.b32.xlu1 %v4265_v60, %s3260_s12 }
 0x3ac   : > { %1211 = vst.msk [vmem:[#allocation2 + $0xc0] sm:$0xff] %vm501_vm1, %v1140_v25  ;;  %2534 = vrot.lane.b32.xlu0 %v4279_v48, %s3260_s12 }
 0x3ae   : > { %v1392_v44 = vpop.permute.xlu1 %1391 }
 0x3af   : > { %v2124_v27 = vld [vmem:[#allocation2 + $0xa1] sm:$0xff]  ;;  %v2125_v32 = vld [vmem:[#allocation2 + $0xa9] sm:$0x7f]  ;;  %v1390_v54 = vpop.permute.xlu0 %1389  ;;  %v1456_v29 = vadd.f32 %v1392_v44, %v1336_v21  ;;  %2540 = vrot.lane.b32.xlu1 %v4444_v4, %s3260_s12  ;;  %v2126_v4 = vld [vmem:[#allocation2 + $0xb1] sm:$0xff] }
 0x3b0   : > { %v2244_v22 = vadd.f32 %v4513_v63, %v2124_v27  ;;  %v2245_v58 = vadd.f32 %v4515_v55, %v2125_v32  ;;  %v1455_v43 = vadd.f32 %v1390_v54, %v1335_v61  ;;  %2538 = vrot.lane.b32.xlu0 %v4459_v50, %s3260_s12  ;;  %v2127_v15 = vld [vmem:[#allocation2 + $0xb9] sm:$0x7f] }
 0x3b1   : > { %1486 = vst.msk [vmem:[#allocation2 + $0xd8] sm:$0xff] %vm501_vm1, %v1456_v29 }
 0x3b2   : > { %2274 = vst.msk [vmem:[#allocation2 + $0xa1] sm:$0xff] %vm501_vm1, %v2244_v22  ;;  %1485 = vst.msk [vmem:[#allocation2 + $0xd0] sm:$0xff] %vm501_vm1, %v1455_v43  ;;  %v1243_v48 = vld [vmem:[#allocation2 + $0xc9] sm:$0x7f]  ;;  %v4687_v55 = vpop.permute.xlu1 %1799 }
 0x3b3   : > { %2275 = vst.msk [vmem:[#allocation2 + $0xa9] sm:$0x7f] %vm1281_vm4, %v2245_v58  ;;  %v1242_v60 = vld [vmem:[#allocation2 + $0xc1] sm:$0xff]  ;;  %v4685_v63 = vpop.permute.xlu0 %1797  ;;  %v1273_v46 = vadd.f32 %v3769_v10, %v1243_v48  ;;  %2544 = vrot.lane.b32.xlu1 %v4415_v1, %s3260_s12 }
 0x3b4   : > { %v1272_v24 = vadd.f32 %v3757_v59, %v1242_v60  ;;  %2542 = vrot.lane.b32.xlu0 %v4429_v11, %s3260_s12 }
 0x3b5   : > { %1304 = vst.msk [vmem:[#allocation2 + $0xc9] sm:$0x7f] %vm1281_vm4, %v1273_v46 }
 0x3b6   : > { %1303 = vst.msk [vmem:[#allocation2 + $0xc1] sm:$0xff] %vm501_vm1, %v1272_v24  ;;  %v2181_v28 = vpop.permute.xlu1 %2180 }
 0x3b7   : > { %v2179_v50 = vpop.permute.xlu0 %2178  ;;  %v2247_v59 = vadd.f32 %v2181_v28, %v2127_v15  ;;  %2548 = vrot.lane.b32.xlu1 %v4116_v31, %s3260_s12 }
 0x3b8   : > { %v2246_v8 = vadd.f32 %v2179_v50, %v2126_v4  ;;  %2546 = vrot.lane.b32.xlu0 %v4947_v26, %s3260_s12 }
 0x3b9   : > { %v2304_v62 = vld [vmem:[#allocation2 + $0xa0] sm:$0xff]  ;;  %2277 = vst.msk [vmem:[#allocation2 + $0xb9] sm:$0x7f] %vm1281_vm4, %v2247_v59  ;;  %v1515_v12 = vld [vmem:[#allocation2 + $0xd0] sm:$0xff] }
 0x3ba   : > { %v2305_v5 = vld [vmem:[#allocation2 + $0xa8] sm:$0xff]  ;;  %v2424_v33 = vadd.f32 %v4526_v56, %v2304_v62  ;;  %2276 = vst.msk [vmem:[#allocation2 + $0xb1] sm:$0xff] %vm501_vm1, %v2246_v8  ;;  %v2361_v11 = vpop.permute.xlu1 %2360 }
 0x3bb   : > { %v2425_v10 = vadd.f32 %v4528_v6, %v2305_v5  ;;  %v2359_v1 = vpop.permute.xlu0 %2358  ;;  %2552 = vrot.lane.b32.xlu1 %v4111_v18, %s3260_s12 }
 0x3bc   : > { %2454 = vst.msk [vmem:[#allocation2 + $0xa0] sm:$0xff] %vm501_vm1, %v2424_v33  ;;  %2550 = vrot.lane.b32.xlu0 %v4121_v36, %s3260_s12  ;;  %v1516_v36 = vld [vmem:[#allocation2 + $0xd8] sm:$0x7f] }
 0x3bd   : > { %2455 = vst.msk [vmem:[#allocation2 + $0xa8] sm:$0xff] %vm501_vm1, %v2425_v10  ;;  %v1333_v37 = vld [vmem:[#allocation2 + $0xc0] sm:$0xff]  ;;  %v1334_v6 = vld [vmem:[#allocation2 + $0xc8] sm:$0xff] }
 0x3be   : > { %v1453_v31 = vadd.f32 %v4489_v20, %v1333_v37  ;;  %v1454_v56 = vadd.f32 %v4491_v34, %v1334_v6  ;;  %v4715_v57 = vpop.permute.xlu1 %1621  ;;  %v2469_v37 = vld [vmem:[#allocation2 + $0x28] sm:$0x7f] }
 0x3bf   : > { %v4713_v26 = vpop.permute.xlu0 %1619 }
 0x3c0   : > { %1483 = vst.msk [vmem:[#allocation2 + $0xc0] sm:$0xff] %vm501_vm1, %v1453_v31  ;;  %1484 = vst.msk [vmem:[#allocation2 + $0xc8] sm:$0xff] %vm501_vm1, %v1454_v56 }
 0x3c1   : > { %v2306_v40 = vld [vmem:[#allocation2 + $0xb0] sm:$0xff]  ;;  %v2307_v35 = vld [vmem:[#allocation2 + $0xb8] sm:$0xff] }
 0x3c2   : > { %v2426_v47 = vadd.f32 %v2359_v1, %v2306_v40  ;;  %v2427_v16 = vadd.f32 %v2361_v11, %v2307_v35  ;;  %v1999_v42 = vpop.permute.xlu1 %1998  ;;  %v2468_v1 = vld [vmem:[#allocation2 + $0x20] sm:$0xff] }
 0x3c3   : > { %v1997_v18 = vpop.permute.xlu0 %1996 }
 0x3c4   : > { %2456 = vst.msk [vmem:[#allocation2 + $0xb0] sm:$0xff] %vm501_vm1, %v2426_v47  ;;  %2457 = vst.msk [vmem:[#allocation2 + $0xb8] sm:$0xff] %vm501_vm1, %v2427_v16  ;;  %v2471_v16 = vld [vmem:[#allocation2 + $0x38] sm:$0x7f] }
 0x3c6   : > { %v1618_v38 = vpop.permute.xlu1 %1617 }
 0x3c7   : > { %v1513_v20 = vld [vmem:[#allocation2 + $0xc0] sm:$0xff]  ;;  %v1514_v34 = vld [vmem:[#allocation2 + $0xc8] sm:$0x7f]  ;;  %v1616_v52 = vpop.permute.xlu0 %1615  ;;  %v1682_v25 = vadd.f32 %v1618_v38, %v1516_v36 }
 0x3c8   : > { %v1679_v49 = vadd.f32 %v4579_v23, %v1513_v20  ;;  %v1680_v9 = vadd.f32 %v4581_v14, %v1514_v34  ;;  %v1681_v51 = vadd.f32 %v1616_v52, %v1515_v12 }
 0x3c9   : > { %1712 = vst.msk [vmem:[#allocation2 + $0xd8] sm:$0x7f] %vm1281_vm4, %v1682_v25 }
 0x3ca   : > { %1709 = vst.msk [vmem:[#allocation2 + $0xc0] sm:$0xff] %vm501_vm1, %v1679_v49  ;;  %1711 = vst.msk [vmem:[#allocation2 + $0xd0] sm:$0xff] %vm501_vm1, %v1681_v51  ;;  %v1995_v27 = vpop.permute.xlu1 %1994 }
 0x3cb   : > { %1710 = vst.msk [vmem:[#allocation2 + $0xc8] sm:$0x7f] %vm1281_vm4, %v1680_v9  ;;  %v1993_v32 = vpop.permute.xlu0 %1992  ;;  %v2473_v9 = vld [vmem:[#allocation2 + $0x48] sm:$0x7f] }
 0x3ce   : > { %v1154_v58 = vpop.permute.xlu1 %1153 }
 0x3cf   : > { %v1152_v22 = vpop.permute.xlu0 %1151  ;;  %1218 = vst.msk [vmem:[#allocation2 + $0xf8] sm:$0xff] %vm501_vm1, %v1154_v58  ;;  %v2475_v58 = vld [vmem:[#allocation2 + $0x58] sm:$0x7f] }
 0x3d0   : > { %1217 = vst.msk [vmem:[#allocation2 + $0xf0] sm:$0xff] %vm501_vm1, %v1152_v22  ;;  %v1744_v54 = vld [vmem:[#allocation2 + $0xd9] sm:$0x7f] }
 0x3d1   : > { %v1872_v21 = vadd.f32 %v4637_v0, %v1744_v54  ;;  %v1743_v43 = vld [vmem:[#allocation2 + $0xd1] sm:$0xff] }
 0x3d2   : > { %v1741_v23 = vld [vmem:[#allocation2 + $0xc1] sm:$0xff]  ;;  %v1742_v14 = vld [vmem:[#allocation2 + $0xc9] sm:$0x7f]  ;;  %v1871_v29 = vadd.f32 %v4635_v3, %v1743_v43  ;;  %v4735_v48 = vpop.permute.xlu1 %1811 }
 0x3d3   : > { %v1869_v61 = vadd.f32 %v4685_v63, %v1741_v23  ;;  %v1870_v44 = vadd.f32 %v4687_v55, %v1742_v14  ;;  %v4733_v60 = vpop.permute.xlu0 %1809  ;;  %1904 = vst.msk [vmem:[#allocation2 + $0xd9] sm:$0x7f] %vm1281_vm4, %v1872_v21 }
 0x3d4   : > { %1903 = vst.msk [vmem:[#allocation2 + $0xd1] sm:$0xff] %vm501_vm1, %v1871_v29 }
 0x3d5   : > { %1901 = vst.msk [vmem:[#allocation2 + $0xc1] sm:$0xff] %vm501_vm1, %v1869_v61 }
 0x3d6   : > { %1902 = vst.msk [vmem:[#allocation2 + $0xc9] sm:$0x7f] %vm1281_vm4, %v1870_v44  ;;  %v1249_v24 = vld [vmem:[#allocation2 + $0xf9] sm:$0x7f]  ;;  %v4743_v0 = vpop.permute.xlu1 %2192 }
 0x3d7   : > { %v1248_v63 = vld [vmem:[#allocation2 + $0xf1] sm:$0xff]  ;;  %v4741_v55 = vpop.permute.xlu0 %2190  ;;  %v1279_v46 = vadd.f32 %v1249_v24, %v4107_v41 }
 0x3d8   : > { %v1278_v3 = vadd.f32 %v1248_v63, %v4093_v53 }
 0x3d9   : > { %1310 = vst.msk [vmem:[#allocation2 + $0xf9] sm:$0x7f] %vm1281_vm4, %v1279_v46 }
 0x3da   : > { %1309 = vst.msk [vmem:[#allocation2 + $0xf1] sm:$0xff] %vm501_vm1, %v1278_v3  ;;  %v4751_v28 = vpop.permute.xlu1 %2372 }
 0x3db   : > { %v4749_v15 = vpop.permute.xlu0 %2370  ;;  %v1935_v5 = vld [vmem:[#allocation2 + $0xd0] sm:$0xff]  ;;  %v1936_v59 = vld [vmem:[#allocation2 + $0xd8] sm:$0x7f] }
 0x3dc   : > { %v1933_v50 = vld [vmem:[#allocation2 + $0xc0] sm:$0xff]  ;;  %v2066_v10 = vadd.f32 %v1997_v18, %v1935_v5  ;;  %v2067_v33 = vadd.f32 %v1999_v42, %v1936_v59 }
 0x3dd   : > { %v1934_v4 = vld [vmem:[#allocation2 + $0xc8] sm:$0x7f]  ;;  %v2064_v8 = vadd.f32 %v1993_v32, %v1933_v50 }
 0x3de   : > { %v2065_v62 = vadd.f32 %v1995_v27, %v1934_v4  ;;  %2098 = vst.msk [vmem:[#allocation2 + $0xd0] sm:$0xff] %vm501_vm1, %v2066_v10  ;;  %v1150_v41 = vpop.permute.xlu1 %1149  ;;  %v2477_v10 = vld [vmem:[#allocation2 + $0x68] sm:$0x7f] }
 0x3df   : > { %2096 = vst.msk [vmem:[#allocation2 + $0xc0] sm:$0xff] %vm501_vm1, %v2064_v8  ;;  %v1148_v53 = vpop.permute.xlu0 %1147  ;;  %1216 = vst.msk [vmem:[#allocation2 + $0xe8] sm:$0xff] %vm501_vm1, %v1150_v41 }
 0x3e0   : > { %2097 = vst.msk [vmem:[#allocation2 + $0xc8] sm:$0x7f] %vm1281_vm4, %v2065_v62  ;;  %2099 = vst.msk [vmem:[#allocation2 + $0xd8] sm:$0x7f] %vm1281_vm4, %v2067_v33 }
 0x3e1   : > { %1215 = vst.msk [vmem:[#allocation2 + $0xe0] sm:$0xff] %vm501_vm1, %v1148_v53  ;;  %v1339_v34 = vld [vmem:[#allocation2 + $0xf0] sm:$0xff] }
 0x3e2   : > { %v2505_v6 = vpop.permute.xlu1 %2504  ;;  %v2470_v53 = vld [vmem:[#allocation2 + $0x30] sm:$0xff] }
 0x3e3   : > { %v2503_v11 = vpop.permute.xlu0 %2502  ;;  %v2589_v56 = vadd.f32 %v2505_v6, %v2469_v37 }
 0x3e4   : > { %v2588_v31 = vadd.f32 %v2503_v11, %v2468_v1  ;;  %v1340_v11 = vld [vmem:[#allocation2 + $0xf8] sm:$0xff] }
 0x3e5   : > { %2619 = vst.msk [vmem:[#allocation2 + $0x28] sm:$0x7f] %vm1281_vm4, %v2589_v56 }
 0x3e6   : > { %2618 = vst.msk [vmem:[#allocation2 + $0x20] sm:$0xff] %vm501_vm1, %v2588_v31  ;;  %v1247_v36 = vld [vmem:[#allocation2 + $0xe9] sm:$0x7f]  ;;  %v2509_v38 = vpop.permute.xlu1 %2508 }
 0x3e7   : > { %v2128_v40 = vld [vmem:[#allocation2 + $0xc1] sm:$0xff]  ;;  %v2129_v35 = vld [vmem:[#allocation2 + $0xc9] sm:$0x7f]  ;;  %v1398_v20 = vpop.permute.xlu0 %1397  ;;  %v1277_v52 = vadd.f32 %v3926_v13, %v1247_v36  ;;  %v4776_v13 = vld [vmem:[%s4939_s7] ss:$0 sm:$0xff] }
 0x3e8   : > { %v2248_v47 = vadd.f32 %v4647_v19, %v2128_v40  ;;  %v2249_v18 = vadd.f32 %v4649_v2, %v2129_v35  ;;  %v1246_v42 = vld [vmem:[#allocation2 + $0xe1] sm:$0xff]  ;;  %v1459_v49 = vadd.f32 %v1398_v20, %v1339_v34  ;;  %v2591_v19 = vadd.f32 %v2509_v38, %v2471_v16  ;;  %v2130_v23 = vld [vmem:[#allocation2 + $0xd1] sm:$0xff] }
 0x3e9   : > { %v1276_v12 = vadd.f32 %v3914_v45, %v1246_v42  ;;  %1308 = vst.msk [vmem:[#allocation2 + $0xe9] sm:$0x7f] %vm1281_vm4, %v1277_v52  ;;  %v2472_v42 = vld [vmem:[#allocation2 + $0x40] sm:$0xff] }
 0x3ea   : > { %2278 = vst.msk [vmem:[#allocation2 + $0xc1] sm:$0xff] %vm501_vm1, %v2248_v47  ;;  %1489 = vst.msk [vmem:[#allocation2 + $0xf0] sm:$0xff] %vm501_vm1, %v1459_v49  ;;  %v2513_v25 = vpop.permute.xlu1 %2512 }
 0x3eb   : > { %2279 = vst.msk [vmem:[#allocation2 + $0xc9] sm:$0x7f] %vm1281_vm4, %v2249_v18  ;;  %2621 = vst.msk [vmem:[#allocation2 + $0x38] sm:$0x7f] %vm1281_vm4, %v2591_v19  ;;  %v4771_v2 = vpop.permute.xlu0 %1805  ;;  %v2593_v51 = vadd.f32 %v2513_v25, %v2473_v9  ;;  %v2474_v9 = vld [vmem:[#allocation2 + $0x50] sm:$0xff] }
 0x3ec   : > { %1307 = vst.msk [vmem:[#allocation2 + $0xe1] sm:$0xff] %vm501_vm1, %v1276_v12  ;;  %v2649_v27 = vld [vmem:[#allocation2 + $0x28] sm:$0xff]  ;;  %v2131_v25 = vld [vmem:[#allocation2 + $0xd9] sm:$0x7f] }
 0x3ed   : > { %v2648_v45 = vld [vmem:[#allocation2 + $0x20] sm:$0xff]  ;;  %v2688_v22 = vadd.f32 %v4776_v13, %v2649_v27  ;;  %2623 = vst.msk [vmem:[#allocation2 + $0x48] sm:$0x7f] %vm1281_vm4, %v2593_v51 }
 0x3ee   : > { %v2687_v32 = vadd.f32 %v4776_v13, %v2648_v45  ;;  %v2517_v54 = vpop.permute.xlu1 %2516 }
 0x3ef   : > { %v2187_v14 = vpop.permute.xlu0 %2186  ;;  %v3018_v43 = vpack.c.bf16 %v2688_v22, %v2688_v22  ;;  %v2595_v63 = vadd.f32 %v2517_v54, %v2475_v58  ;;  %v2476_v58 = vld [vmem:[#allocation2 + $0x60] sm:$0xff] }
 0x3f0   : > { %v3017_v21 = vpack.c.bf16 %v2687_v32, %v2687_v32  ;;  %v2250_v29 = vadd.f32 %v2187_v14, %v2130_v23 }
 0x3f1   : > { %v2308_v44 = vld [vmem:[#allocation2 + $0xc0] sm:$0xff]  ;;  %2849 = vst.msk [vmem:[%s3933_s17 + $0x14] sm:$0xf] %vm2843_vm5, %v3018_v43 }
 0x3f2   : > { %v2309_v61 = vld [vmem:[#allocation2 + $0xc8] sm:$0xff]  ;;  %v2651_v46 = vld [vmem:[#allocation2 + $0x38] sm:$0xff]  ;;  %v2428_v50 = vadd.f32 %v4660_v17, %v2308_v44  ;;  %2848 = vst.msk [vmem:[%s3933_s17 + $0x10] sm:$0xf] %vm2843_vm5, %v3017_v21 }
 0x3f3   : > { %v1337_v24 = vld [vmem:[#allocation2 + $0xe0] sm:$0xff]  ;;  %v1338_v3 = vld [vmem:[#allocation2 + $0xe8] sm:$0xff]  ;;  %v2429_v4 = vadd.f32 %v4662_v39, %v2309_v61  ;;  %v2690_v8 = vadd.f32 %v4776_v13, %v2651_v46  ;;  %2280 = vst.msk [vmem:[#allocation2 + $0xd1] sm:$0xff] %vm501_vm1, %v2250_v29  ;;  %v2367_v59 = vpop.permute.xlu0 %2366  ;;  %v2521_v39 = vpop.permute.xlu1 %2520 }
 0x3f4   : > { %v1457_v5 = vadd.f32 %v4623_v7, %v1337_v24  ;;  %v1458_v62 = vadd.f32 %v4625_v30, %v1338_v3  ;;  %2625 = vst.msk [vmem:[#allocation2 + $0x58] sm:$0x7f] %vm1281_vm4, %v2595_v63  ;;  %v2597_v30 = vadd.f32 %v2521_v39, %v2477_v10  ;;  %v2653_v17 = vld [vmem:[#allocation2 + $0x48] sm:$0xff]  ;;  %v1519_v10 = vld [vmem:[#allocation2 + $0xf0] sm:$0xff] }
 0x3f5   : > { %2459 = vst.msk [vmem:[#allocation2 + $0xc8] sm:$0xff] %vm501_vm1, %v2429_v4  ;;  %2458 = vst.msk [vmem:[#allocation2 + $0xc0] sm:$0xff] %vm501_vm1, %v2428_v50  ;;  %v3020_v7 = vpack.c.bf16 %v2690_v8, %v2690_v8  ;;  %v2692_v33 = vadd.f32 %v4776_v13, %v2653_v17 }
 0x3f6   : > { %1487 = vst.msk [vmem:[#allocation2 + $0xe0] sm:$0xff] %vm501_vm1, %v1457_v5  ;;  %1488 = vst.msk [vmem:[#allocation2 + $0xe8] sm:$0xff] %vm501_vm1, %v1458_v62 }
 0x3f7   : > { %2851 = vst.msk [vmem:[%s3933_s17 + $0x1c] sm:$0xf] %vm2843_vm5, %v3020_v7  ;;  %v2507_v41 = vpop.permute.xlu0 %2506  ;;  %v1400_v1 = vpop.permute.xlu1 %1399  ;;  %v3022_v37 = vpack.c.bf16 %v2692_v33, %v2692_v33 }
 0x3f8   : > { %2627 = vst.msk [vmem:[#allocation2 + $0x68] sm:$0x7f] %vm1281_vm4, %v2597_v30  ;;  %v2590_v6 = vadd.f32 %v2507_v41, %v2470_v53  ;;  %v1460_v31 = vadd.f32 %v1400_v1, %v1340_v11 }
 0x3f9   : > { %2853 = vst.msk [vmem:[%s3933_s17 + $0x24] sm:$0xf] %vm2843_vm5, %v3022_v37 }
 0x3fa   : > { %v2310_v40 = vld [vmem:[#allocation2 + $0xd0] sm:$0xff]  ;;  %2620 = vst.msk [vmem:[#allocation2 + $0x30] sm:$0xff] %vm501_vm1, %v2590_v6  ;;  %1490 = vst.msk [vmem:[#allocation2 + $0xf8] sm:$0xff] %vm501_vm1, %v1460_v31 }
 0x3fb   : > { %v2655_v56 = vld [vmem:[#allocation2 + $0x58] sm:$0xff]  ;;  %v2430_v47 = vadd.f32 %v2367_v59, %v2310_v40  ;;  %v2511_v36 = vpop.permute.xlu0 %2510  ;;  %v1808_v20 = vpop.permute.xlu1 %1807 }
 0x3fc   : > { %v2694_v35 = vadd.f32 %v4776_v13, %v2655_v56  ;;  %v2592_v52 = vadd.f32 %v2511_v36, %v2472_v42  ;;  %v2479_v40 = vld [vmem:[#allocation2 + $0x78] sm:$0x7f] }
 0x3fd   : > { %v1517_v16 = vld [vmem:[#allocation2 + $0xe0] sm:$0xff]  ;;  %v1518_v18 = vld [vmem:[#allocation2 + $0xe8] sm:$0x7f]  ;;  %2460 = vst.msk [vmem:[#allocation2 + $0xd0] sm:$0xff] %vm501_vm1, %v2430_v47  ;;  %v2478_v47 = vld [vmem:[#allocation2 + $0x70] sm:$0xff] }
 0x3fe   : > { %v1683_v34 = vadd.f32 %v4713_v26, %v1517_v16  ;;  %v1684_v38 = vadd.f32 %v4715_v57, %v1518_v18  ;;  %v3024_v12 = vpack.c.bf16 %v2694_v35, %v2694_v35  ;;  %2622 = vst.msk [vmem:[#allocation2 + $0x40] sm:$0xff] %vm501_vm1, %v2592_v52 }
 0x3ff   : > { %v2657_v49 = vld [vmem:[#allocation2 + $0x68] sm:$0xff]  ;;  %v2515_v26 = vpop.permute.xlu0 %2514  ;;  %v2189_v57 = vpop.permute.xlu1 %2188 }
 0x400   : > { %1713 = vst.msk [vmem:[#allocation2 + $0xe0] sm:$0xff] %vm501_vm1, %v1683_v34  ;;  %v2696_v19 = vadd.f32 %v4776_v13, %v2657_v49  ;;  %v2594_v45 = vadd.f32 %v2515_v26, %v2474_v9  ;;  %v2251_v27 = vadd.f32 %v2189_v57, %v2131_v25  ;;  %v2480_v49 = vld [vmem:[#allocation2 + $0x80] sm:$0xff] }
 0x401   : > { %1714 = vst.msk [vmem:[#allocation2 + $0xe8] sm:$0x7f] %vm1281_vm4, %v1684_v38  ;;  %v2650_v32 = vld [vmem:[#allocation2 + $0x30] sm:$0xff]  ;;  %v1520_v59 = vld [vmem:[#allocation2 + $0xf8] sm:$0x7f] }
 0x402   : > { %2855 = vst.msk [vmem:[%s3933_s17 + $0x2c] sm:$0xf] %vm2843_vm5, %v3024_v12  ;;  %v3026_v51 = vpack.c.bf16 %v2696_v19, %v2696_v19  ;;  %v2689_v22 = vadd.f32 %v4776_v13, %v2650_v32  ;;  %v2481_v12 = vld [vmem:[#allocation2 + $0x88] sm:$0x7f] }
 0x403   : > { %2624 = vst.msk [vmem:[#allocation2 + $0x50] sm:$0xff] %vm501_vm1, %v2594_v45  ;;  %v2519_v23 = vpop.permute.xlu0 %2518  ;;  %v2369_v14 = vpop.permute.xlu1 %2368 }
 0x404   : > { %2857 = vst.msk [vmem:[%s3933_s17 + $0x34] sm:$0xf] %vm2843_vm5, %v3026_v51  ;;  %v3019_v54 = vpack.c.bf16 %v2689_v22, %v2689_v22  ;;  %v2596_v61 = vadd.f32 %v2519_v23, %v2476_v58  ;;  %v2483_v51 = vld [vmem:[#allocation2 + $0x98] sm:$0x7f] }
 0x405   : > { %2281 = vst.msk [vmem:[#allocation2 + $0xd9] sm:$0x7f] %vm1281_vm4, %v2251_v27  ;;  %v2652_v21 = vld [vmem:[#allocation2 + $0x40] sm:$0xff]  ;;  %v2482_v27 = vld [vmem:[#allocation2 + $0x90] sm:$0xff] }
 0x406   : > { %2850 = vst.msk [vmem:[%s3933_s17 + $0x18] sm:$0xf] %vm2843_vm5, %v3019_v54  ;;  %v2691_v63 = vadd.f32 %v4776_v13, %v2652_v21 }
 0x407   : > { %2626 = vst.msk [vmem:[#allocation2 + $0x60] sm:$0xff] %vm501_vm1, %v2596_v61  ;;  %v4824_v3 = vpop.permute.xlu0 %2004  ;;  %v4826_v46 = vpop.permute.xlu1 %2006 }
 0x408   : > { %v1745_v44 = vld [vmem:[#allocation2 + $0xe1] sm:$0xff]  ;;  %v1746_v43 = vld [vmem:[#allocation2 + $0xe9] sm:$0x7f]  ;;  %v3021_v4 = vpack.c.bf16 %v2691_v63, %v2691_v63 }
 0x409   : > { %v1873_v29 = vadd.f32 %v4771_v2, %v1745_v44  ;;  %v1874_v24 = vadd.f32 %v1808_v20, %v1746_v43 }
 0x40a   : > { %v2654_v50 = vld [vmem:[#allocation2 + $0x50] sm:$0xff]  ;;  %2852 = vst.msk [vmem:[%s3933_s17 + $0x20] sm:$0xf] %vm2843_vm5, %v3021_v4  ;;  %v2485_v4 = vld [vmem:[#allocation2 + $0xa8] sm:$0x7f] }
 0x40b   : > { %1905 = vst.msk [vmem:[#allocation2 + $0xe1] sm:$0xff] %vm501_vm1, %v1873_v29  ;;  %v2693_v2 = vadd.f32 %v4776_v13, %v2654_v50  ;;  %v1626_v8 = vpop.permute.xlu1 %1625  ;;  %v1624_v39 = vpop.permute.xlu0 %1623  ;;  %v2484_v50 = vld [vmem:[#allocation2 + $0xa0] sm:$0xff] }
 0x40c   : > { %1906 = vst.msk [vmem:[#allocation2 + $0xe9] sm:$0x7f] %vm1281_vm4, %v1874_v24  ;;  %v2311_v5 = vld [vmem:[#allocation2 + $0xd8] sm:$0xff]  ;;  %v1686_v30 = vadd.f32 %v1626_v8, %v1520_v59  ;;  %v1685_v17 = vadd.f32 %v1624_v39, %v1519_v10  ;;  %v2486_v39 = vld [vmem:[#allocation2 + $0xb0] sm:$0xff] }
 0x40d   : > { %v2431_v62 = vadd.f32 %v2369_v14, %v2311_v5  ;;  %v3023_v7 = vpack.c.bf16 %v2693_v2, %v2693_v2  ;;  %v2487_v59 = vld [vmem:[#allocation2 + $0xb8] sm:$0x7f] }
 0x40e   : > { %v2656_v33 = vld [vmem:[#allocation2 + $0x60] sm:$0xff]  ;;  %1716 = vst.msk [vmem:[#allocation2 + $0xf8] sm:$0x7f] %vm1281_vm4, %v1686_v30 }
 0x40f   : > { %2461 = vst.msk [vmem:[#allocation2 + $0xd8] sm:$0xff] %vm501_vm1, %v2431_v62  ;;  %v2695_v53 = vadd.f32 %v4776_v13, %v2656_v33  ;;  %1715 = vst.msk [vmem:[#allocation2 + $0xf0] sm:$0xff] %vm501_vm1, %v1685_v17  ;;  %v2003_v1 = vpop.permute.xlu1 %2002  ;;  %v2001_v37 = vpop.permute.xlu0 %2000 }
 0x410   : > { %2854 = vst.msk [vmem:[%s3933_s17 + $0x28] sm:$0xf] %vm2843_vm5, %v3023_v7 }
 0x411   : > { %v3025_v6 = vpack.c.bf16 %v2695_v53, %v2695_v53 }
 0x412   : > { %v1937_v11 = vld [vmem:[#allocation2 + $0xe0] sm:$0xff] }
 0x413   : > { %v1938_v41 = vld [vmem:[#allocation2 + $0xe8] sm:$0x7f]  ;;  %v2068_v56 = vadd.f32 %v2001_v37, %v1937_v11  ;;  %2856 = vst.msk [vmem:[%s3933_s17 + $0x30] sm:$0xf] %vm2843_vm5, %v3025_v6  ;;  %v2525_v35 = vpop.permute.xlu1 %2524  ;;  %v2523_v16 = vpop.permute.xlu0 %2522 }
 0x414   : > { %v2069_v31 = vadd.f32 %v2003_v1, %v1938_v41  ;;  %v2599_v18 = vadd.f32 %v2525_v35, %v2479_v40  ;;  %v2598_v42 = vadd.f32 %v2523_v16, %v2478_v47  ;;  %v2489_v35 = vld [vmem:[#allocation2 + $0xc8] sm:$0x7f]  ;;  %v2488_v16 = vld [vmem:[#allocation2 + $0xc0] sm:$0xff] }
 0x415   : > { %2100 = vst.msk [vmem:[#allocation2 + $0xe0] sm:$0xff] %vm501_vm1, %v2068_v56  ;;  %v1748_v36 = vld [vmem:[#allocation2 + $0xf9] sm:$0x7f] }
 0x416   : > { %2101 = vst.msk [vmem:[#allocation2 + $0xe8] sm:$0x7f] %vm1281_vm4, %v2069_v31  ;;  %v1747_v20 = vld [vmem:[#allocation2 + $0xf1] sm:$0xff]  ;;  %v1876_v34 = vadd.f32 %v4735_v48, %v1748_v36  ;;  %2629 = vst.msk [vmem:[#allocation2 + $0x78] sm:$0x7f] %vm1281_vm4, %v2599_v18 }
 0x417   : > { %v1875_v38 = vadd.f32 %v4733_v60, %v1747_v20  ;;  %2628 = vst.msk [vmem:[#allocation2 + $0x70] sm:$0xff] %vm501_vm1, %v2598_v42  ;;  %v2529_v52 = vpop.permute.xlu1 %2528  ;;  %v2527_v19 = vpop.permute.xlu0 %2526 }
 0x418   : > { %1908 = vst.msk [vmem:[#allocation2 + $0xf9] sm:$0x7f] %vm1281_vm4, %v1876_v34  ;;  %v2601_v9 = vadd.f32 %v2529_v52, %v2481_v12  ;;  %v2600_v26 = vadd.f32 %v2527_v19, %v2480_v49 }
 0x419   : > { %1907 = vst.msk [vmem:[#allocation2 + $0xf1] sm:$0xff] %vm501_vm1, %v1875_v38 }
 0x41a   : > { %2631 = vst.msk [vmem:[#allocation2 + $0x88] sm:$0x7f] %vm1281_vm4, %v2601_v9 }
 0x41b   : > { %2630 = vst.msk [vmem:[#allocation2 + $0x80] sm:$0xff] %vm501_vm1, %v2600_v26  ;;  %v2533_v45 = vpop.permute.xlu1 %2532  ;;  %v2531_v32 = vpop.permute.xlu0 %2530  ;;  %v2491_v26 = vld [vmem:[#allocation2 + $0xd8] sm:$0x7f] }
 0x41c   : > { %v2603_v22 = vadd.f32 %v2533_v45, %v2483_v51  ;;  %v2602_v58 = vadd.f32 %v2531_v32, %v2482_v27 }
 0x41d   : > { %v2132_v25 = vld [vmem:[#allocation2 + $0xe1] sm:$0xff]  ;;  %v2133_v57 = vld [vmem:[#allocation2 + $0xe9] sm:$0x7f]  ;;  %v2659_v23 = vld [vmem:[#allocation2 + $0x78] sm:$0xff] }
 0x41e   : > { %v2252_v48 = vadd.f32 %v4741_v55, %v2132_v25  ;;  %v2253_v60 = vadd.f32 %v4743_v0, %v2133_v57  ;;  %v2658_v14 = vld [vmem:[#allocation2 + $0x70] sm:$0xff]  ;;  %v2698_v55 = vadd.f32 %v4776_v13, %v2659_v23  ;;  %2633 = vst.msk [vmem:[#allocation2 + $0x98] sm:$0x7f] %vm1281_vm4, %v2603_v22 }
 0x41f   : > { %v2697_v54 = vadd.f32 %v4776_v13, %v2658_v14  ;;  %2632 = vst.msk [vmem:[#allocation2 + $0x90] sm:$0xff] %vm501_vm1, %v2602_v58  ;;  %v2537_v44 = vpop.permute.xlu1 %2536  ;;  %v2535_v21 = vpop.permute.xlu0 %2534  ;;  %v2490_v57 = vld [vmem:[#allocation2 + $0xd0] sm:$0xff] }
 0x420   : > { %2282 = vst.msk [vmem:[#allocation2 + $0xe1] sm:$0xff] %vm501_vm1, %v2252_v48  ;;  %v1939_v0 = vld [vmem:[#allocation2 + $0xf0] sm:$0xff]  ;;  %v1940_v61 = vld [vmem:[#allocation2 + $0xf8] sm:$0x7f]  ;;  %v3028_v63 = vpack.c.bf16 %v2698_v55, %v2698_v55  ;;  %v2605_v62 = vadd.f32 %v2537_v44, %v2485_v4  ;;  %v2604_v8 = vadd.f32 %v2535_v21, %v2484_v50 }
 0x421   : > { %2283 = vst.msk [vmem:[#allocation2 + $0xe9] sm:$0x7f] %vm1281_vm4, %v2253_v60  ;;  %v2070_v43 = vadd.f32 %v4824_v3, %v1939_v0  ;;  %v2071_v29 = vadd.f32 %v4826_v46, %v1940_v61  ;;  %v3027_v24 = vpack.c.bf16 %v2697_v54, %v2697_v54  ;;  %v2661_v5 = vld [vmem:[#allocation2 + $0x88] sm:$0xff] }
 0x422   : > { %v2660_v2 = vld [vmem:[#allocation2 + $0x80] sm:$0xff]  ;;  %2859 = vst.msk [vmem:[%s3933_s17 + $0x3c] sm:$0xf] %vm2843_vm5, %v3028_v63  ;;  %v2700_v3 = vadd.f32 %v4776_v13, %v2661_v5 }
 0x423   : > { %2102 = vst.msk [vmem:[#allocation2 + $0xf0] sm:$0xff] %vm501_vm1, %v2070_v43  ;;  %v2699_v46 = vadd.f32 %v4776_v13, %v2660_v2  ;;  %2634 = vst.msk [vmem:[#allocation2 + $0xa0] sm:$0xff] %vm501_vm1, %v2604_v8  ;;  %v2541_v10 = vpop.permute.xlu1 %2540  ;;  %v2539_v7 = vpop.permute.xlu0 %2538 }
 0x424   : > { %2103 = vst.msk [vmem:[#allocation2 + $0xf8] sm:$0x7f] %vm1281_vm4, %v2071_v29  ;;  %2635 = vst.msk [vmem:[#allocation2 + $0xa8] sm:$0x7f] %vm1281_vm4, %v2605_v62  ;;  %v3030_v33 = vpack.c.bf16 %v2700_v3, %v2700_v3  ;;  %v2607_v41 = vadd.f32 %v2541_v10, %v2487_v59  ;;  %v2606_v1 = vadd.f32 %v2539_v7, %v2486_v39 }
 0x425   : > { %2858 = vst.msk [vmem:[%s3933_s17 + $0x38] sm:$0xf] %vm2843_vm5, %v3027_v24  ;;  %v3029_v53 = vpack.c.bf16 %v2699_v46, %v2699_v46  ;;  %v2663_v11 = vld [vmem:[#allocation2 + $0x98] sm:$0xff] }
 0x426   : > { %v2662_v37 = vld [vmem:[#allocation2 + $0x90] sm:$0xff]  ;;  %2861 = vst.msk [vmem:[%s3933_s17 + $0x44] sm:$0xf] %vm2843_vm5, %v3030_v33  ;;  %v2702_v56 = vadd.f32 %v4776_v13, %v2663_v11 }
 0x427   : > { %v2312_v17 = vld [vmem:[#allocation2 + $0xe0] sm:$0xff]  ;;  %2860 = vst.msk [vmem:[%s3933_s17 + $0x40] sm:$0xf] %vm2843_vm5, %v3029_v53  ;;  %v2701_v40 = vadd.f32 %v4776_v13, %v2662_v37  ;;  %v2545_v47 = vpop.permute.xlu1 %2544 }
 0x428   : > { %v2313_v30 = vld [vmem:[#allocation2 + $0xe8] sm:$0xff]  ;;  %v2432_v31 = vadd.f32 %v4749_v15, %v2312_v17  ;;  %2637 = vst.msk [vmem:[#allocation2 + $0xb8] sm:$0x7f] %vm1281_vm4, %v2607_v41  ;;  %v3032_v15 = vpack.c.bf16 %v2702_v56, %v2702_v56  ;;  %v2609_v42 = vadd.f32 %v2545_v47, %v2489_v35 }
 0x429   : > { %v2433_v6 = vadd.f32 %v4751_v28, %v2313_v30  ;;  %2636 = vst.msk [vmem:[#allocation2 + $0xb0] sm:$0xff] %vm501_vm1, %v2606_v1  ;;  %v2543_v28 = vpop.permute.xlu0 %2542  ;;  %v3031_v18 = vpack.c.bf16 %v2701_v40, %v2701_v40 }
 0x42a   : > { %2462 = vst.msk [vmem:[#allocation2 + $0xe0] sm:$0xff] %vm501_vm1, %v2432_v31  ;;  %v2608_v36 = vadd.f32 %v2543_v28, %v2488_v16  ;;  %v2674_v20 = vld [vmem:[#allocation2 + $0xf0] sm:$0xff]  ;;  %v2664_v49 = vld [vmem:[#allocation2 + $0xa0] sm:$0xff] }
 0x42b   : > { %2463 = vst.msk [vmem:[#allocation2 + $0xe8] sm:$0xff] %vm501_vm1, %v2433_v6  ;;  %v2675_v34 = vld [vmem:[#allocation2 + $0xf8] sm:$0xff]  ;;  %v2713_v38 = vadd.f32 %v4776_v13, %v2674_v20  ;;  %v2665_v52 = vld [vmem:[#allocation2 + $0xa8] sm:$0xff]  ;;  %v2703_v9 = vadd.f32 %v4776_v13, %v2664_v49  ;;  %v2549_v25 = vpop.permute.xlu1 %2548 }
 0x42c   : > { %v2714_v12 = vadd.f32 %v4776_v13, %v2675_v34  ;;  %2863 = vst.msk [vmem:[%s3933_s17 + $0x4c] sm:$0xf] %vm2843_vm5, %v3032_v15  ;;  %2862 = vst.msk [vmem:[%s3933_s17 + $0x48] sm:$0xf] %vm2843_vm5, %v3031_v18  ;;  %v2704_v19 = vadd.f32 %v4776_v13, %v2665_v52  ;;  %v2611_v45 = vadd.f32 %v2549_v25, %v2491_v26 }
 0x42d   : > { %2639 = vst.msk [vmem:[#allocation2 + $0xc8] sm:$0x7f] %vm1281_vm4, %v2609_v42  ;;  %v2547_v48 = vpop.permute.xlu0 %2546  ;;  %v3043_v60 = vpack.c.bf16 %v2713_v38, %v2713_v38  ;;  %v3033_v22 = vpack.c.bf16 %v2703_v9, %v2703_v9 }
 0x42e   : > { %2638 = vst.msk [vmem:[#allocation2 + $0xc0] sm:$0xff] %vm501_vm1, %v2608_v36  ;;  %v3044_v51 = vpack.c.bf16 %v2714_v12, %v2714_v12  ;;  %v2610_v27 = vadd.f32 %v2547_v48, %v2490_v57  ;;  %v3034_v32 = vpack.c.bf16 %v2704_v19, %v2704_v19 }
 0x42f   : > { %v2667_v58 = vld [vmem:[#allocation2 + $0xb8] sm:$0xff]  ;;  %2874 = vst.msk [vmem:[%s3933_s17 + $0x78] sm:$0xf] %vm2843_vm5, %v3043_v60  ;;  %2864 = vst.msk [vmem:[%s3933_s17 + $0x50] sm:$0xf] %vm2843_vm5, %v3033_v22  ;;  %v2553_v54 = vpop.permute.xlu1 %2552 }
 0x430   : > { %v2666_v23 = vld [vmem:[#allocation2 + $0xb0] sm:$0xff]  ;;  %2875 = vst.msk [vmem:[%s3933_s17 + $0x7c] sm:$0xf] %vm2843_vm5, %v3044_v51  ;;  %v2706_v14 = vadd.f32 %v4776_v13, %v2667_v58  ;;  %2865 = vst.msk [vmem:[%s3933_s17 + $0x54] sm:$0xf] %vm2843_vm5, %v3034_v32 }
 0x431   : > { %v2705_v55 = vadd.f32 %v4776_v13, %v2666_v23  ;;  %2641 = vst.msk [vmem:[#allocation2 + $0xd8] sm:$0x7f] %vm1281_vm4, %v2611_v45  ;;  %v2492_v61 = vld [vmem:[#allocation2 + $0xe0] sm:$0xff]  ;;  %v2551_v44 = vpop.permute.xlu0 %2550 }
 0x432   : > { %2640 = vst.msk [vmem:[#allocation2 + $0xd0] sm:$0xff] %vm501_vm1, %v2610_v27  ;;  %v2493_v0 = vld [vmem:[#allocation2 + $0xe8] sm:$0x7f]  ;;  %v3036_v21 = vpack.c.bf16 %v2706_v14, %v2706_v14  ;;  %v2612_v63 = vadd.f32 %v2551_v44, %v2492_v61 }
 0x433   : > { %v3035_v43 = vpack.c.bf16 %v2705_v55, %v2705_v55  ;;  %v2613_v29 = vadd.f32 %v2553_v54, %v2493_v0 }
 0x434   : > { %v2669_v24 = vld [vmem:[#allocation2 + $0xc8] sm:$0xff]  ;;  %2867 = vst.msk [vmem:[%s3933_s17 + $0x5c] sm:$0xf] %vm2843_vm5, %v3036_v21 }
 0x435   : > { %v2668_v4 = vld [vmem:[#allocation2 + $0xc0] sm:$0xff]  ;;  %2866 = vst.msk [vmem:[%s3933_s17 + $0x58] sm:$0xf] %vm2843_vm5, %v3035_v43  ;;  %v2708_v50 = vadd.f32 %v4776_v13, %v2669_v24 }
 0x436   : > { %v2707_v5 = vadd.f32 %v4776_v13, %v2668_v4  ;;  %2643 = vst.msk [vmem:[#allocation2 + $0xe8] sm:$0x7f] %vm1281_vm4, %v2613_v29 }
 0x437   : > { %2642 = vst.msk [vmem:[#allocation2 + $0xe0] sm:$0xff] %vm501_vm1, %v2612_v63  ;;  %v3038_v2 = vpack.c.bf16 %v2708_v50, %v2708_v50 }
 0x438   : > { %v3037_v62 = vpack.c.bf16 %v2707_v5, %v2707_v5  ;;  %v2671_v8 = vld [vmem:[#allocation2 + $0xd8] sm:$0xff] }
 0x439   : > { %v2670_v3 = vld [vmem:[#allocation2 + $0xd0] sm:$0xff]  ;;  %2869 = vst.msk [vmem:[%s3933_s17 + $0x64] sm:$0xf] %vm2843_vm5, %v3038_v2  ;;  %v2710_v46 = vadd.f32 %v4776_v13, %v2671_v8 }
 0x43a   : > { %2868 = vst.msk [vmem:[%s3933_s17 + $0x60] sm:$0xf] %vm2843_vm5, %v3037_v62  ;;  %v2709_v59 = vadd.f32 %v4776_v13, %v2670_v3 }
 0x43b   : > { %v3040_v10 = vpack.c.bf16 %v2710_v46, %v2710_v46 }
 0x43c   : > { %v3039_v39 = vpack.c.bf16 %v2709_v59, %v2709_v59 }
 0x43d   : > { %v2673_v7 = vld [vmem:[#allocation2 + $0xe8] sm:$0xff]  ;;  %2871 = vst.msk [vmem:[%s3933_s17 + $0x6c] sm:$0xf] %vm2843_vm5, %v3040_v10 }
 0x43e   : > { %v2672_v30 = vld [vmem:[#allocation2 + $0xe0] sm:$0xff]  ;;  %2870 = vst.msk [vmem:[%s3933_s17 + $0x68] sm:$0xf] %vm2843_vm5, %v3039_v39  ;;  %v2712_v17 = vadd.f32 %v4776_v13, %v2673_v7 }
 0x43f   : > { %v2711_v33 = vadd.f32 %v4776_v13, %v2672_v30 }
 0x440   : > { %v3042_v53 = vpack.c.bf16 %v2712_v17, %v2712_v17 }
 0x441   : > { %v3041_v41 = vpack.c.bf16 %v2711_v33, %v2711_v33 }
 0x442   : > { %2873 = vst.msk [vmem:[%s3933_s17 + $0x74] sm:$0xf] %vm2843_vm5, %v3042_v53 }
 0x443   : > { %2872 = vst.msk [vmem:[%s3933_s17 + $0x70] sm:$0xf] %vm2843_vm5, %v3041_v41 }
 0x444 PF: > { %s18_s27 = sadd.s32 1, %s3251_s27  }
 0x445   : > { %p15_p4 = scmp.ge.s32.totalorder %s18_s27, 4  }
 0x447   :  { %17 = sbr.rel (!%p15_p4) target bundleno = 1 (0x1), region = 83 }

// kernel: dense_block_forward_nhwc.3
= control target key start
LH: loop header
LB: loop body
LE: loop exit
PB: predicated region body
PF: predicated region fallthrough
CT: control target
= control target key end

     0   :  { %s4057_s21 = smov 0   ;;  %s5850_s0 = inlined_call_operand.vmem [shape: bf16[512,4], index: 0, kind: input, shape index: {}]   ;;  %s5851_s1 = inlined_call_operand.vmem [shape: bf16[512,4], index: 1, kind: input, shape index: {}]   ;;  %s5852_s2 = inlined_call_operand.vmem [shape: f32[1,4], index: 2, kind: input, shape index: {}]   ;;  %s5853_s3 = inlined_call_operand.vmem [shape: f32[1,4], index: 3, kind: input, shape index: {}]   ;;  %s5854_s4 = inlined_call_operand.vmem [shape: f32[1,4], index: 4, kind: input, shape index: {}]   ;;  %s5855_s5 = inlined_call_operand.vmem [shape: f32[1,4], index: 5, kind: input, shape index: {}]   ;;  %s5856_s6 = inlined_call_operand.vmem [shape: bf16[4,16], index: 6, kind: input, shape index: {}]   ;;  %s5857_s7 = inlined_call_operand.vmem [shape: bf16[4,16], index: 7, kind: input, shape index: {}]   ;;  %s5858_s8 = inlined_call_operand.vmem [shape: f32[1,16], index: 8, kind: input, shape index: {}]   ;;  %s5859_s9 = inlined_call_operand.vmem [shape: f32[1,16], index: 9, kind: input, shape index: {}]   ;;  %s5860_s10 = inlined_call_operand.vmem [shape: bf16[16,36], index: 10, kind: input, shape index: {}]   ;;  %s5861_s11 = inlined_call_operand.vmem [shape: f32[1,4], index: 11, kind: input, shape index: {}]   ;;  %s5862_s12 = inlined_call_operand.vmem [shape: bf16[512,4], index: 12, kind: output, shape index: {}]  }
   0x1 LB: > { %s3477_s22 = sadd.s32 4294967295, %s3982_s21   ;;  %p3481_p0 = scmp.ge.s32.totalorder %s3982_s21, 1  ;;  %s3982_s21 = sphi %s4057_s21, %s22_s21  }
   0x2   : > { %p374_p1 = scmp.lt.s32.totalorder %s3982_s21, 3 }
   0x4   : > { %p375_p2 = pnand %p3481_p0, %p374_p1 }
   0x6   : > { %378 = sbr.rel (%p375_p2) target bundleno = 1122 (0x462), region = 68 }
   0xd   : > { %v821_v0 = vld [vmem:[%s5857_s7] sm:$0x3]  ;;  %vm871_vm0 = vcmask 1041408   ;;  %s3482_s25 = sshll.u32 %s3477_s22, 5  ;;  %vm822_vm1 = vcmask 31744   ;;  %vm1382_vm2 = vcmask 130048  }
   0xe   : > { %3955 = vmatprep.subr.msk.bf16.mxu0 %vm871_vm0, %v821_v0  ;;  %v873_v1 = vsel %vm871_vm0, %v821_v0, 0  ;;  %p422_p3 = scmp.lt.s32.totalorder %s3482_s25, 63  ;;  %3956 = vmatprep.subr.msk.bf16.mxu1 %vm871_vm0, %v821_v0  ;;  %v4074_v2 = vld [vmem:[%s5860_s10] sm:$0xff]   ;;  %s3985_s16 = smov 112   ;;  %vm2054_vm3 = vcmask 1046528   ;;  %vm1814_vm4 = vcmask 30720  }
   0xf   : > { %3820 = vmatpush3.bf16.msra.mxu0 %v873_v1  ;;  %v630_v3 = vld [vmem:[%s5856_s6] sm:$0x3]  ;;  %3922 = vmatpush3.bf16.msra.mxu1 %v873_v1  ;;  %s3986_s17 = smov 116   ;;  %s3987_s18 = smov 104   ;;  %vm3376_vm5 = vcmask 27648  }
  0x10   : > { %s5887_s25 = smov (!%p422_p3, %s3482_s25), 63  ;;  %3957 = vmatprep.subr.msk.bf16.mxu0 %vm871_vm0, %v630_v3  ;;  %3887 = vmatprep.subr.bf16.mxu1 %v4074_v2  ;;  %v4092_v4 = vld [vmem:[%s5853_s3] ss:$0 sm:$0xff]  ;;  %v1085_v47 = vsel %vm871_vm0, %v630_v3, 0  ;;  %s3988_s19 = smov 100  }
  0x11   : > { %s4081_s30 = sshll.u32 %s5887_s25, 2  ;;  %v4101_v13 = vld [vmem:[%s5855_s5] ss:$0 sm:$0xff]  ;;  %s3989_s20 = smov 120  }
  0x12   : > { %s4087_s15 = scalar_lea.vmem %s5851_s1, %s4081_s30  ;;  %s4126_s23 = scalar_lea.vmem %s5850_s0, %s4081_s30 }
  0x13   : > { %v3675_v5 = vld [vmem:[%s4087_s15] sm:$0xff]   ;;  %v3753_v6 = vld [vmem:[%s4087_s15 + $0x8] sm:$0xff]   ;;  %v3754_v7 = vld [vmem:[%s4087_s15 + $0x10] sm:$0xff]   ;;  %s3990_s22 = smov 108   ;;  %s4876_s28 = scalar_lea.vmem %s5862_s12, %s4081_s30 }
  0x14   : > { %v3676_v8 = vunpack.c.l.bf16 %v3675_v5  ;;  %v3677_v9 = vunpack.c.h.bf16 %v3675_v5  ;;  %v3680_v10 = vunpack.c.l.bf16 %v3753_v6  ;;  %v3681_v11 = vunpack.c.h.bf16 %v3753_v6  ;;  %v3755_v12 = vld [vmem:[%s4087_s15 + $0x18] sm:$0xff]   ;;  %v3756_v32 = vld [vmem:[%s4087_s15 + $0x20] sm:$0xff]   ;;  %v3757_v37 = vld [vmem:[%s4087_s15 + $0x28] sm:$0xff]  }
  0x15   : > { %v3684_v14 = vunpack.c.l.bf16 %v3754_v7  ;;  %v3685_v15 = vunpack.c.h.bf16 %v3754_v7  ;;  %v3688_v16 = vunpack.c.l.bf16 %v3755_v12  ;;  %v3689_v17 = vunpack.c.h.bf16 %v3755_v12  ;;  %v3758_v42 = vld [vmem:[%s4087_s15 + $0x30] sm:$0xff]   ;;  %v3759_v59 = vld [vmem:[%s4087_s15 + $0x38] sm:$0xff]   ;;  %v3611_v63 = vld [vmem:[%s4126_s23] sm:$0xff]  }
  0x16   : > { %v702_v18 = vmul.f32 %v3676_v8, %v4092_v4  ;;  %v703_v19 = vmul.f32 %v3677_v9, %v4092_v4  ;;  %v704_v20 = vmul.f32 %v3680_v10, %v4092_v4  ;;  %v705_v21 = vmul.f32 %v3681_v11, %v4092_v4  ;;  %v3738_v11 = vld [vmem:[%s4126_s23 + $0x8] sm:$0xff]  }
  0x17   : > { %v706_v22 = vmul.f32 %v3684_v14, %v4092_v4  ;;  %v707_v23 = vmul.f32 %v3685_v15, %v4092_v4  ;;  %v708_v24 = vmul.f32 %v3688_v16, %v4092_v4  ;;  %v709_v25 = vmul.f32 %v3689_v17, %v4092_v4  ;;  %v4150_v17 = vld [vmem:[%s5852_s2] ss:$0 sm:$0xff] }
  0x18   : > { %v741_v26 = vadd.f32 %v4101_v13, %v702_v18  ;;  %v742_v27 = vadd.f32 %v4101_v13, %v703_v19  ;;  %v743_v28 = vadd.f32 %v4101_v13, %v704_v20  ;;  %v744_v29 = vadd.f32 %v4101_v13, %v705_v21  ;;  %v3739_v21 = vld [vmem:[%s4126_s23 + $0x10] sm:$0xff]  }
  0x19   : > { %v745_v30 = vadd.f32 %v4101_v13, %v706_v22  ;;  %v746_v31 = vadd.f32 %v4101_v13, %v707_v23  ;;  %v747_v40 = vadd.f32 %v4101_v13, %v708_v24  ;;  %v748_v41 = vadd.f32 %v4101_v13, %v709_v25 }
  0x1a   : > { %v773_v33 = vmax.f32 %v741_v26, 0.0  ;;  %v774_v34 = vmax.f32 %v742_v27, 0.0  ;;  %v775_v35 = vmax.f32 %v743_v28, 0.0  ;;  %v776_v36 = vmax.f32 %v744_v29, 0.0  ;;  %v3740_v29 = vld [vmem:[%s4126_s23 + $0x18] sm:$0xff]  }
  0x1b   : > { %v777_v38 = vmax.f32 %v745_v30, 0.0  ;;  %v778_v39 = vmax.f32 %v746_v31, 0.0  ;;  %v3692_v45 = vunpack.c.l.bf16 %v3756_v32  ;;  %v3693_v46 = vunpack.c.h.bf16 %v3756_v32  ;;  %v4163_v30 = vld [vmem:[%s5854_s4] ss:$0 sm:$0xff] }
  0x1c   : > { %v805_v43 = vpack.c.bf16 %v774_v34, %v773_v33  ;;  %v806_v44 = vpack.c.bf16 %v776_v36, %v775_v35  ;;  %v3696_v49 = vunpack.c.l.bf16 %v3757_v37  ;;  %v3697_v50 = vunpack.c.h.bf16 %v3757_v37 }
  0x1d   : > { %v807_v48 = vpack.c.bf16 %v778_v39, %v777_v38  ;;  %v710_v51 = vmul.f32 %v3692_v45, %v4092_v4  ;;  %v711_v52 = vmul.f32 %v3693_v46, %v4092_v4  ;;  %v3700_v53 = vunpack.c.l.bf16 %v3758_v42 }
  0x1e   : > { %3821 = vmatprep.mubr.msk.bf16.mxu0 %vm822_vm1, %v805_v43  ;;  %v3701_v54 = vunpack.c.h.bf16 %v3758_v42  ;;  %v779_v55 = vmax.f32 %v747_v40, 0.0  ;;  %v780_v56 = vmax.f32 %v748_v41, 0.0  ;;  %v712_v57 = vmul.f32 %v3696_v49, %v4092_v4 }
  0x1f   : > { %3822 = vmatmul.mubr.msk.bf16.vlgmr.msra.gmra.mrb[0].mxu0 %vm822_vm1, %v806_v44  ;;  %v713_v58 = vmul.f32 %v3697_v50, %v4092_v4  ;;  %v749_v60 = vadd.f32 %v4101_v13, %v710_v51  ;;  %v750_v61 = vadd.f32 %v4101_v13, %v711_v52  ;;  %v714_v62 = vmul.f32 %v3700_v53, %v4092_v4 }
  0x20   : > { %3854 = vmatpush3.bf16.msra.mxu0 %v1085_v47  ;;  %3825 = vmatprep.mubr.msk.bf16.mxu0 %vm822_vm1, %v807_v48  ;;  %v715_v0 = vmul.f32 %v3701_v54, %v4092_v4  ;;  %v3704_v5 = vunpack.c.l.bf16 %v3759_v59  ;;  %v3705_v6 = vunpack.c.h.bf16 %v3759_v59  ;;  %v808_v7 = vpack.c.bf16 %v780_v56, %v779_v55  ;;  %v3741_v48 = vld [vmem:[%s4126_s23 + $0x20] sm:$0xff]   ;;  %v3742_v54 = vld [vmem:[%s4126_s23 + $0x28] sm:$0xff]  }
  0x21   : > { %v781_v1 = vmax.f32 %v749_v60, 0.0  ;;  %v782_v3 = vmax.f32 %v750_v61, 0.0  ;;  %v751_v8 = vadd.f32 %v4101_v13, %v712_v57  ;;  %v752_v9 = vadd.f32 %v4101_v13, %v713_v58  ;;  %v3760_v59 = vld [vmem:[%s4087_s15 + $0x40] sm:$0xff]  }
  0x22   : > { %v3612_v10 = vunpack.c.l.bf16 %v3611_v63  ;;  %v753_v14 = vadd.f32 %v4101_v13, %v714_v62  ;;  %v754_v15 = vadd.f32 %v4101_v13, %v715_v0  ;;  %v3613_v16 = vunpack.c.h.bf16 %v3611_v63 }
  0x23   : > { %v809_v12 = vpack.c.bf16 %v782_v3, %v781_v1  ;;  %v716_v18 = vmul.f32 %v3704_v5, %v4092_v4  ;;  %v717_v19 = vmul.f32 %v3705_v6, %v4092_v4  ;;  %v3616_v20 = vunpack.c.l.bf16 %v3738_v11 }
  0x24   : > { %v783_v22 = vmax.f32 %v751_v8, 0.0  ;;  %v784_v23 = vmax.f32 %v752_v9, 0.0  ;;  %v3617_v24 = vunpack.c.h.bf16 %v3738_v11  ;;  %v785_v25 = vmax.f32 %v753_v14, 0.0 }
  0x25   : > { %v786_v26 = vmax.f32 %v754_v15, 0.0  ;;  %v511_v27 = vmul.f32 %v3612_v10, %v4150_v17  ;;  %v512_v28 = vmul.f32 %v3613_v16, %v4150_v17  ;;  %v3620_v31 = vunpack.c.l.bf16 %v3739_v21  ;;  %v3743_v10 = vld [vmem:[%s4126_s23 + $0x30] sm:$0xff]   ;;  %v3761_v15 = vld [vmem:[%s4087_s15 + $0x48] sm:$0xff]  }
  0x26   : > { %v3621_v32 = vunpack.c.h.bf16 %v3739_v21  ;;  %v755_v33 = vadd.f32 %v4101_v13, %v716_v18  ;;  %v756_v34 = vadd.f32 %v4101_v13, %v717_v19  ;;  %v513_v35 = vmul.f32 %v3616_v20, %v4150_v17 }
  0x27   : > { %3826 = vmatmul.mubr.msk.bf16.gmra.mrb[4].mxu0 %vm822_vm1, %v808_v7  ;;  %v810_v36 = vpack.c.bf16 %v784_v23, %v783_v22  ;;  %v514_v37 = vmul.f32 %v3617_v24, %v4150_v17  ;;  %v3624_v38 = vunpack.c.l.bf16 %v3740_v29  ;;  %v3625_v39 = vunpack.c.h.bf16 %v3740_v29  ;;  %v3744_v23 = vld [vmem:[%s4126_s23 + $0x38] sm:$0xff]  }
  0x28   : > { %3829 = vmatprep.mubr.msk.bf16.mxu0 %vm822_vm1, %v809_v12  ;;  %v811_v40 = vpack.c.bf16 %v786_v26, %v785_v25  ;;  %v550_v41 = vadd.f32 %v4163_v30, %v511_v27  ;;  %v551_v42 = vadd.f32 %v4163_v30, %v512_v28  ;;  %v515_v43 = vmul.f32 %v3620_v31, %v4150_v17 }
  0x29   : > { %v516_v44 = vmul.f32 %v3621_v32, %v4150_v17  ;;  %v787_v45 = vmax.f32 %v755_v33, 0.0  ;;  %v788_v46 = vmax.f32 %v756_v34, 0.0  ;;  %v552_v47 = vadd.f32 %v4163_v30, %v513_v35  ;;  %v3762_v35 = vld [vmem:[%s4087_s15 + $0x50] sm:$0xff]  }
  0x2a   : > { %v553_v49 = vadd.f32 %v4163_v30, %v514_v37  ;;  %v517_v50 = vmul.f32 %v3624_v38, %v4150_v17  ;;  %v518_v51 = vmul.f32 %v3625_v39, %v4150_v17  ;;  %v582_v52 = vmax.f32 %v550_v41, 0.0 }
  0x2b   : > { %v583_v53 = vmax.f32 %v551_v42, 0.0  ;;  %v554_v55 = vadd.f32 %v4163_v30, %v515_v43  ;;  %v555_v56 = vadd.f32 %v4163_v30, %v516_v44  ;;  %v3628_v57 = vunpack.c.l.bf16 %v3741_v48 }
  0x2c   : > { %v3629_v58 = vunpack.c.h.bf16 %v3741_v48  ;;  %v812_v60 = vpack.c.bf16 %v788_v46, %v787_v45  ;;  %v584_v61 = vmax.f32 %v552_v47, 0.0  ;;  %v585_v62 = vmax.f32 %v553_v49, 0.0 }
  0x2d   : > { %v556_v63 = vadd.f32 %v4163_v30, %v517_v50  ;;  %v557_v0 = vadd.f32 %v4163_v30, %v518_v51  ;;  %v3632_v1 = vunpack.c.l.bf16 %v3742_v54  ;;  %v614_v3 = vpack.c.bf16 %v583_v53, %v582_v52  ;;  %v3745_v51 = vld [vmem:[%s4126_s23 + $0x40] sm:$0xff]  }
  0x2e   : > { %v3708_v5 = vunpack.c.l.bf16 %v3760_v59  ;;  %v586_v6 = vmax.f32 %v554_v55, 0.0  ;;  %v587_v7 = vmax.f32 %v555_v56, 0.0  ;;  %v519_v8 = vmul.f32 %v3628_v57, %v4150_v17  ;;  %v3763_v57 = vld [vmem:[%s4087_s15 + $0x58] sm:$0xff]  }
  0x2f   : > { %3830 = vmatmul.mubr.msk.bf16.gmra.mrb[8].mxu0 %vm822_vm1, %v810_v36  ;;  %v520_v9 = vmul.f32 %v3629_v58, %v4150_v17  ;;  %v3633_v11 = vunpack.c.h.bf16 %v3742_v54  ;;  %v3709_v12 = vunpack.c.h.bf16 %v3760_v59  ;;  %v615_v16 = vpack.c.bf16 %v585_v62, %v584_v61 }
  0x30   : > { %3833 = vmatprep.mubr.msk.bf16.mxu0 %vm822_vm1, %v811_v40  ;;  %v718_v14 = vmul.f32 %v3708_v5, %v4092_v4  ;;  %v588_v18 = vmax.f32 %v556_v63, 0.0  ;;  %v589_v19 = vmax.f32 %v557_v0, 0.0  ;;  %v521_v20 = vmul.f32 %v3632_v1, %v4150_v17 }
  0x31   : > { %v3636_v21 = vunpack.c.l.bf16 %v3743_v10  ;;  %v3637_v22 = vunpack.c.h.bf16 %v3743_v10  ;;  %v719_v24 = vmul.f32 %v3709_v12, %v4092_v4  ;;  %v616_v26 = vpack.c.bf16 %v587_v7, %v586_v6  ;;  %v3764_v12 = vld [vmem:[%s4087_s15 + $0x60] sm:$0xff]  }
  0x32   : > { %v757_v25 = vadd.f32 %v4101_v13, %v718_v14  ;;  %v558_v27 = vadd.f32 %v4163_v30, %v519_v8  ;;  %v559_v28 = vadd.f32 %v4163_v30, %v520_v9  ;;  %v3712_v29 = vunpack.c.l.bf16 %v3761_v15 }
  0x33   : > { %v522_v31 = vmul.f32 %v3633_v11, %v4150_v17  ;;  %v758_v32 = vadd.f32 %v4101_v13, %v719_v24  ;;  %v3713_v34 = vunpack.c.h.bf16 %v3761_v15  ;;  %v617_v36 = vpack.c.bf16 %v589_v19, %v588_v18 }
  0x34   : > { %v789_v33 = vmax.f32 %v757_v25, 0.0  ;;  %v560_v37 = vadd.f32 %v4163_v30, %v521_v20  ;;  %v3640_v38 = vunpack.c.l.bf16 %v3744_v23  ;;  %v720_v39 = vmul.f32 %v3712_v29, %v4092_v4 }
  0x35   : > { %v523_v40 = vmul.f32 %v3636_v21, %v4150_v17  ;;  %v524_v41 = vmul.f32 %v3637_v22, %v4150_v17  ;;  %v790_v42 = vmax.f32 %v758_v32, 0.0  ;;  %v721_v43 = vmul.f32 %v3713_v34, %v4092_v4  ;;  %v3746_v21 = vld [vmem:[%s4126_s23 + $0x48] sm:$0xff]  }
  0x36   : > { %v590_v44 = vmax.f32 %v558_v27, 0.0  ;;  %v591_v45 = vmax.f32 %v559_v28, 0.0  ;;  %v759_v46 = vadd.f32 %v4101_v13, %v720_v39  ;;  %v3716_v47 = vunpack.c.l.bf16 %v3762_v35 }
  0x37   : > { %3834 = vmatmul.mubr.msk.bf16.gmra.mrb[12].mxu0 %vm822_vm1, %v812_v60  ;;  %v561_v48 = vadd.f32 %v4163_v30, %v522_v31  ;;  %v3641_v49 = vunpack.c.h.bf16 %v3744_v23  ;;  %v813_v50 = vpack.c.bf16 %v790_v42, %v789_v33  ;;  %v760_v52 = vadd.f32 %v4101_v13, %v721_v43 }
  0x38   : > { %3855 = vmatprep.mubr.msk.bf16.mxu0 %vm822_vm1, %v614_v3  ;;  %v525_v53 = vmul.f32 %v3640_v38, %v4150_v17  ;;  %v791_v54 = vmax.f32 %v759_v46, 0.0  ;;  %v3717_v55 = vunpack.c.h.bf16 %v3762_v35  ;;  %v722_v56 = vmul.f32 %v3716_v47, %v4092_v4 }
  0x39   : > { %v592_v58 = vmax.f32 %v560_v37, 0.0  ;;  %v562_v59 = vadd.f32 %v4163_v30, %v523_v40  ;;  %v563_v60 = vadd.f32 %v4163_v30, %v524_v41  ;;  %3837 = vmatprep.mubr.msk.bf16.mxu1 %vm822_vm1, %v813_v50  ;;  %v792_v61 = vmax.f32 %v760_v52, 0.0  ;;  %v3765_v37 = vld [vmem:[%s4087_s15 + $0x68] sm:$0xff]  }
  0x3a   : > { %v3644_v62 = vunpack.c.l.bf16 %v3745_v51  ;;  %v3645_v63 = vunpack.c.h.bf16 %v3745_v51  ;;  %v723_v0 = vmul.f32 %v3717_v55, %v4092_v4  ;;  %v761_v1 = vadd.f32 %v4101_v13, %v722_v56 }
  0x3b   : > { %v593_v3 = vmax.f32 %v561_v48, 0.0  ;;  %v526_v5 = vmul.f32 %v3641_v49, %v4150_v17  ;;  %v814_v6 = vpack.c.bf16 %v792_v61, %v791_v54  ;;  %v3720_v7 = vunpack.c.l.bf16 %v3763_v57 }
  0x3c   : > { %v4223_v8 = vadd.f32 %v4163_v30, %v525_v53  ;;  %v762_v9 = vadd.f32 %v4101_v13, %v723_v0  ;;  %v793_v10 = vmax.f32 %v761_v1, 0.0  ;;  %v3721_v11 = vunpack.c.h.bf16 %v3763_v57  ;;  %v3766_v53 = vld [vmem:[%s4087_s15 + $0x70] sm:$0xff]  }
  0x3d   : > { %v618_v14 = vpack.c.bf16 %v591_v45, %v590_v44  ;;  %v594_v15 = vmax.f32 %v562_v59, 0.0  ;;  %3838 = vmatmul.mubr.msk.bf16.vlgmr.msra.gmra.mrb[0].mxu1 %vm822_vm1, %v814_v6  ;;  %v724_v18 = vmul.f32 %v3720_v7, %v4092_v4  ;;  %v527_v19 = vmul.f32 %v3644_v62, %v4150_v17  ;;  %v3748_v62 = vld [vmem:[%s4126_s23 + $0x58] sm:$0xff]  }
  0x3e   : > { %v528_v20 = vmul.f32 %v3645_v63, %v4150_v17  ;;  %v794_v22 = vmax.f32 %v762_v9, 0.0  ;;  %3888 = vmatpush3.bf16.msra.mxu1 %v4074_v2  ;;  %v725_v23 = vmul.f32 %v3721_v11, %v4092_v4  ;;  %v565_v24 = vadd.f32 %v4163_v30, %v526_v5  ;;  %v3747_v2 = vld [vmem:[%s4126_s23 + $0x50] sm:$0xff]  }
  0x3f   : > { %3856 = vmatmul.mubr.msk.bf16.vlgmr.msra.gmra.mrb[0].mxu0 %vm822_vm1, %v615_v16  ;;  %v595_v16 = vmax.f32 %v563_v60, 0.0  ;;  %v763_v25 = vadd.f32 %v4101_v13, %v724_v18  ;;  %v619_v27 = vpack.c.bf16 %v593_v3, %v592_v58  ;;  %v596_v28 = vmax.f32 %v4223_v8, 0.0  ;;  %v3749_v8 = vld [vmem:[%s4126_s23 + $0x60] sm:$0xff]  }
  0x40   : > { %3859 = vmatprep.mubr.msk.bf16.mxu0 %vm822_vm1, %v616_v26  ;;  %v3724_v26 = vunpack.c.l.bf16 %v3764_v12  ;;  %v815_v29 = vpack.c.bf16 %v794_v22, %v793_v10  ;;  %v764_v31 = vadd.f32 %v4101_v13, %v725_v23  ;;  %v3648_v32 = vunpack.c.l.bf16 %v3746_v21 }
  0x41   : > { %v795_v33 = vmax.f32 %v763_v25, 0.0  ;;  %v3725_v34 = vunpack.c.h.bf16 %v3764_v12  ;;  %v620_v38 = vpack.c.bf16 %v595_v16, %v594_v15  ;;  %v566_v39 = vadd.f32 %v4163_v30, %v527_v19  ;;  %v3767_v12 = vld [vmem:[%s4087_s15 + $0x78] sm:$0xff]   ;;  %s3984_s15 = smov 124  }
  0x42   : > { %v726_v35 = vmul.f32 %v3724_v26, %v4092_v4  ;;  %3841 = vmatprep.mubr.msk.bf16.mxu1 %vm822_vm1, %v815_v29  ;;  %v796_v40 = vmax.f32 %v764_v31, 0.0  ;;  %v597_v41 = vmax.f32 %v565_v24, 0.0  ;;  %v3649_v42 = vunpack.c.h.bf16 %v3746_v21 }
  0x43   : > { %v727_v43 = vmul.f32 %v3725_v34, %v4092_v4  ;;  %v3652_v45 = vunpack.c.l.bf16 %v3747_v2  ;;  %v3653_v46 = vunpack.c.h.bf16 %v3747_v2  ;;  %v3728_v48 = vunpack.c.l.bf16 %v3765_v37 }
  0x44   : > { %v765_v44 = vadd.f32 %v4101_v13, %v726_v35  ;;  %v816_v47 = vpack.c.bf16 %v796_v40, %v795_v33  ;;  %v529_v49 = vmul.f32 %v3648_v32, %v4150_v17  ;;  %v3729_v52 = vunpack.c.h.bf16 %v3765_v37 }
  0x45   : > { %v766_v50 = vadd.f32 %v4101_v13, %v727_v43  ;;  %v598_v54 = vmax.f32 %v566_v39, 0.0  ;;  %v728_v56 = vmul.f32 %v3728_v48, %v4092_v4  ;;  %v530_v57 = vmul.f32 %v3649_v42, %v4150_v17 }
  0x46   : > { %v797_v51 = vmax.f32 %v765_v44, 0.0  ;;  %3842 = vmatmul.mubr.msk.bf16.gmra.mrb[4].mxu1 %vm822_vm1, %v816_v47  ;;  %v729_v59 = vmul.f32 %v3729_v52, %v4092_v4  ;;  %v531_v60 = vmul.f32 %v3652_v45, %v4150_v17  ;;  %v532_v61 = vmul.f32 %v3653_v46, %v4150_v17  ;;  %v3751_v44 = vld [vmem:[%s4126_s23 + $0x70] sm:$0xff]  }
  0x47   : > { %3860 = vmatmul.mubr.msk.bf16.gmra.mrb[4].mxu0 %vm822_vm1, %v617_v36  ;;  %v567_v36 = vadd.f32 %v4163_v30, %v528_v20  ;;  %v798_v58 = vmax.f32 %v766_v50, 0.0  ;;  %v767_v63 = vadd.f32 %v4101_v13, %v728_v56  ;;  %v3732_v0 = vunpack.c.l.bf16 %v3766_v53 }
  0x48   : > { %3863 = vmatprep.mubr.msk.bf16.mxu0 %vm822_vm1, %v618_v14  ;;  %v621_v1 = vpack.c.bf16 %v597_v41, %v596_v28  ;;  %v568_v3 = vadd.f32 %v4163_v30, %v529_v49  ;;  %v768_v6 = vadd.f32 %v4101_v13, %v729_v59  ;;  %v3733_v10 = vunpack.c.h.bf16 %v3766_v53  ;;  %v3750_v41 = vld [vmem:[%s4126_s23 + $0x68] sm:$0xff]  }
  0x49   : > { %v599_v55 = vmax.f32 %v567_v36, 0.0  ;;  %v817_v5 = vpack.c.bf16 %v798_v58, %v797_v51  ;;  %v799_v9 = vmax.f32 %v767_v63, 0.0  ;;  %v730_v11 = vmul.f32 %v3732_v0, %v4092_v4 }
  0x4a   : > { %v569_v14 = vadd.f32 %v4163_v30, %v530_v57  ;;  %v3656_v15 = vunpack.c.l.bf16 %v3748_v62  ;;  %v3657_v16 = vunpack.c.h.bf16 %v3748_v62  ;;  %v800_v18 = vmax.f32 %v768_v6, 0.0 }
  0x4b   : > { %v622_v7 = vpack.c.bf16 %v599_v55, %v598_v54  ;;  %3845 = vmatprep.mubr.msk.bf16.mxu1 %vm822_vm1, %v817_v5  ;;  %v570_v19 = vadd.f32 %v4163_v30, %v531_v60  ;;  %v571_v20 = vadd.f32 %v4163_v30, %v532_v61  ;;  %v731_v21 = vmul.f32 %v3733_v10, %v4092_v4 }
  0x4c   : > { %v769_v22 = vadd.f32 %v4101_v13, %v730_v11  ;;  %v3660_v23 = vunpack.c.l.bf16 %v3749_v8  ;;  %v3661_v24 = vunpack.c.h.bf16 %v3749_v8  ;;  %v818_v25 = vpack.c.bf16 %v800_v18, %v799_v9 }
  0x4d   : > { %v3736_v26 = vunpack.c.l.bf16 %v3767_v12  ;;  %v770_v28 = vadd.f32 %v4101_v13, %v731_v21  ;;  %v3737_v31 = vunpack.c.h.bf16 %v3767_v12  ;;  %v601_v32 = vmax.f32 %v569_v14, 0.0 }
  0x4e   : > { %v801_v29 = vmax.f32 %v769_v22, 0.0  ;;  %v533_v2 = vmul.f32 %v3656_v15, %v4150_v17  ;;  %v534_v33 = vmul.f32 %v3657_v16, %v4150_v17  ;;  %3846 = vmatmul.mubr.msk.bf16.gmra.mrb[8].mxu1 %vm822_vm1, %v818_v25  ;;  %v602_v35 = vmax.f32 %v570_v19, 0.0 }
  0x4f   : > { %3864 = vmatmul.mubr.msk.bf16.gmra.mrb[8].mxu0 %vm822_vm1, %v619_v27  ;;  %v600_v27 = vmax.f32 %v568_v3, 0.0  ;;  %v732_v34 = vmul.f32 %v3736_v26, %v4092_v4  ;;  %v603_v37 = vmax.f32 %v571_v20, 0.0  ;;  %v733_v39 = vmul.f32 %v3737_v31, %v4092_v4 }
  0x50   : > { %3867 = vmatprep.mubr.msk.bf16.mxu0 %vm822_vm1, %v620_v38  ;;  %v802_v38 = vmax.f32 %v770_v28, 0.0  ;;  %v535_v36 = vmul.f32 %v3660_v23, %v4150_v17  ;;  %v536_v40 = vmul.f32 %v3661_v24, %v4150_v17  ;;  %v572_v47 = vadd.f32 %v4163_v30, %v533_v2 }
  0x51   : > { %v771_v42 = vadd.f32 %v4101_v13, %v732_v34  ;;  %v772_v45 = vadd.f32 %v4101_v13, %v733_v39  ;;  %v623_v46 = vpack.c.bf16 %v601_v32, %v600_v27  ;;  %v573_v48 = vadd.f32 %v4163_v30, %v534_v33 }
  0x52   : > { %v819_v43 = vpack.c.bf16 %v802_v38, %v801_v29  ;;  %v624_v4 = vpack.c.bf16 %v603_v37, %v602_v35  ;;  %v3664_v50 = vunpack.c.l.bf16 %v3750_v41  ;;  %v3665_v51 = vunpack.c.h.bf16 %v3750_v41 }
  0x53   : > { %v803_v49 = vmax.f32 %v771_v42, 0.0  ;;  %v804_v52 = vmax.f32 %v772_v45, 0.0  ;;  %v574_v53 = vadd.f32 %v4163_v30, %v535_v36  ;;  %v575_v54 = vadd.f32 %v4163_v30, %v536_v40 }
  0x54   : > { %3849 = vmatprep.mubr.msk.bf16.mxu1 %vm822_vm1, %v819_v43  ;;  %v3668_v55 = vunpack.c.l.bf16 %v3751_v44  ;;  %v3669_v56 = vunpack.c.h.bf16 %v3751_v44  ;;  %v604_v57 = vmax.f32 %v572_v47, 0.0  ;;  %v605_v58 = vmax.f32 %v573_v48, 0.0 }
  0x55   : > { %v820_v13 = vpack.c.bf16 %v804_v52, %v803_v49  ;;  %v537_v59 = vmul.f32 %v3664_v50, %v4150_v17  ;;  %v538_v60 = vmul.f32 %v3665_v51, %v4150_v17  ;;  %v606_v61 = vmax.f32 %v574_v53, 0.0 }
  0x56   : > { %v607_v62 = vmax.f32 %v575_v54, 0.0  ;;  %v539_v63 = vmul.f32 %v3668_v55, %v4150_v17  ;;  %v540_v0 = vmul.f32 %v3669_v56, %v4150_v17  ;;  %v625_v3 = vpack.c.bf16 %v605_v58, %v604_v57 }
  0x57   : > { %3868 = vmatmul.mubr.msk.bf16.gmra.mrb[12].mxu0 %vm822_vm1, %v621_v1  ;;  %3850 = vmatmul.mubr.msk.bf16.gmra.mrb[12].mxu1 %vm822_vm1, %v820_v13  ;;  %v3752_v1 = vld [vmem:[%s4126_s23 + $0x78] sm:$0xff]   ;;  %v576_v5 = vadd.f32 %v4163_v30, %v537_v59  ;;  %v577_v6 = vadd.f32 %v4163_v30, %v538_v60  ;;  %s3991_s23 = smov 96  }
  0x58   : > { %3871 = vmatprep.mubr.msk.bf16.mxu0 %vm822_vm1, %v622_v7  ;;  %v3672_v7 = vunpack.c.l.bf16 %v3752_v1  ;;  %v3673_v8 = vunpack.c.h.bf16 %v3752_v1  ;;  %v626_v9 = vpack.c.bf16 %v607_v62, %v606_v61  ;;  %v578_v10 = vadd.f32 %v4163_v30, %v539_v63 }
  0x59   : > { %v579_v11 = vadd.f32 %v4163_v30, %v540_v0  ;;  %v608_v12 = vmax.f32 %v576_v5, 0.0  ;;  %v609_v14 = vmax.f32 %v577_v6, 0.0 }
  0x5a   : > { %v541_v15 = vmul.f32 %v3672_v7, %v4150_v17  ;;  %v542_v16 = vmul.f32 %v3673_v8, %v4150_v17  ;;  %v610_v18 = vmax.f32 %v578_v10, 0.0  ;;  %v4315_v17 = vld [vmem:[%s5858_s8] ss:$0 sm:$0xff] }
  0x5b   : > { %v611_v19 = vmax.f32 %v579_v11, 0.0  ;;  %v627_v20 = vpack.c.bf16 %v609_v14, %v608_v12 }
  0x5c   : > { %v580_v21 = vadd.f32 %v4163_v30, %v541_v15  ;;  %v581_v22 = vadd.f32 %v4163_v30, %v542_v16  ;;  %v4320_v30 = vld [vmem:[%s5859_s9] ss:$0 sm:$0xff] }
  0x5d   : > { %v628_v23 = vpack.c.bf16 %v611_v19, %v610_v18 }
  0x5e   : > { %v612_v24 = vmax.f32 %v580_v21, 0.0  ;;  %v613_v25 = vmax.f32 %v581_v22, 0.0 }
  0x5f   : > { %3872 = vmatmul.mubr.msk.bf16.gmra.mrb[16].mxu0 %vm822_vm1, %v623_v46 }
  0x60   : > { %3875 = vmatprep.mubr.msk.bf16.mxu0 %vm822_vm1, %v624_v4  ;;  %v629_v26 = vpack.c.bf16 %v613_v25, %v612_v24 }
  0x67   : > { %3876 = vmatmul.mubr.msk.bf16.gmra.mrb[20].mxu0 %vm822_vm1, %v625_v3 }
  0x68   : > { %3879 = vmatprep.mubr.msk.bf16.mxu0 %vm822_vm1, %v626_v9 }
  0x6f   : > { %3880 = vmatmul.mubr.msk.bf16.gmra.mrb[24].mxu0 %vm822_vm1, %v627_v20 }
  0x70   : > { %3883 = vmatprep.mubr.msk.bf16.mxu0 %vm822_vm1, %v628_v23 }
  0x77   : > { %3884 = vmatmul.mubr.msk.bf16.gmra.mrb[28].mxu0 %vm822_vm1, %v629_v26 }
 0x110   : > { %v4329_v39 = vpop.f32.mrb[0].mxu1 }
 0x111   : > { %v4332_v40 = vpop.f32.mrb[1].mxu1 }
 0x112   : > { %v3857_v27 = vpop.f32.mrb[0].mxu0  ;;  %v4334_v43 = vpop.f32.mrb[2].mxu1 }
 0x113   : > { %v1257_v28 = vmul.f32 %v3857_v27, %v4315_v17  ;;  %v1121_v29 = vpop.f32.mrb[1].mxu0  ;;  %v4336_v47 = vpop.f32.mrb[3].mxu1 }
 0x114   : > { %v1255_v31 = vmul.f32 %v4315_v17, %v1121_v29  ;;  %v3858_v32 = vpop.f32.mrb[2].mxu0 }
 0x115   : > { %v1296_v2 = vadd.f32 %v4320_v30, %v1257_v28  ;;  %v1258_v33 = vmul.f32 %v3858_v32, %v4315_v17  ;;  %v1124_v34 = vpop.f32.mrb[3].mxu0 }
 0x116   : > { %v1294_v35 = vadd.f32 %v4320_v30, %v1255_v31  ;;  %v1256_v37 = vmul.f32 %v4315_v17, %v1124_v34 }
 0x117   : > { %v1297_v38 = vadd.f32 %v4320_v30, %v1258_v33  ;;  %v1328_v41 = vmax.f32 %v1296_v2, 0.0 }
 0x118   : > { %v1295_v36 = vadd.f32 %v4320_v30, %v1256_v37  ;;  %v1326_v44 = vmax.f32 %v1294_v35, 0.0 }
 0x119   : > { %v1329_v42 = vmax.f32 %v1297_v38, 0.0  ;;  %v4348_v59 = vpop.f32.mrb[4].mxu1 }
 0x11a   : > { %v1327_v45 = vmax.f32 %v1295_v36, 0.0  ;;  %v3861_v46 = vpop.f32.mrb[4].mxu0  ;;  %v4350_v62 = vpop.f32.mrb[5].mxu1 }
 0x11b   : > { %v1359_v48 = vpack.c.bf16 %v1329_v42, %v1328_v41  ;;  %v1261_v49 = vmul.f32 %v3861_v46, %v4315_v17  ;;  %v1137_v4 = vpop.f32.mrb[5].mxu0  ;;  %v4352_v3 = vpop.f32.mrb[6].mxu1 }
 0x11c   : > { %v1358_v50 = vpack.c.bf16 %v1327_v45, %v1326_v44  ;;  %v1259_v51 = vmul.f32 %v4315_v17, %v1137_v4  ;;  %v3862_v52 = vpop.f32.mrb[6].mxu0  ;;  %v4355_v8 = vpop.f32.mrb[7].mxu1 }
 0x11d   : > { %v1300_v53 = vadd.f32 %v4320_v30, %v1261_v49  ;;  %v1262_v54 = vmul.f32 %v3862_v52, %v4315_v17  ;;  %v1140_v55 = vpop.f32.mrb[7].mxu0 }
 0x11e   : > { %v1298_v56 = vadd.f32 %v4320_v30, %v1259_v51  ;;  %v1260_v13 = vmul.f32 %v4315_v17, %v1140_v55  ;;  %3889 = vmatprep.mubr.msk.bf16.mxu1 %vm1382_vm2, %v1358_v50 }
 0x11f   : > { %v1301_v57 = vadd.f32 %v4320_v30, %v1262_v54  ;;  %3890 = vmatmul.mubr.msk.bf16.vlgmr.msra.gmra.mrb[16].mxu1 %vm1382_vm2, %v1359_v48  ;;  %v1332_v60 = vmax.f32 %v1300_v53, 0.0 }
 0x120   : > { %v1299_v58 = vadd.f32 %v4320_v30, %v1260_v13  ;;  %v1330_v63 = vmax.f32 %v1298_v56, 0.0 }
 0x121   : > { %v1333_v61 = vmax.f32 %v1301_v57, 0.0  ;;  %v4366_v23 = vpop.f32.mrb[8].mxu1 }
 0x122   : > { %v1331_v0 = vmax.f32 %v1299_v58, 0.0  ;;  %v3865_v1 = vpop.f32.mrb[8].mxu0  ;;  %v4368_v27 = vpop.f32.mrb[9].mxu1 }
 0x123   : > { %v1361_v5 = vpack.c.bf16 %v1333_v61, %v1332_v60  ;;  %v1265_v6 = vmul.f32 %v3865_v1, %v4315_v17  ;;  %v1153_v7 = vpop.f32.mrb[9].mxu0  ;;  %v4371_v32 = vpop.f32.mrb[10].mxu1 }
 0x124   : > { %v1360_v9 = vpack.c.bf16 %v1331_v0, %v1330_v63  ;;  %v1263_v10 = vmul.f32 %v4315_v17, %v1153_v7  ;;  %v3866_v11 = vpop.f32.mrb[10].mxu0  ;;  %v4374_v35 = vpop.f32.mrb[11].mxu1 }
 0x125   : > { %v1304_v12 = vadd.f32 %v4320_v30, %v1265_v6  ;;  %v1266_v14 = vmul.f32 %v3866_v11, %v4315_v17  ;;  %v1156_v15 = vpop.f32.mrb[11].mxu0 }
 0x126   : > { %v1302_v16 = vadd.f32 %v4320_v30, %v1263_v10  ;;  %v1264_v18 = vmul.f32 %v4315_v17, %v1156_v15  ;;  %3893 = vmatprep.mubr.msk.bf16.mxu1 %vm1382_vm2, %v1360_v9 }
 0x127   : > { %v1305_v19 = vadd.f32 %v4320_v30, %v1266_v14  ;;  %3894 = vmatmul.mubr.msk.bf16.gmra.mrb[20].mxu1 %vm1382_vm2, %v1361_v5  ;;  %v1336_v21 = vmax.f32 %v1304_v12, 0.0 }
 0x128   : > { %v1303_v20 = vadd.f32 %v4320_v30, %v1264_v18  ;;  %v1334_v24 = vmax.f32 %v1302_v16, 0.0 }
 0x129   : > { %v1337_v22 = vmax.f32 %v1305_v19, 0.0 }
 0x12a   : > { %v1335_v25 = vmax.f32 %v1303_v20, 0.0  ;;  %v3869_v26 = vpop.f32.mrb[12].mxu0  ;;  %v4384_v51 = vpop.f32.mrb[12].mxu1 }
 0x12b   : > { %v1363_v28 = vpack.c.bf16 %v1337_v22, %v1336_v21  ;;  %v1269_v29 = vmul.f32 %v3869_v26, %v4315_v17  ;;  %v1169_v31 = vpop.f32.mrb[13].mxu0  ;;  %v4387_v55 = vpop.f32.mrb[13].mxu1 }
 0x12c   : > { %v1362_v2 = vpack.c.bf16 %v1335_v25, %v1334_v24  ;;  %v1267_v33 = vmul.f32 %v4315_v17, %v1169_v31  ;;  %v3870_v34 = vpop.f32.mrb[14].mxu0  ;;  %v4390_v58 = vpop.f32.mrb[14].mxu1 }
 0x12d   : > { %v1308_v37 = vadd.f32 %v4320_v30, %v1269_v29  ;;  %v1270_v38 = vmul.f32 %v3870_v34, %v4315_v17  ;;  %v1172_v36 = vpop.f32.mrb[15].mxu0  ;;  %v4394_v0 = vpop.f32.mrb[15].mxu1 }
 0x12e   : > { %v1306_v41 = vadd.f32 %v4320_v30, %v1267_v33  ;;  %v1268_v42 = vmul.f32 %v4315_v17, %v1172_v36  ;;  %3897 = vmatprep.mubr.msk.bf16.mxu1 %vm1382_vm2, %v1362_v2 }
 0x12f   : > { %v1309_v44 = vadd.f32 %v4320_v30, %v1270_v38  ;;  %3898 = vmatmul.mubr.msk.bf16.gmra.mrb[24].mxu1 %vm1382_vm2, %v1363_v28  ;;  %v1340_v46 = vmax.f32 %v1308_v37, 0.0 }
 0x130   : > { %v1307_v45 = vadd.f32 %v4320_v30, %v1268_v42  ;;  %v1338_v49 = vmax.f32 %v1306_v41, 0.0 }
 0x131   : > { %v1341_v48 = vmax.f32 %v1309_v44, 0.0 }
 0x132   : > { %v1339_v4 = vmax.f32 %v1307_v45, 0.0  ;;  %v3873_v50 = vpop.f32.mrb[16].mxu0 }
 0x133   : > { %v1365_v52 = vpack.c.bf16 %v1341_v48, %v1340_v46  ;;  %v1194_v53 = vadd.f32 %v3873_v50, %v4329_v39  ;;  %v1185_v54 = vpop.f32.mrb[17].mxu0 }
 0x134   : > { %v1364_v56 = vpack.c.bf16 %v1339_v4, %v1338_v49  ;;  %v1186_v13 = vadd.f32 %v1185_v54, %v4332_v40  ;;  %v3874_v57 = vpop.f32.mrb[18].mxu0 }
 0x135   : > { %v1273_v60 = vmul.f32 %v4315_v17, %v1194_v53  ;;  %v1197_v61 = vadd.f32 %v3874_v57, %v4334_v43  ;;  %v1188_v63 = vpop.f32.mrb[19].mxu0 }
 0x136   : > { %3901 = vmatprep.mubr.msk.bf16.mxu1 %vm1382_vm2, %v1364_v56  ;;  %v1271_v39 = vmul.f32 %v4315_v17, %v1186_v13  ;;  %v1189_v1 = vadd.f32 %v1188_v63, %v4336_v47 }
 0x137   : > { %3902 = vmatmul.mubr.msk.bf16.gmra.mrb[28].mxu1 %vm1382_vm2, %v1365_v52  ;;  %v1312_v40 = vadd.f32 %v4320_v30, %v1273_v60  ;;  %v1274_v5 = vmul.f32 %v4315_v17, %v1197_v61 }
 0x138   : > { %v1310_v6 = vadd.f32 %v4320_v30, %v1271_v39  ;;  %v1272_v7 = vmul.f32 %v4315_v17, %v1189_v1 }
 0x139   : > { %v1344_v43 = vmax.f32 %v1312_v40, 0.0  ;;  %v1313_v9 = vadd.f32 %v4320_v30, %v1274_v5 }
 0x13a   : > { %v1342_v10 = vmax.f32 %v1310_v6, 0.0  ;;  %v1311_v11 = vadd.f32 %v4320_v30, %v1272_v7  ;;  %v3877_v12 = vpop.f32.mrb[20].mxu0 }
 0x13b   : > { %v1345_v14 = vmax.f32 %v1313_v9, 0.0  ;;  %v1210_v47 = vadd.f32 %v3877_v12, %v4348_v59  ;;  %v1201_v15 = vpop.f32.mrb[21].mxu0 }
 0x13c   : > { %v1343_v16 = vmax.f32 %v1311_v11, 0.0  ;;  %v1202_v18 = vadd.f32 %v1201_v15, %v4350_v62  ;;  %v3878_v19 = vpop.f32.mrb[22].mxu0 }
 0x13d   : > { %v1367_v20 = vpack.c.bf16 %v1345_v14, %v1344_v43  ;;  %v1277_v21 = vmul.f32 %v4315_v17, %v1210_v47  ;;  %v1213_v22 = vadd.f32 %v3878_v19, %v4352_v3  ;;  %v1204_v24 = vpop.f32.mrb[23].mxu0 }
 0x13e   : > { %v1366_v25 = vpack.c.bf16 %v1343_v16, %v1342_v10  ;;  %v1275_v26 = vmul.f32 %v4315_v17, %v1202_v18  ;;  %v1205_v28 = vadd.f32 %v1204_v24, %v4355_v8 }
 0x13f   : > { %v1316_v29 = vadd.f32 %v4320_v30, %v1277_v21  ;;  %v1278_v59 = vmul.f32 %v4315_v17, %v1213_v22 }
 0x140   : > { %v1314_v31 = vadd.f32 %v4320_v30, %v1275_v26  ;;  %v1276_v62 = vmul.f32 %v4315_v17, %v1205_v28  ;;  %3905 = vmatprep.mubr.msk.bf16.mxu1 %vm1382_vm2, %v1366_v25 }
 0x141   : > { %v1348_v2 = vmax.f32 %v1316_v29, 0.0  ;;  %v1317_v33 = vadd.f32 %v4320_v30, %v1278_v59  ;;  %3906 = vmatmul.mubr.msk.bf16.gmra.mrb[32].mxu1 %vm1382_vm2, %v1367_v20 }
 0x142   : > { %v1346_v3 = vmax.f32 %v1314_v31, 0.0  ;;  %v1315_v34 = vadd.f32 %v4320_v30, %v1276_v62  ;;  %v3881_v37 = vpop.f32.mrb[24].mxu0 }
 0x143   : > { %v1349_v8 = vmax.f32 %v1317_v33, 0.0  ;;  %v1226_v38 = vadd.f32 %v3881_v37, %v4366_v23  ;;  %v1217_v36 = vpop.f32.mrb[25].mxu0 }
 0x144   : > { %v1347_v41 = vmax.f32 %v1315_v34, 0.0  ;;  %v1218_v42 = vadd.f32 %v1217_v36, %v4368_v27  ;;  %v3882_v44 = vpop.f32.mrb[26].mxu0 }
 0x145   : > { %v1369_v45 = vpack.c.bf16 %v1349_v8, %v1348_v2  ;;  %v1281_v46 = vmul.f32 %v4315_v17, %v1226_v38  ;;  %v1229_v48 = vadd.f32 %v3882_v44, %v4371_v32  ;;  %v1220_v49 = vpop.f32.mrb[27].mxu0 }
 0x146   : > { %v1368_v4 = vpack.c.bf16 %v1347_v41, %v1346_v3  ;;  %v1279_v50 = vmul.f32 %v4315_v17, %v1218_v42  ;;  %v1221_v52 = vadd.f32 %v1220_v49, %v4374_v35 }
 0x147   : > { %v1320_v53 = vadd.f32 %v4320_v30, %v1281_v46  ;;  %v1282_v23 = vmul.f32 %v4315_v17, %v1229_v48 }
 0x148   : > { %v1318_v54 = vadd.f32 %v4320_v30, %v1279_v50  ;;  %v1280_v27 = vmul.f32 %v4315_v17, %v1221_v52  ;;  %3909 = vmatprep.mubr.msk.bf16.mxu1 %vm1382_vm2, %v1368_v4 }
 0x149   : > { %v1352_v56 = vmax.f32 %v1320_v53, 0.0  ;;  %v1321_v13 = vadd.f32 %v4320_v30, %v1282_v23  ;;  %3910 = vmatmul.mubr.msk.bf16.gmra.mrb[36].mxu1 %vm1382_vm2, %v1369_v45 }
 0x14a   : > { %v1350_v32 = vmax.f32 %v1318_v54, 0.0  ;;  %v1319_v57 = vadd.f32 %v4320_v30, %v1280_v27  ;;  %v3885_v60 = vpop.f32.mrb[28].mxu0 }
 0x14b   : > { %v1353_v35 = vmax.f32 %v1321_v13, 0.0  ;;  %v1242_v61 = vadd.f32 %v3885_v60, %v4384_v51  ;;  %v1233_v63 = vpop.f32.mrb[29].mxu0 }
 0x14c   : > { %v1351_v39 = vmax.f32 %v1319_v57, 0.0  ;;  %v1234_v1 = vadd.f32 %v1233_v63, %v4387_v55  ;;  %v3886_v40 = vpop.f32.mrb[30].mxu0 }
 0x14d   : > { %v1371_v5 = vpack.c.bf16 %v1353_v35, %v1352_v56  ;;  %v1285_v6 = vmul.f32 %v4315_v17, %v1242_v61  ;;  %v1245_v7 = vadd.f32 %v3886_v40, %v4390_v58  ;;  %v1236_v43 = vpop.f32.mrb[31].mxu0 }
 0x14e   : > { %v1370_v9 = vpack.c.bf16 %v1351_v39, %v1350_v32  ;;  %v1283_v10 = vmul.f32 %v4315_v17, %v1234_v1  ;;  %v1237_v11 = vadd.f32 %v1236_v43, %v4394_v0 }
 0x14f   : > { %v1324_v12 = vadd.f32 %v4320_v30, %v1285_v6  ;;  %v1286_v51 = vmul.f32 %v4315_v17, %v1245_v7 }
 0x150   : > { %v1322_v14 = vadd.f32 %v4320_v30, %v1283_v10  ;;  %v1284_v55 = vmul.f32 %v4315_v17, %v1237_v11  ;;  %3913 = vmatprep.mubr.msk.bf16.mxu1 %vm1382_vm2, %v1370_v9 }
 0x151   : > { %v1356_v47 = vmax.f32 %v1324_v12, 0.0  ;;  %v1325_v15 = vadd.f32 %v4320_v30, %v1286_v51  ;;  %3914 = vmatmul.mubr.msk.bf16.gmra.mrb[40].mxu1 %vm1382_vm2, %v1371_v5 }
 0x152   : > { %v1354_v58 = vmax.f32 %v1322_v14, 0.0  ;;  %v1323_v16 = vadd.f32 %v4320_v30, %v1284_v55 }
 0x153   : > { %v1357_v18 = vmax.f32 %v1325_v15, 0.0 }
 0x154   : > { %v1355_v0 = vmax.f32 %v1323_v16, 0.0 }
 0x155   : > { %v1373_v19 = vpack.c.bf16 %v1357_v18, %v1356_v47 }
 0x156   : > { %v1372_v20 = vpack.c.bf16 %v1355_v0, %v1354_v58 }
 0x158   : > { %3917 = vmatprep.mubr.msk.bf16.mxu1 %vm1382_vm2, %v1372_v20 }
 0x159   : > { %3918 = vmatmul.mubr.msk.bf16.gmra.mrb[44].mxu1 %vm1382_vm2, %v1373_v19 }
 0x1f2   : > { %v4450_v21 = vpop.f32.mrb[16].mxu1 }
 0x1f3   : > { %1878 = vrot.lane.b32.xlu0 %v4450_v21, %s3984_s15  ;;  %1628 = vrot.lane.b32.xlu1 %v4450_v21, %s3985_s16  ;;  %v4456_v17 = vpop.f32.mrb[17].mxu1  ;;  %v2058_v25 = vrot.slane %v4450_v21, 1 }
 0x1f4   : > { %v4458_v30 = vpop.f32.mrb[18].mxu1  ;;  %v2055_v28 = vrot.slane %v4456_v17, 1 }
 0x1f5   : > { %v4460_v22 = vpop.f32.mrb[19].mxu1  ;;  %v2059_v24 = vrot.slane %v4458_v30, 1 }
 0x1f6   : > { %v2056_v26 = vrot.slane %v4460_v22, 1 }
 0x1f7   : > { %2286 = vrot.lane.b32.xlu0 %v4450_v21, %s3986_s17  ;;  %1630 = vrot.lane.b32.xlu1 %v4458_v30, %s3985_s16  ;;  %v2060_v29 = vsel %vm2054_vm3, %v2058_v25, %v2059_v24 }
 0x1f8   : > { %v2057_v59 = vsel %vm2054_vm3, %v2055_v28, %v2056_v26 }
 0x1fa   : > { %v4472_v31 = vpop.f32.mrb[20].mxu1 }
 0x1fb   : > { %2667 = vrot.lane.b32.xlu0 %v4450_v21, %s3987_s18  ;;  %1880 = vrot.lane.b32.xlu1 %v4458_v30, %s3984_s15  ;;  %v4478_v62 = vpop.f32.mrb[21].mxu1  ;;  %v2064_v6 = vrot.slane %v4472_v31, 1 }
 0x1fc   : > { %v4480_v2 = vpop.f32.mrb[22].mxu1  ;;  %v2061_v34 = vrot.slane %v4478_v62, 1 }
 0x1fd   : > { %v4482_v33 = vpop.f32.mrb[23].mxu1  ;;  %v4607_v63 = vrot.slane %v4480_v2, 1 }
 0x1fe   : > { %v4485_v3 = vrot.slane %v4482_v33, 1 }
 0x1ff   : > { %2847 = vrot.lane.b32.xlu0 %v4450_v21, %s3988_s19  ;;  %2288 = vrot.lane.b32.xlu1 %v4458_v30, %s3986_s17  ;;  %v4632_v9 = vsel %vm2054_vm3, %v2064_v6, %v4607_v63 }
 0x200   : > { %v4494_v37 = vsel %vm2054_vm3, %v2061_v34, %v4485_v3 }
 0x202   : > { %v4496_v8 = vpop.f32.mrb[24].mxu1 }
 0x203   : > { %1624 = vrot.lane.b32.xlu0 %v4456_v17, %s3985_s16  ;;  %2669 = vrot.lane.b32.xlu1 %v4458_v30, %s3987_s18  ;;  %v4502_v38 = vpop.f32.mrb[25].mxu1  ;;  %v2070_v6 = vrot.slane %v4496_v8, 1 }
 0x204   : > { %v4504_v36 = vpop.f32.mrb[26].mxu1 }
 0x205   : > { %v4506_v41 = vpop.f32.mrb[27].mxu1 }
 0x207   : > { %1874 = vrot.lane.b32.xlu0 %v4456_v17, %s3984_s15  ;;  %2849 = vrot.lane.b32.xlu1 %v4458_v30, %s3988_s19 }
 0x20a   : > { %v4512_v42 = vpop.f32.mrb[28].mxu1 }
 0x20b   : > { %2282 = vrot.lane.b32.xlu0 %v4456_v17, %s3986_s17  ;;  %1876 = vrot.lane.b32.xlu1 %v4460_v22, %s3984_s15  ;;  %v4518_v44 = vpop.f32.mrb[29].mxu1 }
 0x20c   : > { %v4520_v45 = vpop.f32.mrb[30].mxu1 }
 0x20d   : > { %v4522_v46 = vpop.f32.mrb[31].mxu1 }
 0x20f   : > { %2284 = vrot.lane.b32.xlu1 %v4460_v22, %s3986_s17  ;;  %1626 = vrot.lane.b32.xlu0 %v4460_v22, %s3985_s16 }
 0x213   : > { %2106 = vrot.lane.b32.xlu1 %v2059_v24, %s3989_s20  ;;  %2104 = vrot.lane.b32.xlu0 %v2060_v29, %s3989_s20 }
 0x214   : > { %v4546_v48 = vpop.f32.mrb[32].mxu1 }
 0x215   : > { %v4548_v49 = vpop.f32.mrb[33].mxu1 }
 0x216   : > { %v4554_v4 = vpop.f32.mrb[34].mxu1 }
 0x217   : > { %2483 = vrot.lane.b32.xlu1 %v2059_v24, %s3990_s22  ;;  %2481 = vrot.lane.b32.xlu0 %v2060_v29, %s3990_s22  ;;  %v4556_v50 = vpop.f32.mrb[35].mxu1 }
 0x21b   : > { %3029 = vrot.lane.b32.xlu1 %v2059_v24, %s3991_s23  ;;  %3027 = vrot.lane.b32.xlu0 %v2060_v29, %s3991_s23 }
 0x21c   : > { %v4562_v52 = vpop.f32.mrb[36].mxu1 }
 0x21d   : > { %v4564_v53 = vpop.f32.mrb[37].mxu1 }
 0x21e   : > { %v4570_v23 = vpop.f32.mrb[38].mxu1 }
 0x21f   : > { %2102 = vrot.lane.b32.xlu1 %v2056_v26, %s3989_s20  ;;  %2100 = vrot.lane.b32.xlu0 %v2057_v59, %s3989_s20  ;;  %v4572_v54 = vpop.f32.mrb[39].mxu1 }
 0x223   : > { %2479 = vrot.lane.b32.xlu1 %v2056_v26, %s3990_s22  ;;  %2477 = vrot.lane.b32.xlu0 %v2057_v59, %s3990_s22 }
 0x224   : > { %v4578_v27 = vpop.f32.mrb[40].mxu1 }
 0x225   : > { %v4580_v56 = vpop.f32.mrb[41].mxu1 }
 0x226   : > { %v4586_v13 = vpop.f32.mrb[42].mxu1 }
 0x227   : > { %1636 = vrot.lane.b32.xlu0 %v4472_v31, %s3985_s16  ;;  %1638 = vrot.lane.b32.xlu1 %v4480_v2, %s3985_s16  ;;  %v4588_v32 = vpop.f32.mrb[43].mxu1 }
 0x22b   : > { %1886 = vrot.lane.b32.xlu0 %v4472_v31, %s3984_s15  ;;  %1888 = vrot.lane.b32.xlu1 %v4480_v2, %s3984_s15 }
 0x22c   : > { %v4594_v57 = vpop.f32.mrb[44].mxu1 }
 0x22d   : > { %v4596_v60 = vpop.f32.mrb[45].mxu1  ;;  %v2474_v39 = vrot.slane %v4594_v57, 1 }
 0x22e   : > { %v4602_v35 = vpop.f32.mrb[46].mxu1  ;;  %v2097_v5 = vrot.slane %v4596_v60, 1 }
 0x22f   : > { %2294 = vrot.lane.b32.xlu0 %v4472_v31, %s3986_s17  ;;  %2296 = vrot.lane.b32.xlu1 %v4480_v2, %s3986_s17  ;;  %v4604_v61 = vpop.f32.mrb[47].mxu1  ;;  %v4615_v1 = vrot.slane %v4602_v35, 1 }
 0x230   : > { %v4618_v40 = vrot.slane %v4604_v61, 1 }
 0x231   : > { %5872 = vst [vmem:[#allocation3_spill] sm:$0xff] %v4615_v1  ;;  %v4624_v7 = vsel %vm2054_vm3, %v2474_v39, %v4615_v1 }
 0x232   : > { %5873 = vst [vmem:[#allocation4_spill] sm:$0xff] %v4618_v40  ;;  %5874 = vst [vmem:[#allocation5_spill] sm:$0xff] %v4624_v7  ;;  %v4628_v43 = vsel %vm2054_vm3, %v2097_v5, %v4618_v40  ;;  %v4721_v5 = vrot.slane %v4504_v36, 1 }
 0x233   : > { %2675 = vrot.lane.b32.xlu0 %v4472_v31, %s3987_s18  ;;  %2677 = vrot.lane.b32.xlu1 %v4480_v2, %s3987_s18  ;;  %5875 = vst [vmem:[#allocation6_spill] sm:$0xff] %v4628_v43 }
 0x237   : > { %2855 = vrot.lane.b32.xlu0 %v4472_v31, %s3988_s19  ;;  %2857 = vrot.lane.b32.xlu1 %v4480_v2, %s3988_s19 }
 0x23b   : > { %1632 = vrot.lane.b32.xlu0 %v4478_v62, %s3985_s16  ;;  %1634 = vrot.lane.b32.xlu1 %v4482_v33, %s3985_s16 }
 0x23f   : > { %1882 = vrot.lane.b32.xlu0 %v4478_v62, %s3984_s15  ;;  %1884 = vrot.lane.b32.xlu1 %v4482_v33, %s3984_s15 }
 0x243   : > { %2290 = vrot.lane.b32.xlu0 %v4478_v62, %s3986_s17  ;;  %2292 = vrot.lane.b32.xlu1 %v4482_v33, %s3986_s17 }
 0x247   : > { %2671 = vrot.lane.b32.xlu0 %v4478_v62, %s3987_s18  ;;  %2673 = vrot.lane.b32.xlu1 %v4482_v33, %s3987_s18 }
 0x24b   : > { %2851 = vrot.lane.b32.xlu0 %v4478_v62, %s3988_s19  ;;  %2853 = vrot.lane.b32.xlu1 %v4482_v33, %s3988_s19 }
 0x24f   : > { %2112 = vrot.lane.b32.xlu0 %v4632_v9, %s3989_s20  ;;  %2114 = vrot.lane.b32.xlu1 %v4607_v63, %s3989_s20 }
 0x253   : > { %2489 = vrot.lane.b32.xlu0 %v4632_v9, %s3990_s22  ;;  %2491 = vrot.lane.b32.xlu1 %v4607_v63, %s3990_s22 }
 0x257   : > { %2110 = vrot.lane.b32.xlu1 %v4485_v3, %s3989_s20  ;;  %2108 = vrot.lane.b32.xlu0 %v4494_v37, %s3989_s20 }
 0x25b   : > { %2487 = vrot.lane.b32.xlu1 %v4485_v3, %s3990_s22  ;;  %2485 = vrot.lane.b32.xlu0 %v4494_v37, %s3990_s22 }
 0x25f   : > { %3033 = vrot.lane.b32.xlu1 %v4485_v3, %s3991_s23  ;;  %3031 = vrot.lane.b32.xlu0 %v4494_v37, %s3991_s23 }
 0x263   : > { %1644 = vrot.lane.b32.xlu0 %v4496_v8, %s3985_s16  ;;  %1646 = vrot.lane.b32.xlu1 %v4504_v36, %s3985_s16 }
 0x265   : > { %v4658_v10 = vpop.permute.xlu0 %1878  ;;  %v1629_v11 = vpop.permute.xlu1 %1628 }
 0x266   : > { %1722 = vst.msk [vmem:[#allocation2 + $0x10] sm:$0xff] %vm822_vm1, %v1629_v11 }
 0x267   : > { %1894 = vrot.lane.b32.xlu0 %v4496_v8, %s3984_s15  ;;  %1896 = vrot.lane.b32.xlu1 %v4504_v36, %s3984_s15 }
 0x269   : > { %v4665_v12 = vpop.permute.xlu0 %2286  ;;  %v1631_v51 = vpop.permute.xlu1 %1630 }
 0x26a   : > { %1723 = vst.msk [vmem:[#allocation2 + $0x18] sm:$0xff] %vm822_vm1, %v1631_v51 }
 0x26b   : > { %2302 = vrot.lane.b32.xlu0 %v4496_v8, %s3986_s17  ;;  %2304 = vrot.lane.b32.xlu1 %v4504_v36, %s3986_s17 }
 0x26d   : > { %v4672_v14 = vpop.permute.xlu0 %2667  ;;  %v4674_v55 = vpop.permute.xlu1 %1880 }
 0x26f   : > { %2683 = vrot.lane.b32.xlu0 %v4496_v8, %s3987_s18  ;;  %2685 = vrot.lane.b32.xlu1 %v4504_v36, %s3987_s18 }
 0x271   : > { %v1753_v47 = vld [vmem:[#allocation2 + $0x11] sm:$0xff]  ;;  %v1754_v15 = vld [vmem:[#allocation2 + $0x19] sm:$0x7f]  ;;  %v4680_v58 = vpop.permute.xlu0 %2847  ;;  %v4682_v16 = vpop.permute.xlu1 %2288 }
 0x272   : > { %v1783_v18 = vadd.f32 %v1753_v47, %v4456_v17  ;;  %v1784_v0 = vadd.f32 %v1754_v15, %v4460_v22 }
 0x273   : > { %2863 = vrot.lane.b32.xlu0 %v4496_v8, %s3988_s19  ;;  %2865 = vrot.lane.b32.xlu1 %v4504_v36, %s3988_s19 }
 0x274   : > { %1813 = vst.msk [vmem:[#allocation2 + $0x11] sm:$0xff] %vm822_vm1, %v1783_v18 }
 0x275   : > { %1815 = vst.msk [vmem:[#allocation2 + $0x19] sm:$0x7f] %vm1814_vm4, %v1784_v0  ;;  %v1625_v19 = vpop.permute.xlu0 %1624  ;;  %v4692_v20 = vpop.permute.xlu1 %2669 }
 0x276   : > { %1720 = vst.msk [vmem:[#allocation2] sm:$0xff] %vm822_vm1, %v1625_v19  ;;  %v4734_v19 = vsel %vm2054_vm3, %v2070_v6, %v4721_v5 }
 0x277   : > { %1640 = vrot.lane.b32.xlu0 %v4502_v38, %s3985_s16  ;;  %1642 = vrot.lane.b32.xlu1 %v4506_v41, %s3985_s16  ;;  %5876 = vst [vmem:[#allocation7_spill] sm:$0xff] %v4734_v19 }
 0x279   : > { %v1875_v17 = vpop.permute.xlu0 %1874  ;;  %v4699_v22 = vpop.permute.xlu1 %2849 }
 0x27b   : > { %v1844_v24 = vld [vmem:[#allocation2 + $0x10] sm:$0xff]  ;;  %1890 = vrot.lane.b32.xlu0 %v4502_v38, %s3984_s15  ;;  %1892 = vrot.lane.b32.xlu1 %v4506_v41, %s3984_s15 }
 0x27c   : > { %v1964_v25 = vadd.f32 %v1875_v17, %v1844_v24  ;;  %v1845_v29 = vld [vmem:[#allocation2 + $0x18] sm:$0xff] }
 0x27d   : > { %v2283_v26 = vpop.permute.xlu0 %2282  ;;  %v1877_v28 = vpop.permute.xlu1 %1876 }
 0x27e   : > { %1994 = vst.msk [vmem:[#allocation2 + $0x10] sm:$0xff] %vm822_vm1, %v1964_v25  ;;  %v1965_v59 = vadd.f32 %v1877_v28, %v1845_v29  ;;  %v4747_v25 = vrot.slane %v4506_v41, 1 }
 0x27f   : > { %2298 = vrot.lane.b32.xlu0 %v4502_v38, %s3986_s17  ;;  %2300 = vrot.lane.b32.xlu1 %v4506_v41, %s3986_s17 }
 0x280   : > { %1995 = vst.msk [vmem:[#allocation2 + $0x18] sm:$0xff] %vm822_vm1, %v1965_v59 }
 0x281   : > { %v2285_v3 = vpop.permute.xlu1 %2284  ;;  %v1627_v34 = vpop.permute.xlu0 %1626 }
 0x282   : > { %1721 = vst.msk [vmem:[#allocation2 + $0x8] sm:$0xff] %vm822_vm1, %v1627_v34 }
 0x283   : > { %2679 = vrot.lane.b32.xlu0 %v4502_v38, %s3987_s18  ;;  %2681 = vrot.lane.b32.xlu1 %v4506_v41, %s3987_s18 }
 0x285   : > { %v4716_v37 = vpop.permute.xlu1 %2106  ;;  %v4718_v39 = vpop.permute.xlu0 %2104  ;;  %v2024_v59 = vld [vmem:[#allocation2 + $0x10] sm:$0xff] }
 0x287   : > { %2859 = vrot.lane.b32.xlu0 %v4502_v38, %s3988_s19  ;;  %2861 = vrot.lane.b32.xlu1 %v4506_v41, %s3988_s19  ;;  %v2025_v29 = vld [vmem:[#allocation2 + $0x18] sm:$0x7f] }
 0x289   : > { %v2250_v11 = vld [vmem:[#allocation2 + $0x1] sm:$0xff]  ;;  %v2251_v51 = vld [vmem:[#allocation2 + $0x9] sm:$0x7f]  ;;  %v4728_v47 = vpop.permute.xlu1 %2483  ;;  %v4730_v15 = vpop.permute.xlu0 %2481 }
 0x28a   : > { %v2378_v18 = vadd.f32 %v2283_v26, %v2250_v11  ;;  %v2379_v0 = vadd.f32 %v2285_v3, %v2251_v51  ;;  %v2067_v26 = vrot.slane %v4502_v38, 1 }
 0x28b   : > { %2120 = vrot.lane.b32.xlu0 %v4734_v19, %s3989_s20  ;;  %2122 = vrot.lane.b32.xlu1 %v4721_v5, %s3989_s20 }
 0x28c   : > { %2410 = vst.msk [vmem:[#allocation2 + $0x1] sm:$0xff] %vm822_vm1, %v2378_v18  ;;  %v4756_v11 = vsel %vm2054_vm3, %v2067_v26, %v4747_v25 }
 0x28d   : > { %2411 = vst.msk [vmem:[#allocation2 + $0x9] sm:$0x7f] %vm1814_vm4, %v2379_v0  ;;  %v4742_v17 = vpop.permute.xlu1 %3029  ;;  %v4744_v24 = vpop.permute.xlu0 %3027 }
 0x28f   : > { %2497 = vrot.lane.b32.xlu0 %v4734_v19, %s3990_s22  ;;  %2499 = vrot.lane.b32.xlu1 %v4721_v5, %s3990_s22 }
 0x291   : > { %v2103_v28 = vpop.permute.xlu1 %2102  ;;  %v2101_v3 = vpop.permute.xlu0 %2100 }
 0x292   : > { %v2191_v34 = vadd.f32 %v2103_v28, %v2025_v29  ;;  %v2190_v6 = vadd.f32 %v2101_v3, %v2024_v59 }
 0x293   : > { %2118 = vrot.lane.b32.xlu1 %v4747_v25, %s3989_s20  ;;  %2116 = vrot.lane.b32.xlu0 %v4756_v11, %s3989_s20  ;;  %v2442_v0 = vld [vmem:[#allocation2] sm:$0xff] }
 0x294   : > { %2221 = vst.msk [vmem:[#allocation2 + $0x18] sm:$0x7f] %vm1814_vm4, %v2191_v34  ;;  %v2443_v51 = vld [vmem:[#allocation2 + $0x8] sm:$0x7f] }
 0x295   : > { %2220 = vst.msk [vmem:[#allocation2 + $0x10] sm:$0xff] %vm822_vm1, %v2190_v6  ;;  %v2480_v18 = vpop.permute.xlu1 %2479  ;;  %v2478_v43 = vpop.permute.xlu0 %2477 }
 0x296   : > { %v2574_v28 = vadd.f32 %v2480_v18, %v2443_v51  ;;  %v2573_v29 = vadd.f32 %v2478_v43, %v2442_v0 }
 0x297   : > { %2495 = vrot.lane.b32.xlu1 %v4747_v25, %s3990_s22  ;;  %2493 = vrot.lane.b32.xlu0 %v4756_v11, %s3990_s22 }
 0x298   : > { %2606 = vst.msk [vmem:[#allocation2 + $0x8] sm:$0x7f] %vm1814_vm4, %v2574_v28 }
 0x299   : > { %2605 = vst.msk [vmem:[#allocation2] sm:$0xff] %vm822_vm1, %v2573_v29  ;;  %v1637_v26 = vpop.permute.xlu0 %1636  ;;  %v1639_v59 = vpop.permute.xlu1 %1638 }
 0x29a   : > { %1726 = vst.msk [vmem:[#allocation2 + $0x30] sm:$0xff] %vm822_vm1, %v1637_v26  ;;  %1727 = vst.msk [vmem:[#allocation2 + $0x38] sm:$0xff] %vm822_vm1, %v1639_v59 }
 0x29b   : > { %v2253_v3 = vld [vmem:[#allocation2 + $0x19] sm:$0x7f]  ;;  %1652 = vrot.lane.b32.xlu0 %v4512_v42, %s3985_s16  ;;  %1654 = vrot.lane.b32.xlu1 %v4520_v45, %s3985_s16 }
 0x29c   : > { %v2252_v34 = vld [vmem:[#allocation2 + $0x11] sm:$0xff]  ;;  %v2381_v43 = vadd.f32 %v4682_v16, %v2253_v3 }
 0x29d   : > { %v2380_v6 = vadd.f32 %v4665_v12, %v2252_v34  ;;  %v4778_v51 = vpop.permute.xlu0 %1886  ;;  %v4780_v18 = vpop.permute.xlu1 %1888 }
 0x29e   : > { %2413 = vst.msk [vmem:[#allocation2 + $0x19] sm:$0x7f] %vm1814_vm4, %v2381_v43 }
 0x29f   : > { %2412 = vst.msk [vmem:[#allocation2 + $0x11] sm:$0xff] %vm822_vm1, %v2380_v6  ;;  %v2638_v0 = vld [vmem:[#allocation2 + $0x9] sm:$0x7f]  ;;  %1902 = vrot.lane.b32.xlu0 %v4512_v42, %s3984_s15  ;;  %1904 = vrot.lane.b32.xlu1 %v4520_v45, %s3984_s15 }
 0x2a0   : > { %v2637_v28 = vld [vmem:[#allocation2 + $0x1] sm:$0xff]  ;;  %v2758_v16 = vadd.f32 %v4692_v20, %v2638_v0 }
 0x2a1   : > { %v2757_v12 = vadd.f32 %v4672_v14, %v2637_v28  ;;  %v1757_v29 = vld [vmem:[#allocation2 + $0x31] sm:$0xff]  ;;  %v1758_v26 = vld [vmem:[#allocation2 + $0x39] sm:$0x7f]  ;;  %v4790_v59 = vpop.permute.xlu0 %2294  ;;  %v4792_v3 = vpop.permute.xlu1 %2296 }
 0x2a2   : > { %2788 = vst.msk [vmem:[#allocation2 + $0x9] sm:$0x7f] %vm1814_vm4, %v2758_v16  ;;  %v1787_v34 = vadd.f32 %v1757_v29, %v4478_v62  ;;  %v1788_v43 = vadd.f32 %v1758_v26, %v4482_v33 }
 0x2a3   : > { %2787 = vst.msk [vmem:[#allocation2 + $0x1] sm:$0xff] %vm822_vm1, %v2757_v12  ;;  %2310 = vrot.lane.b32.xlu0 %v4512_v42, %s3986_s17  ;;  %2312 = vrot.lane.b32.xlu1 %v4520_v45, %s3986_s17 }
 0x2a4   : > { %1818 = vst.msk [vmem:[#allocation2 + $0x31] sm:$0xff] %vm822_vm1, %v1787_v34 }
 0x2a5   : > { %1819 = vst.msk [vmem:[#allocation2 + $0x39] sm:$0x7f] %vm1814_vm4, %v1788_v43  ;;  %v4804_v20 = vpop.permute.xlu0 %2675  ;;  %v4806_v6 = vpop.permute.xlu1 %2677 }
 0x2a6   : > { %v2444_v14 = vld [vmem:[#allocation2 + $0x10] sm:$0xff]  ;;  %v2445_v0 = vld [vmem:[#allocation2 + $0x18] sm:$0x7f] }
 0x2a7   : > { %v2575_v62 = vadd.f32 %v4730_v15, %v2444_v14  ;;  %v2576_v33 = vadd.f32 %v4728_v47, %v2445_v0  ;;  %2691 = vrot.lane.b32.xlu0 %v4512_v42, %s3987_s18  ;;  %2693 = vrot.lane.b32.xlu1 %v4520_v45, %s3987_s18 }
 0x2a9   : > { %2607 = vst.msk [vmem:[#allocation2 + $0x10] sm:$0xff] %vm822_vm1, %v2575_v62  ;;  %v4816_v12 = vpop.permute.xlu0 %2855  ;;  %v4818_v29 = vpop.permute.xlu1 %2857 }
 0x2aa   : > { %2608 = vst.msk [vmem:[#allocation2 + $0x18] sm:$0x7f] %vm1814_vm4, %v2576_v33  ;;  %v2817_v28 = vld [vmem:[#allocation2] sm:$0xff]  ;;  %v2818_v16 = vld [vmem:[#allocation2 + $0x8] sm:$0xff] }
 0x2ab   : > { %v2937_v15 = vadd.f32 %v4680_v58, %v2817_v28  ;;  %v2938_v47 = vadd.f32 %v4699_v22, %v2818_v16  ;;  %2871 = vrot.lane.b32.xlu0 %v4512_v42, %s3988_s19  ;;  %2873 = vrot.lane.b32.xlu1 %v4520_v45, %s3988_s19  ;;  %v1848_v22 = vld [vmem:[#allocation2 + $0x30] sm:$0xff] }
 0x2ac   : > { %v1849_v14 = vld [vmem:[#allocation2 + $0x38] sm:$0xff] }
 0x2ad   : > { %2967 = vst.msk [vmem:[#allocation2] sm:$0xff] %vm822_vm1, %v2937_v15  ;;  %2968 = vst.msk [vmem:[#allocation2 + $0x8] sm:$0xff] %vm822_vm1, %v2938_v47  ;;  %v1633_v26 = vpop.permute.xlu0 %1632  ;;  %v1635_v34 = vpop.permute.xlu1 %1634 }
 0x2ae   : > { %1724 = vst.msk [vmem:[#allocation2 + $0x20] sm:$0xff] %vm822_vm1, %v1633_v26  ;;  %1725 = vst.msk [vmem:[#allocation2 + $0x28] sm:$0xff] %vm822_vm1, %v1635_v34 }
 0x2af   : > { %1648 = vrot.lane.b32.xlu0 %v4518_v44, %s3985_s16  ;;  %1650 = vrot.lane.b32.xlu1 %v4522_v46, %s3985_s16 }
 0x2b1   : > { %v1883_v58 = vpop.permute.xlu0 %1882  ;;  %v1885_v43 = vpop.permute.xlu1 %1884 }
 0x2b2   : > { %v1968_v0 = vadd.f32 %v1883_v58, %v1848_v22  ;;  %v1969_v62 = vadd.f32 %v1885_v43, %v1849_v14  ;;  %v2640_v14 = vld [vmem:[#allocation2 + $0x19] sm:$0x7f] }
 0x2b3   : > { %1898 = vrot.lane.b32.xlu0 %v4518_v44, %s3984_s15  ;;  %1900 = vrot.lane.b32.xlu1 %v4522_v46, %s3984_s15 }
 0x2b4   : > { %v2997_v33 = vld [vmem:[#allocation2] sm:$0xff]  ;;  %v2998_v28 = vld [vmem:[#allocation2 + $0x8] sm:$0x7f]  ;;  %1998 = vst.msk [vmem:[#allocation2 + $0x30] sm:$0xff] %vm822_vm1, %v1968_v0  ;;  %1999 = vst.msk [vmem:[#allocation2 + $0x38] sm:$0xff] %vm822_vm1, %v1969_v62 }
 0x2b5   : > { %v3117_v16 = vadd.f32 %v4744_v24, %v2997_v33  ;;  %v3118_v15 = vadd.f32 %v4742_v17, %v2998_v28  ;;  %v1755_v47 = vld [vmem:[#allocation2 + $0x21] sm:$0xff]  ;;  %v1756_v26 = vld [vmem:[#allocation2 + $0x29] sm:$0x7f]  ;;  %v4842_v34 = vpop.permute.xlu0 %2290  ;;  %v4844_v58 = vpop.permute.xlu1 %2292  ;;  %v2639_v17 = vld [vmem:[#allocation2 + $0x11] sm:$0xff] }
 0x2b6   : > { %v1785_v22 = vadd.f32 %v4450_v21, %v1755_v47  ;;  %v1786_v24 = vadd.f32 %v4458_v30, %v1756_v26  ;;  %v4859_v21 = vld [vmem:[%s5861_s11] ss:$0 sm:$0xff] }
 0x2b7   : > { %3147 = vst.msk [vmem:[#allocation2] sm:$0xff] %vm822_vm1, %v3117_v16  ;;  %2306 = vrot.lane.b32.xlu0 %v4518_v44, %s3986_s17  ;;  %2308 = vrot.lane.b32.xlu1 %v4522_v46, %s3986_s17 }
 0x2b8   : > { %3148 = vst.msk [vmem:[#allocation2 + $0x8] sm:$0x7f] %vm1814_vm4, %v3118_v15  ;;  %1817 = vst.msk [vmem:[#allocation2 + $0x29] sm:$0x7f] %vm1814_vm4, %v1786_v24 }
 0x2b9   : > { %1816 = vst.msk [vmem:[#allocation2 + $0x21] sm:$0xff] %vm822_vm1, %v1785_v22  ;;  %v2672_v43 = vpop.permute.xlu0 %2671  ;;  %v2674_v0 = vpop.permute.xlu1 %2673  ;;  %v4870_v22 = vrot.slane %v4520_v45, 1 }
 0x2ba   : > { %v2759_v62 = vadd.f32 %v2672_v43, %v2639_v17  ;;  %v2760_v33 = vadd.f32 %v2674_v0, %v2640_v14  ;;  %v2076_v43 = vrot.slane %v4512_v42, 1 }
 0x2bb   : > { %2687 = vrot.lane.b32.xlu0 %v4518_v44, %s3987_s18  ;;  %2689 = vrot.lane.b32.xlu1 %v4522_v46, %s3987_s18 }
 0x2bc   : > { %2789 = vst.msk [vmem:[#allocation2 + $0x11] sm:$0xff] %vm822_vm1, %v2759_v62 }
 0x2bd   : > { %2790 = vst.msk [vmem:[#allocation2 + $0x19] sm:$0x7f] %vm1814_vm4, %v2760_v33  ;;  %v2852_v16 = vpop.permute.xlu0 %2851  ;;  %v2854_v15 = vpop.permute.xlu1 %2853 }
 0x2be   : > { %v3177_v30 = vld [vmem:[#allocation2] sm:$0xff] }
 0x2bf   : > { %v3178_v28 = vld [vmem:[#allocation2 + $0x8] sm:$0xff]  ;;  %v3216_v47 = vadd.f32 %v4859_v21, %v3177_v30  ;;  %2867 = vrot.lane.b32.xlu0 %v4518_v44, %s3988_s19  ;;  %2869 = vrot.lane.b32.xlu1 %v4522_v46, %s3988_s19 }
 0x2c0   : > { %v3217_v26 = vadd.f32 %v4859_v21, %v3178_v28  ;;  %v1846_v24 = vld [vmem:[#allocation2 + $0x20] sm:$0xff]  ;;  %v1847_v17 = vld [vmem:[#allocation2 + $0x28] sm:$0xff] }
 0x2c1   : > { %v3578_v14 = vpack.c.bf16 %v3216_v47, %v3216_v47  ;;  %v1966_v62 = vadd.f32 %v4658_v10, %v1846_v24  ;;  %v1967_v33 = vadd.f32 %v4674_v55, %v1847_v17  ;;  %v4885_v30 = vpop.permute.xlu0 %2112  ;;  %v4887_v28 = vpop.permute.xlu1 %2114  ;;  %v4897_v47 = vsel %vm2054_vm3, %v2076_v43, %v4870_v22 }
 0x2c2   : > { %v3579_v0 = vpack.c.bf16 %v3217_v26, %v3217_v26  ;;  %5877 = vst [vmem:[#allocation8_spill] sm:$0xff] %v4897_v47 }
 0x2c3   : > { %3377 = vst.msk [vmem:[%s4876_s28] sm:$0xf] %vm3376_vm5, %v3578_v14  ;;  %v2819_v26 = vld [vmem:[#allocation2 + $0x10] sm:$0xff]  ;;  %2128 = vrot.lane.b32.xlu0 %v4897_v47, %s3989_s20  ;;  %2130 = vrot.lane.b32.xlu1 %v4870_v22, %s3989_s20 }
 0x2c4   : > { %3378 = vst.msk [vmem:[%s4876_s28 + $0x4] sm:$0xf] %vm3376_vm5, %v3579_v0  ;;  %v2820_v10 = vld [vmem:[#allocation2 + $0x18] sm:$0xff]  ;;  %v2939_v55 = vadd.f32 %v2852_v16, %v2819_v26  ;;  %v4908_v0 = vrot.slane %v4522_v46, 1  ;;  %v2073_v16 = vrot.slane %v4518_v44, 1  ;;  %v2028_v26 = vld [vmem:[#allocation2 + $0x30] sm:$0xff] }
 0x2c5   : > { %1996 = vst.msk [vmem:[#allocation2 + $0x20] sm:$0xff] %vm822_vm1, %v1966_v62  ;;  %1997 = vst.msk [vmem:[#allocation2 + $0x28] sm:$0xff] %vm822_vm1, %v1967_v33  ;;  %v2940_v24 = vadd.f32 %v2854_v15, %v2820_v10  ;;  %v4903_v17 = vpop.permute.xlu0 %2489  ;;  %v4905_v14 = vpop.permute.xlu1 %2491  ;;  %v2029_v15 = vld [vmem:[#allocation2 + $0x38] sm:$0x7f] }
 0x2c6   : > { %2969 = vst.msk [vmem:[#allocation2 + $0x10] sm:$0xff] %vm822_vm1, %v2939_v55  ;;  %v4919_v40 = vsel %vm2054_vm3, %v2073_v16, %v4908_v0 }
 0x2c7   : > { %2970 = vst.msk [vmem:[#allocation2 + $0x18] sm:$0xff] %vm822_vm1, %v2940_v24  ;;  %2505 = vrot.lane.b32.xlu0 %v4897_v47, %s3990_s22  ;;  %2507 = vrot.lane.b32.xlu1 %v4870_v22, %s3990_s22  ;;  %5878 = vst [vmem:[#allocation9_spill] sm:$0xff] %v4919_v40 }
 0x2c9   : > { %v2111_v33 = vpop.permute.xlu1 %2110  ;;  %v2109_v10 = vpop.permute.xlu0 %2108 }
 0x2ca   : > { %v2195_v1 = vadd.f32 %v2111_v33, %v2029_v15  ;;  %v2194_v7 = vadd.f32 %v2109_v10, %v2028_v26 }
 0x2cb   : > { %2126 = vrot.lane.b32.xlu1 %v4908_v0, %s3989_s20  ;;  %2124 = vrot.lane.b32.xlu0 %v4919_v40, %s3989_s20 }
 0x2cc   : > { %v2026_v43 = vld [vmem:[#allocation2 + $0x20] sm:$0xff]  ;;  %v2027_v62 = vld [vmem:[#allocation2 + $0x28] sm:$0x7f]  ;;  %2225 = vst.msk [vmem:[#allocation2 + $0x38] sm:$0x7f] %vm1814_vm4, %v2195_v1 }
 0x2cd   : > { %v2192_v55 = vadd.f32 %v4718_v39, %v2026_v43  ;;  %v2193_v24 = vadd.f32 %v4716_v37, %v2027_v62  ;;  %2224 = vst.msk [vmem:[#allocation2 + $0x30] sm:$0xff] %vm822_vm1, %v2194_v7  ;;  %v2488_v16 = vpop.permute.xlu1 %2487  ;;  %v2486_v39 = vpop.permute.xlu0 %2485  ;;  %v2999_v43 = vld [vmem:[#allocation2 + $0x10] sm:$0xff] }
 0x2ce   : > { %v3000_v37 = vld [vmem:[#allocation2 + $0x18] sm:$0x7f] }
 0x2cf   : > { %2222 = vst.msk [vmem:[#allocation2 + $0x20] sm:$0xff] %vm822_vm1, %v2192_v55  ;;  %2503 = vrot.lane.b32.xlu1 %v4908_v0, %s3990_s22  ;;  %2501 = vrot.lane.b32.xlu0 %v4919_v40, %s3990_s22 }
 0x2d0   : > { %2223 = vst.msk [vmem:[#allocation2 + $0x28] sm:$0x7f] %vm1814_vm4, %v2193_v24 }
 0x2d1   : > { %v3034_v15 = vpop.permute.xlu1 %3033  ;;  %v3032_v62 = vpop.permute.xlu0 %3031 }
 0x2d2   : > { %v3120_v33 = vadd.f32 %v3034_v15, %v3000_v37  ;;  %v3119_v26 = vadd.f32 %v3032_v62, %v2999_v43 }
 0x2d3   : > { %v2257_v24 = vld [vmem:[#allocation2 + $0x39] sm:$0x7f]  ;;  %1660 = vrot.lane.b32.xlu0 %v4546_v48, %s3985_s16  ;;  %1662 = vrot.lane.b32.xlu1 %v4554_v4, %s3985_s16 }
 0x2d4   : > { %v2385_v47 = vadd.f32 %v4792_v3, %v2257_v24  ;;  %v2256_v40 = vld [vmem:[#allocation2 + $0x31] sm:$0xff]  ;;  %3150 = vst.msk [vmem:[#allocation2 + $0x18] sm:$0x7f] %vm1814_vm4, %v3120_v33 }
 0x2d5   : > { %3149 = vst.msk [vmem:[#allocation2 + $0x10] sm:$0xff] %vm822_vm1, %v3119_v26  ;;  %v2384_v37 = vadd.f32 %v4790_v59, %v2256_v40  ;;  %v1645_v15 = vpop.permute.xlu0 %1644  ;;  %v1647_v43 = vpop.permute.xlu1 %1646 }
 0x2d6   : > { %2417 = vst.msk [vmem:[#allocation2 + $0x39] sm:$0x7f] %vm1814_vm4, %v2385_v47 }
 0x2d7   : > { %v2254_v10 = vld [vmem:[#allocation2 + $0x21] sm:$0xff]  ;;  %v2255_v55 = vld [vmem:[#allocation2 + $0x29] sm:$0x7f]  ;;  %1730 = vst.msk [vmem:[#allocation2 + $0x50] sm:$0xff] %vm822_vm1, %v1645_v15  ;;  %1731 = vst.msk [vmem:[#allocation2 + $0x58] sm:$0xff] %vm822_vm1, %v1647_v43  ;;  %1910 = vrot.lane.b32.xlu0 %v4546_v48, %s3984_s15  ;;  %1912 = vrot.lane.b32.xlu1 %v4554_v4, %s3984_s15 }
 0x2d8   : > { %v2382_v1 = vadd.f32 %v4842_v34, %v2254_v10  ;;  %v2383_v7 = vadd.f32 %v4844_v58, %v2255_v55  ;;  %2416 = vst.msk [vmem:[#allocation2 + $0x31] sm:$0xff] %vm822_vm1, %v2384_v37 }
 0x2d9   : > { %v4955_v40 = vpop.permute.xlu0 %1894  ;;  %v4957_v59 = vpop.permute.xlu1 %1896 }
 0x2da   : > { %2414 = vst.msk [vmem:[#allocation2 + $0x21] sm:$0xff] %vm822_vm1, %v2382_v1 }
 0x2db   : > { %2415 = vst.msk [vmem:[#allocation2 + $0x29] sm:$0x7f] %vm1814_vm4, %v2383_v7  ;;  %v3180_v3 = vld [vmem:[#allocation2 + $0x18] sm:$0xff]  ;;  %2318 = vrot.lane.b32.xlu0 %v4546_v48, %s3986_s17  ;;  %2320 = vrot.lane.b32.xlu1 %v4554_v4, %s3986_s17 }
 0x2dc   : > { %v3179_v34 = vld [vmem:[#allocation2 + $0x10] sm:$0xff]  ;;  %v3219_v58 = vadd.f32 %v4859_v21, %v3180_v3 }
 0x2dd   : > { %v3218_v47 = vadd.f32 %v4859_v21, %v3179_v34  ;;  %v4965_v10 = vpop.permute.xlu0 %2302  ;;  %v4967_v55 = vpop.permute.xlu1 %2304 }
 0x2de   : > { %v1761_v26 = vld [vmem:[#allocation2 + $0x51] sm:$0xff]  ;;  %v3581_v37 = vpack.c.bf16 %v3219_v58, %v3219_v58  ;;  %v1762_v43 = vld [vmem:[#allocation2 + $0x59] sm:$0x7f] }
 0x2df   : > { %v2448_v24 = vld [vmem:[#allocation2 + $0x30] sm:$0xff]  ;;  %v3580_v15 = vpack.c.bf16 %v3218_v47, %v3218_v47  ;;  %v2449_v19 = vld [vmem:[#allocation2 + $0x38] sm:$0x7f]  ;;  %v1791_v21 = vadd.f32 %v1761_v26, %v4502_v38  ;;  %v1792_v34 = vadd.f32 %v1762_v43, %v4506_v41  ;;  %2699 = vrot.lane.b32.xlu0 %v4546_v48, %s3987_s18  ;;  %2701 = vrot.lane.b32.xlu1 %v4554_v4, %s3987_s18 }
 0x2e0   : > { %v2579_v3 = vadd.f32 %v4903_v17, %v2448_v24  ;;  %3380 = vst.msk [vmem:[%s4876_s28 + $0xc] sm:$0xf] %vm3376_vm5, %v3581_v37  ;;  %v2580_v17 = vadd.f32 %v4905_v14, %v2449_v19 }
 0x2e1   : > { %v2446_v33 = vld [vmem:[#allocation2 + $0x20] sm:$0xff]  ;;  %3379 = vst.msk [vmem:[%s4876_s28 + $0x8] sm:$0xf] %vm3376_vm5, %v3580_v15  ;;  %v4986_v38 = vpop.permute.xlu0 %2683  ;;  %v4988_v41 = vpop.permute.xlu1 %2685 }
 0x2e2   : > { %v2447_v62 = vld [vmem:[#allocation2 + $0x28] sm:$0x7f]  ;;  %v2577_v7 = vadd.f32 %v2486_v39, %v2446_v33  ;;  %2611 = vst.msk [vmem:[#allocation2 + $0x30] sm:$0xff] %vm822_vm1, %v2579_v3  ;;  %1822 = vst.msk [vmem:[#allocation2 + $0x51] sm:$0xff] %vm822_vm1, %v1791_v21 }
 0x2e3   : > { %v2578_v1 = vadd.f32 %v2488_v16, %v2447_v62  ;;  %1823 = vst.msk [vmem:[#allocation2 + $0x59] sm:$0x7f] %vm1814_vm4, %v1792_v34  ;;  %2612 = vst.msk [vmem:[#allocation2 + $0x38] sm:$0x7f] %vm1814_vm4, %v2580_v17  ;;  %2879 = vrot.lane.b32.xlu0 %v4546_v48, %s3988_s19  ;;  %2881 = vrot.lane.b32.xlu1 %v4554_v4, %s3988_s19 }
 0x2e4   : > { %2609 = vst.msk [vmem:[#allocation2 + $0x20] sm:$0xff] %vm822_vm1, %v2577_v7 }
 0x2e5   : > { %2610 = vst.msk [vmem:[#allocation2 + $0x28] sm:$0x7f] %vm1814_vm4, %v2578_v1  ;;  %v4995_v16 = vpop.permute.xlu0 %2863  ;;  %v4997_v19 = vpop.permute.xlu1 %2865 }
 0x2e7   : > { %1656 = vrot.lane.b32.xlu0 %v4548_v49, %s3985_s16  ;;  %1658 = vrot.lane.b32.xlu1 %v4556_v50, %s3985_s16 }
 0x2e9   : > { %v1641_v62 = vpop.permute.xlu0 %1640  ;;  %v1643_v33 = vpop.permute.xlu1 %1642 }
 0x2ea   : > { %1728 = vst.msk [vmem:[#allocation2 + $0x40] sm:$0xff] %vm822_vm1, %v1641_v62  ;;  %1729 = vst.msk [vmem:[#allocation2 + $0x48] sm:$0xff] %vm822_vm1, %v1643_v33 }
 0x2eb   : > { %1906 = vrot.lane.b32.xlu0 %v4548_v49, %s3984_s15  ;;  %1908 = vrot.lane.b32.xlu1 %v4556_v50, %s3984_s15 }
 0x2ec   : > { %v2641_v14 = vld [vmem:[#allocation2 + $0x21] sm:$0xff]  ;;  %v2642_v39 = vld [vmem:[#allocation2 + $0x29] sm:$0x7f] }
 0x2ed   : > { %v2761_v58 = vadd.f32 %v4804_v20, %v2641_v14  ;;  %v2762_v47 = vadd.f32 %v4806_v6, %v2642_v39  ;;  %v1891_v26 = vpop.permute.xlu0 %1890  ;;  %v1852_v20 = vld [vmem:[#allocation2 + $0x50] sm:$0xff]  ;;  %v1893_v24 = vpop.permute.xlu1 %1892  ;;  %v1853_v6 = vld [vmem:[#allocation2 + $0x58] sm:$0xff] }
 0x2ee   : > { %v1972_v1 = vadd.f32 %v1891_v26, %v1852_v20  ;;  %v1973_v7 = vadd.f32 %v1893_v24, %v1853_v6  ;;  %v2082_v26 = vrot.slane %v4546_v48, 1  ;;  %v5037_v20 = vrot.slane %v4554_v4, 1 }
 0x2ef   : > { %2791 = vst.msk [vmem:[#allocation2 + $0x21] sm:$0xff] %vm822_vm1, %v2761_v58  ;;  %2314 = vrot.lane.b32.xlu0 %v4548_v49, %s3986_s17  ;;  %2316 = vrot.lane.b32.xlu1 %v4556_v50, %s3986_s17 }
 0x2f0   : > { %2792 = vst.msk [vmem:[#allocation2 + $0x29] sm:$0x7f] %vm1814_vm4, %v2762_v47  ;;  %v5047_v6 = vsel %vm2054_vm3, %v2082_v26, %v5037_v20 }
 0x2f1   : > { %2002 = vst.msk [vmem:[#allocation2 + $0x50] sm:$0xff] %vm822_vm1, %v1972_v1  ;;  %2003 = vst.msk [vmem:[#allocation2 + $0x58] sm:$0xff] %vm822_vm1, %v1973_v7  ;;  %v1759_v37 = vld [vmem:[#allocation2 + $0x41] sm:$0xff]  ;;  %v1760_v15 = vld [vmem:[#allocation2 + $0x49] sm:$0x7f]  ;;  %v5019_v43 = vpop.permute.xlu0 %2298  ;;  %v5021_v3 = vpop.permute.xlu1 %2300 }
 0x2f2   : > { %v1789_v34 = vadd.f32 %v4472_v31, %v1759_v37  ;;  %v1790_v17 = vadd.f32 %v4480_v2, %v1760_v15  ;;  %v2643_v31 = vld [vmem:[#allocation2 + $0x31] sm:$0xff]  ;;  %v2644_v2 = vld [vmem:[#allocation2 + $0x39] sm:$0x7f] }
 0x2f3   : > { %2695 = vrot.lane.b32.xlu0 %v4548_v49, %s3987_s18  ;;  %2697 = vrot.lane.b32.xlu1 %v4556_v50, %s3987_s18 }
 0x2f4   : > { %1820 = vst.msk [vmem:[#allocation2 + $0x41] sm:$0xff] %vm822_vm1, %v1789_v34 }
 0x2f5   : > { %1821 = vst.msk [vmem:[#allocation2 + $0x49] sm:$0x7f] %vm1814_vm4, %v1790_v17  ;;  %v2680_v47 = vpop.permute.xlu0 %2679  ;;  %v2682_v62 = vpop.permute.xlu1 %2681  ;;  %v5062_v17 = vrot.slane %v4556_v50, 1 }
 0x2f6   : > { %v2821_v21 = vld [vmem:[#allocation2 + $0x20] sm:$0xff]  ;;  %v2764_v33 = vadd.f32 %v2682_v62, %v2644_v2 }
 0x2f7   : > { %v2941_v14 = vadd.f32 %v4816_v12, %v2821_v21  ;;  %v2822_v39 = vld [vmem:[#allocation2 + $0x28] sm:$0xff]  ;;  %v2763_v12 = vadd.f32 %v2680_v47, %v2643_v31  ;;  %2875 = vrot.lane.b32.xlu0 %v4548_v49, %s3988_s19  ;;  %2877 = vrot.lane.b32.xlu1 %v4556_v50, %s3988_s19 }
 0x2f8   : > { %v2942_v58 = vadd.f32 %v4818_v29, %v2822_v39  ;;  %2794 = vst.msk [vmem:[#allocation2 + $0x39] sm:$0x7f] %vm1814_vm4, %v2764_v33  ;;  %v2033_v62 = vld [vmem:[#allocation2 + $0x58] sm:$0x7f] }
 0x2f9   : > { %2971 = vst.msk [vmem:[#allocation2 + $0x20] sm:$0xff] %vm822_vm1, %v2941_v14  ;;  %2793 = vst.msk [vmem:[#allocation2 + $0x31] sm:$0xff] %vm822_vm1, %v2763_v12  ;;  %v2860_v29 = vpop.permute.xlu0 %2859  ;;  %v2862_v24 = vpop.permute.xlu1 %2861  ;;  %v2079_v14 = vrot.slane %v4548_v49, 1 }
 0x2fa   : > { %2972 = vst.msk [vmem:[#allocation2 + $0x28] sm:$0xff] %vm822_vm1, %v2942_v58 }
 0x2fb   : > { %v1850_v1 = vld [vmem:[#allocation2 + $0x40] sm:$0xff]  ;;  %2136 = vrot.lane.b32.xlu0 %v5047_v6, %s3989_s20  ;;  %2138 = vrot.lane.b32.xlu1 %v5037_v20, %s3989_s20  ;;  %v5077_v2 = vsel %vm2054_vm3, %v2079_v14, %v5062_v17 }
 0x2fc   : > { %v1851_v7 = vld [vmem:[#allocation2 + $0x48] sm:$0xff]  ;;  %v1970_v37 = vadd.f32 %v4778_v51, %v1850_v1 }
 0x2fd   : > { %v1971_v15 = vadd.f32 %v4780_v18, %v1851_v7  ;;  %v5055_v21 = vpop.permute.xlu0 %2120  ;;  %v5057_v34 = vpop.permute.xlu1 %2122 }
 0x2fe   : > { %2000 = vst.msk [vmem:[#allocation2 + $0x40] sm:$0xff] %vm822_vm1, %v1970_v37 }
 0x2ff   : > { %2001 = vst.msk [vmem:[#allocation2 + $0x48] sm:$0xff] %vm822_vm1, %v1971_v15  ;;  %2513 = vrot.lane.b32.xlu0 %v5047_v6, %s3990_s22  ;;  %2515 = vrot.lane.b32.xlu1 %v5037_v20, %s3990_s22 }
 0x300   : > { %v2823_v39 = vld [vmem:[#allocation2 + $0x30] sm:$0xff]  ;;  %v2824_v58 = vld [vmem:[#allocation2 + $0x38] sm:$0xff] }
 0x301   : > { %v2943_v51 = vadd.f32 %v2860_v29, %v2823_v39  ;;  %v2944_v18 = vadd.f32 %v2862_v24, %v2824_v58  ;;  %v5069_v31 = vpop.permute.xlu0 %2497  ;;  %v5071_v47 = vpop.permute.xlu1 %2499  ;;  %v2032_v29 = vld [vmem:[#allocation2 + $0x50] sm:$0xff] }
 0x303   : > { %2973 = vst.msk [vmem:[#allocation2 + $0x30] sm:$0xff] %vm822_vm1, %v2943_v51  ;;  %2974 = vst.msk [vmem:[#allocation2 + $0x38] sm:$0xff] %vm822_vm1, %v2944_v18  ;;  %2134 = vrot.lane.b32.xlu1 %v5062_v17, %s3989_s20  ;;  %2132 = vrot.lane.b32.xlu0 %v5077_v2, %s3989_s20 }
 0x305   : > { %v2030_v12 = vld [vmem:[#allocation2 + $0x40] sm:$0xff]  ;;  %v2119_v26 = vpop.permute.xlu1 %2118  ;;  %v2117_v24 = vpop.permute.xlu0 %2116 }
 0x306   : > { %v2031_v33 = vld [vmem:[#allocation2 + $0x48] sm:$0x7f]  ;;  %v2196_v1 = vadd.f32 %v4885_v30, %v2030_v12  ;;  %v2199_v37 = vadd.f32 %v2119_v26, %v2033_v62  ;;  %v2198_v15 = vadd.f32 %v2117_v24, %v2032_v29 }
 0x307   : > { %v2197_v7 = vadd.f32 %v4887_v28, %v2031_v33  ;;  %2511 = vrot.lane.b32.xlu1 %v5062_v17, %s3990_s22  ;;  %2509 = vrot.lane.b32.xlu0 %v5077_v2, %s3990_s22 }
 0x308   : > { %2226 = vst.msk [vmem:[#allocation2 + $0x40] sm:$0xff] %vm822_vm1, %v2196_v1  ;;  %2228 = vst.msk [vmem:[#allocation2 + $0x50] sm:$0xff] %vm822_vm1, %v2198_v15 }
 0x309   : > { %2227 = vst.msk [vmem:[#allocation2 + $0x48] sm:$0x7f] %vm1814_vm4, %v2197_v7  ;;  %2229 = vst.msk [vmem:[#allocation2 + $0x58] sm:$0x7f] %vm1814_vm4, %v2199_v37  ;;  %v2496_v14 = vpop.permute.xlu1 %2495  ;;  %v2494_v30 = vpop.permute.xlu0 %2493 }
 0x30b   : > { %1668 = vrot.lane.b32.xlu0 %v4562_v52, %s3985_s16  ;;  %1670 = vrot.lane.b32.xlu1 %v4570_v23, %s3985_s16 }
 0x30d   : > { %v1653_v28 = vpop.permute.xlu0 %1652  ;;  %v1655_v39 = vpop.permute.xlu1 %1654 }
 0x30e   : > { %1734 = vst.msk [vmem:[#allocation2 + $0x70] sm:$0xff] %vm822_vm1, %v1653_v28  ;;  %1735 = vst.msk [vmem:[#allocation2 + $0x78] sm:$0xff] %vm822_vm1, %v1655_v39 }
 0x30f   : > { %1918 = vrot.lane.b32.xlu0 %v4562_v52, %s3984_s15  ;;  %1920 = vrot.lane.b32.xlu1 %v4570_v23, %s3984_s15 }
 0x310   : > { %v2258_v58 = vld [vmem:[#allocation2 + $0x41] sm:$0xff]  ;;  %v2259_v51 = vld [vmem:[#allocation2 + $0x49] sm:$0x7f]  ;;  %v2261_v18 = vld [vmem:[#allocation2 + $0x59] sm:$0x7f] }
 0x311   : > { %v2386_v62 = vadd.f32 %v5019_v43, %v2258_v58  ;;  %v2387_v12 = vadd.f32 %v5021_v3, %v2259_v51  ;;  %v2389_v33 = vadd.f32 %v4967_v55, %v2261_v18  ;;  %v2260_v26 = vld [vmem:[#allocation2 + $0x51] sm:$0xff]  ;;  %v5107_v24 = vpop.permute.xlu0 %1902  ;;  %v5109_v1 = vpop.permute.xlu1 %1904 }
 0x312   : > { %v2388_v29 = vadd.f32 %v4965_v10, %v2260_v26 }
 0x313   : > { %2418 = vst.msk [vmem:[#allocation2 + $0x41] sm:$0xff] %vm822_vm1, %v2386_v62  ;;  %2326 = vrot.lane.b32.xlu0 %v4562_v52, %s3986_s17  ;;  %2328 = vrot.lane.b32.xlu1 %v4570_v23, %s3986_s17 }
 0x314   : > { %2419 = vst.msk [vmem:[#allocation2 + $0x49] sm:$0x7f] %vm1814_vm4, %v2387_v12  ;;  %2421 = vst.msk [vmem:[#allocation2 + $0x59] sm:$0x7f] %vm1814_vm4, %v2389_v33 }
 0x315   : > { %2420 = vst.msk [vmem:[#allocation2 + $0x51] sm:$0xff] %vm822_vm1, %v2388_v29  ;;  %v1765_v55 = vld [vmem:[#allocation2 + $0x71] sm:$0xff]  ;;  %v1766_v10 = vld [vmem:[#allocation2 + $0x79] sm:$0x7f]  ;;  %v5119_v43 = vpop.permute.xlu0 %2310  ;;  %v5121_v3 = vpop.permute.xlu1 %2312 }
 0x316   : > { %v1795_v7 = vadd.f32 %v1765_v55, %v4518_v44  ;;  %v1796_v37 = vadd.f32 %v1766_v10, %v4522_v46 }
 0x317   : > { %2707 = vrot.lane.b32.xlu0 %v4562_v52, %s3987_s18  ;;  %2709 = vrot.lane.b32.xlu1 %v4570_v23, %s3987_s18 }
 0x318   : > { %1826 = vst.msk [vmem:[#allocation2 + $0x71] sm:$0xff] %vm822_vm1, %v1795_v7 }
 0x319   : > { %1827 = vst.msk [vmem:[#allocation2 + $0x79] sm:$0x7f] %vm1814_vm4, %v1796_v37  ;;  %v5131_v39 = vpop.permute.xlu0 %2691  ;;  %v5133_v58 = vpop.permute.xlu1 %2693 }
 0x31a   : > { %v2450_v28 = vld [vmem:[#allocation2 + $0x40] sm:$0xff] }
 0x31b   : > { %v2451_v15 = vld [vmem:[#allocation2 + $0x48] sm:$0x7f]  ;;  %v2581_v18 = vadd.f32 %v2494_v30, %v2450_v28  ;;  %2887 = vrot.lane.b32.xlu0 %v4562_v52, %s3988_s19  ;;  %2889 = vrot.lane.b32.xlu1 %v4570_v23, %s3988_s19 }
 0x31c   : > { %v2452_v51 = vld [vmem:[#allocation2 + $0x50] sm:$0xff]  ;;  %v2582_v44 = vadd.f32 %v2496_v14, %v2451_v15  ;;  %v2453_v46 = vld [vmem:[#allocation2 + $0x58] sm:$0x7f] }
 0x31d   : > { %v2583_v62 = vadd.f32 %v5069_v31, %v2452_v51  ;;  %v2584_v12 = vadd.f32 %v5071_v47, %v2453_v46  ;;  %2613 = vst.msk [vmem:[#allocation2 + $0x40] sm:$0xff] %vm822_vm1, %v2581_v18  ;;  %v5144_v33 = vpop.permute.xlu0 %2871  ;;  %v5146_v14 = vpop.permute.xlu1 %2873 }
 0x31e   : > { %2614 = vst.msk [vmem:[#allocation2 + $0x48] sm:$0x7f] %vm1814_vm4, %v2582_v44 }
 0x31f   : > { %2615 = vst.msk [vmem:[#allocation2 + $0x50] sm:$0xff] %vm822_vm1, %v2583_v62  ;;  %1664 = vrot.lane.b32.xlu0 %v4564_v53, %s3985_s16  ;;  %1666 = vrot.lane.b32.xlu1 %v4572_v54, %s3985_s16  ;;  %v1856_v7 = vld [vmem:[#allocation2 + $0x70] sm:$0xff] }
 0x320   : > { %2616 = vst.msk [vmem:[#allocation2 + $0x58] sm:$0x7f] %vm1814_vm4, %v2584_v12  ;;  %v1857_v15 = vld [vmem:[#allocation2 + $0x78] sm:$0xff] }
 0x321   : > { %v1649_v31 = vpop.permute.xlu0 %1648  ;;  %v1651_v47 = vpop.permute.xlu1 %1650 }
 0x322   : > { %1732 = vst.msk [vmem:[#allocation2 + $0x60] sm:$0xff] %vm822_vm1, %v1649_v31  ;;  %1733 = vst.msk [vmem:[#allocation2 + $0x68] sm:$0xff] %vm822_vm1, %v1651_v47 }
 0x323   : > { %1914 = vrot.lane.b32.xlu0 %v4564_v53, %s3984_s15  ;;  %1916 = vrot.lane.b32.xlu1 %v4572_v54, %s3984_s15 }
 0x325   : > { %v2645_v30 = vld [vmem:[#allocation2 + $0x41] sm:$0xff]  ;;  %v2646_v26 = vld [vmem:[#allocation2 + $0x49] sm:$0x7f]  ;;  %v1899_v10 = vpop.permute.xlu0 %1898  ;;  %v1901_v37 = vpop.permute.xlu1 %1900 }
 0x326   : > { %v2765_v29 = vadd.f32 %v4986_v38, %v2645_v30  ;;  %v2766_v55 = vadd.f32 %v4988_v41, %v2646_v26  ;;  %v1976_v28 = vadd.f32 %v1899_v10, %v1856_v7  ;;  %v1977_v51 = vadd.f32 %v1901_v37, %v1857_v15 }
 0x327   : > { %2322 = vrot.lane.b32.xlu0 %v4564_v53, %s3986_s17  ;;  %2324 = vrot.lane.b32.xlu1 %v4572_v54, %s3986_s17  ;;  %v2647_v12 = vld [vmem:[#allocation2 + $0x51] sm:$0xff]  ;;  %v2648_v47 = vld [vmem:[#allocation2 + $0x59] sm:$0x7f]  ;;  %v2088_v26 = vrot.slane %v4562_v52, 1 }
 0x328   : > { %2795 = vst.msk [vmem:[#allocation2 + $0x41] sm:$0xff] %vm822_vm1, %v2765_v29  ;;  %2006 = vst.msk [vmem:[#allocation2 + $0x70] sm:$0xff] %vm822_vm1, %v1976_v28 }
 0x329   : > { %2796 = vst.msk [vmem:[#allocation2 + $0x49] sm:$0x7f] %vm1814_vm4, %v2766_v55  ;;  %v1763_v38 = vld [vmem:[#allocation2 + $0x61] sm:$0xff]  ;;  %v1764_v41 = vld [vmem:[#allocation2 + $0x69] sm:$0x7f]  ;;  %v5169_v44 = vpop.permute.xlu0 %2306  ;;  %v5171_v18 = vpop.permute.xlu1 %2308 }
 0x32a   : > { %2007 = vst.msk [vmem:[#allocation2 + $0x78] sm:$0xff] %vm822_vm1, %v1977_v51  ;;  %v1793_v46 = vadd.f32 %v4496_v8, %v1763_v38  ;;  %v1794_v62 = vadd.f32 %v4504_v36, %v1764_v41  ;;  %v5183_v8 = vrot.slane %v4570_v23, 1 }
 0x32b   : > { %2703 = vrot.lane.b32.xlu0 %v4564_v53, %s3987_s18  ;;  %2705 = vrot.lane.b32.xlu1 %v4572_v54, %s3987_s18 }
 0x32c   : > { %1824 = vst.msk [vmem:[#allocation2 + $0x61] sm:$0xff] %vm822_vm1, %v1793_v46 }
 0x32d   : > { %1825 = vst.msk [vmem:[#allocation2 + $0x69] sm:$0x7f] %vm1814_vm4, %v1794_v62  ;;  %v2688_v31 = vpop.permute.xlu0 %2687  ;;  %v2690_v30 = vpop.permute.xlu1 %2689 }
 0x32e   : > { %v2767_v55 = vadd.f32 %v2688_v31, %v2647_v12  ;;  %v2768_v10 = vadd.f32 %v2690_v30, %v2648_v47  ;;  %v5212_v12 = vrot.slane %v4572_v54, 1  ;;  %v2085_v31 = vrot.slane %v4564_v53, 1 }
 0x32f   : > { %v2825_v29 = vld [vmem:[#allocation2 + $0x40] sm:$0xff]  ;;  %2883 = vrot.lane.b32.xlu0 %v4564_v53, %s3988_s19  ;;  %2885 = vrot.lane.b32.xlu1 %v4572_v54, %s3988_s19 }
 0x330   : > { %v2826_v36 = vld [vmem:[#allocation2 + $0x48] sm:$0xff]  ;;  %v2945_v37 = vadd.f32 %v4995_v16, %v2825_v29  ;;  %2797 = vst.msk [vmem:[#allocation2 + $0x51] sm:$0xff] %vm822_vm1, %v2767_v55  ;;  %v5227_v29 = vsel %vm2054_vm3, %v2085_v31, %v5212_v12 }
 0x331   : > { %v2946_v7 = vadd.f32 %v4997_v19, %v2826_v36  ;;  %2798 = vst.msk [vmem:[#allocation2 + $0x59] sm:$0x7f] %vm1814_vm4, %v2768_v10  ;;  %v2868_v15 = vpop.permute.xlu0 %2867  ;;  %v2870_v28 = vpop.permute.xlu1 %2869  ;;  %v5197_v19 = vsel %vm2054_vm3, %v2088_v26, %v5183_v8  ;;  %v2037_v55 = vld [vmem:[#allocation2 + $0x78] sm:$0x7f] }
 0x332   : > { %2975 = vst.msk [vmem:[#allocation2 + $0x40] sm:$0xff] %vm822_vm1, %v2945_v37 }
 0x333   : > { %2976 = vst.msk [vmem:[#allocation2 + $0x48] sm:$0xff] %vm822_vm1, %v2946_v7  ;;  %v1854_v16 = vld [vmem:[#allocation2 + $0x60] sm:$0xff]  ;;  %2144 = vrot.lane.b32.xlu0 %v5197_v19, %s3989_s20  ;;  %2146 = vrot.lane.b32.xlu1 %v5183_v8, %s3989_s20 }
 0x334   : > { %v1855_v51 = vld [vmem:[#allocation2 + $0x68] sm:$0xff]  ;;  %v1974_v38 = vadd.f32 %v4955_v40, %v1854_v16 }
 0x335   : > { %v1975_v41 = vadd.f32 %v4957_v59, %v1855_v51  ;;  %v5205_v46 = vpop.permute.xlu0 %2128  ;;  %v5207_v62 = vpop.permute.xlu1 %2130 }
 0x336   : > { %2004 = vst.msk [vmem:[#allocation2 + $0x60] sm:$0xff] %vm822_vm1, %v1974_v38 }
 0x337   : > { %2005 = vst.msk [vmem:[#allocation2 + $0x68] sm:$0xff] %vm822_vm1, %v1975_v41  ;;  %v2827_v47 = vld [vmem:[#allocation2 + $0x50] sm:$0xff]  ;;  %2521 = vrot.lane.b32.xlu0 %v5197_v19, %s3990_s22  ;;  %2523 = vrot.lane.b32.xlu1 %v5183_v8, %s3990_s22 }
 0x338   : > { %v2828_v30 = vld [vmem:[#allocation2 + $0x58] sm:$0xff]  ;;  %v2947_v40 = vadd.f32 %v2868_v15, %v2827_v47  ;;  %v2036_v15 = vld [vmem:[#allocation2 + $0x70] sm:$0xff] }
 0x339   : > { %v2948_v59 = vadd.f32 %v2870_v28, %v2828_v30  ;;  %v5219_v26 = vpop.permute.xlu0 %2505  ;;  %v5221_v36 = vpop.permute.xlu1 %2507 }
 0x33a   : > { %2977 = vst.msk [vmem:[#allocation2 + $0x50] sm:$0xff] %vm822_vm1, %v2947_v40 }
 0x33b   : > { %2978 = vst.msk [vmem:[#allocation2 + $0x58] sm:$0xff] %vm822_vm1, %v2948_v59  ;;  %2142 = vrot.lane.b32.xlu1 %v5212_v12, %s3989_s20  ;;  %2140 = vrot.lane.b32.xlu0 %v5227_v29, %s3989_s20 }
 0x33d   : > { %v2034_v10 = vld [vmem:[#allocation2 + $0x60] sm:$0xff]  ;;  %v2127_v37 = vpop.permute.xlu1 %2126  ;;  %v2125_v28 = vpop.permute.xlu0 %2124 }
 0x33e   : > { %v2035_v7 = vld [vmem:[#allocation2 + $0x68] sm:$0x7f]  ;;  %v2200_v16 = vadd.f32 %v5055_v21, %v2034_v10  ;;  %v2203_v38 = vadd.f32 %v2127_v37, %v2037_v55  ;;  %v2202_v41 = vadd.f32 %v2125_v28, %v2036_v15 }
 0x33f   : > { %v2201_v51 = vadd.f32 %v5057_v34, %v2035_v7  ;;  %2519 = vrot.lane.b32.xlu1 %v5212_v12, %s3990_s22  ;;  %2517 = vrot.lane.b32.xlu0 %v5227_v29, %s3990_s22 }
 0x340   : > { %2230 = vst.msk [vmem:[#allocation2 + $0x60] sm:$0xff] %vm822_vm1, %v2200_v16  ;;  %2232 = vst.msk [vmem:[#allocation2 + $0x70] sm:$0xff] %vm822_vm1, %v2202_v41 }
 0x341   : > { %2231 = vst.msk [vmem:[#allocation2 + $0x68] sm:$0x7f] %vm1814_vm4, %v2201_v51  ;;  %2233 = vst.msk [vmem:[#allocation2 + $0x78] sm:$0x7f] %vm1814_vm4, %v2203_v38  ;;  %v2504_v31 = vpop.permute.xlu1 %2503  ;;  %v2502_v21 = vpop.permute.xlu0 %2501 }
 0x343   : > { %1676 = vrot.lane.b32.xlu0 %v4578_v27, %s3985_s16  ;;  %1678 = vrot.lane.b32.xlu1 %v4586_v13, %s3985_s16 }
 0x345   : > { %v1661_v34 = vpop.permute.xlu0 %1660  ;;  %v1663_v47 = vpop.permute.xlu1 %1662 }
 0x346   : > { %1738 = vst.msk [vmem:[#allocation2 + $0x90] sm:$0xff] %vm822_vm1, %v1661_v34  ;;  %1739 = vst.msk [vmem:[#allocation2 + $0x98] sm:$0xff] %vm822_vm1, %v1663_v47 }
 0x347   : > { %1926 = vrot.lane.b32.xlu0 %v4578_v27, %s3984_s15  ;;  %1928 = vrot.lane.b32.xlu1 %v4586_v13, %s3984_s15 }
 0x348   : > { %v2262_v30 = vld [vmem:[#allocation2 + $0x61] sm:$0xff]  ;;  %v2263_v40 = vld [vmem:[#allocation2 + $0x69] sm:$0x7f]  ;;  %v2265_v59 = vld [vmem:[#allocation2 + $0x79] sm:$0x7f] }
 0x349   : > { %v2390_v55 = vadd.f32 %v5169_v44, %v2262_v30  ;;  %v2391_v10 = vadd.f32 %v5171_v18, %v2263_v40  ;;  %v2393_v7 = vadd.f32 %v5121_v3, %v2265_v59  ;;  %v2264_v37 = vld [vmem:[#allocation2 + $0x71] sm:$0xff]  ;;  %v5257_v28 = vpop.permute.xlu0 %1910  ;;  %v5259_v16 = vpop.permute.xlu1 %1912 }
 0x34a   : > { %v2392_v15 = vadd.f32 %v5119_v43, %v2264_v37 }
 0x34b   : > { %2422 = vst.msk [vmem:[#allocation2 + $0x61] sm:$0xff] %vm822_vm1, %v2390_v55  ;;  %2334 = vrot.lane.b32.xlu0 %v4578_v27, %s3986_s17  ;;  %2336 = vrot.lane.b32.xlu1 %v4586_v13, %s3986_s17 }
 0x34c   : > { %2423 = vst.msk [vmem:[#allocation2 + $0x69] sm:$0x7f] %vm1814_vm4, %v2391_v10  ;;  %2425 = vst.msk [vmem:[#allocation2 + $0x79] sm:$0x7f] %vm1814_vm4, %v2393_v7 }
 0x34d   : > { %2424 = vst.msk [vmem:[#allocation2 + $0x71] sm:$0xff] %vm822_vm1, %v2392_v15  ;;  %v1769_v3 = vld [vmem:[#allocation2 + $0x91] sm:$0xff]  ;;  %v1770_v43 = vld [vmem:[#allocation2 + $0x99] sm:$0x7f]  ;;  %v5269_v44 = vpop.permute.xlu0 %2318  ;;  %v5271_v18 = vpop.permute.xlu1 %2320 }
 0x34e   : > { %v1799_v51 = vadd.f32 %v1769_v3, %v4548_v49  ;;  %v1800_v38 = vadd.f32 %v1770_v43, %v4556_v50 }
 0x34f   : > { %2715 = vrot.lane.b32.xlu0 %v4578_v27, %s3987_s18  ;;  %2717 = vrot.lane.b32.xlu1 %v4586_v13, %s3987_s18 }
 0x350   : > { %1830 = vst.msk [vmem:[#allocation2 + $0x91] sm:$0xff] %vm822_vm1, %v1799_v51 }
 0x351   : > { %1831 = vst.msk [vmem:[#allocation2 + $0x99] sm:$0x7f] %vm1814_vm4, %v1800_v38  ;;  %v5281_v47 = vpop.permute.xlu0 %2699  ;;  %v5283_v30 = vpop.permute.xlu1 %2701 }
 0x352   : > { %v2454_v34 = vld [vmem:[#allocation2 + $0x60] sm:$0xff] }
 0x353   : > { %v2455_v41 = vld [vmem:[#allocation2 + $0x68] sm:$0x7f]  ;;  %v2585_v59 = vadd.f32 %v2502_v21, %v2454_v34  ;;  %2895 = vrot.lane.b32.xlu0 %v4578_v27, %s3988_s19  ;;  %2897 = vrot.lane.b32.xlu1 %v4586_v13, %s3988_s19 }
 0x354   : > { %v2456_v40 = vld [vmem:[#allocation2 + $0x70] sm:$0xff]  ;;  %v2586_v49 = vadd.f32 %v2504_v31, %v2455_v41  ;;  %v2457_v50 = vld [vmem:[#allocation2 + $0x78] sm:$0x7f] }
 0x355   : > { %v2587_v55 = vadd.f32 %v5219_v26, %v2456_v40  ;;  %v2588_v10 = vadd.f32 %v5221_v36, %v2457_v50  ;;  %2617 = vst.msk [vmem:[#allocation2 + $0x60] sm:$0xff] %vm822_vm1, %v2585_v59  ;;  %v5294_v7 = vpop.permute.xlu0 %2879  ;;  %v5296_v31 = vpop.permute.xlu1 %2881 }
 0x356   : > { %2618 = vst.msk [vmem:[#allocation2 + $0x68] sm:$0x7f] %vm1814_vm4, %v2586_v49 }
 0x357   : > { %2619 = vst.msk [vmem:[#allocation2 + $0x70] sm:$0xff] %vm822_vm1, %v2587_v55  ;;  %1672 = vrot.lane.b32.xlu0 %v4580_v56, %s3985_s16  ;;  %1674 = vrot.lane.b32.xlu1 %v4588_v32, %s3985_s16  ;;  %v1860_v51 = vld [vmem:[#allocation2 + $0x90] sm:$0xff] }
 0x358   : > { %2620 = vst.msk [vmem:[#allocation2 + $0x78] sm:$0x7f] %vm1814_vm4, %v2588_v10  ;;  %v1861_v41 = vld [vmem:[#allocation2 + $0x98] sm:$0xff] }
 0x359   : > { %v1657_v26 = vpop.permute.xlu0 %1656  ;;  %v1659_v36 = vpop.permute.xlu1 %1658 }
 0x35a   : > { %1736 = vst.msk [vmem:[#allocation2 + $0x80] sm:$0xff] %vm822_vm1, %v1657_v26  ;;  %1737 = vst.msk [vmem:[#allocation2 + $0x88] sm:$0xff] %vm822_vm1, %v1659_v36 }
 0x35b   : > { %1922 = vrot.lane.b32.xlu0 %v4580_v56, %s3984_s15  ;;  %1924 = vrot.lane.b32.xlu1 %v4588_v32, %s3984_s15 }
 0x35d   : > { %v2649_v21 = vld [vmem:[#allocation2 + $0x61] sm:$0xff]  ;;  %v2650_v37 = vld [vmem:[#allocation2 + $0x69] sm:$0x7f]  ;;  %v1907_v43 = vpop.permute.xlu0 %1906  ;;  %v1909_v38 = vpop.permute.xlu1 %1908 }
 0x35e   : > { %v2769_v15 = vadd.f32 %v5131_v39, %v2649_v21  ;;  %v2770_v3 = vadd.f32 %v5133_v58, %v2650_v37  ;;  %v1980_v34 = vadd.f32 %v1907_v43, %v1860_v51  ;;  %v1981_v40 = vadd.f32 %v1909_v38, %v1861_v41 }
 0x35f   : > { %2330 = vrot.lane.b32.xlu0 %v4580_v56, %s3986_s17  ;;  %2332 = vrot.lane.b32.xlu1 %v4588_v32, %s3986_s17  ;;  %v2651_v10 = vld [vmem:[#allocation2 + $0x71] sm:$0xff]  ;;  %v2652_v36 = vld [vmem:[#allocation2 + $0x79] sm:$0x7f]  ;;  %v2094_v37 = vrot.slane %v4578_v27, 1 }
 0x360   : > { %2799 = vst.msk [vmem:[#allocation2 + $0x61] sm:$0xff] %vm822_vm1, %v2769_v15  ;;  %2010 = vst.msk [vmem:[#allocation2 + $0x90] sm:$0xff] %vm822_vm1, %v1980_v34 }
 0x361   : > { %2800 = vst.msk [vmem:[#allocation2 + $0x69] sm:$0x7f] %vm1814_vm4, %v2770_v3  ;;  %v1767_v39 = vld [vmem:[#allocation2 + $0x81] sm:$0xff]  ;;  %v1768_v58 = vld [vmem:[#allocation2 + $0x89] sm:$0x7f]  ;;  %v5319_v49 = vpop.permute.xlu0 %2314  ;;  %v5321_v59 = vpop.permute.xlu1 %2316 }
 0x362   : > { %2011 = vst.msk [vmem:[#allocation2 + $0x98] sm:$0xff] %vm822_vm1, %v1981_v40  ;;  %v1797_v50 = vadd.f32 %v4512_v42, %v1767_v39  ;;  %v1798_v55 = vadd.f32 %v4520_v45, %v1768_v58  ;;  %v5333_v42 = vrot.slane %v4586_v13, 1 }
 0x363   : > { %2711 = vrot.lane.b32.xlu0 %v4580_v56, %s3987_s18  ;;  %2713 = vrot.lane.b32.xlu1 %v4588_v32, %s3987_s18 }
 0x364   : > { %1828 = vst.msk [vmem:[#allocation2 + $0x81] sm:$0xff] %vm822_vm1, %v1797_v50 }
 0x365   : > { %1829 = vst.msk [vmem:[#allocation2 + $0x89] sm:$0x7f] %vm1814_vm4, %v1798_v55  ;;  %v2696_v26 = vpop.permute.xlu0 %2695  ;;  %v2698_v21 = vpop.permute.xlu1 %2697 }
 0x366   : > { %v2771_v3 = vadd.f32 %v2696_v26, %v2651_v10  ;;  %v2772_v43 = vadd.f32 %v2698_v21, %v2652_v36  ;;  %v5362_v10 = vrot.slane %v4588_v32, 1  ;;  %v2091_v26 = vrot.slane %v4580_v56, 1 }
 0x367   : > { %v2829_v15 = vld [vmem:[#allocation2 + $0x60] sm:$0xff]  ;;  %2891 = vrot.lane.b32.xlu0 %v4580_v56, %s3988_s19  ;;  %2893 = vrot.lane.b32.xlu1 %v4588_v32, %s3988_s19 }
 0x368   : > { %v2830_v45 = vld [vmem:[#allocation2 + $0x68] sm:$0xff]  ;;  %v2949_v38 = vadd.f32 %v5144_v33, %v2829_v15  ;;  %2801 = vst.msk [vmem:[#allocation2 + $0x71] sm:$0xff] %vm822_vm1, %v2771_v3  ;;  %v5377_v15 = vsel %vm2054_vm3, %v2091_v26, %v5362_v10 }
 0x369   : > { %v2950_v51 = vadd.f32 %v5146_v14, %v2830_v45  ;;  %2802 = vst.msk [vmem:[#allocation2 + $0x79] sm:$0x7f] %vm1814_vm4, %v2772_v43  ;;  %v2876_v41 = vpop.permute.xlu0 %2875  ;;  %v2878_v34 = vpop.permute.xlu1 %2877  ;;  %v5347_v14 = vsel %vm2054_vm3, %v2094_v37, %v5333_v42  ;;  %v2041_v3 = vld [vmem:[#allocation2 + $0x98] sm:$0x7f] }
 0x36a   : > { %2979 = vst.msk [vmem:[#allocation2 + $0x60] sm:$0xff] %vm822_vm1, %v2949_v38 }
 0x36b   : > { %2980 = vst.msk [vmem:[#allocation2 + $0x68] sm:$0xff] %vm822_vm1, %v2950_v51  ;;  %v1858_v33 = vld [vmem:[#allocation2 + $0x80] sm:$0xff]  ;;  %2152 = vrot.lane.b32.xlu0 %v5347_v14, %s3989_s20  ;;  %2154 = vrot.lane.b32.xlu1 %v5333_v42, %s3989_s20 }
 0x36c   : > { %v1859_v40 = vld [vmem:[#allocation2 + $0x88] sm:$0xff]  ;;  %v1978_v39 = vadd.f32 %v5107_v24, %v1858_v33 }
 0x36d   : > { %v1979_v58 = vadd.f32 %v5109_v1, %v1859_v40  ;;  %v5355_v50 = vpop.permute.xlu0 %2136  ;;  %v5357_v55 = vpop.permute.xlu1 %2138 }
 0x36e   : > { %2008 = vst.msk [vmem:[#allocation2 + $0x80] sm:$0xff] %vm822_vm1, %v1978_v39 }
 0x36f   : > { %2009 = vst.msk [vmem:[#allocation2 + $0x88] sm:$0xff] %vm822_vm1, %v1979_v58  ;;  %v2831_v36 = vld [vmem:[#allocation2 + $0x70] sm:$0xff]  ;;  %2529 = vrot.lane.b32.xlu0 %v5347_v14, %s3990_s22  ;;  %2531 = vrot.lane.b32.xlu1 %v5333_v42, %s3990_s22 }
 0x370   : > { %v2832_v21 = vld [vmem:[#allocation2 + $0x78] sm:$0xff]  ;;  %v2951_v24 = vadd.f32 %v2876_v41, %v2831_v36  ;;  %v2040_v41 = vld [vmem:[#allocation2 + $0x90] sm:$0xff] }
 0x371   : > { %v2952_v1 = vadd.f32 %v2878_v34, %v2832_v21  ;;  %v5369_v37 = vpop.permute.xlu0 %2513  ;;  %v5371_v45 = vpop.permute.xlu1 %2515 }
 0x372   : > { %2981 = vst.msk [vmem:[#allocation2 + $0x70] sm:$0xff] %vm822_vm1, %v2951_v24 }
 0x373   : > { %2982 = vst.msk [vmem:[#allocation2 + $0x78] sm:$0xff] %vm822_vm1, %v2952_v1  ;;  %2150 = vrot.lane.b32.xlu1 %v5362_v10, %s3989_s20  ;;  %2148 = vrot.lane.b32.xlu0 %v5377_v15, %s3989_s20 }
 0x375   : > { %v2038_v43 = vld [vmem:[#allocation2 + $0x80] sm:$0xff]  ;;  %v2135_v38 = vpop.permute.xlu1 %2134  ;;  %v2133_v34 = vpop.permute.xlu0 %2132 }
 0x376   : > { %v2039_v51 = vld [vmem:[#allocation2 + $0x88] sm:$0x7f]  ;;  %v2204_v33 = vadd.f32 %v5205_v46, %v2038_v43  ;;  %v2207_v39 = vadd.f32 %v2135_v38, %v2041_v3  ;;  %v2206_v58 = vadd.f32 %v2133_v34, %v2040_v41 }
 0x377   : > { %v2205_v40 = vadd.f32 %v5207_v62, %v2039_v51  ;;  %2527 = vrot.lane.b32.xlu1 %v5362_v10, %s3990_s22  ;;  %2525 = vrot.lane.b32.xlu0 %v5377_v15, %s3990_s22 }
 0x378   : > { %2234 = vst.msk [vmem:[#allocation2 + $0x80] sm:$0xff] %vm822_vm1, %v2204_v33  ;;  %2236 = vst.msk [vmem:[#allocation2 + $0x90] sm:$0xff] %vm822_vm1, %v2206_v58 }
 0x379   : > { %2235 = vst.msk [vmem:[#allocation2 + $0x88] sm:$0x7f] %vm1814_vm4, %v2205_v40  ;;  %2237 = vst.msk [vmem:[#allocation2 + $0x98] sm:$0x7f] %vm1814_vm4, %v2207_v39  ;;  %v2512_v26 = vpop.permute.xlu1 %2511  ;;  %v2510_v46 = vpop.permute.xlu0 %2509 }
 0x37b   : > { %1684 = vrot.lane.b32.xlu0 %v4594_v57, %s3985_s16  ;;  %1686 = vrot.lane.b32.xlu1 %v4602_v35, %s3985_s16 }
 0x37d   : > { %v1669_v62 = vpop.permute.xlu0 %1668  ;;  %v1671_v36 = vpop.permute.xlu1 %1670 }
 0x37e   : > { %1742 = vst.msk [vmem:[#allocation2 + $0xb0] sm:$0xff] %vm822_vm1, %v1669_v62  ;;  %1743 = vst.msk [vmem:[#allocation2 + $0xb8] sm:$0xff] %vm822_vm1, %v1671_v36 }
 0x37f   : > { %2342 = vrot.lane.b32.xlu0 %v4594_v57, %s3986_s17  ;;  %2344 = vrot.lane.b32.xlu1 %v4602_v35, %s3986_s17 }
 0x380   : > { %v2266_v21 = vld [vmem:[#allocation2 + $0x81] sm:$0xff]  ;;  %v2267_v24 = vld [vmem:[#allocation2 + $0x89] sm:$0x7f]  ;;  %v2269_v1 = vld [vmem:[#allocation2 + $0x99] sm:$0x7f] }
 0x381   : > { %v2394_v3 = vadd.f32 %v5319_v49, %v2266_v21  ;;  %v2395_v43 = vadd.f32 %v5321_v59, %v2267_v24  ;;  %v2397_v51 = vadd.f32 %v5271_v18, %v2269_v1  ;;  %v2268_v38 = vld [vmem:[#allocation2 + $0x91] sm:$0xff]  ;;  %v5407_v34 = vpop.permute.xlu0 %1918  ;;  %v5409_v33 = vpop.permute.xlu1 %1920 }
 0x382   : > { %v2396_v41 = vadd.f32 %v5269_v44, %v2268_v38 }
 0x383   : > { %2426 = vst.msk [vmem:[#allocation2 + $0x81] sm:$0xff] %vm822_vm1, %v2394_v3  ;;  %2723 = vrot.lane.b32.xlu0 %v4594_v57, %s3987_s18  ;;  %2725 = vrot.lane.b32.xlu1 %v4602_v35, %s3987_s18 }
 0x384   : > { %2427 = vst.msk [vmem:[#allocation2 + $0x89] sm:$0x7f] %vm1814_vm4, %v2395_v43  ;;  %2429 = vst.msk [vmem:[#allocation2 + $0x99] sm:$0x7f] %vm1814_vm4, %v2397_v51 }
 0x385   : > { %2428 = vst.msk [vmem:[#allocation2 + $0x91] sm:$0xff] %vm822_vm1, %v2396_v41  ;;  %v1773_v18 = vld [vmem:[#allocation2 + $0xb1] sm:$0xff]  ;;  %v1774_v44 = vld [vmem:[#allocation2 + $0xb9] sm:$0x7f]  ;;  %v5419_v49 = vpop.permute.xlu0 %2326  ;;  %v5421_v59 = vpop.permute.xlu1 %2328 }
 0x386   : > { %v1803_v40 = vadd.f32 %v1773_v18, %v4564_v53  ;;  %v1804_v39 = vadd.f32 %v1774_v44, %v4572_v54 }
 0x387   : > { %2903 = vrot.lane.b32.xlu0 %v4594_v57, %s3988_s19  ;;  %2905 = vrot.lane.b32.xlu1 %v4602_v35, %s3988_s19 }
 0x388   : > { %1834 = vst.msk [vmem:[#allocation2 + $0xb1] sm:$0xff] %vm822_vm1, %v1803_v40 }
 0x389   : > { %1835 = vst.msk [vmem:[#allocation2 + $0xb9] sm:$0x7f] %vm1814_vm4, %v1804_v39  ;;  %v5431_v36 = vpop.permute.xlu0 %2707  ;;  %v5433_v21 = vpop.permute.xlu1 %2709 }
 0x38a   : > { %v2458_v62 = vld [vmem:[#allocation2 + $0x80] sm:$0xff] }
 0x38b   : > { %v2459_v58 = vld [vmem:[#allocation2 + $0x88] sm:$0x7f]  ;;  %v2589_v1 = vadd.f32 %v2510_v46, %v2458_v62  ;;  %1680 = vrot.lane.b32.xlu0 %v4596_v60, %s3985_s16  ;;  %1682 = vrot.lane.b32.xlu1 %v4604_v61, %s3985_s16 }
 0x38c   : > { %v2460_v24 = vld [vmem:[#allocation2 + $0x90] sm:$0xff]  ;;  %v2590_v53 = vadd.f32 %v2512_v26, %v2459_v58  ;;  %v2461_v54 = vld [vmem:[#allocation2 + $0x98] sm:$0x7f] }
 0x38d   : > { %v2591_v3 = vadd.f32 %v5369_v37, %v2460_v24  ;;  %v2592_v57 = vadd.f32 %v5371_v45, %v2461_v54  ;;  %2621 = vst.msk [vmem:[#allocation2 + $0x80] sm:$0xff] %vm822_vm1, %v2589_v1  ;;  %v5444_v35 = vpop.permute.xlu0 %2887  ;;  %v5446_v26 = vpop.permute.xlu1 %2889 }
 0x38e   : > { %2622 = vst.msk [vmem:[#allocation2 + $0x88] sm:$0x7f] %vm1814_vm4, %v2590_v53 }
 0x38f   : > { %2623 = vst.msk [vmem:[#allocation2 + $0x90] sm:$0xff] %vm822_vm1, %v2591_v3  ;;  %3035 = vrot.lane.b32.xlu0 %v4632_v9, %s3991_s23  ;;  %3037 = vrot.lane.b32.xlu1 %v4607_v63, %s3991_s23  ;;  %v1864_v63 = vld [vmem:[#allocation2 + $0xb0] sm:$0xff] }
 0x390   : > { %2624 = vst.msk [vmem:[#allocation2 + $0x98] sm:$0x7f] %vm1814_vm4, %v2592_v57  ;;  %v1865_v18 = vld [vmem:[#allocation2 + $0xb8] sm:$0xff] }
 0x391   : > { %v1665_v37 = vpop.permute.xlu0 %1664  ;;  %v1667_v45 = vpop.permute.xlu1 %1666 }
 0x392   : > { %1740 = vst.msk [vmem:[#allocation2 + $0xa0] sm:$0xff] %vm822_vm1, %v1665_v37  ;;  %1741 = vst.msk [vmem:[#allocation2 + $0xa8] sm:$0xff] %vm822_vm1, %v1667_v45 }
 0x393   : > { %1930 = vrot.lane.b32.xlu0 %v4596_v60, %s3984_s15  ;;  %3041 = vrot.lane.b32.xlu1 %v4747_v25, %s3991_s23 }
 0x395   : > { %v2653_v46 = vld [vmem:[#allocation2 + $0x81] sm:$0xff]  ;;  %v2654_v43 = vld [vmem:[#allocation2 + $0x89] sm:$0x7f]  ;;  %v1915_v38 = vpop.permute.xlu0 %1914  ;;  %v1917_v41 = vpop.permute.xlu1 %1916 }
 0x396   : > { %v2773_v51 = vadd.f32 %v5281_v47, %v2653_v46  ;;  %v2774_v9 = vadd.f32 %v5283_v30, %v2654_v43  ;;  %v1984_v44 = vadd.f32 %v1915_v38, %v1864_v63  ;;  %v1985_v40 = vadd.f32 %v1917_v41, %v1865_v18  ;;  %v5879_v63 = vld [vmem:[#allocation7_spill] sm:$0xff]  ;;  %v5880_v18 = vld [vmem:[#allocation9_spill] sm:$0xff] }
 0x397   : > { %2338 = vrot.lane.b32.xlu0 %v4596_v60, %s3986_s17  ;;  %3045 = vrot.lane.b32.xlu1 %v4721_v5, %s3991_s23  ;;  %v2655_v5 = vld [vmem:[#allocation2 + $0x91] sm:$0xff]  ;;  %v2656_v53 = vld [vmem:[#allocation2 + $0x99] sm:$0x7f] }
 0x398   : > { %2803 = vst.msk [vmem:[#allocation2 + $0x81] sm:$0xff] %vm822_vm1, %v2773_v51  ;;  %2014 = vst.msk [vmem:[#allocation2 + $0xb0] sm:$0xff] %vm822_vm1, %v1984_v44 }
 0x399   : > { %2804 = vst.msk [vmem:[#allocation2 + $0x89] sm:$0x7f] %vm1814_vm4, %v2774_v9  ;;  %v1771_v25 = vld [vmem:[#allocation2 + $0xa1] sm:$0xff]  ;;  %v1772_v47 = vld [vmem:[#allocation2 + $0xa9] sm:$0x7f]  ;;  %v5469_v30 = vpop.permute.xlu0 %2322  ;;  %v5471_v39 = vpop.permute.xlu1 %2324 }
 0x39a   : > { %2015 = vst.msk [vmem:[#allocation2 + $0xb8] sm:$0xff] %vm822_vm1, %v1985_v40  ;;  %v1801_v58 = vadd.f32 %v4546_v48, %v1771_v25  ;;  %v1802_v62 = vadd.f32 %v4554_v4, %v1772_v47 }
 0x39b   : > { %2719 = vrot.lane.b32.xlu0 %v4596_v60, %s3987_s18  ;;  %3049 = vrot.lane.b32.xlu1 %v4908_v0, %s3991_s23 }
 0x39c   : > { %1832 = vst.msk [vmem:[#allocation2 + $0xa1] sm:$0xff] %vm822_vm1, %v1801_v58 }
 0x39d   : > { %1833 = vst.msk [vmem:[#allocation2 + $0xa9] sm:$0x7f] %vm1814_vm4, %v1802_v62  ;;  %v2704_v24 = vpop.permute.xlu0 %2703  ;;  %v2706_v1 = vpop.permute.xlu1 %2705 }
 0x39e   : > { %v2775_v57 = vadd.f32 %v2704_v24, %v2655_v5  ;;  %v2776_v48 = vadd.f32 %v2706_v1, %v2656_v53 }
 0x39f   : > { %v2833_v3 = vld [vmem:[#allocation2 + $0x80] sm:$0xff]  ;;  %2899 = vrot.lane.b32.xlu0 %v4596_v60, %s3988_s19  ;;  %3053 = vrot.lane.b32.xlu1 %v4870_v22, %s3991_s23  ;;  %v2044_v58 = vld [vmem:[#allocation2 + $0xb0] sm:$0xff] }
 0x3a0   : > { %v2834_v54 = vld [vmem:[#allocation2 + $0x88] sm:$0xff]  ;;  %v2953_v37 = vadd.f32 %v5294_v7, %v2833_v3  ;;  %2805 = vst.msk [vmem:[#allocation2 + $0x91] sm:$0xff] %vm822_vm1, %v2775_v57  ;;  %v5883_v57 = vld [vmem:[#allocation3_spill] sm:$0xff] }
 0x3a1   : > { %v2954_v4 = vadd.f32 %v5296_v31, %v2834_v54  ;;  %2806 = vst.msk [vmem:[#allocation2 + $0x99] sm:$0x7f] %vm1814_vm4, %v2776_v48  ;;  %v2884_v0 = vpop.permute.xlu0 %2883  ;;  %v2886_v45 = vpop.permute.xlu1 %2885  ;;  %v2045_v44 = vld [vmem:[#allocation2 + $0xb8] sm:$0x7f]  ;;  %v5881_v54 = vld [vmem:[#allocation8_spill] sm:$0xff] }
 0x3a2   : > { %2983 = vst.msk [vmem:[#allocation2 + $0x80] sm:$0xff] %vm822_vm1, %v2953_v37 }
 0x3a3   : > { %2984 = vst.msk [vmem:[#allocation2 + $0x88] sm:$0xff] %vm822_vm1, %v2954_v4  ;;  %v1862_v46 = vld [vmem:[#allocation2 + $0xa0] sm:$0xff]  ;;  %3039 = vrot.lane.b32.xlu0 %v4756_v11, %s3991_s23  ;;  %1932 = vrot.lane.b32.xlu1 %v4604_v61, %s3984_s15 }
 0x3a4   : > { %v1863_v31 = vld [vmem:[#allocation2 + $0xa8] sm:$0xff]  ;;  %v1982_v22 = vadd.f32 %v5257_v28, %v1862_v46 }
 0x3a5   : > { %v1983_v7 = vadd.f32 %v5259_v16, %v1863_v31  ;;  %v5497_v43 = vpop.permute.xlu0 %2144  ;;  %v5499_v51 = vpop.permute.xlu1 %2146  ;;  %v5884_v46 = vld [vmem:[#allocation4_spill] sm:$0xff]  ;;  %v5885_v31 = vld [vmem:[#allocation6_spill] sm:$0xff] }
 0x3a6   : > { %2012 = vst.msk [vmem:[#allocation2 + $0xa0] sm:$0xff] %vm822_vm1, %v1982_v22 }
 0x3a7   : > { %2013 = vst.msk [vmem:[#allocation2 + $0xa8] sm:$0xff] %vm822_vm1, %v1983_v7  ;;  %v2835_v9 = vld [vmem:[#allocation2 + $0x90] sm:$0xff]  ;;  %3043 = vrot.lane.b32.xlu0 %v5879_v63, %s3991_s23  ;;  %2340 = vrot.lane.b32.xlu1 %v4604_v61, %s3986_s17 }
 0x3a8   : > { %v2836_v38 = vld [vmem:[#allocation2 + $0x98] sm:$0xff]  ;;  %v2955_v11 = vadd.f32 %v2884_v0, %v2835_v9 }
 0x3a9   : > { %v2956_v28 = vadd.f32 %v2886_v45, %v2836_v38  ;;  %v5507_v41 = vpop.permute.xlu0 %2521  ;;  %v5509_v16 = vpop.permute.xlu1 %2523 }
 0x3aa   : > { %2985 = vst.msk [vmem:[#allocation2 + $0x90] sm:$0xff] %vm822_vm1, %v2955_v11 }
 0x3ab   : > { %2986 = vst.msk [vmem:[#allocation2 + $0x98] sm:$0xff] %vm822_vm1, %v2956_v28  ;;  %3047 = vrot.lane.b32.xlu0 %v5880_v18, %s3991_s23  ;;  %2721 = vrot.lane.b32.xlu1 %v4604_v61, %s3987_s18 }
 0x3ad   : > { %v2042_v40 = vld [vmem:[#allocation2 + $0xa0] sm:$0xff]  ;;  %v2143_v47 = vpop.permute.xlu1 %2142  ;;  %v2141_v62 = vpop.permute.xlu0 %2140 }
 0x3ae   : > { %v2043_v25 = vld [vmem:[#allocation2 + $0xa8] sm:$0x7f]  ;;  %v2208_v5 = vadd.f32 %v5355_v50, %v2042_v40  ;;  %v2211_v53 = vadd.f32 %v2143_v47, %v2045_v44  ;;  %v2210_v1 = vadd.f32 %v2141_v62, %v2044_v58 }
 0x3af   : > { %v2209_v24 = vadd.f32 %v5357_v55, %v2043_v25  ;;  %3051 = vrot.lane.b32.xlu0 %v5881_v54, %s3991_s23  ;;  %2901 = vrot.lane.b32.xlu1 %v4604_v61, %s3988_s19  ;;  %v5882_v55 = vld [vmem:[#allocation5_spill] sm:$0xff] }
 0x3b0   : > { %2238 = vst.msk [vmem:[#allocation2 + $0xa0] sm:$0xff] %vm822_vm1, %v2208_v5  ;;  %2240 = vst.msk [vmem:[#allocation2 + $0xb0] sm:$0xff] %vm822_vm1, %v2210_v1 }
 0x3b1   : > { %2239 = vst.msk [vmem:[#allocation2 + $0xa8] sm:$0x7f] %vm1814_vm4, %v2209_v24  ;;  %2241 = vst.msk [vmem:[#allocation2 + $0xb8] sm:$0x7f] %vm1814_vm4, %v2211_v53  ;;  %v2520_v3 = vpop.permute.xlu1 %2519  ;;  %v2518_v50 = vpop.permute.xlu0 %2517 }
 0x3b3   : > { %2537 = vrot.lane.b32.xlu0 %v5882_v55, %s3990_s22  ;;  %2539 = vrot.lane.b32.xlu1 %v5883_v57, %s3990_s22 }
 0x3b5   : > { %v1677_v48 = vpop.permute.xlu0 %1676  ;;  %v1679_v4 = vpop.permute.xlu1 %1678 }
 0x3b6   : > { %1746 = vst.msk [vmem:[#allocation2 + $0xd0] sm:$0xff] %vm822_vm1, %v1677_v48  ;;  %1747 = vst.msk [vmem:[#allocation2 + $0xd8] sm:$0xff] %vm822_vm1, %v1679_v4 }
 0x3b7   : > { %2158 = vrot.lane.b32.xlu1 %v5884_v46, %s3989_s20  ;;  %2156 = vrot.lane.b32.xlu0 %v5885_v31, %s3989_s20 }
 0x3b8   : > { %v2270_v37 = vld [vmem:[#allocation2 + $0xa1] sm:$0xff]  ;;  %v2271_v0 = vld [vmem:[#allocation2 + $0xa9] sm:$0x7f]  ;;  %v2273_v45 = vld [vmem:[#allocation2 + $0xb9] sm:$0x7f] }
 0x3b9   : > { %v2398_v22 = vadd.f32 %v5469_v30, %v2270_v37  ;;  %v2399_v7 = vadd.f32 %v5471_v39, %v2271_v0  ;;  %v2401_v9 = vadd.f32 %v5421_v59, %v2273_v45  ;;  %v2272_v38 = vld [vmem:[#allocation2 + $0xb1] sm:$0xff]  ;;  %v5541_v11 = vpop.permute.xlu0 %1926  ;;  %v5543_v28 = vpop.permute.xlu1 %1928 }
 0x3ba   : > { %v2400_v63 = vadd.f32 %v5419_v49, %v2272_v38 }
 0x3bb   : > { %2430 = vst.msk [vmem:[#allocation2 + $0xa1] sm:$0xff] %vm822_vm1, %v2398_v22  ;;  %2535 = vrot.lane.b32.xlu1 %v5884_v46, %s3990_s22  ;;  %2533 = vrot.lane.b32.xlu0 %v5885_v31, %s3990_s22 }
 0x3bc   : > { %2431 = vst.msk [vmem:[#allocation2 + $0xa9] sm:$0x7f] %vm1814_vm4, %v2399_v7  ;;  %2433 = vst.msk [vmem:[#allocation2 + $0xb9] sm:$0x7f] %vm1814_vm4, %v2401_v9 }
 0x3bd   : > { %2432 = vst.msk [vmem:[#allocation2 + $0xb1] sm:$0xff] %vm822_vm1, %v2400_v63  ;;  %v1777_v59 = vld [vmem:[#allocation2 + $0xd1] sm:$0xff]  ;;  %v1778_v49 = vld [vmem:[#allocation2 + $0xd9] sm:$0x7f]  ;;  %v5553_v30 = vpop.permute.xlu0 %2334  ;;  %v5555_v39 = vpop.permute.xlu1 %2336 }
 0x3be   : > { %v1807_v18 = vadd.f32 %v1777_v59, %v4580_v56  ;;  %v1808_v44 = vadd.f32 %v1778_v49, %v4588_v32 }
 0x3bf   : > { %3057 = vrot.lane.b32.xlu1 %v5062_v17, %s3991_s23  ;;  %3055 = vrot.lane.b32.xlu0 %v5077_v2, %s3991_s23 }
 0x3c0   : > { %1838 = vst.msk [vmem:[#allocation2 + $0xd1] sm:$0xff] %vm822_vm1, %v1807_v18 }
 0x3c1   : > { %1839 = vst.msk [vmem:[#allocation2 + $0xd9] sm:$0x7f] %vm1814_vm4, %v1808_v44  ;;  %v5565_v47 = vpop.permute.xlu0 %2715  ;;  %v5567_v58 = vpop.permute.xlu1 %2717 }
 0x3c2   : > { %v2462_v25 = vld [vmem:[#allocation2 + $0xa0] sm:$0xff] }
 0x3c3   : > { %v2463_v40 = vld [vmem:[#allocation2 + $0xa8] sm:$0x7f]  ;;  %v2593_v5 = vadd.f32 %v2518_v50, %v2462_v25  ;;  %3061 = vrot.lane.b32.xlu1 %v5037_v20, %s3991_s23  ;;  %3059 = vrot.lane.b32.xlu0 %v5047_v6, %s3991_s23 }
 0x3c4   : > { %v2464_v62 = vld [vmem:[#allocation2 + $0xb0] sm:$0xff]  ;;  %v2594_v56 = vadd.f32 %v2520_v3, %v2463_v40  ;;  %v2465_v32 = vld [vmem:[#allocation2 + $0xb8] sm:$0x7f] }
 0x3c5   : > { %v2595_v24 = vadd.f32 %v5507_v41, %v2464_v62  ;;  %v2596_v17 = vadd.f32 %v5509_v16, %v2465_v32  ;;  %2625 = vst.msk [vmem:[#allocation2 + $0xa0] sm:$0xff] %vm822_vm1, %v2593_v5  ;;  %v5578_v2 = vpop.permute.xlu0 %2895  ;;  %v5580_v53 = vpop.permute.xlu1 %2897 }
 0x3c6   : > { %2626 = vst.msk [vmem:[#allocation2 + $0xa8] sm:$0x7f] %vm1814_vm4, %v2594_v56 }
 0x3c7   : > { %2627 = vst.msk [vmem:[#allocation2 + $0xb0] sm:$0xff] %vm822_vm1, %v2595_v24  ;;  %3065 = vrot.lane.b32.xlu1 %v5212_v12, %s3991_s23  ;;  %3063 = vrot.lane.b32.xlu0 %v5227_v29, %s3991_s23  ;;  %v1868_v29 = vld [vmem:[#allocation2 + $0xd0] sm:$0xff] }
 0x3c8   : > { %2628 = vst.msk [vmem:[#allocation2 + $0xb8] sm:$0x7f] %vm1814_vm4, %v2596_v17  ;;  %v1869_v50 = vld [vmem:[#allocation2 + $0xd8] sm:$0xff] }
 0x3c9   : > { %v1673_v20 = vpop.permute.xlu0 %1672  ;;  %v1675_v6 = vpop.permute.xlu1 %1674 }
 0x3ca   : > { %1744 = vst.msk [vmem:[#allocation2 + $0xc0] sm:$0xff] %vm822_vm1, %v1673_v20  ;;  %1745 = vst.msk [vmem:[#allocation2 + $0xc8] sm:$0xff] %vm822_vm1, %v1675_v6 }
 0x3cb   : > { %3069 = vrot.lane.b32.xlu1 %v5183_v8, %s3991_s23  ;;  %3067 = vrot.lane.b32.xlu0 %v5197_v19, %s3991_s23 }
 0x3cd   : > { %v2657_v41 = vld [vmem:[#allocation2 + $0xa1] sm:$0xff]  ;;  %v2658_v16 = vld [vmem:[#allocation2 + $0xa9] sm:$0x7f]  ;;  %v1923_v54 = vpop.permute.xlu0 %1922  ;;  %v1925_v3 = vpop.permute.xlu1 %1924 }
 0x3ce   : > { %v2777_v1 = vadd.f32 %v5431_v36, %v2657_v41  ;;  %v2778_v12 = vadd.f32 %v5433_v21, %v2658_v16  ;;  %v1988_v48 = vadd.f32 %v1923_v54, %v1868_v29  ;;  %v1989_v4 = vadd.f32 %v1925_v3, %v1869_v50 }
 0x3cf   : > { %3073 = vrot.lane.b32.xlu1 %v5362_v10, %s3991_s23  ;;  %3071 = vrot.lane.b32.xlu0 %v5377_v15, %s3991_s23  ;;  %v2659_v10 = vld [vmem:[#allocation2 + $0xb1] sm:$0xff]  ;;  %v2660_v45 = vld [vmem:[#allocation2 + $0xb9] sm:$0x7f] }
 0x3d0   : > { %2807 = vst.msk [vmem:[#allocation2 + $0xa1] sm:$0xff] %vm822_vm1, %v2777_v1  ;;  %2018 = vst.msk [vmem:[#allocation2 + $0xd0] sm:$0xff] %vm822_vm1, %v1988_v48 }
 0x3d1   : > { %2808 = vst.msk [vmem:[#allocation2 + $0xa9] sm:$0x7f] %vm1814_vm4, %v2778_v12  ;;  %v1775_v8 = vld [vmem:[#allocation2 + $0xc1] sm:$0xff]  ;;  %v1776_v19 = vld [vmem:[#allocation2 + $0xc9] sm:$0x7f]  ;;  %v5603_v36 = vpop.permute.xlu0 %2330  ;;  %v5605_v21 = vpop.permute.xlu1 %2332 }
 0x3d2   : > { %2019 = vst.msk [vmem:[#allocation2 + $0xd8] sm:$0xff] %vm822_vm1, %v1989_v4  ;;  %v1805_v37 = vadd.f32 %v4562_v52, %v1775_v8  ;;  %v1806_v0 = vadd.f32 %v4570_v23, %v1776_v19 }
 0x3d3   : > { %3077 = vrot.lane.b32.xlu1 %v5333_v42, %s3991_s23  ;;  %3075 = vrot.lane.b32.xlu0 %v5347_v14, %s3991_s23 }
 0x3d4   : > { %1836 = vst.msk [vmem:[#allocation2 + $0xc1] sm:$0xff] %vm822_vm1, %v1805_v37 }
 0x3d5   : > { %1837 = vst.msk [vmem:[#allocation2 + $0xc9] sm:$0x7f] %vm1814_vm4, %v1806_v0  ;;  %v2712_v15 = vpop.permute.xlu0 %2711  ;;  %v2714_v22 = vpop.permute.xlu1 %2713 }
 0x3d6   : > { %v2779_v38 = vadd.f32 %v2712_v15, %v2659_v10  ;;  %v2780_v52 = vadd.f32 %v2714_v22, %v2660_v45 }
 0x3d7   : > { %v2837_v9 = vld [vmem:[#allocation2 + $0xa0] sm:$0xff]  ;;  %3081 = vrot.lane.b32.xlu1 %v5884_v46, %s3991_s23  ;;  %3079 = vrot.lane.b32.xlu0 %v5885_v31, %s3991_s23  ;;  %v2048_v5 = vld [vmem:[#allocation2 + $0xd0] sm:$0xff] }
 0x3d8   : > { %v2838_v7 = vld [vmem:[#allocation2 + $0xa8] sm:$0xff]  ;;  %v2957_v63 = vadd.f32 %v5444_v35, %v2837_v9  ;;  %2809 = vst.msk [vmem:[#allocation2 + $0xb1] sm:$0xff] %vm822_vm1, %v2779_v38 }
 0x3d9   : > { %v2958_v23 = vadd.f32 %v5446_v26, %v2838_v7  ;;  %2810 = vst.msk [vmem:[#allocation2 + $0xb9] sm:$0x7f] %vm1814_vm4, %v2780_v52  ;;  %v2892_v42 = vpop.permute.xlu0 %2891  ;;  %v2894_v14 = vpop.permute.xlu1 %2893 }
 0x3da   : > { %2987 = vst.msk [vmem:[#allocation2 + $0xa0] sm:$0xff] %vm822_vm1, %v2957_v63 }
 0x3db   : > { %2988 = vst.msk [vmem:[#allocation2 + $0xa8] sm:$0xff] %vm822_vm1, %v2958_v23  ;;  %v1866_v59 = vld [vmem:[#allocation2 + $0xc0] sm:$0xff]  ;;  %3085 = vrot.lane.b32.xlu1 %v5883_v57, %s3991_s23  ;;  %3083 = vrot.lane.b32.xlu0 %v5882_v55, %s3991_s23 }
 0x3dc   : > { %v1867_v26 = vld [vmem:[#allocation2 + $0xc8] sm:$0xff]  ;;  %v1986_v35 = vadd.f32 %v5407_v34, %v1866_v59  ;;  %v2049_v34 = vld [vmem:[#allocation2 + $0xd8] sm:$0x7f] }
 0x3dd   : > { %v1987_v46 = vadd.f32 %v5409_v33, %v1867_v26  ;;  %v5631_v31 = vpop.permute.xlu0 %2152  ;;  %v5633_v49 = vpop.permute.xlu1 %2154  ;;  %v3002_v59 = vld [vmem:[#allocation2 + $0x28] sm:$0x7f] }
 0x3de   : > { %2016 = vst.msk [vmem:[#allocation2 + $0xc0] sm:$0xff] %vm822_vm1, %v1986_v35 }
 0x3df   : > { %2017 = vst.msk [vmem:[#allocation2 + $0xc8] sm:$0xff] %vm822_vm1, %v1987_v46  ;;  %v2839_v18 = vld [vmem:[#allocation2 + $0xb0] sm:$0xff] }
 0x3e0   : > { %v2840_v44 = vld [vmem:[#allocation2 + $0xb8] sm:$0xff]  ;;  %v2959_v40 = vadd.f32 %v2892_v42, %v2839_v18  ;;  %v3001_v42 = vld [vmem:[#allocation2 + $0x20] sm:$0xff] }
 0x3e1   : > { %v2960_v25 = vadd.f32 %v2894_v14, %v2840_v44  ;;  %v2530_v57 = vpop.permute.xlu0 %2529  ;;  %v2532_v62 = vpop.permute.xlu1 %2531 }
 0x3e2   : > { %2989 = vst.msk [vmem:[#allocation2 + $0xb0] sm:$0xff] %vm822_vm1, %v2959_v40 }
 0x3e3   : > { %2990 = vst.msk [vmem:[#allocation2 + $0xb8] sm:$0xff] %vm822_vm1, %v2960_v25  ;;  %v3004_v25 = vld [vmem:[#allocation2 + $0x38] sm:$0x7f] }
 0x3e5   : > { %v2046_v33 = vld [vmem:[#allocation2 + $0xc0] sm:$0xff]  ;;  %v2151_v56 = vpop.permute.xlu1 %2150  ;;  %v2149_v32 = vpop.permute.xlu0 %2148 }
 0x3e6   : > { %v2047_v55 = vld [vmem:[#allocation2 + $0xc8] sm:$0x7f]  ;;  %v2212_v24 = vadd.f32 %v5497_v43, %v2046_v33  ;;  %v2215_v20 = vadd.f32 %v2151_v56, %v2049_v34  ;;  %v2214_v6 = vadd.f32 %v2149_v32, %v2048_v5 }
 0x3e7   : > { %v2213_v17 = vadd.f32 %v5499_v51, %v2047_v55 }
 0x3e8   : > { %2242 = vst.msk [vmem:[#allocation2 + $0xc0] sm:$0xff] %vm822_vm1, %v2212_v24  ;;  %2244 = vst.msk [vmem:[#allocation2 + $0xd0] sm:$0xff] %vm822_vm1, %v2214_v6 }
 0x3e9   : > { %2243 = vst.msk [vmem:[#allocation2 + $0xc8] sm:$0x7f] %vm1814_vm4, %v2213_v17  ;;  %2245 = vst.msk [vmem:[#allocation2 + $0xd8] sm:$0x7f] %vm1814_vm4, %v2215_v20  ;;  %v2528_v41 = vpop.permute.xlu1 %2527  ;;  %v2526_v16 = vpop.permute.xlu0 %2525  ;;  %v3006_v17 = vld [vmem:[#allocation2 + $0x48] sm:$0x7f] }
 0x3ed   : > { %v1685_v1 = vpop.permute.xlu0 %1684  ;;  %v1687_v12 = vpop.permute.xlu1 %1686 }
 0x3ee   : > { %1750 = vst.msk [vmem:[#allocation2 + $0xf0] sm:$0xff] %vm822_vm1, %v1685_v1  ;;  %1751 = vst.msk [vmem:[#allocation2 + $0xf8] sm:$0xff] %vm822_vm1, %v1687_v12  ;;  %v3008_v12 = vld [vmem:[#allocation2 + $0x58] sm:$0x7f] }
 0x3f0   : > { %v2274_v43 = vld [vmem:[#allocation2 + $0xc1] sm:$0xff]  ;;  %v2275_v51 = vld [vmem:[#allocation2 + $0xc9] sm:$0x7f]  ;;  %v2277_v54 = vld [vmem:[#allocation2 + $0xd9] sm:$0x7f] }
 0x3f1   : > { %v2402_v29 = vadd.f32 %v5603_v36, %v2274_v43  ;;  %v2403_v3 = vadd.f32 %v5605_v21, %v2275_v51  ;;  %v2405_v50 = vadd.f32 %v5555_v39, %v2277_v54  ;;  %v2276_v48 = vld [vmem:[#allocation2 + $0xd1] sm:$0xff]  ;;  %v5651_v8 = vpop.permute.xlu0 %2342  ;;  %v5653_v19 = vpop.permute.xlu1 %2344 }
 0x3f2   : > { %v2404_v4 = vadd.f32 %v5553_v30, %v2276_v48 }
 0x3f3   : > { %2434 = vst.msk [vmem:[#allocation2 + $0xc1] sm:$0xff] %vm822_vm1, %v2402_v29 }
 0x3f4   : > { %2435 = vst.msk [vmem:[#allocation2 + $0xc9] sm:$0x7f] %vm1814_vm4, %v2403_v3  ;;  %2437 = vst.msk [vmem:[#allocation2 + $0xd9] sm:$0x7f] %vm1814_vm4, %v2405_v50 }
 0x3f5   : > { %2436 = vst.msk [vmem:[#allocation2 + $0xd1] sm:$0xff] %vm822_vm1, %v2404_v4  ;;  %v1781_v36 = vld [vmem:[#allocation2 + $0xf1] sm:$0xff]  ;;  %v1782_v37 = vld [vmem:[#allocation2 + $0xf9] sm:$0x7f]  ;;  %v5659_v21 = vpop.permute.xlu0 %2723  ;;  %v5661_v39 = vpop.permute.xlu1 %2725 }
 0x3f6   : > { %v1811_v30 = vadd.f32 %v1781_v36, %v4596_v60  ;;  %v1812_v0 = vadd.f32 %v1782_v37, %v4604_v61 }
 0x3f8   : > { %1842 = vst.msk [vmem:[#allocation2 + $0xf1] sm:$0xff] %vm822_vm1, %v1811_v30 }
 0x3f9   : > { %1843 = vst.msk [vmem:[#allocation2 + $0xf9] sm:$0x7f] %vm1814_vm4, %v1812_v0  ;;  %v5667_v45 = vpop.permute.xlu0 %2903  ;;  %v5669_v22 = vpop.permute.xlu1 %2905 }
 0x3fa   : > { %v2466_v15 = vld [vmem:[#allocation2 + $0xc0] sm:$0xff] }
 0x3fb   : > { %v2467_v10 = vld [vmem:[#allocation2 + $0xc8] sm:$0x7f]  ;;  %v2597_v38 = vadd.f32 %v2526_v16, %v2466_v15 }
 0x3fc   : > { %v2468_v7 = vld [vmem:[#allocation2 + $0xd0] sm:$0xff]  ;;  %v2598_v9 = vadd.f32 %v2528_v41, %v2467_v10  ;;  %v2469_v52 = vld [vmem:[#allocation2 + $0xd8] sm:$0x7f] }
 0x3fd   : > { %v2599_v23 = vadd.f32 %v2530_v57, %v2468_v7  ;;  %v2600_v63 = vadd.f32 %v2532_v62, %v2469_v52  ;;  %2629 = vst.msk [vmem:[#allocation2 + $0xc0] sm:$0xff] %vm822_vm1, %v2597_v38  ;;  %v1681_v60 = vpop.permute.xlu0 %1680  ;;  %v1683_v61 = vpop.permute.xlu1 %1682 }
 0x3fe   : > { %2630 = vst.msk [vmem:[#allocation2 + $0xc8] sm:$0x7f] %vm1814_vm4, %v2598_v9 }
 0x3ff   : > { %2631 = vst.msk [vmem:[#allocation2 + $0xd0] sm:$0xff] %vm822_vm1, %v2599_v23  ;;  %1748 = vst.msk [vmem:[#allocation2 + $0xe0] sm:$0xff] %vm822_vm1, %v1681_v60  ;;  %v1872_v55 = vld [vmem:[#allocation2 + $0xf0] sm:$0xff]  ;;  %v3010_v23 = vld [vmem:[#allocation2 + $0x68] sm:$0x7f] }
 0x400   : > { %2632 = vst.msk [vmem:[#allocation2 + $0xd8] sm:$0x7f] %vm1814_vm4, %v2600_v63  ;;  %v3003_v60 = vld [vmem:[#allocation2 + $0x30] sm:$0xff] }
 0x401   : > { %1749 = vst.msk [vmem:[#allocation2 + $0xe8] sm:$0xff] %vm822_vm1, %v1683_v61  ;;  %v3036_v14 = vpop.permute.xlu0 %3035  ;;  %v3038_v26 = vpop.permute.xlu1 %3037 }
 0x402   : > { %v3121_v35 = vadd.f32 %v3036_v14, %v3001_v42  ;;  %v3122_v46 = vadd.f32 %v3038_v26, %v3002_v59  ;;  %v1873_v14 = vld [vmem:[#allocation2 + $0xf8] sm:$0xff] }
 0x404   : > { %3151 = vst.msk [vmem:[#allocation2 + $0x20] sm:$0xff] %vm822_vm1, %v3121_v35 }
 0x405   : > { %v2661_v18 = vld [vmem:[#allocation2 + $0xc1] sm:$0xff]  ;;  %v2662_v44 = vld [vmem:[#allocation2 + $0xc9] sm:$0x7f]  ;;  %3152 = vst.msk [vmem:[#allocation2 + $0x28] sm:$0x7f] %vm1814_vm4, %v3122_v46  ;;  %v1931_v33 = vpop.permute.xlu0 %1930  ;;  %v3042_v56 = vpop.permute.xlu1 %3041 }
 0x406   : > { %v2781_v40 = vadd.f32 %v5565_v47, %v2661_v18  ;;  %v2782_v57 = vadd.f32 %v5567_v58, %v2662_v44  ;;  %v1992_v24 = vadd.f32 %v1931_v33, %v1872_v55  ;;  %v3124_v47 = vadd.f32 %v3042_v56, %v3004_v25 }
 0x407   : > { %v2663_v43 = vld [vmem:[#allocation2 + $0xd1] sm:$0xff] }
 0x408   : > { %v1779_v62 = vld [vmem:[#allocation2 + $0xe1] sm:$0xff]  ;;  %v1780_v34 = vld [vmem:[#allocation2 + $0xe9] sm:$0x7f]  ;;  %2811 = vst.msk [vmem:[#allocation2 + $0xc1] sm:$0xff] %vm822_vm1, %v2781_v40  ;;  %2022 = vst.msk [vmem:[#allocation2 + $0xf0] sm:$0xff] %vm822_vm1, %v1992_v24 }
 0x409   : > { %v1809_v5 = vadd.f32 %v4578_v27, %v1779_v62  ;;  %v1810_v32 = vadd.f32 %v4586_v13, %v1780_v34  ;;  %2812 = vst.msk [vmem:[#allocation2 + $0xc9] sm:$0x7f] %vm1814_vm4, %v2782_v57  ;;  %3154 = vst.msk [vmem:[#allocation2 + $0x38] sm:$0x7f] %vm1814_vm4, %v3124_v47  ;;  %v5689_v58 = vpop.permute.xlu0 %2338  ;;  %v3046_v20 = vpop.permute.xlu1 %3045  ;;  %v5694_v13 = vld [vmem:[%s5861_s11] ss:$0 sm:$0xff] }
 0x40a   : > { %v3126_v6 = vadd.f32 %v3046_v20, %v3006_v17  ;;  %v3005_v62 = vld [vmem:[#allocation2 + $0x40] sm:$0xff]  ;;  %v3007_v17 = vld [vmem:[#allocation2 + $0x50] sm:$0xff]  ;;  %v2664_v20 = vld [vmem:[#allocation2 + $0xd9] sm:$0x7f] }
 0x40b   : > { %1840 = vst.msk [vmem:[#allocation2 + $0xe1] sm:$0xff] %vm822_vm1, %v1809_v5  ;;  %v3181_v27 = vld [vmem:[#allocation2 + $0x20] sm:$0xff] }
 0x40c   : > { %1841 = vst.msk [vmem:[#allocation2 + $0xe9] sm:$0x7f] %vm1814_vm4, %v1810_v32  ;;  %v3182_v41 = vld [vmem:[#allocation2 + $0x28] sm:$0xff]  ;;  %v3220_v16 = vadd.f32 %v5694_v13, %v3181_v27  ;;  %3156 = vst.msk [vmem:[#allocation2 + $0x48] sm:$0x7f] %vm1814_vm4, %v3126_v6 }
 0x40d   : > { %v3221_v1 = vadd.f32 %v5694_v13, %v3182_v41  ;;  %v2720_v51 = vpop.permute.xlu0 %2719  ;;  %v3050_v54 = vpop.permute.xlu1 %3049 }
 0x40e   : > { %v3582_v50 = vpack.c.bf16 %v3220_v16, %v3220_v16  ;;  %v2783_v4 = vadd.f32 %v2720_v51, %v2663_v43  ;;  %v3128_v36 = vadd.f32 %v3050_v54, %v3008_v12  ;;  %v3009_v12 = vld [vmem:[#allocation2 + $0x60] sm:$0xff] }
 0x40f   : > { %v2841_v3 = vld [vmem:[#allocation2 + $0xc0] sm:$0xff]  ;;  %v3583_v48 = vpack.c.bf16 %v3221_v1, %v3221_v1 }
 0x410   : > { %v2842_v29 = vld [vmem:[#allocation2 + $0xc8] sm:$0xff]  ;;  %v3184_v0 = vld [vmem:[#allocation2 + $0x38] sm:$0xff]  ;;  %v2961_v15 = vadd.f32 %v5578_v2, %v2841_v3  ;;  %3381 = vst.msk [vmem:[%s4876_s28 + $0x10] sm:$0xf] %vm3376_vm5, %v3582_v50 }
 0x411   : > { %v2962_v10 = vadd.f32 %v5580_v53, %v2842_v29  ;;  %3382 = vst.msk [vmem:[%s4876_s28 + $0x14] sm:$0xf] %vm3376_vm5, %v3583_v48  ;;  %v3223_v38 = vadd.f32 %v5694_v13, %v3184_v0  ;;  %v2900_v52 = vpop.permute.xlu0 %2899  ;;  %v3054_v53 = vpop.permute.xlu1 %3053 }
 0x412   : > { %v1870_v37 = vld [vmem:[#allocation2 + $0xe0] sm:$0xff]  ;;  %2813 = vst.msk [vmem:[#allocation2 + $0xd1] sm:$0xff] %vm822_vm1, %v2783_v4  ;;  %2991 = vst.msk [vmem:[#allocation2 + $0xc0] sm:$0xff] %vm822_vm1, %v2961_v15 }
 0x413   : > { %v1871_v30 = vld [vmem:[#allocation2 + $0xe8] sm:$0xff]  ;;  %v1990_v7 = vadd.f32 %v5541_v11, %v1870_v37  ;;  %3158 = vst.msk [vmem:[#allocation2 + $0x58] sm:$0x7f] %vm1814_vm4, %v3128_v36  ;;  %v3585_v11 = vpack.c.bf16 %v3223_v38, %v3223_v38 }
 0x414   : > { %v1991_v9 = vadd.f32 %v5543_v28, %v1871_v30  ;;  %2992 = vst.msk [vmem:[#allocation2 + $0xc8] sm:$0xff] %vm822_vm1, %v2962_v10  ;;  %v3130_v28 = vadd.f32 %v3054_v53, %v3010_v23  ;;  %v3186_v2 = vld [vmem:[#allocation2 + $0x48] sm:$0xff]  ;;  %v2052_v23 = vld [vmem:[#allocation2 + $0xf0] sm:$0xff] }
 0x415   : > { %2020 = vst.msk [vmem:[#allocation2 + $0xe0] sm:$0xff] %vm822_vm1, %v1990_v7  ;;  %v3225_v63 = vadd.f32 %v5694_v13, %v3186_v2  ;;  %v3040_v61 = vpop.permute.xlu0 %3039  ;;  %v1933_v42 = vpop.permute.xlu1 %1932 }
 0x416   : > { %2021 = vst.msk [vmem:[#allocation2 + $0xe8] sm:$0xff] %vm822_vm1, %v1991_v9  ;;  %v3123_v26 = vadd.f32 %v3040_v61, %v3003_v60  ;;  %v1993_v35 = vadd.f32 %v1933_v42, %v1873_v14 }
 0x417   : > { %3384 = vst.msk [vmem:[%s4876_s28 + $0x1c] sm:$0xf] %vm3376_vm5, %v3585_v11  ;;  %v3587_v59 = vpack.c.bf16 %v3225_v63, %v3225_v63 }
 0x418   : > { %3160 = vst.msk [vmem:[#allocation2 + $0x68] sm:$0x7f] %vm1814_vm4, %v3130_v28 }
 0x419   : > { %v2843_v18 = vld [vmem:[#allocation2 + $0xd0] sm:$0xff]  ;;  %3386 = vst.msk [vmem:[%s4876_s28 + $0x24] sm:$0xf] %vm3376_vm5, %v3587_v59  ;;  %v3044_v34 = vpop.permute.xlu0 %3043  ;;  %v2341_v33 = vpop.permute.xlu1 %2340 }
 0x41a   : > { %v3188_v46 = vld [vmem:[#allocation2 + $0x58] sm:$0xff]  ;;  %v2963_v40 = vadd.f32 %v2900_v52, %v2843_v18  ;;  %3153 = vst.msk [vmem:[#allocation2 + $0x30] sm:$0xff] %vm822_vm1, %v3123_v26  ;;  %2023 = vst.msk [vmem:[#allocation2 + $0xf8] sm:$0xff] %vm822_vm1, %v1993_v35  ;;  %v3125_v32 = vadd.f32 %v3044_v34, %v3005_v62 }
 0x41b   : > { %v3227_v44 = vadd.f32 %v5694_v13, %v3188_v46  ;;  %v3012_v18 = vld [vmem:[#allocation2 + $0x78] sm:$0x7f] }
 0x41c   : > { %v2050_v25 = vld [vmem:[#allocation2 + $0xe0] sm:$0xff]  ;;  %2993 = vst.msk [vmem:[#allocation2 + $0xd0] sm:$0xff] %vm822_vm1, %v2963_v40  ;;  %3155 = vst.msk [vmem:[#allocation2 + $0x40] sm:$0xff] %vm822_vm1, %v3125_v32  ;;  %v3011_v40 = vld [vmem:[#allocation2 + $0x70] sm:$0xff] }
 0x41d   : > { %v2051_v57 = vld [vmem:[#allocation2 + $0xe8] sm:$0x7f]  ;;  %v2216_v55 = vadd.f32 %v5631_v31, %v2050_v25  ;;  %v3589_v5 = vpack.c.bf16 %v3227_v44, %v3227_v44  ;;  %v3048_v31 = vpop.permute.xlu0 %3047 }
 0x41e   : > { %v2217_v56 = vadd.f32 %v5633_v49, %v2051_v57  ;;  %v2722_v49 = vpop.permute.xlu1 %2721  ;;  %v3127_v27 = vadd.f32 %v3048_v31, %v3007_v17 }
 0x41f   : > { %v3190_v24 = vld [vmem:[#allocation2 + $0x68] sm:$0xff]  ;;  %2246 = vst.msk [vmem:[#allocation2 + $0xe0] sm:$0xff] %vm822_vm1, %v2216_v55  ;;  %v2784_v41 = vadd.f32 %v2722_v49, %v2664_v20 }
 0x420   : > { %2247 = vst.msk [vmem:[#allocation2 + $0xe8] sm:$0x7f] %vm1814_vm4, %v2217_v56  ;;  %v3229_v47 = vadd.f32 %v5694_v13, %v3190_v24  ;;  %v3013_v24 = vld [vmem:[#allocation2 + $0x80] sm:$0xff] }
 0x421   : > { %3388 = vst.msk [vmem:[%s4876_s28 + $0x2c] sm:$0xf] %vm3376_vm5, %v3589_v5  ;;  %v3183_v16 = vld [vmem:[#allocation2 + $0x30] sm:$0xff]  ;;  %v3052_v43 = vpop.permute.xlu0 %3051  ;;  %v2053_v52 = vld [vmem:[#allocation2 + $0xf8] sm:$0x7f] }
 0x422   : > { %v3591_v6 = vpack.c.bf16 %v3229_v47, %v3229_v47  ;;  %v3222_v1 = vadd.f32 %v5694_v13, %v3183_v16  ;;  %3157 = vst.msk [vmem:[#allocation2 + $0x50] sm:$0xff] %vm822_vm1, %v3127_v27  ;;  %v2902_v51 = vpop.permute.xlu1 %2901  ;;  %v3129_v29 = vadd.f32 %v3052_v43, %v3009_v12  ;;  %v3014_v5 = vld [vmem:[#allocation2 + $0x88] sm:$0x7f] }
 0x423   : > { %2814 = vst.msk [vmem:[#allocation2 + $0xd9] sm:$0x7f] %vm1814_vm4, %v2784_v41  ;;  %v3185_v50 = vld [vmem:[#allocation2 + $0x40] sm:$0xff]  ;;  %v3015_v41 = vld [vmem:[#allocation2 + $0x90] sm:$0xff] }
 0x424   : > { %3390 = vst.msk [vmem:[%s4876_s28 + $0x34] sm:$0xf] %vm3376_vm5, %v3591_v6  ;;  %v3584_v54 = vpack.c.bf16 %v3222_v1, %v3222_v1  ;;  %v3224_v36 = vadd.f32 %v5694_v13, %v3185_v50  ;;  %v3016_v6 = vld [vmem:[#allocation2 + $0x98] sm:$0x7f] }
 0x425   : > { %3159 = vst.msk [vmem:[#allocation2 + $0x60] sm:$0xff] %vm822_vm1, %v3129_v29  ;;  %v5742_v30 = vpop.permute.xlu0 %2537 }
 0x426   : > { %3383 = vst.msk [vmem:[%s4876_s28 + $0x18] sm:$0xf] %vm3376_vm5, %v3584_v54  ;;  %v5744_v0 = vpop.permute.xlu1 %2539  ;;  %v3586_v10 = vpack.c.bf16 %v3224_v36, %v3224_v36 }
 0x427   : > { %v2278_v3 = vld [vmem:[#allocation2 + $0xe1] sm:$0xff]  ;;  %v2279_v48 = vld [vmem:[#allocation2 + $0xe9] sm:$0x7f] }
 0x428   : > { %v2406_v4 = vadd.f32 %v5689_v58, %v2278_v3  ;;  %v2407_v37 = vadd.f32 %v2341_v33, %v2279_v48  ;;  %3385 = vst.msk [vmem:[%s4876_s28 + $0x20] sm:$0xf] %vm3376_vm5, %v3586_v10  ;;  %v3018_v10 = vld [vmem:[#allocation2 + $0xa8] sm:$0x7f] }
 0x429   : > { %v3187_v15 = vld [vmem:[#allocation2 + $0x50] sm:$0xff]  ;;  %v2157_v53 = vpop.permute.xlu0 %2156 }
 0x42a   : > { %2438 = vst.msk [vmem:[#allocation2 + $0xe1] sm:$0xff] %vm822_vm1, %v2406_v4  ;;  %v2844_v7 = vld [vmem:[#allocation2 + $0xd8] sm:$0xff]  ;;  %v3226_v58 = vadd.f32 %v5694_v13, %v3187_v15  ;;  %v2159_v38 = vpop.permute.xlu1 %2158  ;;  %v2218_v2 = vadd.f32 %v2157_v53, %v2052_v23  ;;  %v3017_v15 = vld [vmem:[#allocation2 + $0xa0] sm:$0xff]  ;;  %v3019_v53 = vld [vmem:[#allocation2 + $0xb0] sm:$0xff] }
 0x42b   : > { %2439 = vst.msk [vmem:[#allocation2 + $0xe9] sm:$0x7f] %vm1814_vm4, %v2407_v37  ;;  %v2964_v9 = vadd.f32 %v2902_v51, %v2844_v7  ;;  %v2219_v28 = vadd.f32 %v2159_v38, %v2053_v52  ;;  %v3020_v52 = vld [vmem:[#allocation2 + $0xb8] sm:$0x7f] }
 0x42c   : > { %v3588_v11 = vpack.c.bf16 %v3226_v58, %v3226_v58  ;;  %v3189_v63 = vld [vmem:[#allocation2 + $0x60] sm:$0xff]  ;;  %2248 = vst.msk [vmem:[#allocation2 + $0xf0] sm:$0xff] %vm822_vm1, %v2218_v2 }
 0x42d   : > { %2994 = vst.msk [vmem:[#allocation2 + $0xd8] sm:$0xff] %vm822_vm1, %v2964_v9  ;;  %v3228_v60 = vadd.f32 %v5694_v13, %v3189_v63  ;;  %v2534_v59 = vpop.permute.xlu0 %2533 }
 0x42e   : > { %3387 = vst.msk [vmem:[%s4876_s28 + $0x28] sm:$0xf] %vm3376_vm5, %v3588_v11  ;;  %v2536_v42 = vpop.permute.xlu1 %2535 }
 0x42f   : > { %2249 = vst.msk [vmem:[#allocation2 + $0xf8] sm:$0x7f] %vm1814_vm4, %v2219_v28  ;;  %v3590_v26 = vpack.c.bf16 %v3228_v60, %v3228_v60 }
 0x431   : > { %v2470_v14 = vld [vmem:[#allocation2 + $0xe0] sm:$0xff]  ;;  %3389 = vst.msk [vmem:[%s4876_s28 + $0x30] sm:$0xf] %vm3376_vm5, %v3590_v26  ;;  %v3056_v25 = vpop.permute.xlu0 %3055 }
 0x432   : > { %v2471_v61 = vld [vmem:[#allocation2 + $0xe8] sm:$0x7f]  ;;  %v2601_v46 = vadd.f32 %v2534_v59, %v2470_v14  ;;  %v3058_v44 = vpop.permute.xlu1 %3057  ;;  %v3131_v62 = vadd.f32 %v3056_v25, %v3011_v40  ;;  %v3021_v25 = vld [vmem:[#allocation2 + $0xc0] sm:$0xff] }
 0x433   : > { %v2602_v35 = vadd.f32 %v2536_v42, %v2471_v61  ;;  %v3132_v57 = vadd.f32 %v3058_v44, %v3012_v18  ;;  %v3022_v44 = vld [vmem:[#allocation2 + $0xc8] sm:$0x7f] }
 0x434   : > { %2633 = vst.msk [vmem:[#allocation2 + $0xe0] sm:$0xff] %vm822_vm1, %v2601_v46  ;;  %3161 = vst.msk [vmem:[#allocation2 + $0x70] sm:$0xff] %vm822_vm1, %v3131_v62 }
 0x435   : > { %2634 = vst.msk [vmem:[#allocation2 + $0xe8] sm:$0x7f] %vm1814_vm4, %v2602_v35  ;;  %3162 = vst.msk [vmem:[#allocation2 + $0x78] sm:$0x7f] %vm1814_vm4, %v3132_v57  ;;  %v3060_v47 = vpop.permute.xlu0 %3059 }
 0x436   : > { %v2281_v34 = vld [vmem:[#allocation2 + $0xf9] sm:$0x7f]  ;;  %v2280_v33 = vld [vmem:[#allocation2 + $0xf1] sm:$0xff]  ;;  %v3062_v32 = vpop.permute.xlu1 %3061  ;;  %v3133_v31 = vadd.f32 %v3060_v47, %v3013_v24 }
 0x437   : > { %v2409_v55 = vadd.f32 %v5653_v19, %v2281_v34  ;;  %v2408_v56 = vadd.f32 %v5651_v8, %v2280_v33  ;;  %v3134_v17 = vadd.f32 %v3062_v32, %v3014_v5 }
 0x438   : > { %3163 = vst.msk [vmem:[#allocation2 + $0x80] sm:$0xff] %vm822_vm1, %v3133_v31  ;;  %v3024_v31 = vld [vmem:[#allocation2 + $0xd8] sm:$0x7f] }
 0x439   : > { %2441 = vst.msk [vmem:[#allocation2 + $0xf9] sm:$0x7f] %vm1814_vm4, %v2409_v55  ;;  %3164 = vst.msk [vmem:[#allocation2 + $0x88] sm:$0x7f] %vm1814_vm4, %v3134_v17  ;;  %v3064_v16 = vpop.permute.xlu0 %3063 }
 0x43a   : > { %2440 = vst.msk [vmem:[#allocation2 + $0xf1] sm:$0xff] %vm822_vm1, %v2408_v56  ;;  %v3066_v27 = vpop.permute.xlu1 %3065  ;;  %v3135_v12 = vadd.f32 %v3064_v16, %v3015_v41 }
 0x43b   : > { %v3136_v1 = vadd.f32 %v3066_v27, %v3016_v6  ;;  %v3191_v51 = vld [vmem:[#allocation2 + $0x70] sm:$0xff] }
 0x43c   : > { %v2665_v20 = vld [vmem:[#allocation2 + $0xe1] sm:$0xff]  ;;  %v2666_v49 = vld [vmem:[#allocation2 + $0xe9] sm:$0x7f]  ;;  %v3192_v43 = vld [vmem:[#allocation2 + $0x78] sm:$0xff]  ;;  %v3230_v54 = vadd.f32 %v5694_v13, %v3191_v51  ;;  %3165 = vst.msk [vmem:[#allocation2 + $0x90] sm:$0xff] %vm822_vm1, %v3135_v12 }
 0x43d   : > { %v2785_v19 = vadd.f32 %v5659_v21, %v2665_v20  ;;  %v2786_v8 = vadd.f32 %v5661_v39, %v2666_v49  ;;  %v3231_v21 = vadd.f32 %v5694_v13, %v3192_v43  ;;  %3166 = vst.msk [vmem:[#allocation2 + $0x98] sm:$0x7f] %vm1814_vm4, %v3136_v1  ;;  %v3068_v50 = vpop.permute.xlu0 %3067  ;;  %v3023_v49 = vld [vmem:[#allocation2 + $0xd0] sm:$0xff] }
 0x43e   : > { %v3070_v3 = vpop.permute.xlu1 %3069  ;;  %v3592_v37 = vpack.c.bf16 %v3230_v54, %v3230_v54  ;;  %v3137_v38 = vadd.f32 %v3068_v50, %v3017_v15 }
 0x43f   : > { %2815 = vst.msk [vmem:[#allocation2 + $0xe1] sm:$0xff] %vm822_vm1, %v2785_v19  ;;  %v3593_v36 = vpack.c.bf16 %v3231_v21, %v3231_v21  ;;  %v3193_v58 = vld [vmem:[#allocation2 + $0x80] sm:$0xff]  ;;  %v3138_v9 = vadd.f32 %v3070_v3, %v3018_v10 }
 0x440   : > { %2816 = vst.msk [vmem:[#allocation2 + $0xe9] sm:$0x7f] %vm1814_vm4, %v2786_v8  ;;  %v3194_v7 = vld [vmem:[#allocation2 + $0x88] sm:$0xff] }
 0x441   : > { %v2472_v39 = vld [vmem:[#allocation2 + $0xf0] sm:$0xff]  ;;  %v2473_v29 = vld [vmem:[#allocation2 + $0xf8] sm:$0x7f]  ;;  %3392 = vst.msk [vmem:[%s4876_s28 + $0x3c] sm:$0xf] %vm3376_vm5, %v3593_v36  ;;  %v3072_v11 = vpop.permute.xlu0 %3071 }
 0x442   : > { %v2603_v48 = vadd.f32 %v5742_v30, %v2472_v39  ;;  %v2604_v4 = vadd.f32 %v5744_v0, %v2473_v29  ;;  %3391 = vst.msk [vmem:[%s4876_s28 + $0x38] sm:$0xf] %vm3376_vm5, %v3592_v37  ;;  %v3233_v30 = vadd.f32 %v5694_v13, %v3194_v7  ;;  %v3232_v0 = vadd.f32 %v5694_v13, %v3193_v58  ;;  %v3074_v23 = vpop.permute.xlu1 %3073 }
 0x443   : > { %3168 = vst.msk [vmem:[#allocation2 + $0xa8] sm:$0x7f] %vm1814_vm4, %v3138_v9  ;;  %v3140_v61 = vadd.f32 %v3074_v23, %v3020_v52  ;;  %v3139_v42 = vadd.f32 %v3072_v11, %v3019_v53  ;;  %v3195_v59 = vld [vmem:[#allocation2 + $0x90] sm:$0xff] }
 0x444   : > { %2635 = vst.msk [vmem:[#allocation2 + $0xf0] sm:$0xff] %vm822_vm1, %v2603_v48  ;;  %3167 = vst.msk [vmem:[#allocation2 + $0xa0] sm:$0xff] %vm822_vm1, %v3137_v38  ;;  %v3595_v63 = vpack.c.bf16 %v3233_v30, %v3233_v30  ;;  %v3594_v60 = vpack.c.bf16 %v3232_v0, %v3232_v0  ;;  %v3196_v14 = vld [vmem:[#allocation2 + $0x98] sm:$0xff]  ;;  %v3234_v18 = vadd.f32 %v5694_v13, %v3195_v59 }
 0x445   : > { %2636 = vst.msk [vmem:[#allocation2 + $0xf8] sm:$0x7f] %vm1814_vm4, %v2604_v4  ;;  %v3235_v46 = vadd.f32 %v5694_v13, %v3196_v14  ;;  %3170 = vst.msk [vmem:[#allocation2 + $0xb8] sm:$0x7f] %vm1814_vm4, %v3140_v61 }
 0x446   : > { %v2845_v2 = vld [vmem:[#allocation2 + $0xe0] sm:$0xff]  ;;  %3394 = vst.msk [vmem:[%s4876_s28 + $0x44] sm:$0xf] %vm3376_vm5, %v3595_v63  ;;  %3393 = vst.msk [vmem:[%s4876_s28 + $0x40] sm:$0xf] %vm3376_vm5, %v3594_v60  ;;  %v3078_v40 = vpop.permute.xlu1 %3077  ;;  %v3596_v57 = vpack.c.bf16 %v3234_v18, %v3234_v18 }
 0x447   : > { %v2846_v28 = vld [vmem:[#allocation2 + $0xe8] sm:$0xff]  ;;  %v2965_v35 = vadd.f32 %v5667_v45, %v2845_v2  ;;  %3169 = vst.msk [vmem:[#allocation2 + $0xb0] sm:$0xff] %vm822_vm1, %v3139_v42  ;;  %v3597_v45 = vpack.c.bf16 %v3235_v46, %v3235_v46  ;;  %v3142_v62 = vadd.f32 %v3078_v40, %v3022_v44 }
 0x448   : > { %v2966_v26 = vadd.f32 %v5669_v22, %v2846_v28  ;;  %v3076_v22 = vpop.permute.xlu0 %3075  ;;  %3395 = vst.msk [vmem:[%s4876_s28 + $0x48] sm:$0xf] %vm3376_vm5, %v3596_v57 }
 0x449   : > { %2995 = vst.msk [vmem:[#allocation2 + $0xe0] sm:$0xff] %vm822_vm1, %v2965_v35  ;;  %v3141_v34 = vadd.f32 %v3076_v22, %v3021_v25 }
 0x44a   : > { %2996 = vst.msk [vmem:[#allocation2 + $0xe8] sm:$0xff] %vm822_vm1, %v2966_v26  ;;  %v3198_v32 = vld [vmem:[#allocation2 + $0xa8] sm:$0xff]  ;;  %v3082_v20 = vpop.permute.xlu1 %3081 }
 0x44b   : > { %v3207_v33 = vld [vmem:[#allocation2 + $0xf0] sm:$0xff]  ;;  %3396 = vst.msk [vmem:[%s4876_s28 + $0x4c] sm:$0xf] %vm3376_vm5, %v3597_v45  ;;  %v3197_v24 = vld [vmem:[#allocation2 + $0xa0] sm:$0xff]  ;;  %v3237_v47 = vadd.f32 %v5694_v13, %v3198_v32  ;;  %v3144_v27 = vadd.f32 %v3082_v20, %v3024_v31 }
 0x44c   : > { %v3208_v55 = vld [vmem:[#allocation2 + $0xf8] sm:$0xff]  ;;  %v3246_v56 = vadd.f32 %v5694_v13, %v3207_v33  ;;  %3172 = vst.msk [vmem:[#allocation2 + $0xc8] sm:$0x7f] %vm1814_vm4, %v3142_v62  ;;  %v3236_v17 = vadd.f32 %v5694_v13, %v3197_v24  ;;  %v3080_v19 = vpop.permute.xlu0 %3079 }
 0x44d   : > { %v3247_v5 = vadd.f32 %v5694_v13, %v3208_v55  ;;  %3171 = vst.msk [vmem:[#allocation2 + $0xc0] sm:$0xff] %vm822_vm1, %v3141_v34  ;;  %v3143_v41 = vadd.f32 %v3080_v19, %v3023_v49  ;;  %v3599_v16 = vpack.c.bf16 %v3237_v47, %v3237_v47  ;;  %v3200_v12 = vld [vmem:[#allocation2 + $0xb8] sm:$0xff] }
 0x44e   : > { %v3608_v8 = vpack.c.bf16 %v3246_v56, %v3246_v56  ;;  %v3598_v1 = vpack.c.bf16 %v3236_v17, %v3236_v17  ;;  %v3199_v43 = vld [vmem:[#allocation2 + $0xb0] sm:$0xff]  ;;  %v3239_v51 = vadd.f32 %v5694_v13, %v3200_v12  ;;  %3174 = vst.msk [vmem:[#allocation2 + $0xd8] sm:$0x7f] %vm1814_vm4, %v3144_v27  ;;  %v3086_v54 = vpop.permute.xlu1 %3085 }
 0x44f   : > { %v3609_v6 = vpack.c.bf16 %v3247_v5, %v3247_v5  ;;  %v3238_v21 = vadd.f32 %v5694_v13, %v3199_v43  ;;  %3173 = vst.msk [vmem:[#allocation2 + $0xd0] sm:$0xff] %vm822_vm1, %v3143_v41 }
 0x450   : > { %3407 = vst.msk [vmem:[%s4876_s28 + $0x78] sm:$0xf] %vm3376_vm5, %v3608_v8  ;;  %3398 = vst.msk [vmem:[%s4876_s28 + $0x54] sm:$0xf] %vm3376_vm5, %v3599_v16  ;;  %v3025_v29 = vld [vmem:[#allocation2 + $0xe0] sm:$0xff]  ;;  %v3084_v3 = vpop.permute.xlu0 %3083  ;;  %v3601_v50 = vpack.c.bf16 %v3239_v51, %v3239_v51 }
 0x451   : > { %3408 = vst.msk [vmem:[%s4876_s28 + $0x7c] sm:$0xf] %vm3376_vm5, %v3609_v6  ;;  %3397 = vst.msk [vmem:[%s4876_s28 + $0x50] sm:$0xf] %vm3376_vm5, %v3598_v1  ;;  %v3026_v39 = vld [vmem:[#allocation2 + $0xe8] sm:$0x7f]  ;;  %v3600_v48 = vpack.c.bf16 %v3238_v21, %v3238_v21  ;;  %v3145_v36 = vadd.f32 %v3084_v3, %v3025_v29 }
 0x452   : > { %v3146_v4 = vadd.f32 %v3086_v54, %v3026_v39  ;;  %3400 = vst.msk [vmem:[%s4876_s28 + $0x5c] sm:$0xf] %vm3376_vm5, %v3601_v50 }
 0x453   : > { %v3202_v37 = vld [vmem:[#allocation2 + $0xc8] sm:$0xff]  ;;  %3399 = vst.msk [vmem:[%s4876_s28 + $0x58] sm:$0xf] %vm3376_vm5, %v3600_v48 }
 0x454   : > { %v3201_v10 = vld [vmem:[#allocation2 + $0xc0] sm:$0xff]  ;;  %v3241_v15 = vadd.f32 %v5694_v13, %v3202_v37  ;;  %3176 = vst.msk [vmem:[#allocation2 + $0xe8] sm:$0x7f] %vm1814_vm4, %v3146_v4 }
 0x455   : > { %v3240_v7 = vadd.f32 %v5694_v13, %v3201_v10  ;;  %3175 = vst.msk [vmem:[#allocation2 + $0xe0] sm:$0xff] %vm822_vm1, %v3145_v36  ;;  %v3204_v38 = vld [vmem:[#allocation2 + $0xd8] sm:$0xff] }
 0x456   : > { %v3603_v58 = vpack.c.bf16 %v3241_v15, %v3241_v15  ;;  %v3203_v30 = vld [vmem:[#allocation2 + $0xd0] sm:$0xff]  ;;  %v3243_v0 = vadd.f32 %v5694_v13, %v3204_v38 }
 0x457   : > { %v3602_v9 = vpack.c.bf16 %v3240_v7, %v3240_v7  ;;  %v3242_v52 = vadd.f32 %v5694_v13, %v3203_v30 }
 0x458   : > { %3402 = vst.msk [vmem:[%s4876_s28 + $0x64] sm:$0xf] %vm3376_vm5, %v3603_v58  ;;  %v3605_v23 = vpack.c.bf16 %v3243_v0, %v3243_v0 }
 0x459   : > { %3401 = vst.msk [vmem:[%s4876_s28 + $0x60] sm:$0xf] %vm3376_vm5, %v3602_v9  ;;  %v3604_v53 = vpack.c.bf16 %v3242_v52, %v3242_v52 }
 0x45a   : > { %3404 = vst.msk [vmem:[%s4876_s28 + $0x6c] sm:$0xf] %vm3376_vm5, %v3605_v23 }
 0x45b   : > { %v3206_v11 = vld [vmem:[#allocation2 + $0xe8] sm:$0xff]  ;;  %3403 = vst.msk [vmem:[%s4876_s28 + $0x68] sm:$0xf] %vm3376_vm5, %v3604_v53 }
 0x45c   : > { %v3205_v28 = vld [vmem:[#allocation2 + $0xe0] sm:$0xff]  ;;  %v3245_v2 = vadd.f32 %v5694_v13, %v3206_v11 }
 0x45d   : > { %v3244_v63 = vadd.f32 %v5694_v13, %v3205_v28 }
 0x45e   : > { %v3607_v60 = vpack.c.bf16 %v3245_v2, %v3245_v2 }
 0x45f   : > { %v3606_v61 = vpack.c.bf16 %v3244_v63, %v3244_v63 }
 0x460   : > { %3406 = vst.msk [vmem:[%s4876_s28 + $0x74] sm:$0xf] %vm3376_vm5, %v3607_v60 }
 0x461   : > { %3405 = vst.msk [vmem:[%s4876_s28 + $0x70] sm:$0xf] %vm3376_vm5, %v3606_v61 }
 0x462 PF: > { %s22_s21 = sadd.s32 1, %s3982_s21  }
 0x463   : > { %p19_p4 = scmp.ge.s32.totalorder %s22_s21, 4  }
 0x465   :  { %21 = sbr.rel (!%p19_p4) target bundleno = 1 (0x1), region = 102 }

</bundles_post_ra>
